<compile_context>
chip_gen: v7x
topology: tpu7x:2x2x1
jax: 0.10.0
libtpu: 0.0.40
codegen_flags: <defaults>
</compile_context>

<pallas_src>
import jax
import jax.numpy as jnp
from jax.experimental import pallas as pl
from jax.experimental.pallas import tpu as pltpu

F32 = jnp.float32

# ----------------------------- configuration ------------------------------- #
B = 2                      # batch (num_imgs)
IN_CH = 3                  # image channels
IMG_H = IMG_W = 32         # original image size (ori_h / ori_w for decoder)
PATCH = 4                  # synthetic backbone stride
FEAT_H = IMG_H // PATCH    # 8
FEAT_W = IMG_W // PATCH    # 8
HW = FEAT_H * FEAT_W       # 64
BHW = B * HW               # 128  -> lane-dense axis for mask / seg logits
C = 32                     # out_channels / in_channels of kernel update head
NUM_PROPOSALS = 8
NUM_CLASSES = 4            # fc_cls out dim (use_sigmoid=True)
NUM_THING = 4              # (cat_stuff_mask=False -> unused)
NUM_STAGES = 2             # kernel iter head stages
NUM_HEADS = 4
HEAD_DIM = C // NUM_HEADS  # 8
FFN_DIM = 64
CONV_KERNEL_SIZE = 1       # K-Net dynamic kernels are 1x1 (K*K == 1)
HARD_MASK_THR = 0.5
MASK_THR = 0.5
MAX_PER_IMG = 8
MASK_UPSAMPLE_STRIDE = 2
LN_EPS = 1e-5


def _vmem_spec():
    # whole array resident in VMEM, no blocking (every tensor here is KiB-scale)
    return pl.BlockSpec(memory_space=pltpu.MemorySpace.VMEM)


# --------------------------- in-kernel math helpers ------------------------- #
def _dot(a, b):
    return jnp.dot(a, b, preferred_element_type=jnp.float32)


def _dot_nt(a, b):
    # [M, K] x [N, K] -> [M, N]  (contract the last dim of both operands)
    return jax.lax.dot_general(
        a, b, (((1,), (1,)), ((), ())), preferred_element_type=jnp.float32)


def _ln(x, ln):
    # torch LayerNorm (biased variance), params stored as [1, C] refs
    mu = jnp.mean(x, axis=-1, keepdims=True)
    xc = x - mu
    var = jnp.mean(xc * xc, axis=-1, keepdims=True)
    return xc * jax.lax.rsqrt(var + LN_EPS) * ln["w"][...] + ln["b"][...]


# ------------------------------- Pallas kernels ----------------------------- #
def _backbone_kernel(xp_ref, wb_ref, bb_ref, wn_ref, bn_ref, o_ref):
    h = jax.nn.relu(_dot(xp_ref[...], wb_ref[...]) + bb_ref[...])
    o_ref[...] = jax.nn.relu(_dot(h, wn_ref[...]) + bn_ref[...])


def _conv_kernel_head_kernel(feat_ref, w_fpn_ref, b_fpn_ref, w_ls_ref, b_ls_ref,
                             w_init_ref, b_init_ref, w_seg_ref, b_seg_ref,
                             prop_ref, xfeat_ref, mask_ref, seg_ref):
    """ConvKernelHeadInference.forward, fully fused.

    feat_ref: [B*HW, C] single-level feature (localization_fpn input).
    Config: feat_downsample_stride=1, semantic_fpn=True,
            proposal_feats_with_obj=True, use_binary=False, cat_stuff_mask=False.
    """
    feat = feat_ref[...]                                        # [B*HW, C]
    # localization_fpn (single-tensor branch of the torch isinstance(list) check)
    loc_base = _dot(feat, w_fpn_ref[...]) + b_fpn_ref[...]
    # loc_convs | seg_convs share loc_base -> one concatenated [C, 2C] matmul
    ls = jax.nn.relu(_dot(loc_base, w_ls_ref[...]) + b_ls_ref[...])
    loc_feats = ls[:, :C]
    sem_feats = ls[:, C:]
    # init_kernels / conv_seg as lane-dense [out, B*HW] matmuls (B*HW = 128)
    w_init = w_init_ref[...]                                    # [Np, C] (torch conv layout)
    mask_t = _dot_nt(w_init, loc_feats) + b_init_ref[...]       # [Np, B*HW]
    seg_t = _dot_nt(w_seg_ref[...], sem_feats) + b_seg_ref[...] # [num_cls, B*HW]
    x_feats = sem_feats + loc_feats                             # [B*HW, C]
    xfeat_ref[...] = x_feats
    mask_ref[...] = mask_t
    seg_ref[...] = seg_t
    # proposal_feats_with_obj (use_binary=False): (sigmoid>0.5)*sigmoid pooling,
    # einsum('bnhw,bchw->bnc') == per-image [Np,HW] @ [HW,C]
    sm = jax.nn.sigmoid(mask_t)
    soft = (sm > 0.5).astype(jnp.float32) * sm
    props = []
    for img in range(B):
        w_img = soft[:, img * HW:(img + 1) * HW]                # [Np, HW]
        x_img = x_feats[img * HW:(img + 1) * HW, :]             # [HW, C]
        props.append(w_init + _dot(w_img, x_img))               # proposal + obj feats
    prop_ref[...] = jnp.concatenate(props, axis=0)              # [B*Np, C]


def _stage_body(w, x_ref, m_ref, o_ref, cls_ref, nmask_ref, oout_ref):
    """One fused KernelUpdateHead stage (KernelUpdator + MHA + FFN + heads)."""
    x_feats = x_ref[...]                                        # [B*HW, C]
    mask_t = m_ref[...]                                         # [Np, B*HW]
    obj_in = o_ref[...]                                         # [B*Np, C]

    # ---- hard-sigmoid mask pooling -> update feature (binary mask) ----------
    hard = (jax.nn.sigmoid(mask_t) > HARD_MASK_THR).astype(jnp.float32)
    xf = [_dot(hard[:, i * HW:(i + 1) * HW], x_feats[i * HW:(i + 1) * HW, :])
          for i in range(B)]
    x_feat = jnp.concatenate(xf, axis=0)                        # [B*Np, C]

    # ---- KernelUpdator (gate_sigmoid=True, activate_out=False, K*K == 1) ----
    params = _dot(x_feat, w["dynamic_layer"]["w"][...]) + w["dynamic_layer"]["b"][...]
    param_in, param_out = params[:, :C], params[:, C:]
    inp = _dot(obj_in, w["input_layer"]["w"][...]) + w["input_layer"]["b"][...]
    input_in, input_out = inp[:, :C], inp[:, C:]
    gate_feats = input_in * param_in
    # input_gate | update_gate concatenated: one [C, 2C] matmul
    gates = _dot(gate_feats, w["gates"]["w"][...]) + w["gates"]["b"][...]
    input_gate = jax.nn.sigmoid(_ln(gates[:, :C], w["input_norm_in"]))
    update_gate = jax.nn.sigmoid(_ln(gates[:, C:], w["norm_in"]))
    param_out = _ln(param_out, w["norm_out"])
    input_out = _ln(input_out, w["input_norm_out"])
    feats = update_gate * param_out + input_gate * input_out
    feats = _dot(feats, w["fc_layer"]["w"][...]) + w["fc_layer"]["b"][...]
    feats = jax.nn.relu(_ln(feats, w["fc_norm"]))               # [B*Np, C]

    # ---- multi-head self-attention over the Np proposals of each image ------
    qkv = _dot(feats, w["attn_in_proj"]["w"][...]) + w["attn_in_proj"]["b"][...]
    w_out = w["attn_out_proj"]["w"][...]                        # [C, C]
    scale = 1.0 / (HEAD_DIM ** 0.5)
    attn_rows = []
    for img in range(B):
        rows = slice(img * NUM_PROPOSALS, (img + 1) * NUM_PROPOSALS)
        out_img = None
        for h in range(NUM_HEADS):
            q0, k0, v0 = h * HEAD_DIM, C + h * HEAD_DIM, 2 * C + h * HEAD_DIM
            qh = qkv[rows, q0:q0 + HEAD_DIM] * scale
            kh = qkv[rows, k0:k0 + HEAD_DIM]
            vh = qkv[rows, v0:v0 + HEAD_DIM]
            logits = _dot_nt(qh, kh)                            # [Np, Np]
            logits = logits - jnp.max(logits, axis=-1, keepdims=True)
            e = jnp.exp(logits)
            attn = e / jnp.sum(e, axis=-1, keepdims=True)
            head = _dot(attn, vh)                               # [Np, head_dim]
            # concat_h(head) @ W_out  ==  sum_h head_h @ W_out[h*d:(h+1)*d, :]
            contrib = _dot(head, w_out[h * HEAD_DIM:(h + 1) * HEAD_DIM, :])
            out_img = contrib if out_img is None else out_img + contrib
        attn_rows.append(out_img)
    attn_out = jnp.concatenate(attn_rows, axis=0) + w["attn_out_proj"]["b"][...]
    obj = _ln(attn_out, w["attention_norm"])

    # ---- FFN (with identity residual) + norm --------------------------------
    ff = jax.nn.relu(_dot(obj, w["ffn_fc1"]["w"][...]) + w["ffn_fc1"]["b"][...])
    ff = _dot(ff, w["ffn_fc2"]["w"][...]) + w["ffn_fc2"]["b"][...]
    obj = _ln(obj + ff, w["ffn_norm"])
    oout_ref[...] = obj                                         # carried object feats

    # ---- classification branch (cls_fc has no bias) --------------------------
    cls_feat = jax.nn.relu(_ln(_dot(obj, w["cls_fc"]["w"][...]), w["cls_fc_norm"]))
    cls_ref[...] = _dot(cls_feat, w["fc_cls"]["w"][...]) + w["fc_cls"]["b"][...]

    # ---- mask branch: per-image dynamic 1x1 conv, lane-dense [Np, B*HW] ------
    mask_feat = jax.nn.relu(_ln(_dot(obj, w["mask_fc"]["w"][...]), w["mask_fc_norm"]))
    kernels = _dot(mask_feat, w["fc_mask"]["w"][...]) + w["fc_mask"]["b"][...]  # [B*Np, C]
    nm = [_dot_nt(kernels[i * NUM_PROPOSALS:(i + 1) * NUM_PROPOSALS, :],
                  x_feats[i * HW:(i + 1) * HW, :]) for i in range(B)]
    nmask_ref[...] = jnp.concatenate(nm, axis=-1)               # [Np, B*HW]


# ------------------------------- call wrappers ------------------------------ #
def backbone_neck(p, x):
    """x: [B, 3, H, W] NCHW image -> stride-4 feature, flattened [B*HW, C]."""
    Bn, Cin, H, W = x.shape
    xp = x.reshape(Bn, Cin, H // PATCH, PATCH, W // PATCH, PATCH)
    xp = xp.transpose(0, 2, 4, 1, 3, 5).reshape(
        Bn * (H // PATCH) * (W // PATCH), Cin * PATCH * PATCH)
    args = (xp.astype(F32), p["backbone"]["w"], p["backbone"]["b"],
            p["neck"]["w"], p["neck"]["b"])
    return pl.pallas_call(
        _backbone_kernel,
        out_shape=jax.ShapeDtypeStruct((xp.shape[0], C), F32),
        in_specs=[_vmem_spec() for _ in args],
        out_specs=_vmem_spec(),
    )(*args)


def conv_kernel_head(p, feat_flat):
    """ConvKernelHeadInference.forward.  Returns (TPU-friendly layouts):
      proposal_feats : [B*Np, C]        (torch: [B, Np, C, 1, 1])
      x_feats        : [B*HW, C]        (torch: [B, C, H, W])
      mask_preds     : [Np, B*HW]       (torch: [B, Np, H, W])
      seg_preds      : [num_cls, B*HW]  (torch: [B, num_cls, H, W])
    """
    args = (feat_flat,
            p["loc_fpn"]["w"], p["loc_fpn"]["b"],
            p["loc_seg_convs"]["w"], p["loc_seg_convs"]["b"],
            p["init_kernels"]["w"], p["init_kernels"]["b"],
            p["conv_seg"]["w"], p["conv_seg"]["b"])
    out_shape = (
        jax.ShapeDtypeStruct((B * NUM_PROPOSALS, C), F32),
        jax.ShapeDtypeStruct((BHW, C), F32),
        jax.ShapeDtypeStruct((NUM_PROPOSALS, BHW), F32),
        jax.ShapeDtypeStruct((NUM_CLASSES, BHW), F32),
    )
    return pl.pallas_call(
        _conv_kernel_head_kernel,
        out_shape=out_shape,
        in_specs=[_vmem_spec() for _ in args],
        out_specs=tuple(_vmem_spec() for _ in out_shape),
    )(*args)


def kernel_update_head(sp, x_flat, mask_t, obj_flat):
    """One KernelUpdateHeadInference stage as a single fused pallas_call."""
    leaves, treedef = jax.tree_util.tree_flatten(sp)
    n = len(leaves)

    def kernel(x_ref, m_ref, o_ref, *rest):
        w = jax.tree_util.tree_unflatten(treedef, rest[:n])
        cls_ref, nmask_ref, oout_ref = rest[n:]
        _stage_body(w, x_ref, m_ref, o_ref, cls_ref, nmask_ref, oout_ref)

    out_shape = (
        jax.ShapeDtypeStruct((B * NUM_PROPOSALS, NUM_CLASSES), F32),  # cls logits
        jax.ShapeDtypeStruct((NUM_PROPOSALS, BHW), F32),              # new mask logits
        jax.ShapeDtypeStruct((B * NUM_PROPOSALS, C), F32),            # object feats
    )
    args = (x_flat, mask_t, obj_flat, *leaves)
    return pl.pallas_call(
        kernel,
        out_shape=out_shape,
        in_specs=[_vmem_spec() for _ in args],
        out_specs=tuple(_vmem_spec() for _ in out_shape),
    )(*args)


def kernel_iter_head(p, x_flat, proposal_flat, mask_t):
    obj_feats = proposal_flat
    cls_flat = None
    for sp in p["stages"]:
        cls_flat, mask_t, obj_feats = kernel_update_head(sp, x_flat, mask_t, obj_feats)
    # [Np, B*HW] (batch-major columns) -> [B, Np, H, W]
    mask_preds = mask_t.reshape(NUM_PROPOSALS, B, FEAT_H, FEAT_W).transpose(1, 0, 2, 3)
    scaled_mask_preds = jax.image.resize(
        mask_preds,
        (B, NUM_PROPOSALS, FEAT_H * MASK_UPSAMPLE_STRIDE, FEAT_W * MASK_UPSAMPLE_STRIDE),
        method="bilinear")
    cls_scores = jax.nn.sigmoid(cls_flat.reshape(B, NUM_PROPOSALS, NUM_CLASSES))
    return cls_scores, scaled_mask_preds


def knet_decoder(cls_scores, scaled_mask_preds):
    """Batched top-k + gather + rescale/threshold (no per-image Python loop)."""
    Bn = cls_scores.shape[0]
    flat = cls_scores.reshape(Bn, -1)                     # [B, Np*num_classes]
    scores, topk_idx = jax.lax.top_k(flat, MAX_PER_IMG)
    mask_idx = topk_idx // NUM_CLASSES
    labels = topk_idx % NUM_CLASSES
    masks = jax.vmap(lambda m, i: m[i])(scaled_mask_preds, mask_idx)
    masks = jax.nn.sigmoid(masks)
    masks = jax.image.resize(masks, (Bn, MAX_PER_IMG, IMG_H, IMG_W), method="bilinear")
    return scores, masks > MASK_THR, labels


def knet_inference(params, x):
    feat_flat = backbone_neck(params, x)
    proposal_flat, x_flat, mask_t, _seg_t = conv_kernel_head(params, feat_flat)
    cls_scores, scaled_mask_preds = kernel_iter_head(params, x_flat, proposal_flat, mask_t)
    return knet_decoder(cls_scores, scaled_mask_preds)


# --------------------------------- parameters ------------------------------- #
def _init_linear(key, fan_in, fan_out, bias=True):
    k1, k2 = jax.random.split(key)
    w = jax.random.normal(k1, (fan_in, fan_out), F32) * (fan_in ** -0.5)
    if not bias:
        return {"w": w}
    b = jax.random.normal(k2, (1, fan_out), F32) * 0.01
    return {"w": w, "b": b}


def _init_conv_nc(key, fan_in, fan_out):
    # torch Conv2d(fan_in, fan_out, 1) weight layout [out, in]; bias kept as a
    # column so the lane-dense [out, B*HW] matmul broadcasts it along lanes.
    k1, k2 = jax.random.split(key)
    w = jax.random.normal(k1, (fan_out, fan_in), F32) * (fan_in ** -0.5)
    b = jax.random.normal(k2, (fan_out, 1), F32) * 0.01
    return {"w": w, "b": b}


def _init_ln(dim):
    return {"w": jnp.ones((1, dim), F32), "b": jnp.zeros((1, dim), F32)}


def build_params(key):
    keys = iter(jax.random.split(key, 64))
    p = {
        "backbone": _init_linear(next(keys), IN_CH * PATCH * PATCH, C),
        "neck": _init_linear(next(keys), C, C),
        "loc_fpn": _init_linear(next(keys), C, C),
        # loc_convs | seg_convs concatenated on the output dim (share loc_base)
        "loc_seg_convs": _init_linear(next(keys), C, 2 * C),
        "init_kernels": _init_conv_nc(next(keys), C, NUM_PROPOSALS),
        "conv_seg": _init_conv_nc(next(keys), C, NUM_CLASSES),
    }
    stages = []
    for _ in range(NUM_STAGES):
        sp = {
            # KernelUpdator
            "dynamic_layer": _init_linear(next(keys), C, 2 * C),
            "input_layer": _init_linear(next(keys), C, 2 * C),
            "gates": _init_linear(next(keys), C, 2 * C),   # [input_gate | update_gate]
            "norm_in": _init_ln(C),
            "norm_out": _init_ln(C),
            "input_norm_in": _init_ln(C),
            "input_norm_out": _init_ln(C),
            "fc_layer": _init_linear(next(keys), C, C),
            "fc_norm": _init_ln(C),
            # self-attention (nn.MultiheadAttention, dropout=0 at eval)
            "attn_in_proj": _init_linear(next(keys), C, 3 * C),
            "attn_out_proj": _init_linear(next(keys), C, C),
            "attention_norm": _init_ln(C),
            # FFN (residual) + norm
            "ffn_fc1": _init_linear(next(keys), C, FFN_DIM),
            "ffn_fc2": _init_linear(next(keys), FFN_DIM, C),
            "ffn_norm": _init_ln(C),
            # cls / mask fcs : Linear(bias=False) -> LN -> ReLU
            "cls_fc": _init_linear(next(keys), C, C, bias=False),
            "cls_fc_norm": _init_ln(C),
            "mask_fc": _init_linear(next(keys), C, C, bias=False),
            "mask_fc_norm": _init_ln(C),
            "fc_cls": _init_linear(next(keys), C, NUM_CLASSES),
            "fc_mask": _init_linear(next(keys), C, C),
        }
        stages.append(sp)
    p["stages"] = stages
    return p


# ----------------------------------- main ----------------------------------- #
if __name__ == "__main__":
    key = jax.random.PRNGKey(0)
    pkey, xkey = jax.random.split(key)
    params = build_params(pkey)
    x = jax.random.normal(xkey, (B, IN_CH, IMG_H, IMG_W), F32)  # NCHW image input
    scores, masks, labels = jax.jit(knet_inference)(params, x)
    jax.block_until_ready((scores, masks, labels))
    assert scores.shape == (B, MAX_PER_IMG)
    assert masks.shape == (B, MAX_PER_IMG, IMG_H, IMG_W) and masks.dtype == jnp.bool_
    assert labels.shape == (B, MAX_PER_IMG)
    print("KERNEL_OK")
</pallas_src>

<mosaic_0001>
module attributes {stable_mosaic.version = 11 : i64} {
  func.func @_backbone_kernel(%arg0: memref<128x48xf32, #tpu.memory_space<vmem>>, %arg1: memref<48x32xf32, #tpu.memory_space<vmem>>, %arg2: memref<1x32xf32, #tpu.memory_space<vmem>>, %arg3: memref<32x32xf32, #tpu.memory_space<vmem>>, %arg4: memref<1x32xf32, #tpu.memory_space<vmem>>, %arg5: memref<128x32xf32, #tpu.memory_space<vmem>>) attributes {dimension_semantics = [], scalar_prefetch = 0 : i64, scratch_operands = 0 : i64, tpu.core_type = #tpu.core_type<tc>} {
    %c0 = arith.constant 0 : index
    %c0_0 = arith.constant 0 : index
    %0 = vector.load %arg0[%c0, %c0_0] : memref<128x48xf32, #tpu.memory_space<vmem>>, vector<128x48xf32>
    %c0_1 = arith.constant 0 : index
    %c0_2 = arith.constant 0 : index
    %1 = vector.load %arg1[%c0_1, %c0_2] : memref<48x32xf32, #tpu.memory_space<vmem>>, vector<48x32xf32>
    %cst = arith.constant dense<0.000000e+00> : vector<128x32xf32>
    %2 = tpu.matmul %0, %1, %cst {dimension_numbers = #tpu.dot_dimension_numbers<[1], [0], [0], [1], [0, 0, 1, 1], [], []>} : vector<128x48xf32>, vector<48x32xf32>, vector<128x32xf32> -> vector<128x32xf32>
    %c0_3 = arith.constant 0 : index
    %c0_4 = arith.constant 0 : index
    %3 = vector.load %arg2[%c0_3, %c0_4] : memref<1x32xf32, #tpu.memory_space<vmem>>, vector<1x32xf32>
    %4 = vector.broadcast %3 : vector<1x32xf32> to vector<128x32xf32>
    %5 = arith.addf %2, %4 : vector<128x32xf32>
    %cst_5 = arith.constant 0.000000e+00 : f32
    %6 = vector.broadcast %cst_5 : f32 to vector<128x32xf32>
    %7 = arith.maximumf %5, %6 : vector<128x32xf32>
    %c0_6 = arith.constant 0 : index
    %c0_7 = arith.constant 0 : index
    %8 = vector.load %arg3[%c0_6, %c0_7] : memref<32x32xf32, #tpu.memory_space<vmem>>, vector<32x32xf32>
    %cst_8 = arith.constant dense<0.000000e+00> : vector<128x32xf32>
    %9 = tpu.matmul %7, %8, %cst_8 {dimension_numbers = #tpu.dot_dimension_numbers<[1], [0], [0], [1], [0, 0, 1, 1], [], []>} : vector<128x32xf32>, vector<32x32xf32>, vector<128x32xf32> -> vector<128x32xf32>
    %c0_9 = arith.constant 0 : index
    %c0_10 = arith.constant 0 : index
    %10 = vector.load %arg4[%c0_9, %c0_10] : memref<1x32xf32, #tpu.memory_space<vmem>>, vector<1x32xf32>
    %11 = vector.broadcast %10 : vector<1x32xf32> to vector<128x32xf32>
    %12 = arith.addf %9, %11 : vector<128x32xf32>
    %cst_11 = arith.constant 0.000000e+00 : f32
    %13 = vector.broadcast %cst_11 : f32 to vector<128x32xf32>
    %14 = arith.maximumf %12, %13 : vector<128x32xf32>
    %c0_12 = arith.constant 0 : index
    %c0_13 = arith.constant 0 : index
    %15 = vector.load %arg5[%c0_12, %c0_13] : memref<128x32xf32, #tpu.memory_space<vmem>>, vector<128x32xf32>
    tpu.vector_store %arg5[%c0_12, %c0_13], %14 {strides = array<i32>} : memref<128x32xf32, #tpu.memory_space<vmem>>, vector<128x32xf32>,
    return
  }
}

module attributes {stable_mosaic.version = 11 : i64} {
  func.func @_conv_kernel_head_kernel(%arg0: memref<128x32xf32, #tpu.memory_space<vmem>>, %arg1: memref<32x32xf32, #tpu.memory_space<vmem>>, %arg2: memref<1x32xf32, #tpu.memory_space<vmem>>, %arg3: memref<32x64xf32, #tpu.memory_space<vmem>>, %arg4: memref<1x64xf32, #tpu.memory_space<vmem>>, %arg5: memref<8x32xf32, #tpu.memory_space<vmem>>, %arg6: memref<8x1xf32, #tpu.memory_space<vmem>>, %arg7: memref<4x32xf32, #tpu.memory_space<vmem>>, %arg8: memref<4x1xf32, #tpu.memory_space<vmem>>, %arg9: memref<16x32xf32, #tpu.memory_space<vmem>>, %arg10: memref<128x32xf32, #tpu.memory_space<vmem>>, %arg11: memref<8x128xf32, #tpu.memory_space<vmem>>, %arg12: memref<4x128xf32, #tpu.memory_space<vmem>>) attributes {dimension_semantics = [], scalar_prefetch = 0 : i64, scratch_operands = 0 : i64, tpu.core_type = #tpu.core_type<tc>} {
    %c0 = arith.constant 0 : index
    %c0_0 = arith.constant 0 : index
    %0 = vector.load %arg0[%c0, %c0_0] : memref<128x32xf32, #tpu.memory_space<vmem>>, vector<128x32xf32>
    %c0_1 = arith.constant 0 : index
    %c0_2 = arith.constant 0 : index
    %1 = vector.load %arg1[%c0_1, %c0_2] : memref<32x32xf32, #tpu.memory_space<vmem>>, vector<32x32xf32>
    %cst = arith.constant dense<0.000000e+00> : vector<128x32xf32>
    %2 = tpu.matmul %0, %1, %cst {dimension_numbers = #tpu.dot_dimension_numbers<[1], [0], [0], [1], [0, 0, 1, 1], [], []>} : vector<128x32xf32>, vector<32x32xf32>, vector<128x32xf32> -> vector<128x32xf32>
    %c0_3 = arith.constant 0 : index
    %c0_4 = arith.constant 0 : index
    %3 = vector.load %arg2[%c0_3, %c0_4] : memref<1x32xf32, #tpu.memory_space<vmem>>, vector<1x32xf32>
    %4 = vector.broadcast %3 : vector<1x32xf32> to vector<128x32xf32>
    %5 = arith.addf %2, %4 : vector<128x32xf32>
    %c0_5 = arith.constant 0 : index
    %c0_6 = arith.constant 0 : index
    %6 = vector.load %arg3[%c0_5, %c0_6] : memref<32x64xf32, #tpu.memory_space<vmem>>, vector<32x64xf32>
    %cst_7 = arith.constant dense<0.000000e+00> : vector<128x64xf32>
    %7 = tpu.matmul %5, %6, %cst_7 {dimension_numbers = #tpu.dot_dimension_numbers<[1], [0], [0], [1], [0, 0, 1, 1], [], []>} : vector<128x32xf32>, vector<32x64xf32>, vector<128x64xf32> -> vector<128x64xf32>
    %c0_8 = arith.constant 0 : index
    %c0_9 = arith.constant 0 : index
    %8 = vector.load %arg4[%c0_8, %c0_9] : memref<1x64xf32, #tpu.memory_space<vmem>>, vector<1x64xf32>
    %9 = vector.broadcast %8 : vector<1x64xf32> to vector<128x64xf32>
    %10 = arith.addf %7, %9 : vector<128x64xf32>
    %cst_10 = arith.constant 0.000000e+00 : f32
    %11 = vector.broadcast %cst_10 : f32 to vector<128x64xf32>
    %12 = arith.maximumf %10, %11 : vector<128x64xf32>
    %13 = vector.extract_strided_slice %12 {offsets = [0, 0], sizes = [128, 32], strides = [1, 1]} : vector<128x64xf32> to vector<128x32xf32>
    %14 = vector.extract_strided_slice %12 {offsets = [0, 32], sizes = [128, 32], strides = [1, 1]} : vector<128x64xf32> to vector<128x32xf32>
    %c0_11 = arith.constant 0 : index
    %c0_12 = arith.constant 0 : index
    %15 = vector.load %arg5[%c0_11, %c0_12] : memref<8x32xf32, #tpu.memory_space<vmem>>, vector<8x32xf32>
    %cst_13 = arith.constant dense<0.000000e+00> : vector<8x128xf32>
    %16 = tpu.matmul %15, %13, %cst_13 {dimension_numbers = #tpu.dot_dimension_numbers<[1], [1], [0], [0], [0, 0, 1, 0], [], []>} : vector<8x32xf32>, vector<128x32xf32>, vector<8x128xf32> -> vector<8x128xf32>
    %c0_14 = arith.constant 0 : index
    %c0_15 = arith.constant 0 : index
    %17 = vector.load %arg6[%c0_14, %c0_15] : memref<8x1xf32, #tpu.memory_space<vmem>>, vector<8x1xf32>
    %18 = vector.broadcast %17 : vector<8x1xf32> to vector<8x128xf32>
    %19 = arith.addf %16, %18 : vector<8x128xf32>
    %c0_16 = arith.constant 0 : index
    %c0_17 = arith.constant 0 : index
    %20 = vector.load %arg7[%c0_16, %c0_17] : memref<4x32xf32, #tpu.memory_space<vmem>>, vector<4x32xf32>
    %cst_18 = arith.constant dense<0.000000e+00> : vector<4x128xf32>
    %21 = tpu.matmul %20, %14, %cst_18 {dimension_numbers = #tpu.dot_dimension_numbers<[1], [1], [0], [0], [0, 0, 1, 0], [], []>} : vector<4x32xf32>, vector<128x32xf32>, vector<4x128xf32> -> vector<4x128xf32>
    %c0_19 = arith.constant 0 : index
    %c0_20 = arith.constant 0 : index
    %22 = vector.load %arg8[%c0_19, %c0_20] : memref<4x1xf32, #tpu.memory_space<vmem>>, vector<4x1xf32>
    %23 = vector.broadcast %22 : vector<4x1xf32> to vector<4x128xf32>
    %24 = arith.addf %21, %23 : vector<4x128xf32>
    %25 = arith.addf %14, %13 : vector<128x32xf32>
    %c0_21 = arith.constant 0 : index
    %c0_22 = arith.constant 0 : index
    %26 = vector.load %arg10[%c0_21, %c0_22] : memref<128x32xf32, #tpu.memory_space<vmem>>, vector<128x32xf32>
    tpu.vector_store %arg10[%c0_21, %c0_22], %25 {strides = array<i32>} : memref<128x32xf32, #tpu.memory_space<vmem>>, vector<128x32xf32>,
    %c0_23 = arith.constant 0 : index
    %c0_24 = arith.constant 0 : index
    %27 = vector.load %arg11[%c0_23, %c0_24] : memref<8x128xf32, #tpu.memory_space<vmem>>, vector<8x128xf32>
    tpu.vector_store %arg11[%c0_23, %c0_24], %19 {strides = array<i32>} : memref<8x128xf32, #tpu.memory_space<vmem>>, vector<8x128xf32>,
    %c0_25 = arith.constant 0 : index
    %c0_26 = arith.constant 0 : index
    %28 = vector.load %arg12[%c0_25, %c0_26] : memref<4x128xf32, #tpu.memory_space<vmem>>, vector<4x128xf32>
    tpu.vector_store %arg12[%c0_25, %c0_26], %24 {strides = array<i32>} : memref<4x128xf32, #tpu.memory_space<vmem>>, vector<4x128xf32>,
    %29 = arith.negf %19 : vector<8x128xf32>
    %30 = math.exp %29 : vector<8x128xf32>
    %cst_27 = arith.constant 1.000000e+00 : f32
    %31 = vector.broadcast %cst_27 : f32 to vector<8x128xf32>
    %32 = arith.addf %31, %30 : vector<8x128xf32>
    %33 = arith.divf %31, %32 : vector<8x128xf32>
    %cst_28 = arith.constant 5.000000e-01 : f32
    %34 = vector.broadcast %cst_28 : f32 to vector<8x128xf32>
    %35 = arith.cmpf ogt, %33, %34 : vector<8x128xf32>
    %36 = arith.extui %35 : vector<8x128xi1> to vector<8x128xi32>
    %37 = arith.sitofp %36 : vector<8x128xi32> to vector<8x128xf32>
    %38 = arith.mulf %37, %33 : vector<8x128xf32>
    %39 = vector.extract_strided_slice %38 {offsets = [0, 0], sizes = [8, 64], strides = [1, 1]} : vector<8x128xf32> to vector<8x64xf32>
    %40 = vector.extract_strided_slice %25 {offsets = [0, 0], sizes = [64, 32], strides = [1, 1]} : vector<128x32xf32> to vector<64x32xf32>
    %cst_29 = arith.constant dense<0.000000e+00> : vector<8x32xf32>
    %41 = tpu.matmul %39, %40, %cst_29 {dimension_numbers = #tpu.dot_dimension_numbers<[1], [0], [0], [1], [0, 0, 1, 1], [], []>} : vector<8x64xf32>, vector<64x32xf32>, vector<8x32xf32> -> vector<8x32xf32>
    %42 = arith.addf %15, %41 : vector<8x32xf32>
    %43 = vector.extract_strided_slice %38 {offsets = [0, 64], sizes = [8, 64], strides = [1, 1]} : vector<8x128xf32> to vector<8x64xf32>
    %44 = vector.extract_strided_slice %25 {offsets = [64, 0], sizes = [64, 32], strides = [1, 1]} : vector<128x32xf32> to vector<64x32xf32>
    %cst_30 = arith.constant dense<0.000000e+00> : vector<8x32xf32>
    %45 = tpu.matmul %43, %44, %cst_30 {dimension_numbers = #tpu.dot_dimension_numbers<[1], [0], [0], [1], [0, 0, 1, 1], [], []>} : vector<8x64xf32>, vector<64x32xf32>, vector<8x32xf32> -> vector<8x32xf32>
    %46 = arith.addf %15, %45 : vector<8x32xf32>
    %47 = tpu.concatenate %42, %46 in 0 : vector<8x32xf32>, vector<8x32xf32> -> vector<16x32xf32>
    %c0_31 = arith.constant 0 : index
    %c0_32 = arith.constant 0 : index
    %48 = vector.load %arg9[%c0_31, %c0_32] : memref<16x32xf32, #tpu.memory_space<vmem>>, vector<16x32xf32>
    tpu.vector_store %arg9[%c0_31, %c0_32], %47 {strides = array<i32>} : memref<16x32xf32, #tpu.memory_space<vmem>>, vector<16x32xf32>,
    return
  }
}

module attributes {stable_mosaic.version = 11 : i64} {
  func.func @kernel(%arg0: memref<128x32xf32, #tpu.memory_space<vmem>>, %arg1: memref<8x128xf32, #tpu.memory_space<vmem>>, %arg2: memref<16x32xf32, #tpu.memory_space<vmem>>, %arg3: memref<1x32xf32, #tpu.memory_space<vmem>>, %arg4: memref<1x32xf32, #tpu.memory_space<vmem>>, %arg5: memref<1x96xf32, #tpu.memory_space<vmem>>, %arg6: memref<32x96xf32, #tpu.memory_space<vmem>>, %arg7: memref<1x32xf32, #tpu.memory_space<vmem>>, %arg8: memref<32x32xf32, #tpu.memory_space<vmem>>, %arg9: memref<32x32xf32, #tpu.memory_space<vmem>>, %arg10: memref<1x32xf32, #tpu.memory_space<vmem>>, %arg11: memref<1x32xf32, #tpu.memory_space<vmem>>, %arg12: memref<1x64xf32, #tpu.memory_space<vmem>>, %arg13: memref<32x64xf32, #tpu.memory_space<vmem>>, %arg14: memref<1x4xf32, #tpu.memory_space<vmem>>, %arg15: memref<32x4xf32, #tpu.memory_space<vmem>>, %arg16: memref<1x32xf32, #tpu.memory_space<vmem>>, %arg17: memref<32x32xf32, #tpu.memory_space<vmem>>, %arg18: memref<1x32xf32, #tpu.memory_space<vmem>>, %arg19: memref<32x32xf32, #tpu.memory_space<vmem>>, %arg20: memref<1x32xf32, #tpu.memory_space<vmem>>, %arg21: memref<1x32xf32, #tpu.memory_space<vmem>>, %arg22: memref<1x64xf32, #tpu.memory_space<vmem>>, %arg23: memref<32x64xf32, #tpu.memory_space<vmem>>, %arg24: memref<1x32xf32, #tpu.memory_space<vmem>>, %arg25: memref<64x32xf32, #tpu.memory_space<vmem>>, %arg26: memref<1x32xf32, #tpu.memory_space<vmem>>, %arg27: memref<1x32xf32, #tpu.memory_space<vmem>>, %arg28: memref<1x64xf32, #tpu.memory_space<vmem>>, %arg29: memref<32x64xf32, #tpu.memory_space<vmem>>, %arg30: memref<1x64xf32, #tpu.memory_space<vmem>>, %arg31: memref<32x64xf32, #tpu.memory_space<vmem>>, %arg32: memref<1x32xf32, #tpu.memory_space<vmem>>, %arg33: memref<1x32xf32, #tpu.memory_space<vmem>>, %arg34: memref<1x32xf32, #tpu.memory_space<vmem>>, %arg35: memref<1x32xf32, #tpu.memory_space<vmem>>, %arg36: memref<32x32xf32, #tpu.memory_space<vmem>>, %arg37: memref<1x32xf32, #tpu.memory_space<vmem>>, %arg38: memref<1x32xf32, #tpu.memory_space<vmem>>, %arg39: memref<1x32xf32, #tpu.memory_space<vmem>>, %arg40: memref<1x32xf32, #tpu.memory_space<vmem>>, %arg41: memref<1x32xf32, #tpu.memory_space<vmem>>, %arg42: memref<1x32xf32, #tpu.memory_space<vmem>>, %arg43: memref<16x4xf32, #tpu.memory_space<vmem>>, %arg44: memref<8x128xf32, #tpu.memory_space<vmem>>, %arg45: memref<16x32xf32, #tpu.memory_space<vmem>>) attributes {dimension_semantics = [], scalar_prefetch = 0 : i64, scratch_operands = 0 : i64, tpu.core_type = #tpu.core_type<tc>} {
    %c0 = arith.constant 0 : index
    %c0_0 = arith.constant 0 : index
    %0 = vector.load %arg0[%c0, %c0_0] : memref<128x32xf32, #tpu.memory_space<vmem>>, vector<128x32xf32>
    %c0_1 = arith.constant 0 : index
    %c0_2 = arith.constant 0 : index
    %1 = vector.load %arg1[%c0_1, %c0_2] : memref<8x128xf32, #tpu.memory_space<vmem>>, vector<8x128xf32>
    %c0_3 = arith.constant 0 : index
    %c0_4 = arith.constant 0 : index
    %2 = vector.load %arg2[%c0_3, %c0_4] : memref<16x32xf32, #tpu.memory_space<vmem>>, vector<16x32xf32>
    %3 = arith.negf %1 : vector<8x128xf32>
    %4 = math.exp %3 : vector<8x128xf32>
    %cst = arith.constant 1.000000e+00 : f32
    %5 = vector.broadcast %cst : f32 to vector<8x128xf32>
    %6 = arith.addf %5, %4 : vector<8x128xf32>
    %7 = arith.divf %5, %6 : vector<8x128xf32>
    %cst_5 = arith.constant 5.000000e-01 : f32
    %8 = vector.broadcast %cst_5 : f32 to vector<8x128xf32>
    %9 = arith.cmpf ogt, %7, %8 : vector<8x128xf32>
    %10 = arith.extui %9 : vector<8x128xi1> to vector<8x128xi32>
    %11 = arith.sitofp %10 : vector<8x128xi32> to vector<8x128xf32>
    %12 = vector.extract_strided_slice %11 {offsets = [0, 0], sizes = [8, 64], strides = [1, 1]} : vector<8x128xf32> to vector<8x64xf32>
    %13 = vector.extract_strided_slice %0 {offsets = [0, 0], sizes = [64, 32], strides = [1, 1]} : vector<128x32xf32> to vector<64x32xf32>
    %cst_6 = arith.constant dense<0.000000e+00> : vector<8x32xf32>
    %14 = tpu.matmul %12, %13, %cst_6 {dimension_numbers = #tpu.dot_dimension_numbers<[1], [0], [0], [1], [0, 0, 1, 1], [], []>} : vector<8x64xf32>, vector<64x32xf32>, vector<8x32xf32> -> vector<8x32xf32>
    %15 = vector.extract_strided_slice %11 {offsets = [0, 64], sizes = [8, 64], strides = [1, 1]} : vector<8x128xf32> to vector<8x64xf32>
    %16 = vector.extract_strided_slice %0 {offsets = [64, 0], sizes = [64, 32], strides = [1, 1]} : vector<128x32xf32> to vector<64x32xf32>
    %cst_7 = arith.constant dense<0.000000e+00> : vector<8x32xf32>
    %17 = tpu.matmul %15, %16, %cst_7 {dimension_numbers = #tpu.dot_dimension_numbers<[1], [0], [0], [1], [0, 0, 1, 1], [], []>} : vector<8x64xf32>, vector<64x32xf32>, vector<8x32xf32> -> vector<8x32xf32>
    %18 = tpu.concatenate %14, %17 in 0 : vector<8x32xf32>, vector<8x32xf32> -> vector<16x32xf32>
    %c0_8 = arith.constant 0 : index
    %c0_9 = arith.constant 0 : index
    %19 = vector.load %arg13[%c0_8, %c0_9] : memref<32x64xf32, #tpu.memory_space<vmem>>, vector<32x64xf32>
    %cst_10 = arith.constant dense<0.000000e+00> : vector<16x64xf32>
    %20 = tpu.matmul %18, %19, %cst_10 {dimension_numbers = #tpu.dot_dimension_numbers<[1], [0], [0], [1], [0, 0, 1, 1], [], []>} : vector<16x32xf32>, vector<32x64xf32>, vector<16x64xf32> -> vector<16x64xf32>
    %c0_11 = arith.constant 0 : index
    %c0_12 = arith.constant 0 : index
    %21 = vector.load %arg12[%c0_11, %c0_12] : memref<1x64xf32, #tpu.memory_space<vmem>>, vector<1x64xf32>
    %22 = vector.broadcast %21 : vector<1x64xf32> to vector<16x64xf32>
    %23 = arith.addf %20, %22 : vector<16x64xf32>
    %24 = vector.extract_strided_slice %23 {offsets = [0, 0], sizes = [16, 32], strides = [1, 1]} : vector<16x64xf32> to vector<16x32xf32>
    %25 = vector.extract_strided_slice %23 {offsets = [0, 32], sizes = [16, 32], strides = [1, 1]} : vector<16x64xf32> to vector<16x32xf32>
    %c0_13 = arith.constant 0 : index
    %c0_14 = arith.constant 0 : index
    %26 = vector.load %arg31[%c0_13, %c0_14] : memref<32x64xf32, #tpu.memory_space<vmem>>, vector<32x64xf32>
    %cst_15 = arith.constant dense<0.000000e+00> : vector<16x64xf32>
    %27 = tpu.matmul %2, %26, %cst_15 {dimension_numbers = #tpu.dot_dimension_numbers<[1], [0], [0], [1], [0, 0, 1, 1], [], []>} : vector<16x32xf32>, vector<32x64xf32>, vector<16x64xf32> -> vector<16x64xf32>
    %c0_16 = arith.constant 0 : index
    %c0_17 = arith.constant 0 : index
    %28 = vector.load %arg30[%c0_16, %c0_17] : memref<1x64xf32, #tpu.memory_space<vmem>>, vector<1x64xf32>
    %29 = vector.broadcast %28 : vector<1x64xf32> to vector<16x64xf32>
    %30 = arith.addf %27, %29 : vector<16x64xf32>
    %31 = vector.extract_strided_slice %30 {offsets = [0, 0], sizes = [16, 32], strides = [1, 1]} : vector<16x64xf32> to vector<16x32xf32>
    %32 = vector.extract_strided_slice %30 {offsets = [0, 32], sizes = [16, 32], strides = [1, 1]} : vector<16x64xf32> to vector<16x32xf32>
    %33 = arith.mulf %31, %24 : vector<16x32xf32>
    %c0_18 = arith.constant 0 : index
    %c0_19 = arith.constant 0 : index
    %34 = vector.load %arg29[%c0_18, %c0_19] : memref<32x64xf32, #tpu.memory_space<vmem>>, vector<32x64xf32>
    %cst_20 = arith.constant dense<0.000000e+00> : vector<16x64xf32>
    %35 = tpu.matmul %33, %34, %cst_20 {dimension_numbers = #tpu.dot_dimension_numbers<[1], [0], [0], [1], [0, 0, 1, 1], [], []>} : vector<16x32xf32>, vector<32x64xf32>, vector<16x64xf32> -> vector<16x64xf32>
    %c0_21 = arith.constant 0 : index
    %c0_22 = arith.constant 0 : index
    %36 = vector.load %arg28[%c0_21, %c0_22] : memref<1x64xf32, #tpu.memory_space<vmem>>, vector<1x64xf32>
    %37 = vector.broadcast %36 : vector<1x64xf32> to vector<16x64xf32>
    %38 = arith.addf %35, %37 : vector<16x64xf32>
    %39 = vector.extract_strided_slice %38 {offsets = [0, 0], sizes = [16, 32], strides = [1, 1]} : vector<16x64xf32> to vector<16x32xf32>
    %cst_23 = arith.constant dense<0.000000e+00> : vector<16xf32>
    %40 = vector.multi_reduction <add>, %39, %cst_23 [1] : vector<16x32xf32> to vector<16xf32>
    %41 = vector.shape_cast %40 : vector<16xf32> to vector<16x1xf32>
    %cst_24 = arith.constant 3.200000e+01 : f32
    %42 = vector.broadcast %cst_24 : f32 to vector<16x1xf32>
    %43 = arith.divf %41, %42 : vector<16x1xf32>
    %44 = vector.broadcast %43 : vector<16x1xf32> to vector<16x32xf32>
    %45 = arith.subf %39, %44 : vector<16x32xf32>
    %46 = arith.mulf %45, %45 : vector<16x32xf32>
    %cst_25 = arith.constant dense<0.000000e+00> : vector<16xf32>
    %47 = vector.multi_reduction <add>, %46, %cst_25 [1] : vector<16x32xf32> to vector<16xf32>
    %48 = vector.shape_cast %47 : vector<16xf32> to vector<16x1xf32>
    %cst_26 = arith.constant 3.200000e+01 : f32
    %49 = vector.broadcast %cst_26 : f32 to vector<16x1xf32>
    %50 = arith.divf %48, %49 : vector<16x1xf32>
    %cst_27 = arith.constant 9.99999974E-6 : f32
    %51 = vector.broadcast %cst_27 : f32 to vector<16x1xf32>
    %52 = arith.addf %50, %51 : vector<16x1xf32>
    %53 = math.rsqrt %52 : vector<16x1xf32>
    %54 = vector.broadcast %53 : vector<16x1xf32> to vector<16x32xf32>
    %55 = arith.mulf %45, %54 : vector<16x32xf32>
    %c0_28 = arith.constant 0 : index
    %c0_29 = arith.constant 0 : index
    %56 = vector.load %arg33[%c0_28, %c0_29] : memref<1x32xf32, #tpu.memory_space<vmem>>, vector<1x32xf32>
    %57 = vector.broadcast %56 : vector<1x32xf32> to vector<16x32xf32>
    %58 = arith.mulf %55, %57 : vector<16x32xf32>
    %c0_30 = arith.constant 0 : index
    %c0_31 = arith.constant 0 : index
    %59 = vector.load %arg32[%c0_30, %c0_31] : memref<1x32xf32, #tpu.memory_space<vmem>>, vector<1x32xf32>
    %60 = vector.broadcast %59 : vector<1x32xf32> to vector<16x32xf32>
    %61 = arith.addf %58, %60 : vector<16x32xf32>
    %62 = arith.negf %61 : vector<16x32xf32>
    %63 = math.exp %62 : vector<16x32xf32>
    %cst_32 = arith.constant 1.000000e+00 : f32
    %64 = vector.broadcast %cst_32 : f32 to vector<16x32xf32>
    %65 = arith.addf %64, %63 : vector<16x32xf32>
    %66 = arith.divf %64, %65 : vector<16x32xf32>
    %67 = vector.extract_strided_slice %38 {offsets = [0, 32], sizes = [16, 32], strides = [1, 1]} : vector<16x64xf32> to vector<16x32xf32>
    %cst_33 = arith.constant dense<0.000000e+00> : vector<16xf32>
    %68 = vector.multi_reduction <add>, %67, %cst_33 [1] : vector<16x32xf32> to vector<16xf32>
    %69 = vector.shape_cast %68 : vector<16xf32> to vector<16x1xf32>
    %cst_34 = arith.constant 3.200000e+01 : f32
    %70 = vector.broadcast %cst_34 : f32 to vector<16x1xf32>
    %71 = arith.divf %69, %70 : vector<16x1xf32>
    %72 = vector.broadcast %71 : vector<16x1xf32> to vector<16x32xf32>
    %73 = arith.subf %67, %72 : vector<16x32xf32>
    %74 = arith.mulf %73, %73 : vector<16x32xf32>
    %cst_35 = arith.constant dense<0.000000e+00> : vector<16xf32>
    %75 = vector.multi_reduction <add>, %74, %cst_35 [1] : vector<16x32xf32> to vector<16xf32>
    %76 = vector.shape_cast %75 : vector<16xf32> to vector<16x1xf32>
    %cst_36 = arith.constant 3.200000e+01 : f32
    %77 = vector.broadcast %cst_36 : f32 to vector<16x1xf32>
    %78 = arith.divf %76, %77 : vector<16x1xf32>
    %cst_37 = arith.constant 9.99999974E-6 : f32
    %79 = vector.broadcast %cst_37 : f32 to vector<16x1xf32>
    %80 = arith.addf %78, %79 : vector<16x1xf32>
    %81 = math.rsqrt %80 : vector<16x1xf32>
    %82 = vector.broadcast %81 : vector<16x1xf32> to vector<16x32xf32>
    %83 = arith.mulf %73, %82 : vector<16x32xf32>
    %c0_38 = arith.constant 0 : index
    %c0_39 = arith.constant 0 : index
    %84 = vector.load %arg40[%c0_38, %c0_39] : memref<1x32xf32, #tpu.memory_space<vmem>>, vector<1x32xf32>
    %85 = vector.broadcast %84 : vector<1x32xf32> to vector<16x32xf32>
    %86 = arith.mulf %83, %85 : vector<16x32xf32>
    %c0_40 = arith.constant 0 : index
    %c0_41 = arith.constant 0 : index
    %87 = vector.load %arg39[%c0_40, %c0_41] : memref<1x32xf32, #tpu.memory_space<vmem>>, vector<1x32xf32>
    %88 = vector.broadcast %87 : vector<1x32xf32> to vector<16x32xf32>
    %89 = arith.addf %86, %88 : vector<16x32xf32>
    %90 = arith.negf %89 : vector<16x32xf32>
    %91 = math.exp %90 : vector<16x32xf32>
    %cst_42 = arith.constant 1.000000e+00 : f32
    %92 = vector.broadcast %cst_42 : f32 to vector<16x32xf32>
    %93 = arith.addf %92, %91 : vector<16x32xf32>
    %94 = arith.divf %92, %93 : vector<16x32xf32>
    %cst_43 = arith.constant dense<0.000000e+00> : vector<16xf32>
    %95 = vector.multi_reduction <add>, %25, %cst_43 [1] : vector<16x32xf32> to vector<16xf32>
    %96 = vector.shape_cast %95 : vector<16xf32> to vector<16x1xf32>
    %cst_44 = arith.constant 3.200000e+01 : f32
    %97 = vector.broadcast %cst_44 : f32 to vector<16x1xf32>
    %98 = arith.divf %96, %97 : vector<16x1xf32>
    %99 = vector.broadcast %98 : vector<16x1xf32> to vector<16x32xf32>
    %100 = arith.subf %25, %99 : vector<16x32xf32>
    %101 = arith.mulf %100, %100 : vector<16x32xf32>
    %cst_45 = arith.constant dense<0.000000e+00> : vector<16xf32>
    %102 = vector.multi_reduction <add>, %101, %cst_45 [1] : vector<16x32xf32> to vector<16xf32>
    %103 = vector.shape_cast %102 : vector<16xf32> to vector<16x1xf32>
    %cst_46 = arith.constant 3.200000e+01 : f32
    %104 = vector.broadcast %cst_46 : f32 to vector<16x1xf32>
    %105 = arith.divf %103, %104 : vector<16x1xf32>
    %cst_47 = arith.constant 9.99999974E-6 : f32
    %106 = vector.broadcast %cst_47 : f32 to vector<16x1xf32>
    %107 = arith.addf %105, %106 : vector<16x1xf32>
    %108 = math.rsqrt %107 : vector<16x1xf32>
    %109 = vector.broadcast %108 : vector<16x1xf32> to vector<16x32xf32>
    %110 = arith.mulf %100, %109 : vector<16x32xf32>
    %c0_48 = arith.constant 0 : index
    %c0_49 = arith.constant 0 : index
    %111 = vector.load %arg42[%c0_48, %c0_49] : memref<1x32xf32, #tpu.memory_space<vmem>>, vector<1x32xf32>
    %112 = vector.broadcast %111 : vector<1x32xf32> to vector<16x32xf32>
    %113 = arith.mulf %110, %112 : vector<16x32xf32>
    %c0_50 = arith.constant 0 : index
    %c0_51 = arith.constant 0 : index
    %114 = vector.load %arg41[%c0_50, %c0_51] : memref<1x32xf32, #tpu.memory_space<vmem>>, vector<1x32xf32>
    %115 = vector.broadcast %114 : vector<1x32xf32> to vector<16x32xf32>
    %116 = arith.addf %113, %115 : vector<16x32xf32>
    %cst_52 = arith.constant dense<0.000000e+00> : vector<16xf32>
    %117 = vector.multi_reduction <add>, %32, %cst_52 [1] : vector<16x32xf32> to vector<16xf32>
    %118 = vector.shape_cast %117 : vector<16xf32> to vector<16x1xf32>
    %cst_53 = arith.constant 3.200000e+01 : f32
    %119 = vector.broadcast %cst_53 : f32 to vector<16x1xf32>
    %120 = arith.divf %118, %119 : vector<16x1xf32>
    %121 = vector.broadcast %120 : vector<16x1xf32> to vector<16x32xf32>
    %122 = arith.subf %32, %121 : vector<16x32xf32>
    %123 = arith.mulf %122, %122 : vector<16x32xf32>
    %cst_54 = arith.constant dense<0.000000e+00> : vector<16xf32>
    %124 = vector.multi_reduction <add>, %123, %cst_54 [1] : vector<16x32xf32> to vector<16xf32>
    %125 = vector.shape_cast %124 : vector<16xf32> to vector<16x1xf32>
    %cst_55 = arith.constant 3.200000e+01 : f32
    %126 = vector.broadcast %cst_55 : f32 to vector<16x1xf32>
    %127 = arith.divf %125, %126 : vector<16x1xf32>
    %cst_56 = arith.constant 9.99999974E-6 : f32
    %128 = vector.broadcast %cst_56 : f32 to vector<16x1xf32>
    %129 = arith.addf %127, %128 : vector<16x1xf32>
    %130 = math.rsqrt %129 : vector<16x1xf32>
    %131 = vector.broadcast %130 : vector<16x1xf32> to vector<16x32xf32>
    %132 = arith.mulf %122, %131 : vector<16x32xf32>
    %c0_57 = arith.constant 0 : index
    %c0_58 = arith.constant 0 : index
    %133 = vector.load %arg35[%c0_57, %c0_58] : memref<1x32xf32, #tpu.memory_space<vmem>>, vector<1x32xf32>
    %134 = vector.broadcast %133 : vector<1x32xf32> to vector<16x32xf32>
    %135 = arith.mulf %132, %134 : vector<16x32xf32>
    %c0_59 = arith.constant 0 : index
    %c0_60 = arith.constant 0 : index
    %136 = vector.load %arg34[%c0_59, %c0_60] : memref<1x32xf32, #tpu.memory_space<vmem>>, vector<1x32xf32>
    %137 = vector.broadcast %136 : vector<1x32xf32> to vector<16x32xf32>
    %138 = arith.addf %135, %137 : vector<16x32xf32>
    %139 = arith.mulf %94, %116 : vector<16x32xf32>
    %140 = arith.mulf %66, %138 : vector<16x32xf32>
    %141 = arith.addf %139, %140 : vector<16x32xf32>
    %c0_61 = arith.constant 0 : index
    %c0_62 = arith.constant 0 : index
    %142 = vector.load %arg17[%c0_61, %c0_62] : memref<32x32xf32, #tpu.memory_space<vmem>>, vector<32x32xf32>
    %cst_63 = arith.constant dense<0.000000e+00> : vector<16x32xf32>
    %143 = tpu.matmul %141, %142, %cst_63 {dimension_numbers = #tpu.dot_dimension_numbers<[1], [0], [0], [1], [0, 0, 1, 1], [], []>} : vector<16x32xf32>, vector<32x32xf32>, vector<16x32xf32> -> vector<16x32xf32>
    %c0_64 = arith.constant 0 : index
    %c0_65 = arith.constant 0 : index
    %144 = vector.load %arg16[%c0_64, %c0_65] : memref<1x32xf32, #tpu.memory_space<vmem>>, vector<1x32xf32>
    %145 = vector.broadcast %144 : vector<1x32xf32> to vector<16x32xf32>
    %146 = arith.addf %143, %145 : vector<16x32xf32>
    %cst_66 = arith.constant dense<0.000000e+00> : vector<16xf32>
    %147 = vector.multi_reduction <add>, %146, %cst_66 [1] : vector<16x32xf32> to vector<16xf32>
    %148 = vector.shape_cast %147 : vector<16xf32> to vector<16x1xf32>
    %cst_67 = arith.constant 3.200000e+01 : f32
    %149 = vector.broadcast %cst_67 : f32 to vector<16x1xf32>
    %150 = arith.divf %148, %149 : vector<16x1xf32>
    %151 = vector.broadcast %150 : vector<16x1xf32> to vector<16x32xf32>
    %152 = arith.subf %146, %151 : vector<16x32xf32>
    %153 = arith.mulf %152, %152 : vector<16x32xf32>
    %cst_68 = arith.constant dense<0.000000e+00> : vector<16xf32>
    %154 = vector.multi_reduction <add>, %153, %cst_68 [1] : vector<16x32xf32> to vector<16xf32>
    %155 = vector.shape_cast %154 : vector<16xf32> to vector<16x1xf32>
    %cst_69 = arith.constant 3.200000e+01 : f32
    %156 = vector.broadcast %cst_69 : f32 to vector<16x1xf32>
    %157 = arith.divf %155, %156 : vector<16x1xf32>
    %cst_70 = arith.constant 9.99999974E-6 : f32
    %158 = vector.broadcast %cst_70 : f32 to vector<16x1xf32>
    %159 = arith.addf %157, %158 : vector<16x1xf32>
    %160 = math.rsqrt %159 : vector<16x1xf32>
    %161 = vector.broadcast %160 : vector<16x1xf32> to vector<16x32xf32>
    %162 = arith.mulf %152, %161 : vector<16x32xf32>
    %c0_71 = arith.constant 0 : index
    %c0_72 = arith.constant 0 : index
    %163 = vector.load %arg21[%c0_71, %c0_72] : memref<1x32xf32, #tpu.memory_space<vmem>>, vector<1x32xf32>
    %164 = vector.broadcast %163 : vector<1x32xf32> to vector<16x32xf32>
    %165 = arith.mulf %162, %164 : vector<16x32xf32>
    %c0_73 = arith.constant 0 : index
    %c0_74 = arith.constant 0 : index
    %166 = vector.load %arg20[%c0_73, %c0_74] : memref<1x32xf32, #tpu.memory_space<vmem>>, vector<1x32xf32>
    %167 = vector.broadcast %166 : vector<1x32xf32> to vector<16x32xf32>
    %168 = arith.addf %165, %167 : vector<16x32xf32>
    %cst_75 = arith.constant 0.000000e+00 : f32
    %169 = vector.broadcast %cst_75 : f32 to vector<16x32xf32>
    %170 = arith.maximumf %168, %169 : vector<16x32xf32>
    %c0_76 = arith.constant 0 : index
    %c0_77 = arith.constant 0 : index
    %171 = vector.load %arg6[%c0_76, %c0_77] : memref<32x96xf32, #tpu.memory_space<vmem>>, vector<32x96xf32>
    %cst_78 = arith.constant dense<0.000000e+00> : vector<16x96xf32>
    %172 = tpu.matmul %170, %171, %cst_78 {dimension_numbers = #tpu.dot_dimension_numbers<[1], [0], [0], [1], [0, 0, 1, 1], [], []>} : vector<16x32xf32>, vector<32x96xf32>, vector<16x96xf32> -> vector<16x96xf32>
    %c0_79 = arith.constant 0 : index
    %c0_80 = arith.constant 0 : index
    %173 = vector.load %arg5[%c0_79, %c0_80] : memref<1x96xf32, #tpu.memory_space<vmem>>, vector<1x96xf32>
    %174 = vector.broadcast %173 : vector<1x96xf32> to vector<16x96xf32>
    %175 = arith.addf %172, %174 : vector<16x96xf32>
    %c0_81 = arith.constant 0 : index
    %c0_82 = arith.constant 0 : index
    %176 = vector.load %arg8[%c0_81, %c0_82] : memref<32x32xf32, #tpu.memory_space<vmem>>, vector<32x32xf32>
    %177 = vector.extract_strided_slice %175 {offsets = [0, 0], sizes = [8, 8], strides = [1, 1]} : vector<16x96xf32> to vector<8x8xf32>
    %cst_83 = arith.constant 0.353553385 : f32
    %178 = vector.broadcast %cst_83 : f32 to vector<8x8xf32>
    %179 = arith.mulf %177, %178 : vector<8x8xf32>
    %180 = vector.extract_strided_slice %175 {offsets = [0, 32], sizes = [8, 8], strides = [1, 1]} : vector<16x96xf32> to vector<8x8xf32>
    %181 = vector.extract_strided_slice %175 {offsets = [0, 64], sizes = [8, 8], strides = [1, 1]} : vector<16x96xf32> to vector<8x8xf32>
    %cst_84 = arith.constant dense<0.000000e+00> : vector<8x8xf32>
    %182 = tpu.matmul %179, %180, %cst_84 {dimension_numbers = #tpu.dot_dimension_numbers<[1], [1], [0], [0], [0, 0, 1, 0], [], []>} : vector<8x8xf32>, vector<8x8xf32>, vector<8x8xf32> -> vector<8x8xf32>
    %cst_85 = arith.constant dense<0xFF800000> : vector<8xf32>
    %183 = vector.multi_reduction <maximumf>, %182, %cst_85 [1] : vector<8x8xf32> to vector<8xf32>
    %184 = vector.shape_cast %183 : vector<8xf32> to vector<8x1xf32>
    %185 = vector.broadcast %184 : vector<8x1xf32> to vector<8x8xf32>
    %186 = arith.subf %182, %185 : vector<8x8xf32>
    %187 = math.exp %186 : vector<8x8xf32>
    %cst_86 = arith.constant dense<0.000000e+00> : vector<8xf32>
    %188 = vector.multi_reduction <add>, %187, %cst_86 [1] : vector<8x8xf32> to vector<8xf32>
    %189 = vector.shape_cast %188 : vector<8xf32> to vector<8x1xf32>
    %190 = vector.broadcast %189 : vector<8x1xf32> to vector<8x8xf32>
    %191 = arith.divf %187, %190 : vector<8x8xf32>
    %cst_87 = arith.constant dense<0.000000e+00> : vector<8x8xf32>
    %192 = tpu.matmul %191, %181, %cst_87 {dimension_numbers = #tpu.dot_dimension_numbers<[1], [0], [0], [1], [0, 0, 1, 1], [], []>} : vector<8x8xf32>, vector<8x8xf32>, vector<8x8xf32> -> vector<8x8xf32>
    %193 = vector.extract_strided_slice %176 {offsets = [0, 0], sizes = [8, 32], strides = [1, 1]} : vector<32x32xf32> to vector<8x32xf32>
    %cst_88 = arith.constant dense<0.000000e+00> : vector<8x32xf32>
    %194 = tpu.matmul %192, %193, %cst_88 {dimension_numbers = #tpu.dot_dimension_numbers<[1], [0], [0], [1], [0, 0, 1, 1], [], []>} : vector<8x8xf32>, vector<8x32xf32>, vector<8x32xf32> -> vector<8x32xf32>
    %195 = vector.extract_strided_slice %175 {offsets = [0, 8], sizes = [8, 8], strides = [1, 1]} : vector<16x96xf32> to vector<8x8xf32>
    %cst_89 = arith.constant 0.353553385 : f32
    %196 = vector.broadcast %cst_89 : f32 to vector<8x8xf32>
    %197 = arith.mulf %195, %196 : vector<8x8xf32>
    %198 = vector.extract_strided_slice %175 {offsets = [0, 40], sizes = [8, 8], strides = [1, 1]} : vector<16x96xf32> to vector<8x8xf32>
    %199 = vector.extract_strided_slice %175 {offsets = [0, 72], sizes = [8, 8], strides = [1, 1]} : vector<16x96xf32> to vector<8x8xf32>
    %cst_90 = arith.constant dense<0.000000e+00> : vector<8x8xf32>
    %200 = tpu.matmul %197, %198, %cst_90 {dimension_numbers = #tpu.dot_dimension_numbers<[1], [1], [0], [0], [0, 0, 1, 0], [], []>} : vector<8x8xf32>, vector<8x8xf32>, vector<8x8xf32> -> vector<8x8xf32>
    %cst_91 = arith.constant dense<0xFF800000> : vector<8xf32>
    %201 = vector.multi_reduction <maximumf>, %200, %cst_91 [1] : vector<8x8xf32> to vector<8xf32>
    %202 = vector.shape_cast %201 : vector<8xf32> to vector<8x1xf32>
    %203 = vector.broadcast %202 : vector<8x1xf32> to vector<8x8xf32>
    %204 = arith.subf %200, %203 : vector<8x8xf32>
    %205 = math.exp %204 : vector<8x8xf32>
    %cst_92 = arith.constant dense<0.000000e+00> : vector<8xf32>
    %206 = vector.multi_reduction <add>, %205, %cst_92 [1] : vector<8x8xf32> to vector<8xf32>
    %207 = vector.shape_cast %206 : vector<8xf32> to vector<8x1xf32>
    %208 = vector.broadcast %207 : vector<8x1xf32> to vector<8x8xf32>
    %209 = arith.divf %205, %208 : vector<8x8xf32>
    %cst_93 = arith.constant dense<0.000000e+00> : vector<8x8xf32>
    %210 = tpu.matmul %209, %199, %cst_93 {dimension_numbers = #tpu.dot_dimension_numbers<[1], [0], [0], [1], [0, 0, 1, 1], [], []>} : vector<8x8xf32>, vector<8x8xf32>, vector<8x8xf32> -> vector<8x8xf32>
    %211 = vector.extract_strided_slice %176 {offsets = [8, 0], sizes = [8, 32], strides = [1, 1]} : vector<32x32xf32> to vector<8x32xf32>
    %cst_94 = arith.constant dense<0.000000e+00> : vector<8x32xf32>
    %212 = tpu.matmul %210, %211, %cst_94 {dimension_numbers = #tpu.dot_dimension_numbers<[1], [0], [0], [1], [0, 0, 1, 1], [], []>} : vector<8x8xf32>, vector<8x32xf32>, vector<8x32xf32> -> vector<8x32xf32>
    %213 = arith.addf %194, %212 : vector<8x32xf32>
    %214 = vector.extract_strided_slice %175 {offsets = [0, 16], sizes = [8, 8], strides = [1, 1]} : vector<16x96xf32> to vector<8x8xf32>
    %cst_95 = arith.constant 0.353553385 : f32
    %215 = vector.broadcast %cst_95 : f32 to vector<8x8xf32>
    %216 = arith.mulf %214, %215 : vector<8x8xf32>
    %217 = vector.extract_strided_slice %175 {offsets = [0, 48], sizes = [8, 8], strides = [1, 1]} : vector<16x96xf32> to vector<8x8xf32>
    %218 = vector.extract_strided_slice %175 {offsets = [0, 80], sizes = [8, 8], strides = [1, 1]} : vector<16x96xf32> to vector<8x8xf32>
    %cst_96 = arith.constant dense<0.000000e+00> : vector<8x8xf32>
    %219 = tpu.matmul %216, %217, %cst_96 {dimension_numbers = #tpu.dot_dimension_numbers<[1], [1], [0], [0], [0, 0, 1, 0], [], []>} : vector<8x8xf32>, vector<8x8xf32>, vector<8x8xf32> -> vector<8x8xf32>
    %cst_97 = arith.constant dense<0xFF800000> : vector<8xf32>
    %220 = vector.multi_reduction <maximumf>, %219, %cst_97 [1] : vector<8x8xf32> to vector<8xf32>
    %221 = vector.shape_cast %220 : vector<8xf32> to vector<8x1xf32>
    %222 = vector.broadcast %221 : vector<8x1xf32> to vector<8x8xf32>
    %223 = arith.subf %219, %222 : vector<8x8xf32>
    %224 = math.exp %223 : vector<8x8xf32>
    %cst_98 = arith.constant dense<0.000000e+00> : vector<8xf32>
    %225 = vector.multi_reduction <add>, %224, %cst_98 [1] : vector<8x8xf32> to vector<8xf32>
    %226 = vector.shape_cast %225 : vector<8xf32> to vector<8x1xf32>
    %227 = vector.broadcast %226 : vector<8x1xf32> to vector<8x8xf32>
    %228 = arith.divf %224, %227 : vector<8x8xf32>
    %cst_99 = arith.constant dense<0.000000e+00> : vector<8x8xf32>
    %229 = tpu.matmul %228, %218, %cst_99 {dimension_numbers = #tpu.dot_dimension_numbers<[1], [0], [0], [1], [0, 0, 1, 1], [], []>} : vector<8x8xf32>, vector<8x8xf32>, vector<8x8xf32> -> vector<8x8xf32>
    %230 = vector.extract_strided_slice %176 {offsets = [16, 0], sizes = [8, 32], strides = [1, 1]} : vector<32x32xf32> to vector<8x32xf32>
    %cst_100 = arith.constant dense<0.000000e+00> : vector<8x32xf32>
    %231 = tpu.matmul %229, %230, %cst_100 {dimension_numbers = #tpu.dot_dimension_numbers<[1], [0], [0], [1], [0, 0, 1, 1], [], []>} : vector<8x8xf32>, vector<8x32xf32>, vector<8x32xf32> -> vector<8x32xf32>
    %232 = arith.addf %213, %231 : vector<8x32xf32>
    %233 = vector.extract_strided_slice %175 {offsets = [0, 24], sizes = [8, 8], strides = [1, 1]} : vector<16x96xf32> to vector<8x8xf32>
    %cst_101 = arith.constant 0.353553385 : f32
    %234 = vector.broadcast %cst_101 : f32 to vector<8x8xf32>
    %235 = arith.mulf %233, %234 : vector<8x8xf32>
    %236 = vector.extract_strided_slice %175 {offsets = [0, 56], sizes = [8, 8], strides = [1, 1]} : vector<16x96xf32> to vector<8x8xf32>
    %237 = vector.extract_strided_slice %175 {offsets = [0, 88], sizes = [8, 8], strides = [1, 1]} : vector<16x96xf32> to vector<8x8xf32>
    %cst_102 = arith.constant dense<0.000000e+00> : vector<8x8xf32>
    %238 = tpu.matmul %235, %236, %cst_102 {dimension_numbers = #tpu.dot_dimension_numbers<[1], [1], [0], [0], [0, 0, 1, 0], [], []>} : vector<8x8xf32>, vector<8x8xf32>, vector<8x8xf32> -> vector<8x8xf32>
    %cst_103 = arith.constant dense<0xFF800000> : vector<8xf32>
    %239 = vector.multi_reduction <maximumf>, %238, %cst_103 [1] : vector<8x8xf32> to vector<8xf32>
    %240 = vector.shape_cast %239 : vector<8xf32> to vector<8x1xf32>
    %241 = vector.broadcast %240 : vector<8x1xf32> to vector<8x8xf32>
    %242 = arith.subf %238, %241 : vector<8x8xf32>
    %243 = math.exp %242 : vector<8x8xf32>
    %cst_104 = arith.constant dense<0.000000e+00> : vector<8xf32>
    %244 = vector.multi_reduction <add>, %243, %cst_104 [1] : vector<8x8xf32> to vector<8xf32>
    %245 = vector.shape_cast %244 : vector<8xf32> to vector<8x1xf32>
    %246 = vector.broadcast %245 : vector<8x1xf32> to vector<8x8xf32>
    %247 = arith.divf %243, %246 : vector<8x8xf32>
    %cst_105 = arith.constant dense<0.000000e+00> : vector<8x8xf32>
    %248 = tpu.matmul %247, %237, %cst_105 {dimension_numbers = #tpu.dot_dimension_numbers<[1], [0], [0], [1], [0, 0, 1, 1], [], []>} : vector<8x8xf32>, vector<8x8xf32>, vector<8x8xf32> -> vector<8x8xf32>
    %249 = vector.extract_strided_slice %176 {offsets = [24, 0], sizes = [8, 32], strides = [1, 1]} : vector<32x32xf32> to vector<8x32xf32>
    %cst_106 = arith.constant dense<0.000000e+00> : vector<8x32xf32>
    %250 = tpu.matmul %248, %249, %cst_106 {dimension_numbers = #tpu.dot_dimension_numbers<[1], [0], [0], [1], [0, 0, 1, 1], [], []>} : vector<8x8xf32>, vector<8x32xf32>, vector<8x32xf32> -> vector<8x32xf32>
    %251 = arith.addf %232, %250 : vector<8x32xf32>
    %252 = vector.extract_strided_slice %175 {offsets = [8, 0], sizes = [8, 8], strides = [1, 1]} : vector<16x96xf32> to vector<8x8xf32>
    %cst_107 = arith.constant 0.353553385 : f32
    %253 = vector.broadcast %cst_107 : f32 to vector<8x8xf32>
    %254 = arith.mulf %252, %253 : vector<8x8xf32>
    %255 = vector.extract_strided_slice %175 {offsets = [8, 32], sizes = [8, 8], strides = [1, 1]} : vector<16x96xf32> to vector<8x8xf32>
    %256 = vector.extract_strided_slice %175 {offsets = [8, 64], sizes = [8, 8], strides = [1, 1]} : vector<16x96xf32> to vector<8x8xf32>
    %cst_108 = arith.constant dense<0.000000e+00> : vector<8x8xf32>
    %257 = tpu.matmul %254, %255, %cst_108 {dimension_numbers = #tpu.dot_dimension_numbers<[1], [1], [0], [0], [0, 0, 1, 0], [], []>} : vector<8x8xf32>, vector<8x8xf32>, vector<8x8xf32> -> vector<8x8xf32>
    %cst_109 = arith.constant dense<0xFF800000> : vector<8xf32>
    %258 = vector.multi_reduction <maximumf>, %257, %cst_109 [1] : vector<8x8xf32> to vector<8xf32>
    %259 = vector.shape_cast %258 : vector<8xf32> to vector<8x1xf32>
    %260 = vector.broadcast %259 : vector<8x1xf32> to vector<8x8xf32>
    %261 = arith.subf %257, %260 : vector<8x8xf32>
    %262 = math.exp %261 : vector<8x8xf32>
    %cst_110 = arith.constant dense<0.000000e+00> : vector<8xf32>
    %263 = vector.multi_reduction <add>, %262, %cst_110 [1] : vector<8x8xf32> to vector<8xf32>
    %264 = vector.shape_cast %263 : vector<8xf32> to vector<8x1xf32>
    %265 = vector.broadcast %264 : vector<8x1xf32> to vector<8x8xf32>
    %266 = arith.divf %262, %265 : vector<8x8xf32>
    %cst_111 = arith.constant dense<0.000000e+00> : vector<8x8xf32>
    %267 = tpu.matmul %266, %256, %cst_111 {dimension_numbers = #tpu.dot_dimension_numbers<[1], [0], [0], [1], [0, 0, 1, 1], [], []>} : vector<8x8xf32>, vector<8x8xf32>, vector<8x8xf32> -> vector<8x8xf32>
    %268 = vector.extract_strided_slice %176 {offsets = [0, 0], sizes = [8, 32], strides = [1, 1]} : vector<32x32xf32> to vector<8x32xf32>
    %cst_112 = arith.constant dense<0.000000e+00> : vector<8x32xf32>
    %269 = tpu.matmul %267, %268, %cst_112 {dimension_numbers = #tpu.dot_dimension_numbers<[1], [0], [0], [1], [0, 0, 1, 1], [], []>} : vector<8x8xf32>, vector<8x32xf32>, vector<8x32xf32> -> vector<8x32xf32>
    %270 = vector.extract_strided_slice %175 {offsets = [8, 8], sizes = [8, 8], strides = [1, 1]} : vector<16x96xf32> to vector<8x8xf32>
    %cst_113 = arith.constant 0.353553385 : f32
    %271 = vector.broadcast %cst_113 : f32 to vector<8x8xf32>
    %272 = arith.mulf %270, %271 : vector<8x8xf32>
    %273 = vector.extract_strided_slice %175 {offsets = [8, 40], sizes = [8, 8], strides = [1, 1]} : vector<16x96xf32> to vector<8x8xf32>
    %274 = vector.extract_strided_slice %175 {offsets = [8, 72], sizes = [8, 8], strides = [1, 1]} : vector<16x96xf32> to vector<8x8xf32>
    %cst_114 = arith.constant dense<0.000000e+00> : vector<8x8xf32>
    %275 = tpu.matmul %272, %273, %cst_114 {dimension_numbers = #tpu.dot_dimension_numbers<[1], [1], [0], [0], [0, 0, 1, 0], [], []>} : vector<8x8xf32>, vector<8x8xf32>, vector<8x8xf32> -> vector<8x8xf32>
    %cst_115 = arith.constant dense<0xFF800000> : vector<8xf32>
    %276 = vector.multi_reduction <maximumf>, %275, %cst_115 [1] : vector<8x8xf32> to vector<8xf32>
    %277 = vector.shape_cast %276 : vector<8xf32> to vector<8x1xf32>
    %278 = vector.broadcast %277 : vector<8x1xf32> to vector<8x8xf32>
    %279 = arith.subf %275, %278 : vector<8x8xf32>
    %280 = math.exp %279 : vector<8x8xf32>
    %cst_116 = arith.constant dense<0.000000e+00> : vector<8xf32>
    %281 = vector.multi_reduction <add>, %280, %cst_116 [1] : vector<8x8xf32> to vector<8xf32>
    %282 = vector.shape_cast %281 : vector<8xf32> to vector<8x1xf32>
    %283 = vector.broadcast %282 : vector<8x1xf32> to vector<8x8xf32>
    %284 = arith.divf %280, %283 : vector<8x8xf32>
    %cst_117 = arith.constant dense<0.000000e+00> : vector<8x8xf32>
    %285 = tpu.matmul %284, %274, %cst_117 {dimension_numbers = #tpu.dot_dimension_numbers<[1], [0], [0], [1], [0, 0, 1, 1], [], []>} : vector<8x8xf32>, vector<8x8xf32>, vector<8x8xf32> -> vector<8x8xf32>
    %286 = vector.extract_strided_slice %176 {offsets = [8, 0], sizes = [8, 32], strides = [1, 1]} : vector<32x32xf32> to vector<8x32xf32>
    %cst_118 = arith.constant dense<0.000000e+00> : vector<8x32xf32>
    %287 = tpu.matmul %285, %286, %cst_118 {dimension_numbers = #tpu.dot_dimension_numbers<[1], [0], [0], [1], [0, 0, 1, 1], [], []>} : vector<8x8xf32>, vector<8x32xf32>, vector<8x32xf32> -> vector<8x32xf32>
    %288 = arith.addf %269, %287 : vector<8x32xf32>
    %289 = vector.extract_strided_slice %175 {offsets = [8, 16], sizes = [8, 8], strides = [1, 1]} : vector<16x96xf32> to vector<8x8xf32>
    %cst_119 = arith.constant 0.353553385 : f32
    %290 = vector.broadcast %cst_119 : f32 to vector<8x8xf32>
    %291 = arith.mulf %289, %290 : vector<8x8xf32>
    %292 = vector.extract_strided_slice %175 {offsets = [8, 48], sizes = [8, 8], strides = [1, 1]} : vector<16x96xf32> to vector<8x8xf32>
    %293 = vector.extract_strided_slice %175 {offsets = [8, 80], sizes = [8, 8], strides = [1, 1]} : vector<16x96xf32> to vector<8x8xf32>
    %cst_120 = arith.constant dense<0.000000e+00> : vector<8x8xf32>
    %294 = tpu.matmul %291, %292, %cst_120 {dimension_numbers = #tpu.dot_dimension_numbers<[1], [1], [0], [0], [0, 0, 1, 0], [], []>} : vector<8x8xf32>, vector<8x8xf32>, vector<8x8xf32> -> vector<8x8xf32>
    %cst_121 = arith.constant dense<0xFF800000> : vector<8xf32>
    %295 = vector.multi_reduction <maximumf>, %294, %cst_121 [1] : vector<8x8xf32> to vector<8xf32>
    %296 = vector.shape_cast %295 : vector<8xf32> to vector<8x1xf32>
    %297 = vector.broadcast %296 : vector<8x1xf32> to vector<8x8xf32>
    %298 = arith.subf %294, %297 : vector<8x8xf32>
    %299 = math.exp %298 : vector<8x8xf32>
    %cst_122 = arith.constant dense<0.000000e+00> : vector<8xf32>
    %300 = vector.multi_reduction <add>, %299, %cst_122 [1] : vector<8x8xf32> to vector<8xf32>
    %301 = vector.shape_cast %300 : vector<8xf32> to vector<8x1xf32>
    %302 = vector.broadcast %301 : vector<8x1xf32> to vector<8x8xf32>
    %303 = arith.divf %299, %302 : vector<8x8xf32>
    %cst_123 = arith.constant dense<0.000000e+00> : vector<8x8xf32>
    %304 = tpu.matmul %303, %293, %cst_123 {dimension_numbers = #tpu.dot_dimension_numbers<[1], [0], [0], [1], [0, 0, 1, 1], [], []>} : vector<8x8xf32>, vector<8x8xf32>, vector<8x8xf32> -> vector<8x8xf32>
    %305 = vector.extract_strided_slice %176 {offsets = [16, 0], sizes = [8, 32], strides = [1, 1]} : vector<32x32xf32> to vector<8x32xf32>
    %cst_124 = arith.constant dense<0.000000e+00> : vector<8x32xf32>
    %306 = tpu.matmul %304, %305, %cst_124 {dimension_numbers = #tpu.dot_dimension_numbers<[1], [0], [0], [1], [0, 0, 1, 1], [], []>} : vector<8x8xf32>, vector<8x32xf32>, vector<8x32xf32> -> vector<8x32xf32>
    %307 = arith.addf %288, %306 : vector<8x32xf32>
    %308 = vector.extract_strided_slice %175 {offsets = [8, 24], sizes = [8, 8], strides = [1, 1]} : vector<16x96xf32> to vector<8x8xf32>
    %cst_125 = arith.constant 0.353553385 : f32
    %309 = vector.broadcast %cst_125 : f32 to vector<8x8xf32>
    %310 = arith.mulf %308, %309 : vector<8x8xf32>
    %311 = vector.extract_strided_slice %175 {offsets = [8, 56], sizes = [8, 8], strides = [1, 1]} : vector<16x96xf32> to vector<8x8xf32>
    %312 = vector.extract_strided_slice %175 {offsets = [8, 88], sizes = [8, 8], strides = [1, 1]} : vector<16x96xf32> to vector<8x8xf32>
    %cst_126 = arith.constant dense<0.000000e+00> : vector<8x8xf32>
    %313 = tpu.matmul %310, %311, %cst_126 {dimension_numbers = #tpu.dot_dimension_numbers<[1], [1], [0], [0], [0, 0, 1, 0], [], []>} : vector<8x8xf32>, vector<8x8xf32>, vector<8x8xf32> -> vector<8x8xf32>
    %cst_127 = arith.constant dense<0xFF800000> : vector<8xf32>
    %314 = vector.multi_reduction <maximumf>, %313, %cst_127 [1] : vector<8x8xf32> to vector<8xf32>
    %315 = vector.shape_cast %314 : vector<8xf32> to vector<8x1xf32>
    %316 = vector.broadcast %315 : vector<8x1xf32> to vector<8x8xf32>
    %317 = arith.subf %313, %316 : vector<8x8xf32>
    %318 = math.exp %317 : vector<8x8xf32>
    %cst_128 = arith.constant dense<0.000000e+00> : vector<8xf32>
    %319 = vector.multi_reduction <add>, %318, %cst_128 [1] : vector<8x8xf32> to vector<8xf32>
    %320 = vector.shape_cast %319 : vector<8xf32> to vector<8x1xf32>
    %321 = vector.broadcast %320 : vector<8x1xf32> to vector<8x8xf32>
    %322 = arith.divf %318, %321 : vector<8x8xf32>
    %cst_129 = arith.constant dense<0.000000e+00> : vector<8x8xf32>
    %323 = tpu.matmul %322, %312, %cst_129 {dimension_numbers = #tpu.dot_dimension_numbers<[1], [0], [0], [1], [0, 0, 1, 1], [], []>} : vector<8x8xf32>, vector<8x8xf32>, vector<8x8xf32> -> vector<8x8xf32>
    %324 = vector.extract_strided_slice %176 {offsets = [24, 0], sizes = [8, 32], strides = [1, 1]} : vector<32x32xf32> to vector<8x32xf32>
    %cst_130 = arith.constant dense<0.000000e+00> : vector<8x32xf32>
    %325 = tpu.matmul %323, %324, %cst_130 {dimension_numbers = #tpu.dot_dimension_numbers<[1], [0], [0], [1], [0, 0, 1, 1], [], []>} : vector<8x8xf32>, vector<8x32xf32>, vector<8x32xf32> -> vector<8x32xf32>
    %326 = arith.addf %307, %325 : vector<8x32xf32>
    %327 = tpu.concatenate %251, %326 in 0 : vector<8x32xf32>, vector<8x32xf32> -> vector<16x32xf32>
    %c0_131 = arith.constant 0 : index
    %c0_132 = arith.constant 0 : index
    %328 = vector.load %arg7[%c0_131, %c0_132] : memref<1x32xf32, #tpu.memory_space<vmem>>, vector<1x32xf32>
    %329 = vector.broadcast %328 : vector<1x32xf32> to vector<16x32xf32>
    %330 = arith.addf %327, %329 : vector<16x32xf32>
    %cst_133 = arith.constant dense<0.000000e+00> : vector<16xf32>
    %331 = vector.multi_reduction <add>, %330, %cst_133 [1] : vector<16x32xf32> to vector<16xf32>
    %332 = vector.shape_cast %331 : vector<16xf32> to vector<16x1xf32>
    %cst_134 = arith.constant 3.200000e+01 : f32
    %333 = vector.broadcast %cst_134 : f32 to vector<16x1xf32>
    %334 = arith.divf %332, %333 : vector<16x1xf32>
    %335 = vector.broadcast %334 : vector<16x1xf32> to vector<16x32xf32>
    %336 = arith.subf %330, %335 : vector<16x32xf32>
    %337 = arith.mulf %336, %336 : vector<16x32xf32>
    %cst_135 = arith.constant dense<0.000000e+00> : vector<16xf32>
    %338 = vector.multi_reduction <add>, %337, %cst_135 [1] : vector<16x32xf32> to vector<16xf32>
    %339 = vector.shape_cast %338 : vector<16xf32> to vector<16x1xf32>
    %cst_136 = arith.constant 3.200000e+01 : f32
    %340 = vector.broadcast %cst_136 : f32 to vector<16x1xf32>
    %341 = arith.divf %339, %340 : vector<16x1xf32>
    %cst_137 = arith.constant 9.99999974E-6 : f32
    %342 = vector.broadcast %cst_137 : f32 to vector<16x1xf32>
    %343 = arith.addf %341, %342 : vector<16x1xf32>
    %344 = math.rsqrt %343 : vector<16x1xf32>
    %345 = vector.broadcast %344 : vector<16x1xf32> to vector<16x32xf32>
    %346 = arith.mulf %336, %345 : vector<16x32xf32>
    %c0_138 = arith.constant 0 : index
    %c0_139 = arith.constant 0 : index
    %347 = vector.load %arg4[%c0_138, %c0_139] : memref<1x32xf32, #tpu.memory_space<vmem>>, vector<1x32xf32>
    %348 = vector.broadcast %347 : vector<1x32xf32> to vector<16x32xf32>
    %349 = arith.mulf %346, %348 : vector<16x32xf32>
    %c0_140 = arith.constant 0 : index
    %c0_141 = arith.constant 0 : index
    %350 = vector.load %arg3[%c0_140, %c0_141] : memref<1x32xf32, #tpu.memory_space<vmem>>, vector<1x32xf32>
    %351 = vector.broadcast %350 : vector<1x32xf32> to vector<16x32xf32>
    %352 = arith.addf %349, %351 : vector<16x32xf32>
    %c0_142 = arith.constant 0 : index
    %c0_143 = arith.constant 0 : index
    %353 = vector.load %arg23[%c0_142, %c0_143] : memref<32x64xf32, #tpu.memory_space<vmem>>, vector<32x64xf32>
    %cst_144 = arith.constant dense<0.000000e+00> : vector<16x64xf32>
    %354 = tpu.matmul %352, %353, %cst_144 {dimension_numbers = #tpu.dot_dimension_numbers<[1], [0], [0], [1], [0, 0, 1, 1], [], []>} : vector<16x32xf32>, vector<32x64xf32>, vector<16x64xf32> -> vector<16x64xf32>
    %c0_145 = arith.constant 0 : index
    %c0_146 = arith.constant 0 : index
    %355 = vector.load %arg22[%c0_145, %c0_146] : memref<1x64xf32, #tpu.memory_space<vmem>>, vector<1x64xf32>
    %356 = vector.broadcast %355 : vector<1x64xf32> to vector<16x64xf32>
    %357 = arith.addf %354, %356 : vector<16x64xf32>
    %cst_147 = arith.constant 0.000000e+00 : f32
    %358 = vector.broadcast %cst_147 : f32 to vector<16x64xf32>
    %359 = arith.maximumf %357, %358 : vector<16x64xf32>
    %c0_148 = arith.constant 0 : index
    %c0_149 = arith.constant 0 : index
    %360 = vector.load %arg25[%c0_148, %c0_149] : memref<64x32xf32, #tpu.memory_space<vmem>>, vector<64x32xf32>
    %cst_150 = arith.constant dense<0.000000e+00> : vector<16x32xf32>
    %361 = tpu.matmul %359, %360, %cst_150 {dimension_numbers = #tpu.dot_dimension_numbers<[1], [0], [0], [1], [0, 0, 1, 1], [], []>} : vector<16x64xf32>, vector<64x32xf32>, vector<16x32xf32> -> vector<16x32xf32>
    %c0_151 = arith.constant 0 : index
    %c0_152 = arith.constant 0 : index
    %362 = vector.load %arg24[%c0_151, %c0_152] : memref<1x32xf32, #tpu.memory_space<vmem>>, vector<1x32xf32>
    %363 = vector.broadcast %362 : vector<1x32xf32> to vector<16x32xf32>
    %364 = arith.addf %361, %363 : vector<16x32xf32>
    %365 = arith.addf %352, %364 : vector<16x32xf32>
    %cst_153 = arith.constant dense<0.000000e+00> : vector<16xf32>
    %366 = vector.multi_reduction <add>, %365, %cst_153 [1] : vector<16x32xf32> to vector<16xf32>
    %367 = vector.shape_cast %366 : vector<16xf32> to vector<16x1xf32>
    %cst_154 = arith.constant 3.200000e+01 : f32
    %368 = vector.broadcast %cst_154 : f32 to vector<16x1xf32>
    %369 = arith.divf %367, %368 : vector<16x1xf32>
    %370 = vector.broadcast %369 : vector<16x1xf32> to vector<16x32xf32>
    %371 = arith.subf %365, %370 : vector<16x32xf32>
    %372 = arith.mulf %371, %371 : vector<16x32xf32>
    %cst_155 = arith.constant dense<0.000000e+00> : vector<16xf32>
    %373 = vector.multi_reduction <add>, %372, %cst_155 [1] : vector<16x32xf32> to vector<16xf32>
    %374 = vector.shape_cast %373 : vector<16xf32> to vector<16x1xf32>
    %cst_156 = arith.constant 3.200000e+01 : f32
    %375 = vector.broadcast %cst_156 : f32 to vector<16x1xf32>
    %376 = arith.divf %374, %375 : vector<16x1xf32>
    %cst_157 = arith.constant 9.99999974E-6 : f32
    %377 = vector.broadcast %cst_157 : f32 to vector<16x1xf32>
    %378 = arith.addf %376, %377 : vector<16x1xf32>
    %379 = math.rsqrt %378 : vector<16x1xf32>
    %380 = vector.broadcast %379 : vector<16x1xf32> to vector<16x32xf32>
    %381 = arith.mulf %371, %380 : vector<16x32xf32>
    %c0_158 = arith.constant 0 : index
    %c0_159 = arith.constant 0 : index
    %382 = vector.load %arg27[%c0_158, %c0_159] : memref<1x32xf32, #tpu.memory_space<vmem>>, vector<1x32xf32>
    %383 = vector.broadcast %382 : vector<1x32xf32> to vector<16x32xf32>
    %384 = arith.mulf %381, %383 : vector<16x32xf32>
    %c0_160 = arith.constant 0 : index
    %c0_161 = arith.constant 0 : index
    %385 = vector.load %arg26[%c0_160, %c0_161] : memref<1x32xf32, #tpu.memory_space<vmem>>, vector<1x32xf32>
    %386 = vector.broadcast %385 : vector<1x32xf32> to vector<16x32xf32>
    %387 = arith.addf %384, %386 : vector<16x32xf32>
    %c0_162 = arith.constant 0 : index
    %c0_163 = arith.constant 0 : index
    %388 = vector.load %arg45[%c0_162, %c0_163] : memref<16x32xf32, #tpu.memory_space<vmem>>, vector<16x32xf32>
    tpu.vector_store %arg45[%c0_162, %c0_163], %387 {strides = array<i32>} : memref<16x32xf32, #tpu.memory_space<vmem>>, vector<16x32xf32>,
    %c0_164 = arith.constant 0 : index
    %c0_165 = arith.constant 0 : index
    %389 = vector.load %arg9[%c0_164, %c0_165] : memref<32x32xf32, #tpu.memory_space<vmem>>, vector<32x32xf32>
    %cst_166 = arith.constant dense<0.000000e+00> : vector<16x32xf32>
    %390 = tpu.matmul %387, %389, %cst_166 {dimension_numbers = #tpu.dot_dimension_numbers<[1], [0], [0], [1], [0, 0, 1, 1], [], []>} : vector<16x32xf32>, vector<32x32xf32>, vector<16x32xf32> -> vector<16x32xf32>
    %cst_167 = arith.constant dense<0.000000e+00> : vector<16xf32>
    %391 = vector.multi_reduction <add>, %390, %cst_167 [1] : vector<16x32xf32> to vector<16xf32>
    %392 = vector.shape_cast %391 : vector<16xf32> to vector<16x1xf32>
    %cst_168 = arith.constant 3.200000e+01 : f32
    %393 = vector.broadcast %cst_168 : f32 to vector<16x1xf32>
    %394 = arith.divf %392, %393 : vector<16x1xf32>
    %395 = vector.broadcast %394 : vector<16x1xf32> to vector<16x32xf32>
    %396 = arith.subf %390, %395 : vector<16x32xf32>
    %397 = arith.mulf %396, %396 : vector<16x32xf32>
    %cst_169 = arith.constant dense<0.000000e+00> : vector<16xf32>
    %398 = vector.multi_reduction <add>, %397, %cst_169 [1] : vector<16x32xf32> to vector<16xf32>
    %399 = vector.shape_cast %398 : vector<16xf32> to vector<16x1xf32>
    %cst_170 = arith.constant 3.200000e+01 : f32
    %400 = vector.broadcast %cst_170 : f32 to vector<16x1xf32>
    %401 = arith.divf %399, %400 : vector<16x1xf32>
    %cst_171 = arith.constant 9.99999974E-6 : f32
    %402 = vector.broadcast %cst_171 : f32 to vector<16x1xf32>
    %403 = arith.addf %401, %402 : vector<16x1xf32>
    %404 = math.rsqrt %403 : vector<16x1xf32>
    %405 = vector.broadcast %404 : vector<16x1xf32> to vector<16x32xf32>
    %406 = arith.mulf %396, %405 : vector<16x32xf32>
    %c0_172 = arith.constant 0 : index
    %c0_173 = arith.constant 0 : index
    %407 = vector.load %arg11[%c0_172, %c0_173] : memref<1x32xf32, #tpu.memory_space<vmem>>, vector<1x32xf32>
    %408 = vector.broadcast %407 : vector<1x32xf32> to vector<16x32xf32>
    %409 = arith.mulf %406, %408 : vector<16x32xf32>
    %c0_174 = arith.constant 0 : index
    %c0_175 = arith.constant 0 : index
    %410 = vector.load %arg10[%c0_174, %c0_175] : memref<1x32xf32, #tpu.memory_space<vmem>>, vector<1x32xf32>
    %411 = vector.broadcast %410 : vector<1x32xf32> to vector<16x32xf32>
    %412 = arith.addf %409, %411 : vector<16x32xf32>
    %cst_176 = arith.constant 0.000000e+00 : f32
    %413 = vector.broadcast %cst_176 : f32 to vector<16x32xf32>
    %414 = arith.maximumf %412, %413 : vector<16x32xf32>
    %c0_177 = arith.constant 0 : index
    %c0_178 = arith.constant 0 : index
    %415 = vector.load %arg15[%c0_177, %c0_178] : memref<32x4xf32, #tpu.memory_space<vmem>>, vector<32x4xf32>
    %cst_179 = arith.constant dense<0.000000e+00> : vector<16x4xf32>
    %416 = tpu.matmul %414, %415, %cst_179 {dimension_numbers = #tpu.dot_dimension_numbers<[1], [0], [0], [1], [0, 0, 1, 1], [], []>} : vector<16x32xf32>, vector<32x4xf32>, vector<16x4xf32> -> vector<16x4xf32>
    %c0_180 = arith.constant 0 : index
    %c0_181 = arith.constant 0 : index
    %417 = vector.load %arg14[%c0_180, %c0_181] : memref<1x4xf32, #tpu.memory_space<vmem>>, vector<1x4xf32>
    %418 = vector.broadcast %417 : vector<1x4xf32> to vector<16x4xf32>
    %419 = arith.addf %416, %418 : vector<16x4xf32>
    %c0_182 = arith.constant 0 : index
    %c0_183 = arith.constant 0 : index
    %420 = vector.load %arg43[%c0_182, %c0_183] : memref<16x4xf32, #tpu.memory_space<vmem>>, vector<16x4xf32>
    tpu.vector_store %arg43[%c0_182, %c0_183], %419 {strides = array<i32>} : memref<16x4xf32, #tpu.memory_space<vmem>>, vector<16x4xf32>,
    %c0_184 = arith.constant 0 : index
    %c0_185 = arith.constant 0 : index
    %421 = vector.load %arg36[%c0_184, %c0_185] : memref<32x32xf32, #tpu.memory_space<vmem>>, vector<32x32xf32>
    %cst_186 = arith.constant dense<0.000000e+00> : vector<16x32xf32>
    %422 = tpu.matmul %387, %421, %cst_186 {dimension_numbers = #tpu.dot_dimension_numbers<[1], [0], [0], [1], [0, 0, 1, 1], [], []>} : vector<16x32xf32>, vector<32x32xf32>, vector<16x32xf32> -> vector<16x32xf32>
    %cst_187 = arith.constant dense<0.000000e+00> : vector<16xf32>
    %423 = vector.multi_reduction <add>, %422, %cst_187 [1] : vector<16x32xf32> to vector<16xf32>
    %424 = vector.shape_cast %423 : vector<16xf32> to vector<16x1xf32>
    %cst_188 = arith.constant 3.200000e+01 : f32
    %425 = vector.broadcast %cst_188 : f32 to vector<16x1xf32>
    %426 = arith.divf %424, %425 : vector<16x1xf32>
    %427 = vector.broadcast %426 : vector<16x1xf32> to vector<16x32xf32>
    %428 = arith.subf %422, %427 : vector<16x32xf32>
    %429 = arith.mulf %428, %428 : vector<16x32xf32>
    %cst_189 = arith.constant dense<0.000000e+00> : vector<16xf32>
    %430 = vector.multi_reduction <add>, %429, %cst_189 [1] : vector<16x32xf32> to vector<16xf32>
    %431 = vector.shape_cast %430 : vector<16xf32> to vector<16x1xf32>
    %cst_190 = arith.constant 3.200000e+01 : f32
    %432 = vector.broadcast %cst_190 : f32 to vector<16x1xf32>
    %433 = arith.divf %431, %432 : vector<16x1xf32>
    %cst_191 = arith.constant 9.99999974E-6 : f32
    %434 = vector.broadcast %cst_191 : f32 to vector<16x1xf32>
    %435 = arith.addf %433, %434 : vector<16x1xf32>
    %436 = math.rsqrt %435 : vector<16x1xf32>
    %437 = vector.broadcast %436 : vector<16x1xf32> to vector<16x32xf32>
    %438 = arith.mulf %428, %437 : vector<16x32xf32>
    %c0_192 = arith.constant 0 : index
    %c0_193 = arith.constant 0 : index
    %439 = vector.load %arg38[%c0_192, %c0_193] : memref<1x32xf32, #tpu.memory_space<vmem>>, vector<1x32xf32>
    %440 = vector.broadcast %439 : vector<1x32xf32> to vector<16x32xf32>
    %441 = arith.mulf %438, %440 : vector<16x32xf32>
    %c0_194 = arith.constant 0 : index
    %c0_195 = arith.constant 0 : index
    %442 = vector.load %arg37[%c0_194, %c0_195] : memref<1x32xf32, #tpu.memory_space<vmem>>, vector<1x32xf32>
    %443 = vector.broadcast %442 : vector<1x32xf32> to vector<16x32xf32>
    %444 = arith.addf %441, %443 : vector<16x32xf32>
    %cst_196 = arith.constant 0.000000e+00 : f32
    %445 = vector.broadcast %cst_196 : f32 to vector<16x32xf32>
    %446 = arith.maximumf %444, %445 : vector<16x32xf32>
    %c0_197 = arith.constant 0 : index
    %c0_198 = arith.constant 0 : index
    %447 = vector.load %arg19[%c0_197, %c0_198] : memref<32x32xf32, #tpu.memory_space<vmem>>, vector<32x32xf32>
    %cst_199 = arith.constant dense<0.000000e+00> : vector<16x32xf32>
    %448 = tpu.matmul %446, %447, %cst_199 {dimension_numbers = #tpu.dot_dimension_numbers<[1], [0], [0], [1], [0, 0, 1, 1], [], []>} : vector<16x32xf32>, vector<32x32xf32>, vector<16x32xf32> -> vector<16x32xf32>
    %c0_200 = arith.constant 0 : index
    %c0_201 = arith.constant 0 : index
    %449 = vector.load %arg18[%c0_200, %c0_201] : memref<1x32xf32, #tpu.memory_space<vmem>>, vector<1x32xf32>
    %450 = vector.broadcast %449 : vector<1x32xf32> to vector<16x32xf32>
    %451 = arith.addf %448, %450 : vector<16x32xf32>
    %452 = vector.extract_strided_slice %451 {offsets = [0, 0], sizes = [8, 32], strides = [1, 1]} : vector<16x32xf32> to vector<8x32xf32>
    %453 = vector.extract_strided_slice %0 {offsets = [0, 0], sizes = [64, 32], strides = [1, 1]} : vector<128x32xf32> to vector<64x32xf32>
    %cst_202 = arith.constant dense<0.000000e+00> : vector<8x64xf32>
    %454 = tpu.matmul %452, %453, %cst_202 {dimension_numbers = #tpu.dot_dimension_numbers<[1], [1], [0], [0], [0, 0, 1, 0], [], []>} : vector<8x32xf32>, vector<64x32xf32>, vector<8x64xf32> -> vector<8x64xf32>
    %455 = vector.extract_strided_slice %451 {offsets = [8, 0], sizes = [8, 32], strides = [1, 1]} : vector<16x32xf32> to vector<8x32xf32>
    %456 = vector.extract_strided_slice %0 {offsets = [64, 0], sizes = [64, 32], strides = [1, 1]} : vector<128x32xf32> to vector<64x32xf32>
    %cst_203 = arith.constant dense<0.000000e+00> : vector<8x64xf32>
    %457 = tpu.matmul %455, %456, %cst_203 {dimension_numbers = #tpu.dot_dimension_numbers<[1], [1], [0], [0], [0, 0, 1, 0], [], []>} : vector<8x32xf32>, vector<64x32xf32>, vector<8x64xf32> -> vector<8x64xf32>
    %458 = tpu.concatenate %454, %457 in 1 : vector<8x64xf32>, vector<8x64xf32> -> vector<8x128xf32>
    %c0_204 = arith.constant 0 : index
    %c0_205 = arith.constant 0 : index
    %459 = vector.load %arg44[%c0_204, %c0_205] : memref<8x128xf32, #tpu.memory_space<vmem>>, vector<8x128xf32>
    tpu.vector_store %arg44[%c0_204, %c0_205], %458 {strides = array<i32>} : memref<8x128xf32, #tpu.memory_space<vmem>>, vector<8x128xf32>,
    return
  }
}

module attributes {stable_mosaic.version = 11 : i64} {
  func.func @kernel(%arg0: memref<128x32xf32, #tpu.memory_space<vmem>>, %arg1: memref<8x128xf32, #tpu.memory_space<vmem>>, %arg2: memref<16x32xf32, #tpu.memory_space<vmem>>, %arg3: memref<1x32xf32, #tpu.memory_space<vmem>>, %arg4: memref<1x32xf32, #tpu.memory_space<vmem>>, %arg5: memref<1x96xf32, #tpu.memory_space<vmem>>, %arg6: memref<32x96xf32, #tpu.memory_space<vmem>>, %arg7: memref<1x32xf32, #tpu.memory_space<vmem>>, %arg8: memref<32x32xf32, #tpu.memory_space<vmem>>, %arg9: memref<32x32xf32, #tpu.memory_space<vmem>>, %arg10: memref<1x32xf32, #tpu.memory_space<vmem>>, %arg11: memref<1x32xf32, #tpu.memory_space<vmem>>, %arg12: memref<1x64xf32, #tpu.memory_space<vmem>>, %arg13: memref<32x64xf32, #tpu.memory_space<vmem>>, %arg14: memref<1x4xf32, #tpu.memory_space<vmem>>, %arg15: memref<32x4xf32, #tpu.memory_space<vmem>>, %arg16: memref<1x32xf32, #tpu.memory_space<vmem>>, %arg17: memref<32x32xf32, #tpu.memory_space<vmem>>, %arg18: memref<1x32xf32, #tpu.memory_space<vmem>>, %arg19: memref<32x32xf32, #tpu.memory_space<vmem>>, %arg20: memref<1x32xf32, #tpu.memory_space<vmem>>, %arg21: memref<1x32xf32, #tpu.memory_space<vmem>>, %arg22: memref<1x64xf32, #tpu.memory_space<vmem>>, %arg23: memref<32x64xf32, #tpu.memory_space<vmem>>, %arg24: memref<1x32xf32, #tpu.memory_space<vmem>>, %arg25: memref<64x32xf32, #tpu.memory_space<vmem>>, %arg26: memref<1x32xf32, #tpu.memory_space<vmem>>, %arg27: memref<1x32xf32, #tpu.memory_space<vmem>>, %arg28: memref<1x64xf32, #tpu.memory_space<vmem>>, %arg29: memref<32x64xf32, #tpu.memory_space<vmem>>, %arg30: memref<1x64xf32, #tpu.memory_space<vmem>>, %arg31: memref<32x64xf32, #tpu.memory_space<vmem>>, %arg32: memref<1x32xf32, #tpu.memory_space<vmem>>, %arg33: memref<1x32xf32, #tpu.memory_space<vmem>>, %arg34: memref<1x32xf32, #tpu.memory_space<vmem>>, %arg35: memref<1x32xf32, #tpu.memory_space<vmem>>, %arg36: memref<32x32xf32, #tpu.memory_space<vmem>>, %arg37: memref<1x32xf32, #tpu.memory_space<vmem>>, %arg38: memref<1x32xf32, #tpu.memory_space<vmem>>, %arg39: memref<1x32xf32, #tpu.memory_space<vmem>>, %arg40: memref<1x32xf32, #tpu.memory_space<vmem>>, %arg41: memref<1x32xf32, #tpu.memory_space<vmem>>, %arg42: memref<1x32xf32, #tpu.memory_space<vmem>>, %arg43: memref<16x4xf32, #tpu.memory_space<vmem>>, %arg44: memref<8x128xf32, #tpu.memory_space<vmem>>, %arg45: memref<16x32xf32, #tpu.memory_space<vmem>>) attributes {dimension_semantics = [], scalar_prefetch = 0 : i64, scratch_operands = 0 : i64, tpu.core_type = #tpu.core_type<tc>} {
    %c0 = arith.constant 0 : index
    %c0_0 = arith.constant 0 : index
    %0 = vector.load %arg0[%c0, %c0_0] : memref<128x32xf32, #tpu.memory_space<vmem>>, vector<128x32xf32>
    %c0_1 = arith.constant 0 : index
    %c0_2 = arith.constant 0 : index
    %1 = vector.load %arg1[%c0_1, %c0_2] : memref<8x128xf32, #tpu.memory_space<vmem>>, vector<8x128xf32>
    %c0_3 = arith.constant 0 : index
    %c0_4 = arith.constant 0 : index
    %2 = vector.load %arg2[%c0_3, %c0_4] : memref<16x32xf32, #tpu.memory_space<vmem>>, vector<16x32xf32>
    %3 = arith.negf %1 : vector<8x128xf32>
    %4 = math.exp %3 : vector<8x128xf32>
    %cst = arith.constant 1.000000e+00 : f32
    %5 = vector.broadcast %cst : f32 to vector<8x128xf32>
    %6 = arith.addf %5, %4 : vector<8x128xf32>
    %7 = arith.divf %5, %6 : vector<8x128xf32>
    %cst_5 = arith.constant 5.000000e-01 : f32
    %8 = vector.broadcast %cst_5 : f32 to vector<8x128xf32>
    %9 = arith.cmpf ogt, %7, %8 : vector<8x128xf32>
    %10 = arith.extui %9 : vector<8x128xi1> to vector<8x128xi32>
    %11 = arith.sitofp %10 : vector<8x128xi32> to vector<8x128xf32>
    %12 = vector.extract_strided_slice %11 {offsets = [0, 0], sizes = [8, 64], strides = [1, 1]} : vector<8x128xf32> to vector<8x64xf32>
    %13 = vector.extract_strided_slice %0 {offsets = [0, 0], sizes = [64, 32], strides = [1, 1]} : vector<128x32xf32> to vector<64x32xf32>
    %cst_6 = arith.constant dense<0.000000e+00> : vector<8x32xf32>
    %14 = tpu.matmul %12, %13, %cst_6 {dimension_numbers = #tpu.dot_dimension_numbers<[1], [0], [0], [1], [0, 0, 1, 1], [], []>} : vector<8x64xf32>, vector<64x32xf32>, vector<8x32xf32> -> vector<8x32xf32>
    %15 = vector.extract_strided_slice %11 {offsets = [0, 64], sizes = [8, 64], strides = [1, 1]} : vector<8x128xf32> to vector<8x64xf32>
    %16 = vector.extract_strided_slice %0 {offsets = [64, 0], sizes = [64, 32], strides = [1, 1]} : vector<128x32xf32> to vector<64x32xf32>
    %cst_7 = arith.constant dense<0.000000e+00> : vector<8x32xf32>
    %17 = tpu.matmul %15, %16, %cst_7 {dimension_numbers = #tpu.dot_dimension_numbers<[1], [0], [0], [1], [0, 0, 1, 1], [], []>} : vector<8x64xf32>, vector<64x32xf32>, vector<8x32xf32> -> vector<8x32xf32>
    %18 = tpu.concatenate %14, %17 in 0 : vector<8x32xf32>, vector<8x32xf32> -> vector<16x32xf32>
    %c0_8 = arith.constant 0 : index
    %c0_9 = arith.constant 0 : index
    %19 = vector.load %arg13[%c0_8, %c0_9] : memref<32x64xf32, #tpu.memory_space<vmem>>, vector<32x64xf32>
    %cst_10 = arith.constant dense<0.000000e+00> : vector<16x64xf32>
    %20 = tpu.matmul %18, %19, %cst_10 {dimension_numbers = #tpu.dot_dimension_numbers<[1], [0], [0], [1], [0, 0, 1, 1], [], []>} : vector<16x32xf32>, vector<32x64xf32>, vector<16x64xf32> -> vector<16x64xf32>
    %c0_11 = arith.constant 0 : index
    %c0_12 = arith.constant 0 : index
    %21 = vector.load %arg12[%c0_11, %c0_12] : memref<1x64xf32, #tpu.memory_space<vmem>>, vector<1x64xf32>
    %22 = vector.broadcast %21 : vector<1x64xf32> to vector<16x64xf32>
    %23 = arith.addf %20, %22 : vector<16x64xf32>
    %24 = vector.extract_strided_slice %23 {offsets = [0, 0], sizes = [16, 32], strides = [1, 1]} : vector<16x64xf32> to vector<16x32xf32>
    %25 = vector.extract_strided_slice %23 {offsets = [0, 32], sizes = [16, 32], strides = [1, 1]} : vector<16x64xf32> to vector<16x32xf32>
    %c0_13 = arith.constant 0 : index
    %c0_14 = arith.constant 0 : index
    %26 = vector.load %arg31[%c0_13, %c0_14] : memref<32x64xf32, #tpu.memory_space<vmem>>, vector<32x64xf32>
    %cst_15 = arith.constant dense<0.000000e+00> : vector<16x64xf32>
    %27 = tpu.matmul %2, %26, %cst_15 {dimension_numbers = #tpu.dot_dimension_numbers<[1], [0], [0], [1], [0, 0, 1, 1], [], []>} : vector<16x32xf32>, vector<32x64xf32>, vector<16x64xf32> -> vector<16x64xf32>
    %c0_16 = arith.constant 0 : index
    %c0_17 = arith.constant 0 : index
    %28 = vector.load %arg30[%c0_16, %c0_17] : memref<1x64xf32, #tpu.memory_space<vmem>>, vector<1x64xf32>
    %29 = vector.broadcast %28 : vector<1x64xf32> to vector<16x64xf32>
    %30 = arith.addf %27, %29 : vector<16x64xf32>
    %31 = vector.extract_strided_slice %30 {offsets = [0, 0], sizes = [16, 32], strides = [1, 1]} : vector<16x64xf32> to vector<16x32xf32>
    %32 = vector.extract_strided_slice %30 {offsets = [0, 32], sizes = [16, 32], strides = [1, 1]} : vector<16x64xf32> to vector<16x32xf32>
    %33 = arith.mulf %31, %24 : vector<16x32xf32>
    %c0_18 = arith.constant 0 : index
    %c0_19 = arith.constant 0 : index
    %34 = vector.load %arg29[%c0_18, %c0_19] : memref<32x64xf32, #tpu.memory_space<vmem>>, vector<32x64xf32>
    %cst_20 = arith.constant dense<0.000000e+00> : vector<16x64xf32>
    %35 = tpu.matmul %33, %34, %cst_20 {dimension_numbers = #tpu.dot_dimension_numbers<[1], [0], [0], [1], [0, 0, 1, 1], [], []>} : vector<16x32xf32>, vector<32x64xf32>, vector<16x64xf32> -> vector<16x64xf32>
    %c0_21 = arith.constant 0 : index
    %c0_22 = arith.constant 0 : index
    %36 = vector.load %arg28[%c0_21, %c0_22] : memref<1x64xf32, #tpu.memory_space<vmem>>, vector<1x64xf32>
    %37 = vector.broadcast %36 : vector<1x64xf32> to vector<16x64xf32>
    %38 = arith.addf %35, %37 : vector<16x64xf32>
    %39 = vector.extract_strided_slice %38 {offsets = [0, 0], sizes = [16, 32], strides = [1, 1]} : vector<16x64xf32> to vector<16x32xf32>
    %cst_23 = arith.constant dense<0.000000e+00> : vector<16xf32>
    %40 = vector.multi_reduction <add>, %39, %cst_23 [1] : vector<16x32xf32> to vector<16xf32>
    %41 = vector.shape_cast %40 : vector<16xf32> to vector<16x1xf32>
    %cst_24 = arith.constant 3.200000e+01 : f32
    %42 = vector.broadcast %cst_24 : f32 to vector<16x1xf32>
    %43 = arith.divf %41, %42 : vector<16x1xf32>
    %44 = vector.broadcast %43 : vector<16x1xf32> to vector<16x32xf32>
    %45 = arith.subf %39, %44 : vector<16x32xf32>
    %46 = arith.mulf %45, %45 : vector<16x32xf32>
    %cst_25 = arith.constant dense<0.000000e+00> : vector<16xf32>
    %47 = vector.multi_reduction <add>, %46, %cst_25 [1] : vector<16x32xf32> to vector<16xf32>
    %48 = vector.shape_cast %47 : vector<16xf32> to vector<16x1xf32>
    %cst_26 = arith.constant 3.200000e+01 : f32
    %49 = vector.broadcast %cst_26 : f32 to vector<16x1xf32>
    %50 = arith.divf %48, %49 : vector<16x1xf32>
    %cst_27 = arith.constant 9.99999974E-6 : f32
    %51 = vector.broadcast %cst_27 : f32 to vector<16x1xf32>
    %52 = arith.addf %50, %51 : vector<16x1xf32>
    %53 = math.rsqrt %52 : vector<16x1xf32>
    %54 = vector.broadcast %53 : vector<16x1xf32> to vector<16x32xf32>
    %55 = arith.mulf %45, %54 : vector<16x32xf32>
    %c0_28 = arith.constant 0 : index
    %c0_29 = arith.constant 0 : index
    %56 = vector.load %arg33[%c0_28, %c0_29] : memref<1x32xf32, #tpu.memory_space<vmem>>, vector<1x32xf32>
    %57 = vector.broadcast %56 : vector<1x32xf32> to vector<16x32xf32>
    %58 = arith.mulf %55, %57 : vector<16x32xf32>
    %c0_30 = arith.constant 0 : index
    %c0_31 = arith.constant 0 : index
    %59 = vector.load %arg32[%c0_30, %c0_31] : memref<1x32xf32, #tpu.memory_space<vmem>>, vector<1x32xf32>
    %60 = vector.broadcast %59 : vector<1x32xf32> to vector<16x32xf32>
    %61 = arith.addf %58, %60 : vector<16x32xf32>
    %62 = arith.negf %61 : vector<16x32xf32>
    %63 = math.exp %62 : vector<16x32xf32>
    %cst_32 = arith.constant 1.000000e+00 : f32
    %64 = vector.broadcast %cst_32 : f32 to vector<16x32xf32>
    %65 = arith.addf %64, %63 : vector<16x32xf32>
    %66 = arith.divf %64, %65 : vector<16x32xf32>
    %67 = vector.extract_strided_slice %38 {offsets = [0, 32], sizes = [16, 32], strides = [1, 1]} : vector<16x64xf32> to vector<16x32xf32>
    %cst_33 = arith.constant dense<0.000000e+00> : vector<16xf32>
    %68 = vector.multi_reduction <add>, %67, %cst_33 [1] : vector<16x32xf32> to vector<16xf32>
    %69 = vector.shape_cast %68 : vector<16xf32> to vector<16x1xf32>
    %cst_34 = arith.constant 3.200000e+01 : f32
    %70 = vector.broadcast %cst_34 : f32 to vector<16x1xf32>
    %71 = arith.divf %69, %70 : vector<16x1xf32>
    %72 = vector.broadcast %71 : vector<16x1xf32> to vector<16x32xf32>
    %73 = arith.subf %67, %72 : vector<16x32xf32>
    %74 = arith.mulf %73, %73 : vector<16x32xf32>
    %cst_35 = arith.constant dense<0.000000e+00> : vector<16xf32>
    %75 = vector.multi_reduction <add>, %74, %cst_35 [1] : vector<16x32xf32> to vector<16xf32>
    %76 = vector.shape_cast %75 : vector<16xf32> to vector<16x1xf32>
    %cst_36 = arith.constant 3.200000e+01 : f32
    %77 = vector.broadcast %cst_36 : f32 to vector<16x1xf32>
    %78 = arith.divf %76, %77 : vector<16x1xf32>
    %cst_37 = arith.constant 9.99999974E-6 : f32
    %79 = vector.broadcast %cst_37 : f32 to vector<16x1xf32>
    %80 = arith.addf %78, %79 : vector<16x1xf32>
    %81 = math.rsqrt %80 : vector<16x1xf32>
    %82 = vector.broadcast %81 : vector<16x1xf32> to vector<16x32xf32>
    %83 = arith.mulf %73, %82 : vector<16x32xf32>
    %c0_38 = arith.constant 0 : index
    %c0_39 = arith.constant 0 : index
    %84 = vector.load %arg40[%c0_38, %c0_39] : memref<1x32xf32, #tpu.memory_space<vmem>>, vector<1x32xf32>
    %85 = vector.broadcast %84 : vector<1x32xf32> to vector<16x32xf32>
    %86 = arith.mulf %83, %85 : vector<16x32xf32>
    %c0_40 = arith.constant 0 : index
    %c0_41 = arith.constant 0 : index
    %87 = vector.load %arg39[%c0_40, %c0_41] : memref<1x32xf32, #tpu.memory_space<vmem>>, vector<1x32xf32>
    %88 = vector.broadcast %87 : vector<1x32xf32> to vector<16x32xf32>
    %89 = arith.addf %86, %88 : vector<16x32xf32>
    %90 = arith.negf %89 : vector<16x32xf32>
    %91 = math.exp %90 : vector<16x32xf32>
    %cst_42 = arith.constant 1.000000e+00 : f32
    %92 = vector.broadcast %cst_42 : f32 to vector<16x32xf32>
    %93 = arith.addf %92, %91 : vector<16x32xf32>
    %94 = arith.divf %92, %93 : vector<16x32xf32>
    %cst_43 = arith.constant dense<0.000000e+00> : vector<16xf32>
    %95 = vector.multi_reduction <add>, %25, %cst_43 [1] : vector<16x32xf32> to vector<16xf32>
    %96 = vector.shape_cast %95 : vector<16xf32> to vector<16x1xf32>
    %cst_44 = arith.constant 3.200000e+01 : f32
    %97 = vector.broadcast %cst_44 : f32 to vector<16x1xf32>
    %98 = arith.divf %96, %97 : vector<16x1xf32>
    %99 = vector.broadcast %98 : vector<16x1xf32> to vector<16x32xf32>
    %100 = arith.subf %25, %99 : vector<16x32xf32>
    %101 = arith.mulf %100, %100 : vector<16x32xf32>
    %cst_45 = arith.constant dense<0.000000e+00> : vector<16xf32>
    %102 = vector.multi_reduction <add>, %101, %cst_45 [1] : vector<16x32xf32> to vector<16xf32>
    %103 = vector.shape_cast %102 : vector<16xf32> to vector<16x1xf32>
    %cst_46 = arith.constant 3.200000e+01 : f32
    %104 = vector.broadcast %cst_46 : f32 to vector<16x1xf32>
    %105 = arith.divf %103, %104 : vector<16x1xf32>
    %cst_47 = arith.constant 9.99999974E-6 : f32
    %106 = vector.broadcast %cst_47 : f32 to vector<16x1xf32>
    %107 = arith.addf %105, %106 : vector<16x1xf32>
    %108 = math.rsqrt %107 : vector<16x1xf32>
    %109 = vector.broadcast %108 : vector<16x1xf32> to vector<16x32xf32>
    %110 = arith.mulf %100, %109 : vector<16x32xf32>
    %c0_48 = arith.constant 0 : index
    %c0_49 = arith.constant 0 : index
    %111 = vector.load %arg42[%c0_48, %c0_49] : memref<1x32xf32, #tpu.memory_space<vmem>>, vector<1x32xf32>
    %112 = vector.broadcast %111 : vector<1x32xf32> to vector<16x32xf32>
    %113 = arith.mulf %110, %112 : vector<16x32xf32>
    %c0_50 = arith.constant 0 : index
    %c0_51 = arith.constant 0 : index
    %114 = vector.load %arg41[%c0_50, %c0_51] : memref<1x32xf32, #tpu.memory_space<vmem>>, vector<1x32xf32>
    %115 = vector.broadcast %114 : vector<1x32xf32> to vector<16x32xf32>
    %116 = arith.addf %113, %115 : vector<16x32xf32>
    %cst_52 = arith.constant dense<0.000000e+00> : vector<16xf32>
    %117 = vector.multi_reduction <add>, %32, %cst_52 [1] : vector<16x32xf32> to vector<16xf32>
    %118 = vector.shape_cast %117 : vector<16xf32> to vector<16x1xf32>
    %cst_53 = arith.constant 3.200000e+01 : f32
    %119 = vector.broadcast %cst_53 : f32 to vector<16x1xf32>
    %120 = arith.divf %118, %119 : vector<16x1xf32>
    %121 = vector.broadcast %120 : vector<16x1xf32> to vector<16x32xf32>
    %122 = arith.subf %32, %121 : vector<16x32xf32>
    %123 = arith.mulf %122, %122 : vector<16x32xf32>
    %cst_54 = arith.constant dense<0.000000e+00> : vector<16xf32>
    %124 = vector.multi_reduction <add>, %123, %cst_54 [1] : vector<16x32xf32> to vector<16xf32>
    %125 = vector.shape_cast %124 : vector<16xf32> to vector<16x1xf32>
    %cst_55 = arith.constant 3.200000e+01 : f32
    %126 = vector.broadcast %cst_55 : f32 to vector<16x1xf32>
    %127 = arith.divf %125, %126 : vector<16x1xf32>
    %cst_56 = arith.constant 9.99999974E-6 : f32
    %128 = vector.broadcast %cst_56 : f32 to vector<16x1xf32>
    %129 = arith.addf %127, %128 : vector<16x1xf32>
    %130 = math.rsqrt %129 : vector<16x1xf32>
    %131 = vector.broadcast %130 : vector<16x1xf32> to vector<16x32xf32>
    %132 = arith.mulf %122, %131 : vector<16x32xf32>
    %c0_57 = arith.constant 0 : index
    %c0_58 = arith.constant 0 : index
    %133 = vector.load %arg35[%c0_57, %c0_58] : memref<1x32xf32, #tpu.memory_space<vmem>>, vector<1x32xf32>
    %134 = vector.broadcast %133 : vector<1x32xf32> to vector<16x32xf32>
    %135 = arith.mulf %132, %134 : vector<16x32xf32>
    %c0_59 = arith.constant 0 : index
    %c0_60 = arith.constant 0 : index
    %136 = vector.load %arg34[%c0_59, %c0_60] : memref<1x32xf32, #tpu.memory_space<vmem>>, vector<1x32xf32>
    %137 = vector.broadcast %136 : vector<1x32xf32> to vector<16x32xf32>
    %138 = arith.addf %135, %137 : vector<16x32xf32>
    %139 = arith.mulf %94, %116 : vector<16x32xf32>
    %140 = arith.mulf %66, %138 : vector<16x32xf32>
    %141 = arith.addf %139, %140 : vector<16x32xf32>
    %c0_61 = arith.constant 0 : index
    %c0_62 = arith.constant 0 : index
    %142 = vector.load %arg17[%c0_61, %c0_62] : memref<32x32xf32, #tpu.memory_space<vmem>>, vector<32x32xf32>
    %cst_63 = arith.constant dense<0.000000e+00> : vector<16x32xf32>
    %143 = tpu.matmul %141, %142, %cst_63 {dimension_numbers = #tpu.dot_dimension_numbers<[1], [0], [0], [1], [0, 0, 1, 1], [], []>} : vector<16x32xf32>, vector<32x32xf32>, vector<16x32xf32> -> vector<16x32xf32>
    %c0_64 = arith.constant 0 : index
    %c0_65 = arith.constant 0 : index
    %144 = vector.load %arg16[%c0_64, %c0_65] : memref<1x32xf32, #tpu.memory_space<vmem>>, vector<1x32xf32>
    %145 = vector.broadcast %144 : vector<1x32xf32> to vector<16x32xf32>
    %146 = arith.addf %143, %145 : vector<16x32xf32>
    %cst_66 = arith.constant dense<0.000000e+00> : vector<16xf32>
    %147 = vector.multi_reduction <add>, %146, %cst_66 [1] : vector<16x32xf32> to vector<16xf32>
    %148 = vector.shape_cast %147 : vector<16xf32> to vector<16x1xf32>
    %cst_67 = arith.constant 3.200000e+01 : f32
    %149 = vector.broadcast %cst_67 : f32 to vector<16x1xf32>
    %150 = arith.divf %148, %149 : vector<16x1xf32>
    %151 = vector.broadcast %150 : vector<16x1xf32> to vector<16x32xf32>
    %152 = arith.subf %146, %151 : vector<16x32xf32>
    %153 = arith.mulf %152, %152 : vector<16x32xf32>
    %cst_68 = arith.constant dense<0.000000e+00> : vector<16xf32>
    %154 = vector.multi_reduction <add>, %153, %cst_68 [1] : vector<16x32xf32> to vector<16xf32>
    %155 = vector.shape_cast %154 : vector<16xf32> to vector<16x1xf32>
    %cst_69 = arith.constant 3.200000e+01 : f32
    %156 = vector.broadcast %cst_69 : f32 to vector<16x1xf32>
    %157 = arith.divf %155, %156 : vector<16x1xf32>
    %cst_70 = arith.constant 9.99999974E-6 : f32
    %158 = vector.broadcast %cst_70 : f32 to vector<16x1xf32>
    %159 = arith.addf %157, %158 : vector<16x1xf32>
    %160 = math.rsqrt %159 : vector<16x1xf32>
    %161 = vector.broadcast %160 : vector<16x1xf32> to vector<16x32xf32>
    %162 = arith.mulf %152, %161 : vector<16x32xf32>
    %c0_71 = arith.constant 0 : index
    %c0_72 = arith.constant 0 : index
    %163 = vector.load %arg21[%c0_71, %c0_72] : memref<1x32xf32, #tpu.memory_space<vmem>>, vector<1x32xf32>
    %164 = vector.broadcast %163 : vector<1x32xf32> to vector<16x32xf32>
    %165 = arith.mulf %162, %164 : vector<16x32xf32>
    %c0_73 = arith.constant 0 : index
    %c0_74 = arith.constant 0 : index
    %166 = vector.load %arg20[%c0_73, %c0_74] : memref<1x32xf32, #tpu.memory_space<vmem>>, vector<1x32xf32>
    %167 = vector.broadcast %166 : vector<1x32xf32> to vector<16x32xf32>
    %168 = arith.addf %165, %167 : vector<16x32xf32>
    %cst_75 = arith.constant 0.000000e+00 : f32
    %169 = vector.broadcast %cst_75 : f32 to vector<16x32xf32>
    %170 = arith.maximumf %168, %169 : vector<16x32xf32>
    %c0_76 = arith.constant 0 : index
    %c0_77 = arith.constant 0 : index
    %171 = vector.load %arg6[%c0_76, %c0_77] : memref<32x96xf32, #tpu.memory_space<vmem>>, vector<32x96xf32>
    %cst_78 = arith.constant dense<0.000000e+00> : vector<16x96xf32>
    %172 = tpu.matmul %170, %171, %cst_78 {dimension_numbers = #tpu.dot_dimension_numbers<[1], [0], [0], [1], [0, 0, 1, 1], [], []>} : vector<16x32xf32>, vector<32x96xf32>, vector<16x96xf32> -> vector<16x96xf32>
    %c0_79 = arith.constant 0 : index
    %c0_80 = arith.constant 0 : index
    %173 = vector.load %arg5[%c0_79, %c0_80] : memref<1x96xf32, #tpu.memory_space<vmem>>, vector<1x96xf32>
    %174 = vector.broadcast %173 : vector<1x96xf32> to vector<16x96xf32>
    %175 = arith.addf %172, %174 : vector<16x96xf32>
    %c0_81 = arith.constant 0 : index
    %c0_82 = arith.constant 0 : index
    %176 = vector.load %arg8[%c0_81, %c0_82] : memref<32x32xf32, #tpu.memory_space<vmem>>, vector<32x32xf32>
    %177 = vector.extract_strided_slice %175 {offsets = [0, 0], sizes = [8, 8], strides = [1, 1]} : vector<16x96xf32> to vector<8x8xf32>
    %cst_83 = arith.constant 0.353553385 : f32
    %178 = vector.broadcast %cst_83 : f32 to vector<8x8xf32>
    %179 = arith.mulf %177, %178 : vector<8x8xf32>
    %180 = vector.extract_strided_slice %175 {offsets = [0, 32], sizes = [8, 8], strides = [1, 1]} : vector<16x96xf32> to vector<8x8xf32>
    %181 = vector.extract_strided_slice %175 {offsets = [0, 64], sizes = [8, 8], strides = [1, 1]} : vector<16x96xf32> to vector<8x8xf32>
    %cst_84 = arith.constant dense<0.000000e+00> : vector<8x8xf32>
    %182 = tpu.matmul %179, %180, %cst_84 {dimension_numbers = #tpu.dot_dimension_numbers<[1], [1], [0], [0], [0, 0, 1, 0], [], []>} : vector<8x8xf32>, vector<8x8xf32>, vector<8x8xf32> -> vector<8x8xf32>
    %cst_85 = arith.constant dense<0xFF800000> : vector<8xf32>
    %183 = vector.multi_reduction <maximumf>, %182, %cst_85 [1] : vector<8x8xf32> to vector<8xf32>
    %184 = vector.shape_cast %183 : vector<8xf32> to vector<8x1xf32>
    %185 = vector.broadcast %184 : vector<8x1xf32> to vector<8x8xf32>
    %186 = arith.subf %182, %185 : vector<8x8xf32>
    %187 = math.exp %186 : vector<8x8xf32>
    %cst_86 = arith.constant dense<0.000000e+00> : vector<8xf32>
    %188 = vector.multi_reduction <add>, %187, %cst_86 [1] : vector<8x8xf32> to vector<8xf32>
    %189 = vector.shape_cast %188 : vector<8xf32> to vector<8x1xf32>
    %190 = vector.broadcast %189 : vector<8x1xf32> to vector<8x8xf32>
    %191 = arith.divf %187, %190 : vector<8x8xf32>
    %cst_87 = arith.constant dense<0.000000e+00> : vector<8x8xf32>
    %192 = tpu.matmul %191, %181, %cst_87 {dimension_numbers = #tpu.dot_dimension_numbers<[1], [0], [0], [1], [0, 0, 1, 1], [], []>} : vector<8x8xf32>, vector<8x8xf32>, vector<8x8xf32> -> vector<8x8xf32>
    %193 = vector.extract_strided_slice %176 {offsets = [0, 0], sizes = [8, 32], strides = [1, 1]} : vector<32x32xf32> to vector<8x32xf32>
    %cst_88 = arith.constant dense<0.000000e+00> : vector<8x32xf32>
    %194 = tpu.matmul %192, %193, %cst_88 {dimension_numbers = #tpu.dot_dimension_numbers<[1], [0], [0], [1], [0, 0, 1, 1], [], []>} : vector<8x8xf32>, vector<8x32xf32>, vector<8x32xf32> -> vector<8x32xf32>
    %195 = vector.extract_strided_slice %175 {offsets = [0, 8], sizes = [8, 8], strides = [1, 1]} : vector<16x96xf32> to vector<8x8xf32>
    %cst_89 = arith.constant 0.353553385 : f32
    %196 = vector.broadcast %cst_89 : f32 to vector<8x8xf32>
    %197 = arith.mulf %195, %196 : vector<8x8xf32>
    %198 = vector.extract_strided_slice %175 {offsets = [0, 40], sizes = [8, 8], strides = [1, 1]} : vector<16x96xf32> to vector<8x8xf32>
    %199 = vector.extract_strided_slice %175 {offsets = [0, 72], sizes = [8, 8], strides = [1, 1]} : vector<16x96xf32> to vector<8x8xf32>
    %cst_90 = arith.constant dense<0.000000e+00> : vector<8x8xf32>
    %200 = tpu.matmul %197, %198, %cst_90 {dimension_numbers = #tpu.dot_dimension_numbers<[1], [1], [0], [0], [0, 0, 1, 0], [], []>} : vector<8x8xf32>, vector<8x8xf32>, vector<8x8xf32> -> vector<8x8xf32>
    %cst_91 = arith.constant dense<0xFF800000> : vector<8xf32>
    %201 = vector.multi_reduction <maximumf>, %200, %cst_91 [1] : vector<8x8xf32> to vector<8xf32>
    %202 = vector.shape_cast %201 : vector<8xf32> to vector<8x1xf32>
    %203 = vector.broadcast %202 : vector<8x1xf32> to vector<8x8xf32>
    %204 = arith.subf %200, %203 : vector<8x8xf32>
    %205 = math.exp %204 : vector<8x8xf32>
    %cst_92 = arith.constant dense<0.000000e+00> : vector<8xf32>
    %206 = vector.multi_reduction <add>, %205, %cst_92 [1] : vector<8x8xf32> to vector<8xf32>
    %207 = vector.shape_cast %206 : vector<8xf32> to vector<8x1xf32>
    %208 = vector.broadcast %207 : vector<8x1xf32> to vector<8x8xf32>
    %209 = arith.divf %205, %208 : vector<8x8xf32>
    %cst_93 = arith.constant dense<0.000000e+00> : vector<8x8xf32>
    %210 = tpu.matmul %209, %199, %cst_93 {dimension_numbers = #tpu.dot_dimension_numbers<[1], [0], [0], [1], [0, 0, 1, 1], [], []>} : vector<8x8xf32>, vector<8x8xf32>, vector<8x8xf32> -> vector<8x8xf32>
    %211 = vector.extract_strided_slice %176 {offsets = [8, 0], sizes = [8, 32], strides = [1, 1]} : vector<32x32xf32> to vector<8x32xf32>
    %cst_94 = arith.constant dense<0.000000e+00> : vector<8x32xf32>
    %212 = tpu.matmul %210, %211, %cst_94 {dimension_numbers = #tpu.dot_dimension_numbers<[1], [0], [0], [1], [0, 0, 1, 1], [], []>} : vector<8x8xf32>, vector<8x32xf32>, vector<8x32xf32> -> vector<8x32xf32>
    %213 = arith.addf %194, %212 : vector<8x32xf32>
    %214 = vector.extract_strided_slice %175 {offsets = [0, 16], sizes = [8, 8], strides = [1, 1]} : vector<16x96xf32> to vector<8x8xf32>
    %cst_95 = arith.constant 0.353553385 : f32
    %215 = vector.broadcast %cst_95 : f32 to vector<8x8xf32>
    %216 = arith.mulf %214, %215 : vector<8x8xf32>
    %217 = vector.extract_strided_slice %175 {offsets = [0, 48], sizes = [8, 8], strides = [1, 1]} : vector<16x96xf32> to vector<8x8xf32>
    %218 = vector.extract_strided_slice %175 {offsets = [0, 80], sizes = [8, 8], strides = [1, 1]} : vector<16x96xf32> to vector<8x8xf32>
    %cst_96 = arith.constant dense<0.000000e+00> : vector<8x8xf32>
    %219 = tpu.matmul %216, %217, %cst_96 {dimension_numbers = #tpu.dot_dimension_numbers<[1], [1], [0], [0], [0, 0, 1, 0], [], []>} : vector<8x8xf32>, vector<8x8xf32>, vector<8x8xf32> -> vector<8x8xf32>
    %cst_97 = arith.constant dense<0xFF800000> : vector<8xf32>
    %220 = vector.multi_reduction <maximumf>, %219, %cst_97 [1] : vector<8x8xf32> to vector<8xf32>
    %221 = vector.shape_cast %220 : vector<8xf32> to vector<8x1xf32>
    %222 = vector.broadcast %221 : vector<8x1xf32> to vector<8x8xf32>
    %223 = arith.subf %219, %222 : vector<8x8xf32>
    %224 = math.exp %223 : vector<8x8xf32>
    %cst_98 = arith.constant dense<0.000000e+00> : vector<8xf32>
    %225 = vector.multi_reduction <add>, %224, %cst_98 [1] : vector<8x8xf32> to vector<8xf32>
    %226 = vector.shape_cast %225 : vector<8xf32> to vector<8x1xf32>
    %227 = vector.broadcast %226 : vector<8x1xf32> to vector<8x8xf32>
    %228 = arith.divf %224, %227 : vector<8x8xf32>
    %cst_99 = arith.constant dense<0.000000e+00> : vector<8x8xf32>
    %229 = tpu.matmul %228, %218, %cst_99 {dimension_numbers = #tpu.dot_dimension_numbers<[1], [0], [0], [1], [0, 0, 1, 1], [], []>} : vector<8x8xf32>, vector<8x8xf32>, vector<8x8xf32> -> vector<8x8xf32>
    %230 = vector.extract_strided_slice %176 {offsets = [16, 0], sizes = [8, 32], strides = [1, 1]} : vector<32x32xf32> to vector<8x32xf32>
    %cst_100 = arith.constant dense<0.000000e+00> : vector<8x32xf32>
    %231 = tpu.matmul %229, %230, %cst_100 {dimension_numbers = #tpu.dot_dimension_numbers<[1], [0], [0], [1], [0, 0, 1, 1], [], []>} : vector<8x8xf32>, vector<8x32xf32>, vector<8x32xf32> -> vector<8x32xf32>
    %232 = arith.addf %213, %231 : vector<8x32xf32>
    %233 = vector.extract_strided_slice %175 {offsets = [0, 24], sizes = [8, 8], strides = [1, 1]} : vector<16x96xf32> to vector<8x8xf32>
    %cst_101 = arith.constant 0.353553385 : f32
    %234 = vector.broadcast %cst_101 : f32 to vector<8x8xf32>
    %235 = arith.mulf %233, %234 : vector<8x8xf32>
    %236 = vector.extract_strided_slice %175 {offsets = [0, 56], sizes = [8, 8], strides = [1, 1]} : vector<16x96xf32> to vector<8x8xf32>
    %237 = vector.extract_strided_slice %175 {offsets = [0, 88], sizes = [8, 8], strides = [1, 1]} : vector<16x96xf32> to vector<8x8xf32>
    %cst_102 = arith.constant dense<0.000000e+00> : vector<8x8xf32>
    %238 = tpu.matmul %235, %236, %cst_102 {dimension_numbers = #tpu.dot_dimension_numbers<[1], [1], [0], [0], [0, 0, 1, 0], [], []>} : vector<8x8xf32>, vector<8x8xf32>, vector<8x8xf32> -> vector<8x8xf32>
    %cst_103 = arith.constant dense<0xFF800000> : vector<8xf32>
    %239 = vector.multi_reduction <maximumf>, %238, %cst_103 [1] : vector<8x8xf32> to vector<8xf32>
    %240 = vector.shape_cast %239 : vector<8xf32> to vector<8x1xf32>
    %241 = vector.broadcast %240 : vector<8x1xf32> to vector<8x8xf32>
    %242 = arith.subf %238, %241 : vector<8x8xf32>
    %243 = math.exp %242 : vector<8x8xf32>
    %cst_104 = arith.constant dense<0.000000e+00> : vector<8xf32>
    %244 = vector.multi_reduction <add>, %243, %cst_104 [1] : vector<8x8xf32> to vector<8xf32>
    %245 = vector.shape_cast %244 : vector<8xf32> to vector<8x1xf32>
    %246 = vector.broadcast %245 : vector<8x1xf32> to vector<8x8xf32>
    %247 = arith.divf %243, %246 : vector<8x8xf32>
    %cst_105 = arith.constant dense<0.000000e+00> : vector<8x8xf32>
    %248 = tpu.matmul %247, %237, %cst_105 {dimension_numbers = #tpu.dot_dimension_numbers<[1], [0], [0], [1], [0, 0, 1, 1], [], []>} : vector<8x8xf32>, vector<8x8xf32>, vector<8x8xf32> -> vector<8x8xf32>
    %249 = vector.extract_strided_slice %176 {offsets = [24, 0], sizes = [8, 32], strides = [1, 1]} : vector<32x32xf32> to vector<8x32xf32>
    %cst_106 = arith.constant dense<0.000000e+00> : vector<8x32xf32>
    %250 = tpu.matmul %248, %249, %cst_106 {dimension_numbers = #tpu.dot_dimension_numbers<[1], [0], [0], [1], [0, 0, 1, 1], [], []>} : vector<8x8xf32>, vector<8x32xf32>, vector<8x32xf32> -> vector<8x32xf32>
    %251 = arith.addf %232, %250 : vector<8x32xf32>
    %252 = vector.extract_strided_slice %175 {offsets = [8, 0], sizes = [8, 8], strides = [1, 1]} : vector<16x96xf32> to vector<8x8xf32>
    %cst_107 = arith.constant 0.353553385 : f32
    %253 = vector.broadcast %cst_107 : f32 to vector<8x8xf32>
    %254 = arith.mulf %252, %253 : vector<8x8xf32>
    %255 = vector.extract_strided_slice %175 {offsets = [8, 32], sizes = [8, 8], strides = [1, 1]} : vector<16x96xf32> to vector<8x8xf32>
    %256 = vector.extract_strided_slice %175 {offsets = [8, 64], sizes = [8, 8], strides = [1, 1]} : vector<16x96xf32> to vector<8x8xf32>
    %cst_108 = arith.constant dense<0.000000e+00> : vector<8x8xf32>
    %257 = tpu.matmul %254, %255, %cst_108 {dimension_numbers = #tpu.dot_dimension_numbers<[1], [1], [0], [0], [0, 0, 1, 0], [], []>} : vector<8x8xf32>, vector<8x8xf32>, vector<8x8xf32> -> vector<8x8xf32>
    %cst_109 = arith.constant dense<0xFF800000> : vector<8xf32>
    %258 = vector.multi_reduction <maximumf>, %257, %cst_109 [1] : vector<8x8xf32> to vector<8xf32>
    %259 = vector.shape_cast %258 : vector<8xf32> to vector<8x1xf32>
    %260 = vector.broadcast %259 : vector<8x1xf32> to vector<8x8xf32>
    %261 = arith.subf %257, %260 : vector<8x8xf32>
    %262 = math.exp %261 : vector<8x8xf32>
    %cst_110 = arith.constant dense<0.000000e+00> : vector<8xf32>
    %263 = vector.multi_reduction <add>, %262, %cst_110 [1] : vector<8x8xf32> to vector<8xf32>
    %264 = vector.shape_cast %263 : vector<8xf32> to vector<8x1xf32>
    %265 = vector.broadcast %264 : vector<8x1xf32> to vector<8x8xf32>
    %266 = arith.divf %262, %265 : vector<8x8xf32>
    %cst_111 = arith.constant dense<0.000000e+00> : vector<8x8xf32>
    %267 = tpu.matmul %266, %256, %cst_111 {dimension_numbers = #tpu.dot_dimension_numbers<[1], [0], [0], [1], [0, 0, 1, 1], [], []>} : vector<8x8xf32>, vector<8x8xf32>, vector<8x8xf32> -> vector<8x8xf32>
    %268 = vector.extract_strided_slice %176 {offsets = [0, 0], sizes = [8, 32], strides = [1, 1]} : vector<32x32xf32> to vector<8x32xf32>
    %cst_112 = arith.constant dense<0.000000e+00> : vector<8x32xf32>
    %269 = tpu.matmul %267, %268, %cst_112 {dimension_numbers = #tpu.dot_dimension_numbers<[1], [0], [0], [1], [0, 0, 1, 1], [], []>} : vector<8x8xf32>, vector<8x32xf32>, vector<8x32xf32> -> vector<8x32xf32>
    %270 = vector.extract_strided_slice %175 {offsets = [8, 8], sizes = [8, 8], strides = [1, 1]} : vector<16x96xf32> to vector<8x8xf32>
    %cst_113 = arith.constant 0.353553385 : f32
    %271 = vector.broadcast %cst_113 : f32 to vector<8x8xf32>
    %272 = arith.mulf %270, %271 : vector<8x8xf32>
    %273 = vector.extract_strided_slice %175 {offsets = [8, 40], sizes = [8, 8], strides = [1, 1]} : vector<16x96xf32> to vector<8x8xf32>
    %274 = vector.extract_strided_slice %175 {offsets = [8, 72], sizes = [8, 8], strides = [1, 1]} : vector<16x96xf32> to vector<8x8xf32>
    %cst_114 = arith.constant dense<0.000000e+00> : vector<8x8xf32>
    %275 = tpu.matmul %272, %273, %cst_114 {dimension_numbers = #tpu.dot_dimension_numbers<[1], [1], [0], [0], [0, 0, 1, 0], [], []>} : vector<8x8xf32>, vector<8x8xf32>, vector<8x8xf32> -> vector<8x8xf32>
    %cst_115 = arith.constant dense<0xFF800000> : vector<8xf32>
    %276 = vector.multi_reduction <maximumf>, %275, %cst_115 [1] : vector<8x8xf32> to vector<8xf32>
    %277 = vector.shape_cast %276 : vector<8xf32> to vector<8x1xf32>
    %278 = vector.broadcast %277 : vector<8x1xf32> to vector<8x8xf32>
    %279 = arith.subf %275, %278 : vector<8x8xf32>
    %280 = math.exp %279 : vector<8x8xf32>
    %cst_116 = arith.constant dense<0.000000e+00> : vector<8xf32>
    %281 = vector.multi_reduction <add>, %280, %cst_116 [1] : vector<8x8xf32> to vector<8xf32>
    %282 = vector.shape_cast %281 : vector<8xf32> to vector<8x1xf32>
    %283 = vector.broadcast %282 : vector<8x1xf32> to vector<8x8xf32>
    %284 = arith.divf %280, %283 : vector<8x8xf32>
    %cst_117 = arith.constant dense<0.000000e+00> : vector<8x8xf32>
    %285 = tpu.matmul %284, %274, %cst_117 {dimension_numbers = #tpu.dot_dimension_numbers<[1], [0], [0], [1], [0, 0, 1, 1], [], []>} : vector<8x8xf32>, vector<8x8xf32>, vector<8x8xf32> -> vector<8x8xf32>
    %286 = vector.extract_strided_slice %176 {offsets = [8, 0], sizes = [8, 32], strides = [1, 1]} : vector<32x32xf32> to vector<8x32xf32>
    %cst_118 = arith.constant dense<0.000000e+00> : vector<8x32xf32>
    %287 = tpu.matmul %285, %286, %cst_118 {dimension_numbers = #tpu.dot_dimension_numbers<[1], [0], [0], [1], [0, 0, 1, 1], [], []>} : vector<8x8xf32>, vector<8x32xf32>, vector<8x32xf32> -> vector<8x32xf32>
    %288 = arith.addf %269, %287 : vector<8x32xf32>
    %289 = vector.extract_strided_slice %175 {offsets = [8, 16], sizes = [8, 8], strides = [1, 1]} : vector<16x96xf32> to vector<8x8xf32>
    %cst_119 = arith.constant 0.353553385 : f32
    %290 = vector.broadcast %cst_119 : f32 to vector<8x8xf32>
    %291 = arith.mulf %289, %290 : vector<8x8xf32>
    %292 = vector.extract_strided_slice %175 {offsets = [8, 48], sizes = [8, 8], strides = [1, 1]} : vector<16x96xf32> to vector<8x8xf32>
    %293 = vector.extract_strided_slice %175 {offsets = [8, 80], sizes = [8, 8], strides = [1, 1]} : vector<16x96xf32> to vector<8x8xf32>
    %cst_120 = arith.constant dense<0.000000e+00> : vector<8x8xf32>
    %294 = tpu.matmul %291, %292, %cst_120 {dimension_numbers = #tpu.dot_dimension_numbers<[1], [1], [0], [0], [0, 0, 1, 0], [], []>} : vector<8x8xf32>, vector<8x8xf32>, vector<8x8xf32> -> vector<8x8xf32>
    %cst_121 = arith.constant dense<0xFF800000> : vector<8xf32>
    %295 = vector.multi_reduction <maximumf>, %294, %cst_121 [1] : vector<8x8xf32> to vector<8xf32>
    %296 = vector.shape_cast %295 : vector<8xf32> to vector<8x1xf32>
    %297 = vector.broadcast %296 : vector<8x1xf32> to vector<8x8xf32>
    %298 = arith.subf %294, %297 : vector<8x8xf32>
    %299 = math.exp %298 : vector<8x8xf32>
    %cst_122 = arith.constant dense<0.000000e+00> : vector<8xf32>
    %300 = vector.multi_reduction <add>, %299, %cst_122 [1] : vector<8x8xf32> to vector<8xf32>
    %301 = vector.shape_cast %300 : vector<8xf32> to vector<8x1xf32>
    %302 = vector.broadcast %301 : vector<8x1xf32> to vector<8x8xf32>
    %303 = arith.divf %299, %302 : vector<8x8xf32>
    %cst_123 = arith.constant dense<0.000000e+00> : vector<8x8xf32>
    %304 = tpu.matmul %303, %293, %cst_123 {dimension_numbers = #tpu.dot_dimension_numbers<[1], [0], [0], [1], [0, 0, 1, 1], [], []>} : vector<8x8xf32>, vector<8x8xf32>, vector<8x8xf32> -> vector<8x8xf32>
    %305 = vector.extract_strided_slice %176 {offsets = [16, 0], sizes = [8, 32], strides = [1, 1]} : vector<32x32xf32> to vector<8x32xf32>
    %cst_124 = arith.constant dense<0.000000e+00> : vector<8x32xf32>
    %306 = tpu.matmul %304, %305, %cst_124 {dimension_numbers = #tpu.dot_dimension_numbers<[1], [0], [0], [1], [0, 0, 1, 1], [], []>} : vector<8x8xf32>, vector<8x32xf32>, vector<8x32xf32> -> vector<8x32xf32>
    %307 = arith.addf %288, %306 : vector<8x32xf32>
    %308 = vector.extract_strided_slice %175 {offsets = [8, 24], sizes = [8, 8], strides = [1, 1]} : vector<16x96xf32> to vector<8x8xf32>
    %cst_125 = arith.constant 0.353553385 : f32
    %309 = vector.broadcast %cst_125 : f32 to vector<8x8xf32>
    %310 = arith.mulf %308, %309 : vector<8x8xf32>
    %311 = vector.extract_strided_slice %175 {offsets = [8, 56], sizes = [8, 8], strides = [1, 1]} : vector<16x96xf32> to vector<8x8xf32>
    %312 = vector.extract_strided_slice %175 {offsets = [8, 88], sizes = [8, 8], strides = [1, 1]} : vector<16x96xf32> to vector<8x8xf32>
    %cst_126 = arith.constant dense<0.000000e+00> : vector<8x8xf32>
    %313 = tpu.matmul %310, %311, %cst_126 {dimension_numbers = #tpu.dot_dimension_numbers<[1], [1], [0], [0], [0, 0, 1, 0], [], []>} : vector<8x8xf32>, vector<8x8xf32>, vector<8x8xf32> -> vector<8x8xf32>
    %cst_127 = arith.constant dense<0xFF800000> : vector<8xf32>
    %314 = vector.multi_reduction <maximumf>, %313, %cst_127 [1] : vector<8x8xf32> to vector<8xf32>
    %315 = vector.shape_cast %314 : vector<8xf32> to vector<8x1xf32>
    %316 = vector.broadcast %315 : vector<8x1xf32> to vector<8x8xf32>
    %317 = arith.subf %313, %316 : vector<8x8xf32>
    %318 = math.exp %317 : vector<8x8xf32>
    %cst_128 = arith.constant dense<0.000000e+00> : vector<8xf32>
    %319 = vector.multi_reduction <add>, %318, %cst_128 [1] : vector<8x8xf32> to vector<8xf32>
    %320 = vector.shape_cast %319 : vector<8xf32> to vector<8x1xf32>
    %321 = vector.broadcast %320 : vector<8x1xf32> to vector<8x8xf32>
    %322 = arith.divf %318, %321 : vector<8x8xf32>
    %cst_129 = arith.constant dense<0.000000e+00> : vector<8x8xf32>
    %323 = tpu.matmul %322, %312, %cst_129 {dimension_numbers = #tpu.dot_dimension_numbers<[1], [0], [0], [1], [0, 0, 1, 1], [], []>} : vector<8x8xf32>, vector<8x8xf32>, vector<8x8xf32> -> vector<8x8xf32>
    %324 = vector.extract_strided_slice %176 {offsets = [24, 0], sizes = [8, 32], strides = [1, 1]} : vector<32x32xf32> to vector<8x32xf32>
    %cst_130 = arith.constant dense<0.000000e+00> : vector<8x32xf32>
    %325 = tpu.matmul %323, %324, %cst_130 {dimension_numbers = #tpu.dot_dimension_numbers<[1], [0], [0], [1], [0, 0, 1, 1], [], []>} : vector<8x8xf32>, vector<8x32xf32>, vector<8x32xf32> -> vector<8x32xf32>
    %326 = arith.addf %307, %325 : vector<8x32xf32>
    %327 = tpu.concatenate %251, %326 in 0 : vector<8x32xf32>, vector<8x32xf32> -> vector<16x32xf32>
    %c0_131 = arith.constant 0 : index
    %c0_132 = arith.constant 0 : index
    %328 = vector.load %arg7[%c0_131, %c0_132] : memref<1x32xf32, #tpu.memory_space<vmem>>, vector<1x32xf32>
    %329 = vector.broadcast %328 : vector<1x32xf32> to vector<16x32xf32>
    %330 = arith.addf %327, %329 : vector<16x32xf32>
    %cst_133 = arith.constant dense<0.000000e+00> : vector<16xf32>
    %331 = vector.multi_reduction <add>, %330, %cst_133 [1] : vector<16x32xf32> to vector<16xf32>
    %332 = vector.shape_cast %331 : vector<16xf32> to vector<16x1xf32>
    %cst_134 = arith.constant 3.200000e+01 : f32
    %333 = vector.broadcast %cst_134 : f32 to vector<16x1xf32>
    %334 = arith.divf %332, %333 : vector<16x1xf32>
    %335 = vector.broadcast %334 : vector<16x1xf32> to vector<16x32xf32>
    %336 = arith.subf %330, %335 : vector<16x32xf32>
    %337 = arith.mulf %336, %336 : vector<16x32xf32>
    %cst_135 = arith.constant dense<0.000000e+00> : vector<16xf32>
    %338 = vector.multi_reduction <add>, %337, %cst_135 [1] : vector<16x32xf32> to vector<16xf32>
    %339 = vector.shape_cast %338 : vector<16xf32> to vector<16x1xf32>
    %cst_136 = arith.constant 3.200000e+01 : f32
    %340 = vector.broadcast %cst_136 : f32 to vector<16x1xf32>
    %341 = arith.divf %339, %340 : vector<16x1xf32>
    %cst_137 = arith.constant 9.99999974E-6 : f32
    %342 = vector.broadcast %cst_137 : f32 to vector<16x1xf32>
    %343 = arith.addf %341, %342 : vector<16x1xf32>
    %344 = math.rsqrt %343 : vector<16x1xf32>
    %345 = vector.broadcast %344 : vector<16x1xf32> to vector<16x32xf32>
    %346 = arith.mulf %336, %345 : vector<16x32xf32>
    %c0_138 = arith.constant 0 : index
    %c0_139 = arith.constant 0 : index
    %347 = vector.load %arg4[%c0_138, %c0_139] : memref<1x32xf32, #tpu.memory_space<vmem>>, vector<1x32xf32>
    %348 = vector.broadcast %347 : vector<1x32xf32> to vector<16x32xf32>
    %349 = arith.mulf %346, %348 : vector<16x32xf32>
    %c0_140 = arith.constant 0 : index
    %c0_141 = arith.constant 0 : index
    %350 = vector.load %arg3[%c0_140, %c0_141] : memref<1x32xf32, #tpu.memory_space<vmem>>, vector<1x32xf32>
    %351 = vector.broadcast %350 : vector<1x32xf32> to vector<16x32xf32>
    %352 = arith.addf %349, %351 : vector<16x32xf32>
    %c0_142 = arith.constant 0 : index
    %c0_143 = arith.constant 0 : index
    %353 = vector.load %arg23[%c0_142, %c0_143] : memref<32x64xf32, #tpu.memory_space<vmem>>, vector<32x64xf32>
    %cst_144 = arith.constant dense<0.000000e+00> : vector<16x64xf32>
    %354 = tpu.matmul %352, %353, %cst_144 {dimension_numbers = #tpu.dot_dimension_numbers<[1], [0], [0], [1], [0, 0, 1, 1], [], []>} : vector<16x32xf32>, vector<32x64xf32>, vector<16x64xf32> -> vector<16x64xf32>
    %c0_145 = arith.constant 0 : index
    %c0_146 = arith.constant 0 : index
    %355 = vector.load %arg22[%c0_145, %c0_146] : memref<1x64xf32, #tpu.memory_space<vmem>>, vector<1x64xf32>
    %356 = vector.broadcast %355 : vector<1x64xf32> to vector<16x64xf32>
    %357 = arith.addf %354, %356 : vector<16x64xf32>
    %cst_147 = arith.constant 0.000000e+00 : f32
    %358 = vector.broadcast %cst_147 : f32 to vector<16x64xf32>
    %359 = arith.maximumf %357, %358 : vector<16x64xf32>
    %c0_148 = arith.constant 0 : index
    %c0_149 = arith.constant 0 : index
    %360 = vector.load %arg25[%c0_148, %c0_149] : memref<64x32xf32, #tpu.memory_space<vmem>>, vector<64x32xf32>
    %cst_150 = arith.constant dense<0.000000e+00> : vector<16x32xf32>
    %361 = tpu.matmul %359, %360, %cst_150 {dimension_numbers = #tpu.dot_dimension_numbers<[1], [0], [0], [1], [0, 0, 1, 1], [], []>} : vector<16x64xf32>, vector<64x32xf32>, vector<16x32xf32> -> vector<16x32xf32>
    %c0_151 = arith.constant 0 : index
    %c0_152 = arith.constant 0 : index
    %362 = vector.load %arg24[%c0_151, %c0_152] : memref<1x32xf32, #tpu.memory_space<vmem>>, vector<1x32xf32>
    %363 = vector.broadcast %362 : vector<1x32xf32> to vector<16x32xf32>
    %364 = arith.addf %361, %363 : vector<16x32xf32>
    %365 = arith.addf %352, %364 : vector<16x32xf32>
    %cst_153 = arith.constant dense<0.000000e+00> : vector<16xf32>
    %366 = vector.multi_reduction <add>, %365, %cst_153 [1] : vector<16x32xf32> to vector<16xf32>
    %367 = vector.shape_cast %366 : vector<16xf32> to vector<16x1xf32>
    %cst_154 = arith.constant 3.200000e+01 : f32
    %368 = vector.broadcast %cst_154 : f32 to vector<16x1xf32>
    %369 = arith.divf %367, %368 : vector<16x1xf32>
    %370 = vector.broadcast %369 : vector<16x1xf32> to vector<16x32xf32>
    %371 = arith.subf %365, %370 : vector<16x32xf32>
    %372 = arith.mulf %371, %371 : vector<16x32xf32>
    %cst_155 = arith.constant dense<0.000000e+00> : vector<16xf32>
    %373 = vector.multi_reduction <add>, %372, %cst_155 [1] : vector<16x32xf32> to vector<16xf32>
    %374 = vector.shape_cast %373 : vector<16xf32> to vector<16x1xf32>
    %cst_156 = arith.constant 3.200000e+01 : f32
    %375 = vector.broadcast %cst_156 : f32 to vector<16x1xf32>
    %376 = arith.divf %374, %375 : vector<16x1xf32>
    %cst_157 = arith.constant 9.99999974E-6 : f32
    %377 = vector.broadcast %cst_157 : f32 to vector<16x1xf32>
    %378 = arith.addf %376, %377 : vector<16x1xf32>
    %379 = math.rsqrt %378 : vector<16x1xf32>
    %380 = vector.broadcast %379 : vector<16x1xf32> to vector<16x32xf32>
    %381 = arith.mulf %371, %380 : vector<16x32xf32>
    %c0_158 = arith.constant 0 : index
    %c0_159 = arith.constant 0 : index
    %382 = vector.load %arg27[%c0_158, %c0_159] : memref<1x32xf32, #tpu.memory_space<vmem>>, vector<1x32xf32>
    %383 = vector.broadcast %382 : vector<1x32xf32> to vector<16x32xf32>
    %384 = arith.mulf %381, %383 : vector<16x32xf32>
    %c0_160 = arith.constant 0 : index
    %c0_161 = arith.constant 0 : index
    %385 = vector.load %arg26[%c0_160, %c0_161] : memref<1x32xf32, #tpu.memory_space<vmem>>, vector<1x32xf32>
    %386 = vector.broadcast %385 : vector<1x32xf32> to vector<16x32xf32>
    %387 = arith.addf %384, %386 : vector<16x32xf32>
    %c0_162 = arith.constant 0 : index
    %c0_163 = arith.constant 0 : index
    %388 = vector.load %arg45[%c0_162, %c0_163] : memref<16x32xf32, #tpu.memory_space<vmem>>, vector<16x32xf32>
    tpu.vector_store %arg45[%c0_162, %c0_163], %387 {strides = array<i32>} : memref<16x32xf32, #tpu.memory_space<vmem>>, vector<16x32xf32>,
    %c0_164 = arith.constant 0 : index
    %c0_165 = arith.constant 0 : index
    %389 = vector.load %arg9[%c0_164, %c0_165] : memref<32x32xf32, #tpu.memory_space<vmem>>, vector<32x32xf32>
    %cst_166 = arith.constant dense<0.000000e+00> : vector<16x32xf32>
    %390 = tpu.matmul %387, %389, %cst_166 {dimension_numbers = #tpu.dot_dimension_numbers<[1], [0], [0], [1], [0, 0, 1, 1], [], []>} : vector<16x32xf32>, vector<32x32xf32>, vector<16x32xf32> -> vector<16x32xf32>
    %cst_167 = arith.constant dense<0.000000e+00> : vector<16xf32>
    %391 = vector.multi_reduction <add>, %390, %cst_167 [1] : vector<16x32xf32> to vector<16xf32>
    %392 = vector.shape_cast %391 : vector<16xf32> to vector<16x1xf32>
    %cst_168 = arith.constant 3.200000e+01 : f32
    %393 = vector.broadcast %cst_168 : f32 to vector<16x1xf32>
    %394 = arith.divf %392, %393 : vector<16x1xf32>
    %395 = vector.broadcast %394 : vector<16x1xf32> to vector<16x32xf32>
    %396 = arith.subf %390, %395 : vector<16x32xf32>
    %397 = arith.mulf %396, %396 : vector<16x32xf32>
    %cst_169 = arith.constant dense<0.000000e+00> : vector<16xf32>
    %398 = vector.multi_reduction <add>, %397, %cst_169 [1] : vector<16x32xf32> to vector<16xf32>
    %399 = vector.shape_cast %398 : vector<16xf32> to vector<16x1xf32>
    %cst_170 = arith.constant 3.200000e+01 : f32
    %400 = vector.broadcast %cst_170 : f32 to vector<16x1xf32>
    %401 = arith.divf %399, %400 : vector<16x1xf32>
    %cst_171 = arith.constant 9.99999974E-6 : f32
    %402 = vector.broadcast %cst_171 : f32 to vector<16x1xf32>
    %403 = arith.addf %401, %402 : vector<16x1xf32>
    %404 = math.rsqrt %403 : vector<16x1xf32>
    %405 = vector.broadcast %404 : vector<16x1xf32> to vector<16x32xf32>
    %406 = arith.mulf %396, %405 : vector<16x32xf32>
    %c0_172 = arith.constant 0 : index
    %c0_173 = arith.constant 0 : index
    %407 = vector.load %arg11[%c0_172, %c0_173] : memref<1x32xf32, #tpu.memory_space<vmem>>, vector<1x32xf32>
    %408 = vector.broadcast %407 : vector<1x32xf32> to vector<16x32xf32>
    %409 = arith.mulf %406, %408 : vector<16x32xf32>
    %c0_174 = arith.constant 0 : index
    %c0_175 = arith.constant 0 : index
    %410 = vector.load %arg10[%c0_174, %c0_175] : memref<1x32xf32, #tpu.memory_space<vmem>>, vector<1x32xf32>
    %411 = vector.broadcast %410 : vector<1x32xf32> to vector<16x32xf32>
    %412 = arith.addf %409, %411 : vector<16x32xf32>
    %cst_176 = arith.constant 0.000000e+00 : f32
    %413 = vector.broadcast %cst_176 : f32 to vector<16x32xf32>
    %414 = arith.maximumf %412, %413 : vector<16x32xf32>
    %c0_177 = arith.constant 0 : index
    %c0_178 = arith.constant 0 : index
    %415 = vector.load %arg15[%c0_177, %c0_178] : memref<32x4xf32, #tpu.memory_space<vmem>>, vector<32x4xf32>
    %cst_179 = arith.constant dense<0.000000e+00> : vector<16x4xf32>
    %416 = tpu.matmul %414, %415, %cst_179 {dimension_numbers = #tpu.dot_dimension_numbers<[1], [0], [0], [1], [0, 0, 1, 1], [], []>} : vector<16x32xf32>, vector<32x4xf32>, vector<16x4xf32> -> vector<16x4xf32>
    %c0_180 = arith.constant 0 : index
    %c0_181 = arith.constant 0 : index
    %417 = vector.load %arg14[%c0_180, %c0_181] : memref<1x4xf32, #tpu.memory_space<vmem>>, vector<1x4xf32>
    %418 = vector.broadcast %417 : vector<1x4xf32> to vector<16x4xf32>
    %419 = arith.addf %416, %418 : vector<16x4xf32>
    %c0_182 = arith.constant 0 : index
    %c0_183 = arith.constant 0 : index
    %420 = vector.load %arg43[%c0_182, %c0_183] : memref<16x4xf32, #tpu.memory_space<vmem>>, vector<16x4xf32>
    tpu.vector_store %arg43[%c0_182, %c0_183], %419 {strides = array<i32>} : memref<16x4xf32, #tpu.memory_space<vmem>>, vector<16x4xf32>,
    %c0_184 = arith.constant 0 : index
    %c0_185 = arith.constant 0 : index
    %421 = vector.load %arg36[%c0_184, %c0_185] : memref<32x32xf32, #tpu.memory_space<vmem>>, vector<32x32xf32>
    %cst_186 = arith.constant dense<0.000000e+00> : vector<16x32xf32>
    %422 = tpu.matmul %387, %421, %cst_186 {dimension_numbers = #tpu.dot_dimension_numbers<[1], [0], [0], [1], [0, 0, 1, 1], [], []>} : vector<16x32xf32>, vector<32x32xf32>, vector<16x32xf32> -> vector<16x32xf32>
    %cst_187 = arith.constant dense<0.000000e+00> : vector<16xf32>
    %423 = vector.multi_reduction <add>, %422, %cst_187 [1] : vector<16x32xf32> to vector<16xf32>
    %424 = vector.shape_cast %423 : vector<16xf32> to vector<16x1xf32>
    %cst_188 = arith.constant 3.200000e+01 : f32
    %425 = vector.broadcast %cst_188 : f32 to vector<16x1xf32>
    %426 = arith.divf %424, %425 : vector<16x1xf32>
    %427 = vector.broadcast %426 : vector<16x1xf32> to vector<16x32xf32>
    %428 = arith.subf %422, %427 : vector<16x32xf32>
    %429 = arith.mulf %428, %428 : vector<16x32xf32>
    %cst_189 = arith.constant dense<0.000000e+00> : vector<16xf32>
    %430 = vector.multi_reduction <add>, %429, %cst_189 [1] : vector<16x32xf32> to vector<16xf32>
    %431 = vector.shape_cast %430 : vector<16xf32> to vector<16x1xf32>
    %cst_190 = arith.constant 3.200000e+01 : f32
    %432 = vector.broadcast %cst_190 : f32 to vector<16x1xf32>
    %433 = arith.divf %431, %432 : vector<16x1xf32>
    %cst_191 = arith.constant 9.99999974E-6 : f32
    %434 = vector.broadcast %cst_191 : f32 to vector<16x1xf32>
    %435 = arith.addf %433, %434 : vector<16x1xf32>
    %436 = math.rsqrt %435 : vector<16x1xf32>
    %437 = vector.broadcast %436 : vector<16x1xf32> to vector<16x32xf32>
    %438 = arith.mulf %428, %437 : vector<16x32xf32>
    %c0_192 = arith.constant 0 : index
    %c0_193 = arith.constant 0 : index
    %439 = vector.load %arg38[%c0_192, %c0_193] : memref<1x32xf32, #tpu.memory_space<vmem>>, vector<1x32xf32>
    %440 = vector.broadcast %439 : vector<1x32xf32> to vector<16x32xf32>
    %441 = arith.mulf %438, %440 : vector<16x32xf32>
    %c0_194 = arith.constant 0 : index
    %c0_195 = arith.constant 0 : index
    %442 = vector.load %arg37[%c0_194, %c0_195] : memref<1x32xf32, #tpu.memory_space<vmem>>, vector<1x32xf32>
    %443 = vector.broadcast %442 : vector<1x32xf32> to vector<16x32xf32>
    %444 = arith.addf %441, %443 : vector<16x32xf32>
    %cst_196 = arith.constant 0.000000e+00 : f32
    %445 = vector.broadcast %cst_196 : f32 to vector<16x32xf32>
    %446 = arith.maximumf %444, %445 : vector<16x32xf32>
    %c0_197 = arith.constant 0 : index
    %c0_198 = arith.constant 0 : index
    %447 = vector.load %arg19[%c0_197, %c0_198] : memref<32x32xf32, #tpu.memory_space<vmem>>, vector<32x32xf32>
    %cst_199 = arith.constant dense<0.000000e+00> : vector<16x32xf32>
    %448 = tpu.matmul %446, %447, %cst_199 {dimension_numbers = #tpu.dot_dimension_numbers<[1], [0], [0], [1], [0, 0, 1, 1], [], []>} : vector<16x32xf32>, vector<32x32xf32>, vector<16x32xf32> -> vector<16x32xf32>
    %c0_200 = arith.constant 0 : index
    %c0_201 = arith.constant 0 : index
    %449 = vector.load %arg18[%c0_200, %c0_201] : memref<1x32xf32, #tpu.memory_space<vmem>>, vector<1x32xf32>
    %450 = vector.broadcast %449 : vector<1x32xf32> to vector<16x32xf32>
    %451 = arith.addf %448, %450 : vector<16x32xf32>
    %452 = vector.extract_strided_slice %451 {offsets = [0, 0], sizes = [8, 32], strides = [1, 1]} : vector<16x32xf32> to vector<8x32xf32>
    %453 = vector.extract_strided_slice %0 {offsets = [0, 0], sizes = [64, 32], strides = [1, 1]} : vector<128x32xf32> to vector<64x32xf32>
    %cst_202 = arith.constant dense<0.000000e+00> : vector<8x64xf32>
    %454 = tpu.matmul %452, %453, %cst_202 {dimension_numbers = #tpu.dot_dimension_numbers<[1], [1], [0], [0], [0, 0, 1, 0], [], []>} : vector<8x32xf32>, vector<64x32xf32>, vector<8x64xf32> -> vector<8x64xf32>
    %455 = vector.extract_strided_slice %451 {offsets = [8, 0], sizes = [8, 32], strides = [1, 1]} : vector<16x32xf32> to vector<8x32xf32>
    %456 = vector.extract_strided_slice %0 {offsets = [64, 0], sizes = [64, 32], strides = [1, 1]} : vector<128x32xf32> to vector<64x32xf32>
    %cst_203 = arith.constant dense<0.000000e+00> : vector<8x64xf32>
    %457 = tpu.matmul %455, %456, %cst_203 {dimension_numbers = #tpu.dot_dimension_numbers<[1], [1], [0], [0], [0, 0, 1, 0], [], []>} : vector<8x32xf32>, vector<64x32xf32>, vector<8x64xf32> -> vector<8x64xf32>
    %458 = tpu.concatenate %454, %457 in 1 : vector<8x64xf32>, vector<8x64xf32> -> vector<8x128xf32>
    %c0_204 = arith.constant 0 : index
    %c0_205 = arith.constant 0 : index
    %459 = vector.load %arg44[%c0_204, %c0_205] : memref<8x128xf32, #tpu.memory_space<vmem>>, vector<8x128xf32>
    tpu.vector_store %arg44[%c0_204, %c0_205], %458 {strides = array<i32>} : memref<8x128xf32, #tpu.memory_space<vmem>>, vector<8x128xf32>,
    return
  }
}

</mosaic_0001>

<bundles_post_ra>
// kernel: knet_inference.4
= control target key start
LH: loop header
LB: loop body
LE: loop exit
PB: predicated region body
PF: predicated region fallthrough
CT: control target
= control target key end

     0   :  { %vm49_vm0 = vcmask 392192   ;;  %vm270_vm1 = vcmask 261120   ;;  %s874_s1 = inlined_call_operand.vmem [shape: f32[48,32], index: 1, kind: input, shape index: {}]   ;;  %s875_s0 = inlined_call_operand.vmem [shape: f32[128,48], index: 0, kind: input, shape index: {}]   ;;  %s876_s3 = inlined_call_operand.vmem [shape: f32[32,32], index: 3, kind: input, shape index: {}]   ;;  %s877_s2 = inlined_call_operand.vmem [shape: f32[1,32], index: 2, kind: input, shape index: {}]   ;;  %s878_s4 = inlined_call_operand.vmem [shape: f32[1,32], index: 4, kind: input, shape index: {}]   ;;  %s879_s5 = inlined_call_operand.vmem [shape: f32[128,32], index: 5, kind: output, shape index: {}]  }
   0x1   :  { %v36_v0 = vld [vmem:[%s874_s1] sm:$0xff]  ;;  %v37_v1 = vld [vmem:[%s874_s1 + $0x8] sm:$0xff]  ;;  %v38_v2 = vld [vmem:[%s874_s1 + $0x10] sm:$0xff] }
   0x2   :  { %v644_v3 = vpack.c.bf16 %v37_v1, %v36_v0  ;;  %v39_v4 = vld [vmem:[%s874_s1 + $0x18] sm:$0xff]  ;;  %v40_v6 = vld [vmem:[%s874_s1 + $0x20] sm:$0xff]  ;;  %v41_v7 = vld [vmem:[%s874_s1 + $0x28] sm:$0xff] }
   0x3   :  { %v648_v5 = vpack.c.bf16 %v39_v4, %v38_v2  ;;  %v20_v8 = vld [vmem:[%s875_s0] sm:$0xff]  ;;  %v652_v9 = vpack.c.bf16 %v41_v7, %v40_v6  ;;  %v260_v11 = vld [vmem:[%s876_s3 + $0x8] sm:$0xff]  ;;  %v22_v14 = vld [vmem:[%s875_s0 + $0x10] sm:$0xff] }
   0x4   :  { %645 = vmatprep.subr.bf16.mxu0 %v644_v3  ;;  %588 = vmatprep.mubr.msk.f32.mxu0 %vm49_vm0, %v20_v8  ;;  %v259_v10 = vld [vmem:[%s876_s3] sm:$0xff]  ;;  %v21_v13 = vld [vmem:[%s875_s0 + $0x8] sm:$0xff]  ;;  %v23_v15 = vld [vmem:[%s875_s0 + $0x18] sm:$0xff] }
   0x5   :  { %647 = vmatpush3.bf16.msra.mxu0 %v644_v3  ;;  %v656_v12 = vpack.c.bf16 %v260_v11, %v259_v10  ;;  %v24_v16 = vld [vmem:[%s875_s0 + $0x20] sm:$0xff]  ;;  %v25_v17 = vld [vmem:[%s875_s0 + $0x28] sm:$0xff]  ;;  %v26_v18 = vld [vmem:[%s875_s0 + $0x30] sm:$0xff] }
   0x6   :  { %649 = vmatprep.subr.bf16.mxu0 %v648_v5  ;;  %v27_v19 = vld [vmem:[%s875_s0 + $0x38] sm:$0xff]  ;;  %v28_v20 = vld [vmem:[%s875_s0 + $0x40] sm:$0xff]  ;;  %v29_v21 = vld [vmem:[%s875_s0 + $0x48] sm:$0xff] }
   0x7   :  { %657 = vmatprep.subr.bf16.mxu1 %v656_v12  ;;  %v30_v22 = vld [vmem:[%s875_s0 + $0x50] sm:$0xff]  ;;  %v31_v23 = vld [vmem:[%s875_s0 + $0x58] sm:$0xff]  ;;  %v32_v24 = vld [vmem:[%s875_s0 + $0x60] sm:$0xff] }
   0x8   :  { %659 = vmatpush3.bf16.msra.mxu1 %v656_v12  ;;  %v33_v25 = vld [vmem:[%s875_s0 + $0x68] sm:$0xff]  ;;  %v34_v26 = vld [vmem:[%s875_s0 + $0x70] sm:$0xff]  ;;  %v35_v27 = vld [vmem:[%s875_s0 + $0x78] sm:$0xff] }
   0x9   :  { %651 = vmatpush3.bf16.msra.mxu0 %v648_v5  ;;  %v261_v28 = vld [vmem:[%s876_s3 + $0x10] sm:$0xff]  ;;  %v262_v29 = vld [vmem:[%s876_s3 + $0x18] sm:$0xff]  ;;  %v500_v31 = vld [vmem:[%s877_s2] ss:$0 sm:$0xff] }
   0xa   :  { %653 = vmatprep.subr.bf16.mxu0 %v652_v9  ;;  %v660_v30 = vpack.c.bf16 %v262_v29, %v261_v28 }
   0xc   :  { %661 = vmatprep.subr.bf16.mxu1 %v660_v30 }
   0xd   :  { %655 = vmatpush3.bf16.msra.mxu0 %v652_v9  ;;  %663 = vmatpush3.bf16.msra.mxu1 %v660_v30 }
  0x10   :  { %589 = vmatmul.mubr.msk.f32.vlgmr.msra.gmra.mrb[0].mxu0 %vm49_vm0, %v21_v13 }
  0x11   :  { %591 = vmatprep.mubr.msk.f32.mxu0 %vm49_vm0, %v22_v14 }
  0x14   :  { %592 = vmatmul.mubr.msk.f32.gmra.mrb[2].mxu0 %vm49_vm0, %v23_v15 }
  0x15   :  { %594 = vmatprep.mubr.msk.f32.mxu0 %vm49_vm0, %v24_v16  ;;  %v517_v16 = vld [vmem:[%s878_s4] ss:$0 sm:$0xff] }
  0x18   :  { %595 = vmatmul.mubr.msk.f32.gmra.mrb[4].mxu0 %vm49_vm0, %v25_v17 }
  0x19   :  { %597 = vmatprep.mubr.msk.f32.mxu0 %vm49_vm0, %v26_v18 }
  0x1c   :  { %598 = vmatmul.mubr.msk.f32.gmra.mrb[6].mxu0 %vm49_vm0, %v27_v19 }
  0x1d   :  { %600 = vmatprep.mubr.msk.f32.mxu0 %vm49_vm0, %v28_v20 }
  0x20   :  { %601 = vmatmul.mubr.msk.f32.gmra.mrb[8].mxu0 %vm49_vm0, %v29_v21 }
  0x21   :  { %603 = vmatprep.mubr.msk.f32.mxu0 %vm49_vm0, %v30_v22 }
  0x24   :  { %604 = vmatmul.mubr.msk.f32.gmra.mrb[10].mxu0 %vm49_vm0, %v31_v23 }
  0x25   :  { %606 = vmatprep.mubr.msk.f32.mxu0 %vm49_vm0, %v32_v24 }
  0x28   :  { %607 = vmatmul.mubr.msk.f32.gmra.mrb[12].mxu0 %vm49_vm0, %v33_v25 }
  0x29   :  { %609 = vmatprep.mubr.msk.f32.mxu0 %vm49_vm0, %v34_v26 }
  0x2c   :  { %610 = vmatmul.mubr.msk.f32.gmra.mrb[14].mxu0 %vm49_vm0, %v35_v27 }
  0xe3   :  { %v590_v32 = vpop.f32.mrb[0].mxu0 }
  0xe4   :  { %v170_v33 = vadd.f32 %v590_v32, %v500_v31  ;;  %v164_v34 = vpop.f32.mrb[1].mxu0 }
  0xe5   :  { %v165_v35 = vadd.f32 %v500_v31, %v164_v34 }
  0xe6   :  { %v244_v38 = vmax.f32 %v170_v33, 0.0 }
  0xe7   :  { %v243_v36 = vmax.f32 %v165_v35, 0.0  ;;  %v593_v37 = vpop.f32.mrb[2].mxu0 }
  0xe8   :  { %v180_v39 = vadd.f32 %v593_v37, %v500_v31  ;;  %v174_v40 = vpop.f32.mrb[3].mxu0 }
  0xe9   :  { %v175_v41 = vadd.f32 %v500_v31, %v174_v40  ;;  %620 = vmatprep.mubr.msk.f32.mxu1 %vm270_vm1, %v243_v36 }
  0xea   :  { %621 = vmatmul.mubr.msk.f32.vlgmr.msra.gmra.mrb[0].mxu1 %vm270_vm1, %v244_v38  ;;  %v246_v44 = vmax.f32 %v180_v39, 0.0 }
  0xeb   :  { %v245_v42 = vmax.f32 %v175_v41, 0.0  ;;  %v596_v43 = vpop.f32.mrb[4].mxu0 }
  0xec   :  { %v190_v45 = vadd.f32 %v596_v43, %v500_v31  ;;  %v184_v46 = vpop.f32.mrb[5].mxu0 }
  0xed   :  { %v185_v47 = vadd.f32 %v500_v31, %v184_v46  ;;  %623 = vmatprep.mubr.msk.f32.mxu1 %vm270_vm1, %v245_v42 }
  0xee   :  { %624 = vmatmul.mubr.msk.f32.gmra.mrb[2].mxu1 %vm270_vm1, %v246_v44  ;;  %v248_v50 = vmax.f32 %v190_v45, 0.0 }
  0xef   :  { %v247_v48 = vmax.f32 %v185_v47, 0.0  ;;  %v599_v49 = vpop.f32.mrb[6].mxu0 }
  0xf0   :  { %v200_v51 = vadd.f32 %v599_v49, %v500_v31  ;;  %v194_v52 = vpop.f32.mrb[7].mxu0 }
  0xf1   :  { %v195_v53 = vadd.f32 %v500_v31, %v194_v52  ;;  %626 = vmatprep.mubr.msk.f32.mxu1 %vm270_vm1, %v247_v48 }
  0xf2   :  { %627 = vmatmul.mubr.msk.f32.gmra.mrb[4].mxu1 %vm270_vm1, %v248_v50  ;;  %v250_v56 = vmax.f32 %v200_v51, 0.0 }
  0xf3   :  { %v249_v54 = vmax.f32 %v195_v53, 0.0  ;;  %v602_v55 = vpop.f32.mrb[8].mxu0 }
  0xf4   :  { %v210_v57 = vadd.f32 %v602_v55, %v500_v31  ;;  %v204_v58 = vpop.f32.mrb[9].mxu0 }
  0xf5   :  { %v205_v59 = vadd.f32 %v500_v31, %v204_v58  ;;  %629 = vmatprep.mubr.msk.f32.mxu1 %vm270_vm1, %v249_v54 }
  0xf6   :  { %630 = vmatmul.mubr.msk.f32.gmra.mrb[6].mxu1 %vm270_vm1, %v250_v56  ;;  %v252_v62 = vmax.f32 %v210_v57, 0.0 }
  0xf7   :  { %v251_v60 = vmax.f32 %v205_v59, 0.0  ;;  %v605_v61 = vpop.f32.mrb[10].mxu0 }
  0xf8   :  { %v220_v63 = vadd.f32 %v605_v61, %v500_v31  ;;  %v214_v0 = vpop.f32.mrb[11].mxu0 }
  0xf9   :  { %v215_v1 = vadd.f32 %v500_v31, %v214_v0  ;;  %632 = vmatprep.mubr.msk.f32.mxu1 %vm270_vm1, %v251_v60 }
  0xfa   :  { %633 = vmatmul.mubr.msk.f32.gmra.mrb[8].mxu1 %vm270_vm1, %v252_v62  ;;  %v254_v4 = vmax.f32 %v220_v63, 0.0 }
  0xfb   :  { %v253_v2 = vmax.f32 %v215_v1, 0.0  ;;  %v608_v3 = vpop.f32.mrb[12].mxu0 }
  0xfc   :  { %v230_v5 = vadd.f32 %v608_v3, %v500_v31  ;;  %v224_v6 = vpop.f32.mrb[13].mxu0 }
  0xfd   :  { %v225_v7 = vadd.f32 %v500_v31, %v224_v6  ;;  %635 = vmatprep.mubr.msk.f32.mxu1 %vm270_vm1, %v253_v2 }
  0xfe   :  { %636 = vmatmul.mubr.msk.f32.gmra.mrb[10].mxu1 %vm270_vm1, %v254_v4  ;;  %v256_v10 = vmax.f32 %v230_v5, 0.0 }
  0xff   :  { %v255_v8 = vmax.f32 %v225_v7, 0.0  ;;  %v611_v9 = vpop.f32.mrb[14].mxu0 }
 0x100   :  { %v240_v11 = vadd.f32 %v611_v9, %v500_v31  ;;  %v234_v12 = vpop.f32.mrb[15].mxu0 }
 0x101   :  { %v235_v13 = vadd.f32 %v500_v31, %v234_v12  ;;  %638 = vmatprep.mubr.msk.f32.mxu1 %vm270_vm1, %v255_v8 }
 0x102   :  { %639 = vmatmul.mubr.msk.f32.gmra.mrb[12].mxu1 %vm270_vm1, %v256_v10  ;;  %v258_v15 = vmax.f32 %v240_v11, 0.0 }
 0x103   :  { %v257_v14 = vmax.f32 %v235_v13, 0.0 }
 0x105   :  { %641 = vmatprep.mubr.msk.f32.mxu1 %vm270_vm1, %v257_v14 }
 0x106   :  { %642 = vmatmul.mubr.msk.f32.gmra.mrb[14].mxu1 %vm270_vm1, %v258_v15 }
 0x1bd   :  { %v622_v17 = vpop.f32.mrb[0].mxu1 }
 0x1be   :  { %v391_v18 = vadd.f32 %v622_v17, %v517_v16  ;;  %v385_v19 = vpop.f32.mrb[1].mxu1 }
 0x1bf   :  { %v386_v20 = vadd.f32 %v517_v16, %v385_v19 }
 0x1c0   :  { %v465_v21 = vmax.f32 %v391_v18, 0.0 }
 0x1c1   :  { %v464_v22 = vmax.f32 %v386_v20, 0.0  ;;  %v625_v23 = vpop.f32.mrb[2].mxu1 }
 0x1c2   :  { %481 = vst.msk [vmem:[%s879_s5 + $0x8] sm:$0xff] %vm270_vm1, %v465_v21  ;;  %v401_v24 = vadd.f32 %v625_v23, %v517_v16  ;;  %v395_v25 = vpop.f32.mrb[3].mxu1 }
 0x1c3   :  { %480 = vst.msk [vmem:[%s879_s5] sm:$0xff] %vm270_vm1, %v464_v22  ;;  %v396_v26 = vadd.f32 %v517_v16, %v395_v25 }
 0x1c4   :  { %v467_v27 = vmax.f32 %v401_v24, 0.0 }
 0x1c5   :  { %v466_v28 = vmax.f32 %v396_v26, 0.0  ;;  %v628_v29 = vpop.f32.mrb[4].mxu1 }
 0x1c6   :  { %483 = vst.msk [vmem:[%s879_s5 + $0x18] sm:$0xff] %vm270_vm1, %v467_v27  ;;  %v411_v30 = vadd.f32 %v628_v29, %v517_v16  ;;  %v405_v31 = vpop.f32.mrb[5].mxu1 }
 0x1c7   :  { %482 = vst.msk [vmem:[%s879_s5 + $0x10] sm:$0xff] %vm270_vm1, %v466_v28  ;;  %v406_v32 = vadd.f32 %v517_v16, %v405_v31 }
 0x1c8   :  { %v469_v33 = vmax.f32 %v411_v30, 0.0 }
 0x1c9   :  { %v468_v34 = vmax.f32 %v406_v32, 0.0  ;;  %v631_v35 = vpop.f32.mrb[6].mxu1 }
 0x1ca   :  { %485 = vst.msk [vmem:[%s879_s5 + $0x28] sm:$0xff] %vm270_vm1, %v469_v33  ;;  %v421_v36 = vadd.f32 %v631_v35, %v517_v16  ;;  %v415_v37 = vpop.f32.mrb[7].mxu1 }
 0x1cb   :  { %484 = vst.msk [vmem:[%s879_s5 + $0x20] sm:$0xff] %vm270_vm1, %v468_v34  ;;  %v416_v38 = vadd.f32 %v517_v16, %v415_v37 }
 0x1cc   :  { %v471_v39 = vmax.f32 %v421_v36, 0.0 }
 0x1cd   :  { %v470_v40 = vmax.f32 %v416_v38, 0.0  ;;  %v634_v41 = vpop.f32.mrb[8].mxu1 }
 0x1ce   :  { %487 = vst.msk [vmem:[%s879_s5 + $0x38] sm:$0xff] %vm270_vm1, %v471_v39  ;;  %v431_v42 = vadd.f32 %v634_v41, %v517_v16  ;;  %v425_v43 = vpop.f32.mrb[9].mxu1 }
 0x1cf   :  { %486 = vst.msk [vmem:[%s879_s5 + $0x30] sm:$0xff] %vm270_vm1, %v470_v40  ;;  %v426_v44 = vadd.f32 %v517_v16, %v425_v43 }
 0x1d0   :  { %v473_v45 = vmax.f32 %v431_v42, 0.0 }
 0x1d1   :  { %v472_v46 = vmax.f32 %v426_v44, 0.0  ;;  %v637_v47 = vpop.f32.mrb[10].mxu1 }
 0x1d2   :  { %489 = vst.msk [vmem:[%s879_s5 + $0x48] sm:$0xff] %vm270_vm1, %v473_v45  ;;  %v441_v48 = vadd.f32 %v637_v47, %v517_v16  ;;  %v435_v49 = vpop.f32.mrb[11].mxu1 }
 0x1d3   :  { %488 = vst.msk [vmem:[%s879_s5 + $0x40] sm:$0xff] %vm270_vm1, %v472_v46  ;;  %v436_v50 = vadd.f32 %v517_v16, %v435_v49 }
 0x1d4   :  { %v475_v51 = vmax.f32 %v441_v48, 0.0 }
 0x1d5   :  { %v474_v52 = vmax.f32 %v436_v50, 0.0  ;;  %v640_v53 = vpop.f32.mrb[12].mxu1 }
 0x1d6   :  { %491 = vst.msk [vmem:[%s879_s5 + $0x58] sm:$0xff] %vm270_vm1, %v475_v51  ;;  %v451_v54 = vadd.f32 %v640_v53, %v517_v16  ;;  %v445_v55 = vpop.f32.mrb[13].mxu1 }
 0x1d7   :  { %490 = vst.msk [vmem:[%s879_s5 + $0x50] sm:$0xff] %vm270_vm1, %v474_v52  ;;  %v446_v56 = vadd.f32 %v517_v16, %v445_v55 }
 0x1d8   :  { %v477_v57 = vmax.f32 %v451_v54, 0.0 }
 0x1d9   :  { %v476_v58 = vmax.f32 %v446_v56, 0.0  ;;  %v643_v59 = vpop.f32.mrb[14].mxu1 }
 0x1da   :  { %493 = vst.msk [vmem:[%s879_s5 + $0x68] sm:$0xff] %vm270_vm1, %v477_v57  ;;  %v461_v60 = vadd.f32 %v643_v59, %v517_v16  ;;  %v455_v61 = vpop.f32.mrb[15].mxu1 }
 0x1db   :  { %492 = vst.msk [vmem:[%s879_s5 + $0x60] sm:$0xff] %vm270_vm1, %v476_v58  ;;  %v456_v62 = vadd.f32 %v517_v16, %v455_v61 }
 0x1dc   :  { %v479_v63 = vmax.f32 %v461_v60, 0.0 }
 0x1dd   :  { %v478_v0 = vmax.f32 %v456_v62, 0.0 }
 0x1de   :  { %495 = vst.msk [vmem:[%s879_s5 + $0x78] sm:$0xff] %vm270_vm1, %v479_v63 }
 0x1df   :  { %494 = vst.msk [vmem:[%s879_s5 + $0x70] sm:$0xff] %vm270_vm1, %v478_v0 }

// kernel: knet_inference.5
= control target key start
LH: loop header
LB: loop body
LE: loop exit
PB: predicated region body
PF: predicated region fallthrough
CT: control target
= control target key end

     0   :  { %vm64_vm0 = vcmask 261120   ;;  %s2118_s0 = inlined_call_operand.vmem [shape: f32[128,32], index: 0, kind: input, shape index: {}]   ;;  %s2119_s1 = inlined_call_operand.vmem [shape: f32[32,32], index: 1, kind: input, shape index: {}]   ;;  %s2120_s2 = inlined_call_operand.vmem [shape: f32[1,32], index: 2, kind: input, shape index: {}]   ;;  %s2121_s3 = inlined_call_operand.vmem [shape: f32[32,64], index: 3, kind: input, shape index: {}]   ;;  %s2122_s4 = inlined_call_operand.vmem [shape: f32[1,64], index: 4, kind: input, shape index: {}]   ;;  %s2123_s5 = inlined_call_operand.vmem [shape: f32[8,32], index: 5, kind: input, shape index: {}]   ;;  %s2124_s6 = inlined_call_operand.vmem [shape: f32[8,1], index: 6, kind: input, shape index: {}]   ;;  %s2125_s7 = inlined_call_operand.vmem [shape: f32[4,32], index: 7, kind: input, shape index: {}]   ;;  %s2126_s8 = inlined_call_operand.vmem [shape: f32[4,1], index: 8, kind: input, shape index: {}]   ;;  %s2127_s9 = inlined_call_operand.vmem [shape: f32[16,32], index: 9, kind: output, shape index: {0}]   ;;  %s2128_s10 = inlined_call_operand.vmem [shape: f32[128,32], index: 10, kind: output, shape index: {1}]   ;;  %s2129_s11 = inlined_call_operand.vmem [shape: f32[8,128], index: 11, kind: output, shape index: {2}]   ;;  %s2130_s12 = inlined_call_operand.hbm [shape: f32[4,128], index: 12, kind: output, shape index: {3}]  }
   0x1   :  { %v53_v0 = vld [vmem:[%s2119_s1] sm:$0xff]  ;;  %v54_v1 = vld [vmem:[%s2119_s1 + $0x8] sm:$0xff]  ;;  %v55_v2 = vld [vmem:[%s2119_s1 + $0x10] sm:$0xff] }
   0x2   :  { %v1420_v3 = vpack.c.bf16 %v54_v1, %v53_v0  ;;  %v56_v4 = vld [vmem:[%s2119_s1 + $0x18] sm:$0xff]  ;;  %v37_v5 = vld [vmem:[%s2118_s0] sm:$0xff]  ;;  %v259_v8 = vld [vmem:[%s2121_s3 + $0x8] sm:$0xff] }
   0x3   :  { %v1424_v6 = vpack.c.bf16 %v56_v4, %v55_v2  ;;  %1256 = vmatprep.mubr.msk.f32.mxu0 %vm64_vm0, %v37_v5  ;;  %v258_v7 = vld [vmem:[%s2121_s3] sm:$0xff] }
   0x4   :  { %1421 = vmatprep.subr.bf16.mxu0 %v1420_v3 }
   0x5   :  { %1423 = vmatpush3.bf16.msra.mxu0 %v1420_v3 }
   0x6   :  { %1425 = vmatprep.subr.bf16.mxu0 %v1424_v6 }
   0x7   :  { %18 = vsyncpa [#allocation3], 0  ;;  %v38_v9 = vld [vmem:[%s2118_s0 + $0x8] sm:$0xff]  ;;  %v1428_v10 = vpack.c.bf16 %v259_v8, %v258_v7  ;;  %v39_v11 = vld [vmem:[%s2118_s0 + $0x10] sm:$0xff]  ;;  %v1601_v29 = vmov 0   ;;  %v1602_v63 = vmov 0.0|0.0  }
   0x8   :  { %v40_v12 = vld [vmem:[%s2118_s0 + $0x18] sm:$0xff]  ;;  %v41_v13 = vld [vmem:[%s2118_s0 + $0x20] sm:$0xff]  ;;  %v42_v14 = vld [vmem:[%s2118_s0 + $0x28] sm:$0xff]  ;;  %1532 = vset.pattern.permute.xlu0 %v1601_v29  ;;  %vm1603_vm1 = vmmov 0   ;;  %v1604_v0 = vmov 0.0   ;;  %vm906_vm4 = vcmask 523264  }
   0x9   :  { %1427 = vmatpush3.bf16.msra.mxu0 %v1424_v6  ;;  %1429 = vmatprep.subr.bf16.mxu1 %v1428_v10  ;;  %v43_v15 = vld [vmem:[%s2118_s0 + $0x30] sm:$0xff]  ;;  %v44_v16 = vld [vmem:[%s2118_s0 + $0x38] sm:$0xff]  ;;  %v45_v17 = vld [vmem:[%s2118_s0 + $0x40] sm:$0xff] }
   0xa   :  { %1431 = vmatpush3.bf16.msra.mxu1 %v1428_v10  ;;  %v46_v18 = vld [vmem:[%s2118_s0 + $0x48] sm:$0xff]  ;;  %v47_v19 = vld [vmem:[%s2118_s0 + $0x50] sm:$0xff]  ;;  %v48_v20 = vld [vmem:[%s2118_s0 + $0x58] sm:$0xff]  ;;  %1436 = vmatprep.subr.bf16.mxu0 %v1602_v63 }
   0xb   :  { %v49_v21 = vld [vmem:[%s2118_s0 + $0x60] sm:$0xff]  ;;  %v50_v22 = vld [vmem:[%s2118_s0 + $0x68] sm:$0xff]  ;;  %v51_v23 = vld [vmem:[%s2118_s0 + $0x70] sm:$0xff] }
   0xc   :  { %1257 = vmatmul.mubr.msk.f32.vlgmr.msra.gmra.mrb[0].mxu0 %vm64_vm0, %v38_v9  ;;  %v52_v24 = vld [vmem:[%s2118_s0 + $0x78] sm:$0xff]  ;;  %v260_v25 = vld [vmem:[%s2121_s3 + $0x10] sm:$0xff]  ;;  %v479_v28 = vld [vmem:[%s2124_s6] sm:$0xff]  ;;  %s1605_s6 = smov 32  }
   0xd   :  { %1259 = vmatprep.mubr.msk.f32.mxu0 %vm64_vm0, %v39_v11  ;;  %v261_v26 = vld [vmem:[%s2121_s3 + $0x18] sm:$0xff]  ;;  %482 = vperm.xlu0 %1532, %v479_v28   ;;  %v1084_v30 = vld [vmem:[%s2120_s2] ss:$0 sm:$0xff]  ;;  %vm1806_vm2 = vmpackc.low %vm64_vm0, %vm64_vm0 }
   0xe   :  { %v1432_v27 = vpack.c.bf16 %v261_v26, %v260_v25  ;;  %v1793_v1 = vld [vmem:[%s2122_s4] ss:$0 sm:$0xff]  ;;  %s1606_s4 = smov 96  }
  0x10   :  { %1260 = vmatmul.mubr.msk.f32.gmra.mrb[2].mxu0 %vm64_vm0, %v40_v12  ;;  %1433 = vmatprep.subr.bf16.mxu1 %v1432_v27 }
  0x11   :  { %1262 = vmatprep.mubr.msk.f32.mxu0 %vm64_vm0, %v41_v13  ;;  %1435 = vmatpush3.bf16.msra.mxu1 %v1432_v27 }
  0x12   :  { %1468 = vmatprep.subr.bf16.mxu1 %v1602_v63 }
  0x14   :  { %1263 = vmatmul.mubr.msk.f32.gmra.mrb[4].mxu0 %vm64_vm0, %v42_v14 }
  0x15   :  { %1265 = vmatprep.mubr.msk.f32.mxu0 %vm64_vm0, %v43_v15 }
  0x18   :  { %1266 = vmatmul.mubr.msk.f32.gmra.mrb[6].mxu0 %vm64_vm0, %v44_v16 }
  0x19   :  { %1268 = vmatprep.mubr.msk.f32.mxu0 %vm64_vm0, %v45_v17 }
  0x1c   :  { %1269 = vmatmul.mubr.msk.f32.gmra.mrb[8].mxu0 %vm64_vm0, %v46_v18 }
  0x1d   :  { %1271 = vmatprep.mubr.msk.f32.mxu0 %vm64_vm0, %v47_v19 }
  0x20   :  { %1272 = vmatmul.mubr.msk.f32.gmra.mrb[10].mxu0 %vm64_vm0, %v48_v20 }
  0x21   :  { %1274 = vmatprep.mubr.msk.f32.mxu0 %vm64_vm0, %v49_v21 }
  0x24   :  { %1275 = vmatmul.mubr.msk.f32.gmra.mrb[12].mxu0 %vm64_vm0, %v50_v22 }
  0x25   :  { %1277 = vmatprep.mubr.msk.f32.mxu0 %vm64_vm0, %v51_v23 }
  0x28   :  { %1278 = vmatmul.mubr.msk.f32.gmra.mrb[14].mxu0 %vm64_vm0, %v52_v24 }
  0x29   :  { %1344 = vmatprep.mubr.msk.f32.mxu0 %vm1603_vm1, %v1604_v0 }
  0xdf   :  { %v1258_v31 = vpop.f32.mrb[0].mxu0 }
  0xe0   :  { %v179_v32 = vpop.f32.mrb[1].mxu0  ;;  %v185_v34 = vadd.f32 %v1258_v31, %v1084_v30 }
  0xe1   :  { %v180_v33 = vadd.f32 %v1084_v30, %v179_v32 }
  0xe3   :  { %1288 = vmatprep.mubr.msk.f32.mxu1 %vm64_vm0, %v180_v33  ;;  %v1261_v35 = vpop.f32.mrb[2].mxu0 }
  0xe4   :  { %v195_v36 = vadd.f32 %v1261_v35, %v1084_v30  ;;  %1289 = vmatmul.mubr.msk.f32.vlgmr.msra.gmra.mrb[0].mxu1 %vm64_vm0, %v185_v34  ;;  %v189_v37 = vpop.f32.mrb[3].mxu0 }
  0xe5   :  { %v190_v38 = vadd.f32 %v1084_v30, %v189_v37 }
  0xe7   :  { %1291 = vmatprep.mubr.msk.f32.mxu1 %vm64_vm0, %v190_v38  ;;  %v1264_v39 = vpop.f32.mrb[4].mxu0 }
  0xe8   :  { %1292 = vmatmul.mubr.msk.f32.gmra.mrb[2].mxu1 %vm64_vm0, %v195_v36  ;;  %v205_v40 = vadd.f32 %v1264_v39, %v1084_v30  ;;  %v199_v41 = vpop.f32.mrb[5].mxu0 }
  0xe9   :  { %v200_v42 = vadd.f32 %v1084_v30, %v199_v41 }
  0xeb   :  { %1294 = vmatprep.mubr.msk.f32.mxu1 %vm64_vm0, %v200_v42  ;;  %v1267_v43 = vpop.f32.mrb[6].mxu0 }
  0xec   :  { %1295 = vmatmul.mubr.msk.f32.gmra.mrb[4].mxu1 %vm64_vm0, %v205_v40  ;;  %v215_v44 = vadd.f32 %v1267_v43, %v1084_v30  ;;  %v209_v45 = vpop.f32.mrb[7].mxu0 }
  0xed   :  { %v210_v46 = vadd.f32 %v1084_v30, %v209_v45 }
  0xef   :  { %v1270_v47 = vpop.f32.mrb[8].mxu0  ;;  %1297 = vmatprep.mubr.msk.f32.mxu1 %vm64_vm0, %v210_v46 }
  0xf0   :  { %v225_v48 = vadd.f32 %v1270_v47, %v1084_v30  ;;  %v219_v49 = vpop.f32.mrb[9].mxu0  ;;  %1298 = vmatmul.mubr.msk.f32.gmra.mrb[6].mxu1 %vm64_vm0, %v215_v44 }
  0xf1   :  { %v220_v50 = vadd.f32 %v1084_v30, %v219_v49 }
  0xf3   :  { %v1273_v51 = vpop.f32.mrb[10].mxu0  ;;  %1300 = vmatprep.mubr.msk.f32.mxu1 %vm64_vm0, %v220_v50 }
  0xf4   :  { %v235_v52 = vadd.f32 %v1273_v51, %v1084_v30  ;;  %v229_v53 = vpop.f32.mrb[11].mxu0  ;;  %1301 = vmatmul.mubr.msk.f32.gmra.mrb[8].mxu1 %vm64_vm0, %v225_v48 }
  0xf5   :  { %v230_v54 = vadd.f32 %v1084_v30, %v229_v53 }
  0xf7   :  { %v1276_v55 = vpop.f32.mrb[12].mxu0  ;;  %1303 = vmatprep.mubr.msk.f32.mxu1 %vm64_vm0, %v230_v54 }
  0xf8   :  { %v245_v56 = vadd.f32 %v1276_v55, %v1084_v30  ;;  %v239_v57 = vpop.f32.mrb[13].mxu0  ;;  %1304 = vmatmul.mubr.msk.f32.gmra.mrb[10].mxu1 %vm64_vm0, %v235_v52 }
  0xf9   :  { %v240_v58 = vadd.f32 %v1084_v30, %v239_v57 }
  0xfb   :  { %v1279_v59 = vpop.f32.mrb[14].mxu0  ;;  %1306 = vmatprep.mubr.msk.f32.mxu1 %vm64_vm0, %v240_v58 }
  0xfc   :  { %v255_v60 = vadd.f32 %v1279_v59, %v1084_v30  ;;  %v249_v61 = vpop.f32.mrb[15].mxu0  ;;  %1307 = vmatmul.mubr.msk.f32.gmra.mrb[12].mxu1 %vm64_vm0, %v245_v56 }
  0xfd   :  { %v250_v62 = vadd.f32 %v1084_v30, %v249_v61 }
  0xff   :  { %1309 = vmatprep.mubr.msk.f32.mxu1 %vm64_vm0, %v250_v62 }
 0x100   :  { %1310 = vmatmul.mubr.msk.f32.gmra.mrb[14].mxu1 %vm64_vm0, %v255_v60 }
 0x101   :  { %1379 = vmatprep.mubr.msk.f32.mxu1 %vm1603_vm1, %v1604_v0 }
 0x1b7   :  { %v1290_v2 = vpop.f32.mrb[0].mxu1 }
 0x1b8   :  { %v389_v3 = vadd.f32 %v1290_v2, %v1793_v1  ;;  %v383_v4 = vpop.f32.mrb[1].mxu1 }
 0x1b9   :  { %v384_v5 = vadd.f32 %v1793_v1, %v383_v4 }
 0x1ba   :  { %v1797_v6 = vmax.f32 %v389_v3, 0.0 }
 0x1bb   :  { %v1799_v7 = vmax.f32 %v384_v5, 0.0  ;;  %v1293_v8 = vpop.f32.mrb[2].mxu1  ;;  %v1948_v5 = vld [vmem:[%s2123_s5] sm:$0xff] }
 0x1bc   :  { %752 = vrot.lane.b32.xlu1 %v1797_v6, %s1605_s6  ;;  %v399_v9 = vadd.f32 %v1293_v8, %v1793_v1  ;;  %v393_v10 = vpop.f32.mrb[3].mxu1  ;;  %v1954_v8 = vpop.permute.xlu0 %482 }
 0x1bd   :  { %v1437_v12 = vpack.c.bf16 %v1797_v6, %v1799_v7  ;;  %v394_v13 = vadd.f32 %v1793_v1, %v393_v10  ;;  %v1533_v14 = vpack.i.bf16 %v1797_v6, %v1799_v7 }
 0x1be   :  { %v1815_v15 = vmax.f32 %v399_v9, 0.0 }
 0x1bf   :  { %1534 = vrot.lane.b32.xlu0 %v1533_v14, %s1606_s4  ;;  %1439 = vmatpush3.bf16.xpose.msk.msra.mxu0 %vm1806_vm2, %v1437_v12  ;;  %v1296_v16 = vpop.f32.mrb[4].mxu1  ;;  %v1824_v19 = vmax.f32 %v394_v13, 0.0 }
 0x1c0   :  { %750 = vrot.lane.b32.xlu1 %v1799_v7, %s1605_s6  ;;  %v409_v17 = vadd.f32 %v1296_v16, %v1793_v1  ;;  %v403_v18 = vpop.f32.mrb[5].mxu1  ;;  %1440 = vmatprep.subr.bf16.mxu0 %v1602_v63 }
 0x1c1   :  { %v404_v20 = vadd.f32 %v1793_v1, %v403_v18  ;;  %v1441_v25 = vpack.c.bf16 %v1815_v15, %v1824_v19  ;;  %v1538_v26 = vpack.i.bf16 %v1815_v15, %v1824_v19 }
 0x1c2   :  { %v1829_v22 = vmax.f32 %v409_v17, 0.0 }
 0x1c3   :  { %756 = vrot.lane.b32.xlu0 %v1815_v15, %s1605_s6  ;;  %v1299_v21 = vpop.f32.mrb[6].mxu1  ;;  %v1831_v23 = vmax.f32 %v404_v20, 0.0 }
 0x1c4   :  { %754 = vrot.lane.b32.xlu1 %v1824_v19, %s1605_s6  ;;  %v413_v24 = vpop.f32.mrb[7].mxu1  ;;  %v419_v29 = vadd.f32 %v1299_v21, %v1793_v1 }
 0x1c5   :  { %v414_v27 = vadd.f32 %v1793_v1, %v413_v24  ;;  %v1543_v30 = vpack.i.bf16 %v1829_v22, %v1831_v23  ;;  %v1445_v38 = vpack.c.bf16 %v1829_v22, %v1831_v23 }
 0x1c6   :  { %v1854_v35 = vmax.f32 %v419_v29, 0.0 }
 0x1c7   :  { %1539 = vrot.lane.b32.xlu0 %v1538_v26, %s1606_s4  ;;  %1443 = vmatpush3.bf16.xpose.msk.msra.mxu0 %vm1806_vm2, %v1441_v25  ;;  %v1302_v28 = vpop.f32.mrb[8].mxu1  ;;  %v1849_v32 = vmax.f32 %v414_v27, 0.0 }
 0x1c8   :  { %758 = vrot.lane.b32.xlu1 %v1831_v23, %s1605_s6  ;;  %v423_v31 = vpop.f32.mrb[9].mxu1  ;;  %1444 = vmatprep.subr.bf16.mxu0 %v1602_v63  ;;  %v429_v36 = vadd.f32 %v1302_v28, %v1793_v1 }
 0x1c9   :  { %v424_v33 = vadd.f32 %v1793_v1, %v423_v31  ;;  %v1449_v51 = vpack.c.bf16 %v1854_v35, %v1849_v32  ;;  %v1548_v59 = vpack.i.bf16 %v1854_v35, %v1849_v32 }
 0x1ca   :  { %v1867_v42 = vmax.f32 %v429_v36, 0.0 }
 0x1cb   :  { %760 = vrot.lane.b32.xlu0 %v1829_v22, %s1605_s6  ;;  %v1305_v34 = vpop.f32.mrb[10].mxu1  ;;  %v1860_v39 = vmax.f32 %v424_v33, 0.0 }
 0x1cc   :  { %1544 = vrot.lane.b32.xlu1 %v1543_v30, %s1606_s4  ;;  %v433_v37 = vpop.f32.mrb[11].mxu1  ;;  %v439_v40 = vadd.f32 %v1305_v34, %v1793_v1 }
 0x1cd   :  { %v434_v43 = vadd.f32 %v1793_v1, %v433_v37  ;;  %v1453_v58 = vpack.c.bf16 %v1867_v42, %v1860_v39  ;;  %v1553_v60 = vpack.i.bf16 %v1867_v42, %v1860_v39 }
 0x1ce   :  { %v1873_v45 = vmax.f32 %v439_v40, 0.0 }
 0x1cf   :  { %762 = vrot.lane.b32.xlu0 %v1849_v32, %s1605_s6  ;;  %1447 = vmatpush3.bf16.xpose.msk.msra.mxu0 %vm1806_vm2, %v1445_v38  ;;  %v1308_v41 = vpop.f32.mrb[12].mxu1  ;;  %v1878_v48 = vmax.f32 %v434_v43, 0.0 }
 0x1d0   :  { %764 = vrot.lane.b32.xlu1 %v1854_v35, %s1605_s6  ;;  %1448 = vmatprep.subr.bf16.mxu0 %v1602_v63  ;;  %v443_v44 = vpop.f32.mrb[13].mxu1  ;;  %v449_v46 = vadd.f32 %v1308_v41, %v1793_v1 }
 0x1d1   :  { %v444_v49 = vadd.f32 %v1793_v1, %v443_v44  ;;  %v1457_v62 = vpack.c.bf16 %v1873_v45, %v1878_v48 }
 0x1d2   :  { %v1885_v52 = vmax.f32 %v449_v46, 0.0 }
 0x1d3   :  { %766 = vrot.lane.b32.xlu0 %v1860_v39, %s1605_s6  ;;  %v1311_v47 = vpop.f32.mrb[14].mxu1  ;;  %v1892_v54 = vmax.f32 %v444_v49, 0.0 }
 0x1d4   :  { %768 = vrot.lane.b32.xlu1 %v1867_v42, %s1605_s6  ;;  %v453_v50 = vpop.f32.mrb[15].mxu1  ;;  %v459_v55 = vadd.f32 %v1311_v47, %v1793_v1 }
 0x1d5   :  { %v454_v53 = vadd.f32 %v1793_v1, %v453_v50  ;;  %v1563_v61 = vpack.i.bf16 %v1885_v52, %v1892_v54  ;;  %v1558_v1 = vpack.i.bf16 %v1873_v45, %v1878_v48  ;;  %v1461_v3 = vpack.c.bf16 %v1885_v52, %v1892_v54 }
 0x1d6   :  { %v1902_v57 = vmax.f32 %v459_v55, 0.0 }
 0x1d7   :  { %772 = vrot.lane.b32.xlu0 %v1873_v45, %s1605_s6  ;;  %1451 = vmatpush3.bf16.xpose.msk.msra.mxu0 %vm1806_vm2, %v1449_v51  ;;  %v1898_v56 = vmax.f32 %v454_v53, 0.0 }
 0x1d8   :  { %770 = vrot.lane.b32.xlu1 %v1878_v48, %s1605_s6  ;;  %1452 = vmatprep.subr.bf16.mxu0 %v1602_v63 }
 0x1d9   :  { %v1568_v2 = vpack.i.bf16 %v1902_v57, %v1898_v56  ;;  %v1465_v4 = vpack.c.bf16 %v1902_v57, %v1898_v56 }
 0x1db   :  { %776 = vrot.lane.b32.xlu0 %v1885_v52, %s1605_s6 }
 0x1dc   :  { %774 = vrot.lane.b32.xlu1 %v1892_v54, %s1605_s6 }
 0x1df   :  { %778 = vrot.lane.b32.xlu0 %v1898_v56, %s1605_s6  ;;  %1455 = vmatpush3.bf16.xpose.msk.msra.mxu0 %vm1806_vm2, %v1453_v58 }
 0x1e0   :  { %780 = vrot.lane.b32.xlu1 %v1902_v57, %s1605_s6  ;;  %1456 = vmatprep.subr.bf16.mxu0 %v1602_v63 }
 0x1e3   :  { %1549 = vrot.lane.b32.xlu0 %v1548_v59, %s1606_s4 }
 0x1e4   :  { %1554 = vrot.lane.b32.xlu1 %v1553_v60, %s1606_s4 }
 0x1e7   :  { %1559 = vrot.lane.b32.xlu0 %v1558_v1, %s1606_s4  ;;  %1459 = vmatpush3.bf16.xpose.msk.msra.mxu0 %vm1806_vm2, %v1457_v62 }
 0x1e8   :  { %1564 = vrot.lane.b32.xlu1 %v1563_v61, %s1606_s4  ;;  %1460 = vmatprep.subr.bf16.mxu0 %v1602_v63 }
 0x1eb   :  { %1569 = vrot.lane.b32.xlu0 %v1568_v2, %s1606_s4 }
 0x1ef   :  { %1463 = vmatpush3.bf16.xpose.msk.msra.mxu0 %vm1806_vm2, %v1461_v3 }
 0x1f0   :  { %1464 = vmatprep.subr.bf16.mxu0 %v1602_v63 }
 0x1f7   :  { %1467 = vmatpush3.bf16.xpose.msk.msra.mxu0 %vm1806_vm2, %v1465_v4 }
 0x1f8   :  { %1500 = vmatprep.subr.bf16.mxu0 %v1602_v63 }
 0x1fe   :  { %1345 = vmatmul.mubr.msk.f32.vlgmr.msra.gmra.mrb[16].mxu0 %vm64_vm0, %v1948_v5 }
 0x1ff   :  { %1398 = vmatprep.mubr.msk.f32.mxu0 %vm1603_vm1, %v1604_v0 }
 0x22e   :  { %v753_v9 = vpop.permute.xlu1 %752 }
 0x22f   :  { %v799_v10 = vadd.f32 %v753_v9, %v1797_v6 }
 0x231   :  { %832 = vrot.lane.b32.xlu0 %v799_v10, %s1606_s4  ;;  %v1535_v12 = vpop.permute.xlu0 %1534 }
 0x232   :  { %v1537_v13 = vunpack.i.h.bf16 %v1535_v12  ;;  %v1536_v14 = vunpack.i.l.bf16 %v1535_v12  ;;  %v751_v16 = vpop.permute.xlu1 %750 }
 0x233   :  { %v798_v17 = vadd.f32 %v751_v16, %v1799_v7 }
 0x234   :  { %v1469_v18 = vpack.c.bf16 %v1537_v13, %v1536_v14 }
 0x235   :  { %830 = vrot.lane.b32.xlu1 %v798_v17, %s1606_s4  ;;  %v757_v20 = vpop.permute.xlu0 %756  ;;  %v606_v17 = vld [vmem:[%s2125_s7] sm:$0xf] }
 0x236   :  { %v801_v21 = vadd.f32 %v757_v20, %v1815_v15  ;;  %v755_v24 = vpop.permute.xlu1 %754  ;;  %1471 = vmatpush3.bf16.xpose.msk.msra.mxu1 %vm1806_vm2, %v1469_v18 }
 0x237   :  { %v800_v6 = vadd.f32 %v755_v24, %v1824_v19  ;;  %1472 = vmatprep.subr.bf16.mxu1 %v1602_v63 }
 0x238   :  { %836 = vrot.lane.b32.xlu0 %v801_v21, %s1606_s4 }
 0x239   :  { %834 = vrot.lane.b32.xlu1 %v800_v6, %s1606_s4  ;;  %v1540_v25 = vpop.permute.xlu0 %1539 }
 0x23a   :  { %v1542_v7 = vunpack.i.h.bf16 %v1540_v25  ;;  %v1541_v26 = vunpack.i.l.bf16 %v1540_v25  ;;  %v759_v27 = vpop.permute.xlu1 %758 }
 0x23b   :  { %v802_v28 = vadd.f32 %v759_v27, %v1831_v23 }
 0x23c   :  { %v1473_v29 = vpack.c.bf16 %v1542_v7, %v1541_v26 }
 0x23d   :  { %838 = vrot.lane.b32.xlu1 %v802_v28, %s1606_s4  ;;  %v761_v15 = vpop.permute.xlu0 %760 }
 0x23e   :  { %v803_v30 = vadd.f32 %v761_v15, %v1829_v22  ;;  %v1545_v31 = vpop.permute.xlu1 %1544  ;;  %1475 = vmatpush3.bf16.xpose.msk.msra.mxu1 %vm1806_vm2, %v1473_v29 }
 0x23f   :  { %1476 = vmatprep.subr.bf16.mxu1 %v1602_v63  ;;  %v1547_v19 = vunpack.i.h.bf16 %v1545_v31  ;;  %v1546_v33 = vunpack.i.l.bf16 %v1545_v31 }
 0x240   :  { %840 = vrot.lane.b32.xlu0 %v803_v30, %s1606_s4 }
 0x241   :  { %v763_v34 = vpop.permute.xlu0 %762  ;;  %v1477_v38 = vpack.c.bf16 %v1547_v19, %v1546_v33 }
 0x242   :  { %v804_v36 = vadd.f32 %v763_v34, %v1849_v32  ;;  %v765_v23 = vpop.permute.xlu1 %764 }
 0x243   :  { %v805_v37 = vadd.f32 %v765_v23, %v1854_v35 }
 0x244   :  { %842 = vrot.lane.b32.xlu1 %v804_v36, %s1606_s4 }
 0x245   :  { %844 = vrot.lane.b32.xlu0 %v805_v37, %s1606_s4  ;;  %v767_v22 = vpop.permute.xlu0 %766 }
 0x246   :  { %v806_v40 = vadd.f32 %v767_v22, %v1860_v39  ;;  %v769_v41 = vpop.permute.xlu1 %768  ;;  %1479 = vmatpush3.bf16.xpose.msk.msra.mxu1 %vm1806_vm2, %v1477_v38 }
 0x247   :  { %v807_v43 = vadd.f32 %v769_v41, %v1867_v42  ;;  %1480 = vmatprep.subr.bf16.mxu1 %v1602_v63 }
 0x248   :  { %846 = vrot.lane.b32.xlu1 %v806_v40, %s1606_s4 }
 0x249   :  { %848 = vrot.lane.b32.xlu0 %v807_v43, %s1606_s4  ;;  %v773_v32 = vpop.permute.xlu0 %772 }
 0x24a   :  { %v809_v35 = vadd.f32 %v773_v32, %v1873_v45  ;;  %v771_v44 = vpop.permute.xlu1 %770 }
 0x24b   :  { %v808_v46 = vadd.f32 %v771_v44, %v1878_v48 }
 0x24d   :  { %850 = vrot.lane.b32.xlu1 %v808_v46, %s1606_s4  ;;  %852 = vrot.lane.b32.xlu0 %v809_v35, %s1606_s4  ;;  %v777_v39 = vpop.permute.xlu0 %776 }
 0x24e   :  { %v811_v47 = vadd.f32 %v777_v39, %v1885_v52  ;;  %v775_v42 = vpop.permute.xlu1 %774 }
 0x24f   :  { %v810_v49 = vadd.f32 %v775_v42, %v1892_v54  ;;  %v607_v54 = vld [vmem:[%s2126_s8] sm:$0xf] }
 0x251   :  { %854 = vrot.lane.b32.xlu1 %v810_v49, %s1606_s4  ;;  %856 = vrot.lane.b32.xlu0 %v811_v47, %s1606_s4  ;;  %v779_v50 = vpop.permute.xlu0 %778 }
 0x252   :  { %v812_v45 = vadd.f32 %v779_v50, %v1898_v56  ;;  %v781_v51 = vpop.permute.xlu1 %780 }
 0x253   :  { %v813_v48 = vadd.f32 %v781_v51, %v1902_v57 }
 0x255   :  { %860 = vrot.lane.b32.xlu0 %v813_v48, %s1606_s4  ;;  %858 = vrot.lane.b32.xlu1 %v812_v45, %s1606_s4  ;;  %v1550_v53 = vpop.permute.xlu0 %1549 }
 0x256   :  { %v1552_v55 = vunpack.i.h.bf16 %v1550_v53  ;;  %v1551_v52 = vunpack.i.l.bf16 %v1550_v53  ;;  %v1555_v59 = vpop.permute.xlu1 %1554 }
 0x257   :  { %v1557_v56 = vunpack.i.h.bf16 %v1555_v59  ;;  %v1556_v57 = vunpack.i.l.bf16 %v1555_v59 }
 0x258   :  { %v1481_v58 = vpack.c.bf16 %v1552_v55, %v1551_v52 }
 0x259   :  { %610 = vperm.xlu0 %1532, %v607_v54   ;;  %v1485_v60 = vpack.c.bf16 %v1557_v56, %v1556_v57  ;;  %v1560_v61 = vpop.permute.xlu0 %1559 }
 0x25a   :  { %1483 = vmatpush3.bf16.xpose.msk.msra.mxu1 %vm1806_vm2, %v1481_v58  ;;  %v1562_v62 = vunpack.i.h.bf16 %v1560_v61  ;;  %v1561_v1 = vunpack.i.l.bf16 %v1560_v61  ;;  %v1565_v3 = vpop.permute.xlu1 %1564 }
 0x25b   :  { %1484 = vmatprep.subr.bf16.mxu1 %v1602_v63  ;;  %v1567_v4 = vunpack.i.h.bf16 %v1565_v3  ;;  %v1566_v9 = vunpack.i.l.bf16 %v1565_v3 }
 0x25c   :  { %v1489_v2 = vpack.c.bf16 %v1562_v62, %v1561_v1 }
 0x25d   :  { %v1493_v10 = vpack.c.bf16 %v1567_v4, %v1566_v9  ;;  %v1570_v12 = vpop.permute.xlu0 %1569 }
 0x25e   :  { %v1572_v13 = vunpack.i.h.bf16 %v1570_v12  ;;  %v1571_v14 = vunpack.i.l.bf16 %v1570_v12 }
 0x260   :  { %v1497_v16 = vpack.c.bf16 %v1572_v13, %v1571_v14 }
 0x262   :  { %1487 = vmatpush3.bf16.xpose.msk.msra.mxu1 %vm1806_vm2, %v1485_v60 }
 0x263   :  { %1488 = vmatprep.subr.bf16.mxu1 %v1602_v63 }
 0x26a   :  { %1491 = vmatpush3.bf16.xpose.msk.msra.mxu1 %vm1806_vm2, %v1489_v2 }
 0x26b   :  { %1492 = vmatprep.subr.bf16.mxu1 %v1602_v63 }
 0x272   :  { %1495 = vmatpush3.bf16.xpose.msk.msra.mxu1 %vm1806_vm2, %v1493_v10 }
 0x273   :  { %1496 = vmatprep.subr.bf16.mxu1 %v1602_v63 }
 0x27a   :  { %1499 = vmatpush3.bf16.xpose.msk.msra.mxu1 %vm1806_vm2, %v1497_v16 }
 0x27b   :  { %1512 = vmatprep.subr.bf16.mxu1 %v1602_v63 }
 0x281   :  { %1380 = vmatmul.mubr.msk.f32.vlgmr.msra.gmra.mrb[16].mxu1 %vm64_vm0, %v606_v17 }
 0x282   :  { %1417 = vmatprep.mubr.msk.f32.mxu1 %vm1603_vm1, %v1604_v0 }
 0x2a3   :  { %v833_v18 = vpop.permute.xlu0 %832 }
 0x2a4   :  { %879 = vst.msk [vmem:[%s2128_s10 + $0x8] sm:$0xff] %vm64_vm0, %v833_v18 }
 0x2a7   :  { %v831_v20 = vpop.permute.xlu1 %830 }
 0x2a8   :  { %878 = vst.msk [vmem:[%s2128_s10] sm:$0xff] %vm64_vm0, %v831_v20  ;;  %v1501_v11 = vpack.c.bf16 %v833_v18, %v831_v20 }
 0x2aa   :  { %v837_v21 = vpop.permute.xlu0 %836  ;;  %1502 = vmatpush3.bf16.msra.mxu0 %v1501_v11 }
 0x2ab   :  { %881 = vst.msk [vmem:[%s2128_s10 + $0x18] sm:$0xff] %vm64_vm0, %v837_v21  ;;  %v835_v24 = vpop.permute.xlu1 %834  ;;  %1503 = vmatprep.subr.bf16.mxu0 %v1602_v63 }
 0x2ac   :  { %880 = vst.msk [vmem:[%s2128_s10 + $0x10] sm:$0xff] %vm64_vm0, %v835_v24  ;;  %v1504_v6 = vpack.c.bf16 %v837_v21, %v835_v24 }
 0x2ae   :  { %1505 = vmatpush3.bf16.msra.mxu0 %v1504_v6 }
 0x2af   :  { %v839_v25 = vpop.permute.xlu1 %838  ;;  %1506 = vmatprep.subr.bf16.mxu0 %v1602_v63 }
 0x2b0   :  { %882 = vst.msk [vmem:[%s2128_s10 + $0x20] sm:$0xff] %vm64_vm0, %v839_v25 }
 0x2b2   :  { %v841_v7 = vpop.permute.xlu0 %840 }
 0x2b3   :  { %883 = vst.msk [vmem:[%s2128_s10 + $0x28] sm:$0xff] %vm64_vm0, %v841_v7  ;;  %v1507_v26 = vpack.c.bf16 %v841_v7, %v839_v25 }
 0x2b5   :  { %1508 = vmatpush3.bf16.msra.mxu0 %v1507_v26 }
 0x2b6   :  { %v843_v27 = vpop.permute.xlu1 %842  ;;  %1509 = vmatprep.subr.bf16.mxu0 %v1602_v63 }
 0x2b7   :  { %884 = vst.msk [vmem:[%s2128_s10 + $0x30] sm:$0xff] %vm64_vm0, %v843_v27  ;;  %v845_v28 = vpop.permute.xlu0 %844 }
 0x2b8   :  { %885 = vst.msk [vmem:[%s2128_s10 + $0x38] sm:$0xff] %vm64_vm0, %v845_v28  ;;  %v1510_v29 = vpack.c.bf16 %v845_v28, %v843_v27 }
 0x2ba   :  { %v847_v15 = vpop.permute.xlu1 %846  ;;  %1511 = vmatpush3.bf16.msra.mxu0 %v1510_v29 }
 0x2bb   :  { %886 = vst.msk [vmem:[%s2128_s10 + $0x40] sm:$0xff] %vm64_vm0, %v847_v15  ;;  %v849_v30 = vpop.permute.xlu0 %848 }
 0x2bc   :  { %887 = vst.msk [vmem:[%s2128_s10 + $0x48] sm:$0xff] %vm64_vm0, %v849_v30  ;;  %v1513_v31 = vpack.c.bf16 %v849_v30, %v847_v15 }
 0x2be   :  { %1514 = vmatpush3.bf16.msra.mxu1 %v1513_v31 }
 0x2bf   :  { %v851_v19 = vpop.permute.xlu1 %850  ;;  %v853_v33 = vpop.permute.xlu0 %852  ;;  %1515 = vmatprep.subr.bf16.mxu1 %v1602_v63 }
 0x2c0   :  { %888 = vst.msk [vmem:[%s2128_s10 + $0x50] sm:$0xff] %vm64_vm0, %v851_v19  ;;  %889 = vst.msk [vmem:[%s2128_s10 + $0x58] sm:$0xff] %vm64_vm0, %v853_v33  ;;  %v1516_v34 = vpack.c.bf16 %v853_v33, %v851_v19 }
 0x2c2   :  { %1517 = vmatpush3.bf16.msra.mxu1 %v1516_v34 }
 0x2c3   :  { %v855_v36 = vpop.permute.xlu1 %854  ;;  %v857_v23 = vpop.permute.xlu0 %856  ;;  %1518 = vmatprep.subr.bf16.mxu1 %v1602_v63 }
 0x2c4   :  { %890 = vst.msk [vmem:[%s2128_s10 + $0x60] sm:$0xff] %vm64_vm0, %v855_v36  ;;  %891 = vst.msk [vmem:[%s2128_s10 + $0x68] sm:$0xff] %vm64_vm0, %v857_v23  ;;  %v1519_v37 = vpack.c.bf16 %v857_v23, %v855_v36 }
 0x2c6   :  { %1520 = vmatpush3.bf16.msra.mxu1 %v1519_v37 }
 0x2c7   :  { %v859_v38 = vpop.permute.xlu1 %858  ;;  %v861_v22 = vpop.permute.xlu0 %860  ;;  %1521 = vmatprep.subr.bf16.mxu1 %v1602_v63 }
 0x2c8   :  { %892 = vst.msk [vmem:[%s2128_s10 + $0x70] sm:$0xff] %vm64_vm0, %v859_v38  ;;  %893 = vst.msk [vmem:[%s2128_s10 + $0x78] sm:$0xff] %vm64_vm0, %v861_v22  ;;  %v1522_v40 = vpack.c.bf16 %v861_v22, %v859_v38  ;;  %s1607_s10 = smov 64  }
 0x2ca   :  { %1523 = vmatpush3.bf16.msra.mxu1 %v1522_v40 }
 0x2d1   :  { %v602_v41 = vpop.f32.mrb[16].mxu0 }
 0x2d2   :  { %v603_v43 = vadd.f32 %v602_v41, %v1954_v8  ;;  %v1346_v32 = vpop.f32.mrb[17].mxu0 }
 0x2d4   :  { %894 = vst [vmem:[%s2129_s11] sm:$0xff] %v603_v43  ;;  %v1152_v63 = vmul.f32 -1.442695, %v603_v43  ;;  %s1608_s11 = smov [#allocation2]  }
 0x2d5   :  { %s1070_s25 = sshll.u32 %s1608_s11, 4  ;;  %s1071_s25 = int_to_ptr.vmem [resolvable:$true] %s1070_s25 }
 0x2d6   :  { %1573 = vpow2.f32 %v1152_v63  ;;  %s1577_s26 = scalar_lea.vmem %s1071_s25, 64  ;;  %p1582_p1 = scmp.lt.s32.totalorder %s1071_s25, %s1071_s25 }
 0x2d7   :  { %p1578_p0 = scmp.ne.s32.totalorder %s1071_s25, %s1577_s26  ;;  %p1583_p2 = scmp.lt.s32.totalorder %s1577_s26, %s1577_s26 }
 0x2d8   :  { %v611_v8 = vpop.permute.xlu0 %610 }
 0x2d9   :  { %p1584_p3 = por %p1583_p2, %p1582_p1 }
 0x2db   :  { %p1585_p4 = pnand %p1584_p3, %p1578_p0 }
 0x2e0   :  { %v1574_v35 = vpop.eup %1573 }
 0x2e1   :  { %v899_v44 = vadd.f32 1.0, %v1574_v35 }
 0x2e3   :  { %1575 = vrcp.f32 %v899_v44 }
 0x2ed   :  { %v1576_v46 = vpop.eup %1575 }
 0x2ee   :  { %vm902_vm3 = vcmp.gt.f32.partialorder %v1576_v46, 0.5 }
 0x2ef   :  { %v1153_v39 = vsel %vm902_vm3, 1.0, %v1604_v0 }
 0x2f0   :  { %v905_v47 = vmul.f32 %v1576_v46, %v1153_v39 }
 0x2f2   :  { %981 = vrot.lane.b32.xlu1 %v905_v47, %s1607_s10  ;;  %1399 = vmatmul.mubr.msk.f32.vlgmr.msra.gmra.mrb[18].mxu0 %vm906_vm4, %v905_v47 }
 0x354   :  { %v746_v42 = vpop.f32.mrb[16].mxu1 }
 0x355   :  { %v747_v49 = vadd.f32 %v746_v42, %v611_v8  ;;  %v1381_v50 = vpop.f32.mrb[17].mxu1 }
 0x357   :  { %895 = vst [vmem:[#allocation2] sm:$0xf] %v747_v49 }
 0x364   :  { %v982_v45 = vpop.permute.xlu1 %981 }
 0x365   :  { %1418 = vmatmul.mubr.msk.f32.vlgmr.msra.gmra.mrb[18].mxu1 %vm906_vm4, %v982_v45 }
 0x366   :  { %1588 = shalt.err (!%p1585_p4)
}
 0x367   :  { %s1589_s29 = scalar_lea.hbm %s2130_s12, 64 }
 0x368   :  { %p1590_p5 = scmp.ne.s32.totalorder %s2130_s12, %s1589_s29  ;;  %p1593_p6 = scmp.lt.u32.totalorder %s1589_s29, %s2130_s12 }
 0x36a   :  { %p1595_p7 = pnand %p1593_p6, %p1590_p5 }
 0x36c   :  { %1598 = shalt.err (!%p1595_p7)
}
 0x36d   :  { %1073 = dma.vmem_to_hbm [thread:$0]  %s1071_s25, 64, %s2130_s12, [#allocation3]  }
 0x3c5   :  { %v976_v0 = vpop.f32.mrb[18].mxu0 }
 0x3c6   :  { %v980_v51 = vadd.f32 %v976_v0, %v1948_v5  ;;  %v1400_v48 = vpop.f32.mrb[19].mxu0 }
 0x3c8   :  { %1056 = vst.msk [vmem:[%s2127_s9] sm:$0xff] %vm64_vm0, %v980_v51 }
 0x438   :  { %v1051_v53 = vpop.f32.mrb[18].mxu1 }
 0x439   :  { %v1055_v55 = vadd.f32 %v1051_v53, %v1948_v5  ;;  %v1419_v52 = vpop.f32.mrb[19].mxu1 }
 0x43b   :  { %1057 = vst.msk [vmem:[%s2127_s9 + $0x8] sm:$0xff] %vm64_vm0, %v1055_v55 }
 0x43c   :  { %1599 = dma.done.wait [#allocation3], 64  }
 0x43d   :  { %1600 = vsyncadd [#allocation3], 4294967232 }
 0x43e   :  { %1083 = vsyncpa [#allocation3], 1 }

// kernel: knet_inference.6
= control target key start
LH: loop header
LB: loop body
LE: loop exit
PB: predicated region body
PF: predicated region fallthrough
CT: control target
= control target key end

     0   :  { %s5640_s6 = smov 1   ;;  %s5641_s10 = smov 2   ;;  %s6547_s0 = inlined_call_operand.smem [shape: u32[46], index: -1, kind: input, shape index: {}] }
   0x1   :  { %s5729_s5 = sld [smem:[%s6547_s0]]   ;;  %s5642_s14 = smov 3  }
   0x2   :  { %s5734_s9 = sld [smem:[%s6547_s0 + %s5640_s6]]   ;;  %s5643_s18 = smov 4  }
   0x3   :  { %s5739_s13 = sld [smem:[%s6547_s0 + %s5641_s10]]   ;;  %s5644_s22 = smov 5  }
   0x4   :  { %s5744_s17 = sld [smem:[%s6547_s0 + %s5642_s14]]   ;;  %s5645_s26 = smov 6  }
   0x5   :  { %s5749_s21 = sld [smem:[%s6547_s0 + %s5643_s18]]   ;;  %s5646_s30 = smov 7  }
   0x6   :  { %s5754_s25 = sld [smem:[%s6547_s0 + %s5644_s22]]   ;;  %s5647_s4 = smov 8  }
   0x7   :  { %6565 = sst [smem:[#allocation43_spill]] %s5729_s5  ;;  %s5648_s10 = smov 9  }
   0x8   :  { %6566 = sst [smem:[#allocation44_spill]] %s5734_s9  ;;  %s5649_s15 = smov 10  }
   0x9   :  { %6567 = sst [smem:[#allocation45_spill]] %s5739_s13  ;;  %s5650_s20 = smov 11  }
   0xa   :  { %6568 = sst [smem:[#allocation46_spill]] %s5744_s17  ;;  %s5652_s1 = smov 13  }
   0xb   :  { %6569 = sst [smem:[#allocation47_spill]] %s5749_s21  ;;  %s5653_s7 = smov 14  }
   0xc   :  { %6570 = sst [smem:[#allocation48_spill]] %s5754_s25  ;;  %s5655_s22 = smov 16  }
   0xd   :  { %s5759_s29 = sld [smem:[%s6547_s0 + %s5645_s26]]   ;;  %s5651_s26 = smov 12  }
   0xe   :  { %s5764_s3 = sld [smem:[%s6547_s0 + %s5646_s30]]   ;;  %s5656_s28 = smov 17  }
   0xf   :  { %s5769_s8 = sld [smem:[%s6547_s0 + %s5647_s4]]  }
  0x10   :  { %s5774_s14 = sld [smem:[%s6547_s0 + %s5648_s10]]  }
  0x11   :  { %s5779_s19 = sld [smem:[%s6547_s0 + %s5649_s15]]   ;;  %s5654_s15 = smov 15  }
  0x12   :  { %s5784_s24 = sld [smem:[%s6547_s0 + %s5650_s20]]  }
  0x13   :  { %6571 = sst [smem:[#allocation49_spill]] %s5759_s29 }
  0x14   :  { %6572 = sst [smem:[#allocation50_spill]] %s5764_s3 }
  0x15   :  { %6573 = sst [smem:[#allocation51_spill]] %s5769_s8 }
  0x16   :  { %6574 = sst [smem:[#allocation52_spill]] %s5774_s14 }
  0x17   :  { %6575 = sst [smem:[#allocation53_spill]] %s5779_s19 }
  0x18   :  { %6576 = sst [smem:[#allocation54_spill]] %s5784_s24 }
  0x19   :  { %s5789_s30 = sld [smem:[%s6547_s0 + %s5651_s26]]  }
  0x1a   :  { %s5794_s6 = sld [smem:[%s6547_s0 + %s5652_s1]]  }
  0x1b   :  { %s5799_s12 = sld [smem:[%s6547_s0 + %s5653_s7]]   ;;  %s5657_s7 = smov 18  }
  0x1c   :  { %s5804_s20 = sld [smem:[%s6547_s0 + %s5654_s15]]   ;;  %s5658_s15 = smov 19  }
  0x1d   :  { %s5809_s27 = sld [smem:[%s6547_s0 + %s5655_s22]]   ;;  %s5659_s22 = smov 20  }
  0x1e   :  { %s5814_s4 = sld [smem:[%s6547_s0 + %s5656_s28]]   ;;  %s5660_s28 = smov 21  }
  0x1f   :  { %6577 = sst [smem:[#allocation55_spill]] %s5789_s30 }
  0x20   :  { %6578 = sst [smem:[#allocation56_spill]] %s5794_s6 }
  0x21   :  { %6579 = sst [smem:[#allocation57_spill]] %s5799_s12 }
  0x22   :  { %6580 = sst [smem:[#allocation58_spill]] %s5804_s20 }
  0x23   :  { %6581 = sst [smem:[#allocation59_spill]] %s5809_s27 }
  0x24   :  { %6582 = sst [smem:[#allocation60_spill]] %s5814_s4 }
  0x25   :  { %s5819_s12 = sld [smem:[%s6547_s0 + %s5657_s7]]   ;;  %s5661_s7 = smov 22  }
  0x26   :  { %s5824_s19 = sld [smem:[%s6547_s0 + %s5658_s15]]   ;;  %s5662_s15 = smov 23  }
  0x27   :  { %s5829_s24 = sld [smem:[%s6547_s0 + %s5659_s22]]   ;;  %s5663_s22 = smov 24  }
  0x28   :  { %s5834_s20 = sld [smem:[%s6547_s0 + %s5660_s28]]   ;;  %s5664_s28 = smov 25  }
  0x29   :  { %s5849_s14 = sld [smem:[%s6547_s0 + %s5663_s22]]   ;;  %s5667_s22 = smov 28  }
  0x2a   :  { %s5854_s17 = sld [smem:[%s6547_s0 + %s5664_s28]]   ;;  %s5668_s28 = smov 29  }
  0x2b   :  { %6583 = sst [smem:[#allocation61_spill]] %s5819_s12 }
  0x2c   :  { %6584 = sst [smem:[#allocation62_spill]] %s5824_s19 }
  0x2d   :  { %s5839_s12 = sld [smem:[%s6547_s0 + %s5661_s7]]   ;;  %s5665_s7 = smov 26  }
  0x2e   :  { %s5844_s19 = sld [smem:[%s6547_s0 + %s5662_s15]]   ;;  %s5666_s15 = smov 27  }
  0x2f   :  { %s5859_s21 = sld [smem:[%s6547_s0 + %s5665_s7]]   ;;  %s5669_s7 = smov 30  }
  0x30   :  { %6586 = sst [smem:[#allocation64_spill]] %s5854_s17 }
  0x31   :  { %s5869_s3 = sld [smem:[%s6547_s0 + %s5667_s22]]   ;;  %s5671_s22 = smov 32  }
  0x32   :  { %s5874_s17 = sld [smem:[%s6547_s0 + %s5668_s28]]   ;;  %s5672_s28 = smov 33  }
  0x33   :  { %s5879_s8 = sld [smem:[%s6547_s0 + %s5669_s7]]   ;;  %s5673_s7 = smov 34  }
  0x34   :  { %6585 = sst [smem:[#allocation63_spill]] %s5844_s19 }
  0x35   :  { %s5864_s19 = sld [smem:[%s6547_s0 + %s5666_s15]]   ;;  %s5670_s15 = smov 31  }
  0x36   :  { %s5884_s25 = sld [smem:[%s6547_s0 + %s5670_s15]]   ;;  %s5674_s15 = smov 35  }
  0x37   :  { %s5889_s29 = sld [smem:[%s6547_s0 + %s5671_s22]]   ;;  %s5675_s22 = smov 36  }
  0x38   :  { %6587 = sst [smem:[#allocation65_spill]] %s5874_s17 }
  0x39   :  { %s5894_s27 = sld [smem:[%s6547_s0 + %s5672_s28]]   ;;  %s5676_s28 = smov 37  }
  0x3a   :  { %s5899_s4 = sld [smem:[%s6547_s0 + %s5673_s7]]   ;;  %s5677_s7 = smov 38  }
  0x3b   :  { %s5904_s30 = sld [smem:[%s6547_s0 + %s5674_s15]]   ;;  %s5678_s15 = smov 39  }
  0x3c   :  { %6588 = sst [smem:[#allocation66_spill]] %s5884_s25 }
  0x3d   :  { %s5909_s17 = sld [smem:[%s6547_s0 + %s5675_s22]]   ;;  %s5679_s22 = smov 40  }
  0x3e   :  { %s5914_s13 = sld [smem:[%s6547_s0 + %s5676_s28]]   ;;  %s5680_s28 = smov 41  }
  0x3f   :  { %s5919_s6 = sld [smem:[%s6547_s0 + %s5677_s7]]   ;;  %s5681_s7 = smov 42  }
  0x40   :  { %s5924_s25 = sld [smem:[%s6547_s0 + %s5678_s15]]   ;;  %s5682_s15 = smov 43  }
  0x41   :  { %s5934_s5 = sld [smem:[%s6547_s0 + %s5680_s28]]   ;;  %s5684_s28 = smov 45  }
  0x42   :  { %s5939_s9 = sld [smem:[%s6547_s0 + %s5681_s7]]  }
  0x43   :  { %6589 = sst [smem:[#allocation67_spill]] %s5909_s17 }
  0x44   :  { %6590 = sst [smem:[#allocation68_spill]] %s5914_s13 }
  0x45   :  { %s5929_s17 = sld [smem:[%s6547_s0 + %s5679_s22]]   ;;  %s5683_s22 = smov 44  }
  0x46   :  { %6591 = sst [smem:[#allocation69_spill]] %s5924_s25 }
  0x47   :  { %6592 = sst [smem:[#allocation70_spill]] %s5934_s5 }
  0x48   :  { %s5944_s25 = sld [smem:[%s6547_s0 + %s5682_s15]]  }
  0x49   :  { %s5949_s13 = sld [smem:[%s6547_s0 + %s5683_s22]]  }
  0x4a   :  { %s5954_s5 = sld [smem:[%s6547_s0 + %s5684_s28]]  }
  0x4b   :  { %97 = vsyncpa [#allocation3], 0 }
  0x4c   :  { %98 = vsyncpa [#allocation6], 0 }
  0x4d   :  { %99 = vsyncpa [#allocation9], 0 }
  0x4e   :  { %100 = vsyncpa [#allocation12], 0 }
  0x4f   :  { %101 = vsyncpa [#allocation15], 0 }
  0x50   :  { %102 = vsyncpa [#allocation18], 0 }
  0x51   :  { %103 = vsyncpa [#allocation21], 0 }
  0x52   :  { %104 = vsyncpa [#allocation24], 0 }
  0x53   :  { %105 = vsyncpa [#allocation27], 0 }
  0x54   :  { %106 = vsyncpa [#allocation30], 0 }
  0x55   :  { %107 = vsyncpa [#allocation4], 0  ;;  %s5685_s7 = smov [#allocation5]   ;;  %s5686_s11 = smov [#allocation8]  }
  0x56   :  { %s164_s10 = sshll.u32 %s5685_s7, 4  ;;  %s186_s15 = sshll.u32 %s5686_s11, 4  ;;  %s165_s10 = int_to_ptr.vmem [resolvable:$true] %s164_s10  ;;  %s187_s15 = int_to_ptr.vmem [resolvable:$true] %s186_s15 }
  0x57   :  { %s5200_s0 = scalar_lea.hbm %s5834_s20, 16 }
  0x58   :  { %p5201_p0 = scmp.ne.s32.totalorder %s5834_s20, %s5200_s0  ;;  %p5204_p1 = scmp.lt.u32.totalorder %s5200_s0, %s5834_s20 }
  0x5a   :  { %p5206_p2 = pnand %p5204_p1, %p5201_p0 }
  0x5c   :  { %5209 = shalt.err (!%p5206_p2)
}
  0x5d   :  { %s5210_s16 = scalar_lea.vmem %s165_s10, 16  ;;  %s5214_s18 = scalar_lea.vmem %s165_s10, 32 }
  0x5e   :  { %p5211_p3 = scmp.ne.s32.totalorder %s165_s10, %s5210_s16  ;;  %p5215_p4 = scmp.lt.s32.totalorder %s165_s10, %s165_s10 }
  0x5f   :  { %p5216_p5 = scmp.lt.s32.totalorder %s5214_s18, %s5210_s16 }
  0x61   :  { %p5217_p6 = por %p5216_p5, %p5215_p4 }
  0x63   :  { %p5218_p7 = pnand %p5217_p6, %p5211_p3 }
  0x65   :  { %5221 = shalt.err (!%p5218_p7)
}
  0x66   :  { %167 = dma.hbm_to_vmem [thread:$0]  %s5834_s20, 16, %s165_s10, [#allocation6]  }
  0x67   :  { %s5222_s22 = scalar_lea.hbm %s5849_s14, 16 }
  0x68   :  { %p5223_p8 = scmp.ne.s32.totalorder %s5849_s14, %s5222_s22  ;;  %p5226_p9 = scmp.lt.u32.totalorder %s5222_s22, %s5849_s14 }
  0x6a   :  { %p5228_p10 = pnand %p5226_p9, %p5223_p8 }
  0x6c   :  { %5231 = shalt.err (!%p5228_p10)
}
  0x6d   :  { %s5232_s23 = scalar_lea.vmem %s187_s15, 16  ;;  %s5236_s26 = scalar_lea.vmem %s187_s15, 32 }
  0x6e   :  { %p5233_p11 = scmp.ne.s32.totalorder %s187_s15, %s5232_s23  ;;  %p5237_p12 = scmp.lt.s32.totalorder %s187_s15, %s187_s15 }
  0x6f   :  { %p5238_p13 = scmp.lt.s32.totalorder %s5236_s26, %s5232_s23 }
  0x71   :  { %p5239_p0 = por %p5238_p13, %p5237_p12 }
  0x73   :  { %p5240_p1 = pnand %p5239_p0, %p5233_p11 }
  0x75   :  { %5243 = shalt.err (!%p5240_p1)
}
  0x76   :  { %189 = dma.hbm_to_vmem [thread:$0]  %s5849_s14, 16, %s187_s15, [#allocation9]  }
  0x77   :  { %s5687_s28 = smov [#allocation11]   ;;  %s5688_s1 = smov [#allocation14]  }
  0x78   :  { %s208_s20 = sshll.u32 %s5687_s28, 4  ;;  %s230_s2 = sshll.u32 %s5688_s1, 4  ;;  %s209_s20 = int_to_ptr.vmem [resolvable:$true] %s208_s20  ;;  %s231_s2 = int_to_ptr.vmem [resolvable:$true] %s230_s2 }
  0x79   :  { %s5244_s7 = scalar_lea.hbm %s5864_s19, 16 }
  0x7a   :  { %p5245_p2 = scmp.ne.s32.totalorder %s5864_s19, %s5244_s7  ;;  %p5248_p3 = scmp.lt.u32.totalorder %s5244_s7, %s5864_s19 }
  0x7c   :  { %p5250_p4 = pnand %p5248_p3, %p5245_p2 }
  0x7e   :  { %5253 = shalt.err (!%p5250_p4)
}
  0x7f   :  { %s5254_s10 = scalar_lea.vmem %s209_s20, 16  ;;  %s5258_s11 = scalar_lea.vmem %s209_s20, 32 }
  0x80   :  { %p5255_p5 = scmp.ne.s32.totalorder %s209_s20, %s5254_s10  ;;  %p5259_p6 = scmp.lt.s32.totalorder %s209_s20, %s209_s20 }
  0x81   :  { %p5260_p7 = scmp.lt.s32.totalorder %s5258_s11, %s5254_s10 }
  0x83   :  { %p5261_p8 = por %p5260_p7, %p5259_p6 }
  0x85   :  { %p5262_p9 = pnand %p5261_p8, %p5255_p5 }
  0x87   :  { %5265 = shalt.err (!%p5262_p9)
}
  0x88   :  { %211 = dma.hbm_to_vmem [thread:$0]  %s5864_s19, 16, %s209_s20, [#allocation12]  }
  0x89   :  { %s5266_s14 = scalar_lea.hbm %s5879_s8, 16 }
  0x8a   :  { %p5267_p10 = scmp.ne.s32.totalorder %s5879_s8, %s5266_s14  ;;  %p5270_p11 = scmp.lt.u32.totalorder %s5266_s14, %s5879_s8 }
  0x8c   :  { %p5272_p12 = pnand %p5270_p11, %p5267_p10 }
  0x8e   :  { %5275 = shalt.err (!%p5272_p12)
}
  0x8f   :  { %s5276_s15 = scalar_lea.vmem %s231_s2, 16  ;;  %s5280_s0 = scalar_lea.vmem %s231_s2, 32 }
  0x90   :  { %p5277_p13 = scmp.ne.s32.totalorder %s231_s2, %s5276_s15  ;;  %p5281_p0 = scmp.lt.s32.totalorder %s231_s2, %s231_s2 }
  0x91   :  { %p5282_p1 = scmp.lt.s32.totalorder %s5280_s0, %s5276_s15 }
  0x93   :  { %p5283_p2 = por %p5282_p1, %p5281_p0 }
  0x95   :  { %p5284_p3 = pnand %p5283_p2, %p5277_p13 }
  0x97   :  { %5287 = shalt.err (!%p5284_p3)
}
  0x98   :  { %233 = dma.hbm_to_vmem [thread:$0]  %s5879_s8, 16, %s231_s2, [#allocation15]  }
  0x99   :  { %s5689_s16 = smov [#allocation17]   ;;  %s5690_s18 = smov [#allocation20]  }
  0x9a   :  { %s252_s19 = sshll.u32 %s5689_s16, 4  ;;  %s272_s22 = sshll.u32 %s5690_s18, 4  ;;  %s253_s19 = int_to_ptr.vmem [resolvable:$true] %s252_s19  ;;  %s273_s22 = int_to_ptr.vmem [resolvable:$true] %s272_s22 }
  0x9b   :  { %s5288_s23 = scalar_lea.hbm %s5894_s27, 16 }
  0x9c   :  { %p5289_p4 = scmp.ne.s32.totalorder %s5894_s27, %s5288_s23  ;;  %p5292_p5 = scmp.lt.u32.totalorder %s5288_s23, %s5894_s27 }
  0x9e   :  { %p5294_p6 = pnand %p5292_p5, %p5289_p4 }
  0xa0   :  { %5297 = shalt.err (!%p5294_p6)
}
  0xa1   :  { %s5298_s26 = scalar_lea.vmem %s253_s19, 16  ;;  %s5302_s28 = scalar_lea.vmem %s253_s19, 32 }
  0xa2   :  { %p5299_p7 = scmp.ne.s32.totalorder %s253_s19, %s5298_s26  ;;  %p5303_p8 = scmp.lt.s32.totalorder %s253_s19, %s253_s19 }
  0xa3   :  { %p5304_p9 = scmp.lt.s32.totalorder %s5302_s28, %s5298_s26 }
  0xa5   :  { %p5305_p10 = por %p5304_p9, %p5303_p8 }
  0xa7   :  { %p5306_p11 = pnand %p5305_p10, %p5299_p7 }
  0xa9   :  { %5309 = shalt.err (!%p5306_p11)
}
  0xaa   :  { %255 = dma.hbm_to_vmem [thread:$0]  %s5894_s27, 16, %s253_s19, [#allocation18]  }
  0xab   :  { %s5310_s8 = scalar_lea.hbm %s5904_s30, 16 }
  0xac   :  { %p5311_p12 = scmp.ne.s32.totalorder %s5904_s30, %s5310_s8  ;;  %p5314_p13 = scmp.lt.u32.totalorder %s5310_s8, %s5904_s30 }
  0xae   :  { %p5316_p0 = pnand %p5314_p13, %p5311_p12 }
  0xb0   :  { %5319 = shalt.err (!%p5316_p0)
}
  0xb1   :  { %s5320_s20 = scalar_lea.vmem %s273_s22, 16  ;;  %s5324_s1 = scalar_lea.vmem %s273_s22, 32 }
  0xb2   :  { %p5321_p1 = scmp.ne.s32.totalorder %s273_s22, %s5320_s20  ;;  %p5325_p2 = scmp.lt.s32.totalorder %s273_s22, %s273_s22 }
  0xb3   :  { %p5326_p3 = scmp.lt.s32.totalorder %s5324_s1, %s5320_s20 }
  0xb5   :  { %p5327_p4 = por %p5326_p3, %p5325_p2 }
  0xb7   :  { %p5328_p5 = pnand %p5327_p4, %p5321_p1 }
  0xb9   :  { %5331 = shalt.err (!%p5328_p5)
}
  0xba   :  { %275 = dma.hbm_to_vmem [thread:$0]  %s5904_s30, 16, %s273_s22, [#allocation21]  }
  0xbb   :  { %s5691_s2 = smov [#allocation23]   ;;  %s5692_s7 = smov [#allocation26]  }
  0xbc   :  { %s294_s27 = sshll.u32 %s5691_s2, 4  ;;  %s314_s10 = sshll.u32 %s5692_s7, 4  ;;  %s295_s27 = int_to_ptr.vmem [resolvable:$true] %s294_s27  ;;  %s315_s10 = int_to_ptr.vmem [resolvable:$true] %s314_s10 }
  0xbd   :  { %s5332_s11 = scalar_lea.hbm %s5919_s6, 16 }
  0xbe   :  { %p5333_p6 = scmp.ne.s32.totalorder %s5919_s6, %s5332_s11  ;;  %p5336_p7 = scmp.lt.u32.totalorder %s5332_s11, %s5919_s6 }
  0xc0   :  { %p5338_p8 = pnand %p5336_p7, %p5333_p6 }
  0xc2   :  { %5341 = shalt.err (!%p5338_p8)
}
  0xc3   :  { %s5342_s14 = scalar_lea.vmem %s295_s27, 16  ;;  %s5346_s15 = scalar_lea.vmem %s295_s27, 32 }
  0xc4   :  { %p5343_p9 = scmp.ne.s32.totalorder %s295_s27, %s5342_s14  ;;  %p5347_p10 = scmp.lt.s32.totalorder %s295_s27, %s295_s27 }
  0xc5   :  { %p5348_p11 = scmp.lt.s32.totalorder %s5346_s15, %s5342_s14 }
  0xc7   :  { %p5349_p12 = por %p5348_p11, %p5347_p10 }
  0xc9   :  { %p5350_p13 = pnand %p5349_p12, %p5343_p9 }
  0xcb   :  { %5353 = shalt.err (!%p5350_p13)
}
  0xcc   :  { %297 = dma.hbm_to_vmem [thread:$0]  %s5919_s6, 16, %s295_s27, [#allocation24]  }
  0xcd   :  { %s5354_s30 = scalar_lea.hbm %s5929_s17, 16 }
  0xce   :  { %p5355_p0 = scmp.ne.s32.totalorder %s5929_s17, %s5354_s30  ;;  %p5358_p1 = scmp.lt.u32.totalorder %s5354_s30, %s5929_s17 }
  0xd0   :  { %p5360_p2 = pnand %p5358_p1, %p5355_p0 }
  0xd2   :  { %5363 = shalt.err (!%p5360_p2)
}
  0xd3   :  { %s5364_s0 = scalar_lea.vmem %s315_s10, 16  ;;  %s5368_s16 = scalar_lea.vmem %s315_s10, 32 }
  0xd4   :  { %p5365_p3 = scmp.ne.s32.totalorder %s315_s10, %s5364_s0  ;;  %p5369_p4 = scmp.lt.s32.totalorder %s315_s10, %s315_s10 }
  0xd5   :  { %p5370_p5 = scmp.lt.s32.totalorder %s5368_s16, %s5364_s0 }
  0xd7   :  { %p5371_p6 = por %p5370_p5, %p5369_p4 }
  0xd9   :  { %p5372_p7 = pnand %p5371_p6, %p5365_p3 }
  0xdb   :  { %5375 = shalt.err (!%p5372_p7)
}
  0xdc   :  { %317 = dma.hbm_to_vmem [thread:$0]  %s5929_s17, 16, %s315_s10, [#allocation27]  }
  0xdd   :  { %s5693_s19 = smov [#allocation2]   ;;  %s5694_s18 = smov [#allocation7]  }
  0xde   :  { %s154_s6 = sshll.u32 %s5693_s19, 4  ;;  %s174_s22 = sshll.u32 %s5694_s18, 4  ;;  %s155_s6 = int_to_ptr.vmem [resolvable:$true] %s154_s6  ;;  %s175_s22 = int_to_ptr.vmem [resolvable:$true] %s174_s22 }
  0xdf   :  { %s5376_s23 = scalar_lea.hbm %s5829_s24, 16 }
  0xe0   :  { %p5377_p8 = scmp.ne.s32.totalorder %s5829_s24, %s5376_s23  ;;  %p5380_p9 = scmp.lt.u32.totalorder %s5376_s23, %s5829_s24 }
  0xe2   :  { %p5382_p10 = pnand %p5380_p9, %p5377_p8 }
  0xe4   :  { %5385 = shalt.err (!%p5382_p10)
}
  0xe5   :  { %s5386_s26 = scalar_lea.vmem %s155_s6, 16  ;;  %s5390_s28 = scalar_lea.vmem %s155_s6, 32 }
  0xe6   :  { %p5387_p11 = scmp.ne.s32.totalorder %s155_s6, %s5386_s26  ;;  %p5391_p12 = scmp.lt.s32.totalorder %s155_s6, %s155_s6 }
  0xe7   :  { %p5392_p13 = scmp.lt.s32.totalorder %s5390_s28, %s5386_s26 }
  0xe9   :  { %p5393_p0 = por %p5392_p13, %p5391_p12 }
  0xeb   :  { %p5394_p1 = pnand %p5393_p0, %p5387_p11 }
  0xed   :  { %5397 = shalt.err (!%p5394_p1)
}
  0xee   :  { %157 = dma.hbm_to_vmem [thread:$0]  %s5829_s24, 16, %s155_s6, [#allocation3]  }
  0xef   :  { %s5398_s17 = scalar_lea.hbm %s5839_s12, 16 }
  0xf0   :  { %p5399_p2 = scmp.ne.s32.totalorder %s5839_s12, %s5398_s17  ;;  %p5402_p3 = scmp.lt.u32.totalorder %s5398_s17, %s5839_s12 }
  0xf2   :  { %p5404_p4 = pnand %p5402_p3, %p5399_p2 }
  0xf4   :  { %5407 = shalt.err (!%p5404_p4)
}
  0xf5   :  { %s5408_s8 = scalar_lea.vmem %s175_s22, 16  ;;  %s5412_s20 = scalar_lea.vmem %s175_s22, 32 }
  0xf6   :  { %p5409_p5 = scmp.ne.s32.totalorder %s175_s22, %s5408_s8  ;;  %p5413_p6 = scmp.lt.s32.totalorder %s175_s22, %s175_s22 }
  0xf7   :  { %p5414_p7 = scmp.lt.s32.totalorder %s5412_s20, %s5408_s8 }
  0xf9   :  { %p5415_p8 = por %p5414_p7, %p5413_p6 }
  0xfb   :  { %p5416_p9 = pnand %p5415_p8, %p5409_p5 }
  0xfd   :  { %5419 = shalt.err (!%p5416_p9)
}
  0xfe   :  { %177 = dma.hbm_to_vmem [thread:$0]  %s5839_s12, 16, %s175_s22, [#allocation6]  }
  0xff   :  { %s5695_s1 = smov [#allocation10]   ;;  %s5696_s2 = smov [#allocation13]  }
 0x100   :  { %s198_s24 = sshll.u32 %s5695_s1, 4  ;;  %s218_s27 = sshll.u32 %s5696_s2, 4  ;;  %s199_s24 = int_to_ptr.vmem [resolvable:$true] %s198_s24  ;;  %s219_s27 = int_to_ptr.vmem [resolvable:$true] %s218_s27 }
 0x101   :  { %s5420_s7 = scalar_lea.hbm %s5859_s21, 16 }
 0x102   :  { %p5421_p10 = scmp.ne.s32.totalorder %s5859_s21, %s5420_s7  ;;  %p5424_p11 = scmp.lt.u32.totalorder %s5420_s7, %s5859_s21 }
 0x104   :  { %p5426_p12 = pnand %p5424_p11, %p5421_p10 }
 0x106   :  { %5429 = shalt.err (!%p5426_p12)
}
 0x107   :  { %s5430_s10 = scalar_lea.vmem %s199_s24, 16  ;;  %s5434_s11 = scalar_lea.vmem %s199_s24, 32 }
 0x108   :  { %p5431_p13 = scmp.ne.s32.totalorder %s199_s24, %s5430_s10  ;;  %p5435_p0 = scmp.lt.s32.totalorder %s199_s24, %s199_s24 }
 0x109   :  { %p5436_p1 = scmp.lt.s32.totalorder %s5434_s11, %s5430_s10 }
 0x10b   :  { %p5437_p2 = por %p5436_p1, %p5435_p0 }
 0x10d   :  { %p5438_p3 = pnand %p5437_p2, %p5431_p13 }
 0x10f   :  { %5441 = shalt.err (!%p5438_p3)
}
 0x110   :  { %201 = dma.hbm_to_vmem [thread:$0]  %s5859_s21, 16, %s199_s24, [#allocation9]  }
 0x111   :  { %s5442_s12 = scalar_lea.hbm %s5869_s3, 16 }
 0x112   :  { %p5443_p4 = scmp.ne.s32.totalorder %s5869_s3, %s5442_s12  ;;  %p5446_p5 = scmp.lt.u32.totalorder %s5442_s12, %s5869_s3 }
 0x114   :  { %p5448_p6 = pnand %p5446_p5, %p5443_p4 }
 0x116   :  { %5451 = shalt.err (!%p5448_p6)
}
 0x117   :  { %s5452_s14 = scalar_lea.vmem %s219_s27, 16  ;;  %s5456_s15 = scalar_lea.vmem %s219_s27, 32 }
 0x118   :  { %p5453_p7 = scmp.ne.s32.totalorder %s219_s27, %s5452_s14  ;;  %p5457_p8 = scmp.lt.s32.totalorder %s219_s27, %s219_s27 }
 0x119   :  { %p5458_p9 = scmp.lt.s32.totalorder %s5456_s15, %s5452_s14 }
 0x11b   :  { %p5459_p10 = por %p5458_p9, %p5457_p8 }
 0x11d   :  { %p5460_p11 = pnand %p5459_p10, %p5453_p7 }
 0x11f   :  { %5463 = shalt.err (!%p5460_p11)
}
 0x120   :  { %221 = dma.hbm_to_vmem [thread:$0]  %s5869_s3, 16, %s219_s27, [#allocation12]  }
 0x121   :  { %s5697_s30 = smov [#allocation16]   ;;  %s5698_s0 = smov [#allocation19]  }
 0x122   :  { %s242_s21 = sshll.u32 %s5697_s30, 4  ;;  %s262_s16 = sshll.u32 %s5698_s0, 4  ;;  %s243_s21 = int_to_ptr.vmem [resolvable:$true] %s242_s21  ;;  %s263_s16 = int_to_ptr.vmem [resolvable:$true] %s262_s16 }
 0x123   :  { %s5464_s19 = scalar_lea.hbm %s5889_s29, 16 }
 0x124   :  { %p5465_p12 = scmp.ne.s32.totalorder %s5889_s29, %s5464_s19  ;;  %p5468_p13 = scmp.lt.u32.totalorder %s5464_s19, %s5889_s29 }
 0x126   :  { %p5470_p0 = pnand %p5468_p13, %p5465_p12 }
 0x128   :  { %5473 = shalt.err (!%p5470_p0)
}
 0x129   :  { %s5474_s6 = scalar_lea.vmem %s243_s21, 16  ;;  %s5478_s18 = scalar_lea.vmem %s243_s21, 32 }
 0x12a   :  { %p5475_p1 = scmp.ne.s32.totalorder %s243_s21, %s5474_s6  ;;  %p5479_p2 = scmp.lt.s32.totalorder %s243_s21, %s243_s21 }
 0x12b   :  { %p5480_p3 = scmp.lt.s32.totalorder %s5478_s18, %s5474_s6 }
 0x12d   :  { %p5481_p4 = por %p5480_p3, %p5479_p2 }
 0x12f   :  { %p5482_p5 = pnand %p5481_p4, %p5475_p1 }
 0x131   :  { %5485 = shalt.err (!%p5482_p5)
}
 0x132   :  { %245 = dma.hbm_to_vmem [thread:$0]  %s5889_s29, 16, %s243_s21, [#allocation15]  }
 0x133   :  { %s5486_s3 = scalar_lea.hbm %s5899_s4, 16 }
 0x134   :  { %p5487_p6 = scmp.ne.s32.totalorder %s5899_s4, %s5486_s3  ;;  %p5490_p7 = scmp.lt.u32.totalorder %s5486_s3, %s5899_s4 }
 0x136   :  { %p5492_p8 = pnand %p5490_p7, %p5487_p6 }
 0x138   :  { %5495 = shalt.err (!%p5492_p8)
}
 0x139   :  { %s5496_s22 = scalar_lea.vmem %s263_s16, 16  ;;  %s5500_s23 = scalar_lea.vmem %s263_s16, 32 }
 0x13a   :  { %p5497_p9 = scmp.ne.s32.totalorder %s263_s16, %s5496_s22  ;;  %p5501_p10 = scmp.lt.s32.totalorder %s263_s16, %s263_s16 }
 0x13b   :  { %p5502_p11 = scmp.lt.s32.totalorder %s5500_s23, %s5496_s22 }
 0x13d   :  { %p5503_p12 = por %p5502_p11, %p5501_p10 }
 0x13f   :  { %p5504_p13 = pnand %p5503_p12, %p5497_p9 }
 0x141   :  { %5507 = shalt.err (!%p5504_p13)
}
 0x142   :  { %s6593_s26 = sld [smem:[#allocation68_spill]]  ;;  %s5699_s28 = smov [#allocation22]  }
 0x143   :  { %265 = dma.hbm_to_vmem [thread:$0]  %s5899_s4, 16, %s263_s16, [#allocation18]  }
 0x144   :  { %s284_s29 = sshll.u32 %s5699_s28, 4  ;;  %s5700_s17 = smov [#allocation25]   ;;  %s285_s29 = int_to_ptr.vmem [resolvable:$true] %s284_s29 }
 0x145   :  { %s304_s8 = sshll.u32 %s5700_s17, 4  ;;  %s305_s8 = int_to_ptr.vmem [resolvable:$true] %s304_s8 }
 0x148   :  { %s5508_s20 = scalar_lea.hbm %s6593_s26, 16 }
 0x149   :  { %p5509_p0 = scmp.ne.s32.totalorder %s6593_s26, %s5508_s20  ;;  %p5512_p1 = scmp.lt.u32.totalorder %s5508_s20, %s6593_s26 }
 0x14b   :  { %p5514_p2 = pnand %p5512_p1, %p5509_p0 }
 0x14d   :  { %5517 = shalt.err (!%p5514_p2)
}
 0x14e   :  { %s5518_s1 = scalar_lea.vmem %s285_s29, 16  ;;  %s5522_s24 = scalar_lea.vmem %s285_s29, 32 }
 0x14f   :  { %p5519_p3 = scmp.ne.s32.totalorder %s285_s29, %s5518_s1  ;;  %p5523_p4 = scmp.lt.s32.totalorder %s285_s29, %s285_s29 }
 0x150   :  { %p5524_p5 = scmp.lt.s32.totalorder %s5522_s24, %s5518_s1 }
 0x152   :  { %p5525_p6 = por %p5524_p5, %p5523_p4 }
 0x154   :  { %p5526_p7 = pnand %p5525_p6, %p5519_p3 }
 0x156   :  { %5529 = shalt.err (!%p5526_p7)
}
 0x157   :  { %s6594_s4 = sld [smem:[#allocation69_spill]] }
 0x158   :  { %287 = dma.hbm_to_vmem [thread:$0]  %s6593_s26, 16, %s285_s29, [#allocation21]  }
 0x15d   :  { %s5530_s2 = scalar_lea.hbm %s6594_s4, 16 }
 0x15e   :  { %p5531_p8 = scmp.ne.s32.totalorder %s6594_s4, %s5530_s2  ;;  %p5534_p9 = scmp.lt.u32.totalorder %s5530_s2, %s6594_s4 }
 0x160   :  { %p5536_p10 = pnand %p5534_p9, %p5531_p8 }
 0x162   :  { %5539 = shalt.err (!%p5536_p10)
}
 0x163   :  { %s5540_s27 = scalar_lea.vmem %s305_s8, 16  ;;  %s5544_s7 = scalar_lea.vmem %s305_s8, 32 }
 0x164   :  { %p5541_p11 = scmp.ne.s32.totalorder %s305_s8, %s5540_s27  ;;  %p5545_p12 = scmp.lt.s32.totalorder %s305_s8, %s305_s8 }
 0x165   :  { %p5546_p13 = scmp.lt.s32.totalorder %s5544_s7, %s5540_s27 }
 0x167   :  { %p5547_p0 = por %p5546_p13, %p5545_p12 }
 0x169   :  { %p5548_p1 = pnand %p5547_p0, %p5541_p11 }
 0x16b   :  { %5551 = shalt.err (!%p5548_p1)
}
 0x16c   :  { %s6595_s10 = sld [smem:[#allocation70_spill]]  ;;  %s5701_s11 = smov [#allocation28]  }
 0x16d   :  { %307 = dma.hbm_to_vmem [thread:$0]  %s6594_s4, 16, %s305_s8, [#allocation24]  }
 0x16e   :  { %s324_s12 = sshll.u32 %s5701_s11, 4  ;;  %s5702_s14 = smov [#allocation29]   ;;  %s325_s12 = int_to_ptr.vmem [resolvable:$true] %s324_s12 }
 0x16f   :  { %s334_s15 = sshll.u32 %s5702_s14, 4  ;;  %s335_s15 = int_to_ptr.vmem [resolvable:$true] %s334_s15 }
 0x172   :  { %s5552_s30 = scalar_lea.hbm %s6595_s10, 16 }
 0x173   :  { %p5553_p2 = scmp.ne.s32.totalorder %s6595_s10, %s5552_s30  ;;  %p5556_p3 = scmp.lt.u32.totalorder %s5552_s30, %s6595_s10 }
 0x175   :  { %p5558_p4 = pnand %p5556_p3, %p5553_p2 }
 0x177   :  { %5561 = shalt.err (!%p5558_p4)
}
 0x178   :  { %s5562_s21 = scalar_lea.vmem %s325_s12, 16  ;;  %s5566_s0 = scalar_lea.vmem %s325_s12, 32 }
 0x179   :  { %p5563_p5 = scmp.ne.s32.totalorder %s325_s12, %s5562_s21  ;;  %p5567_p6 = scmp.lt.s32.totalorder %s325_s12, %s325_s12 }
 0x17a   :  { %p5568_p7 = scmp.lt.s32.totalorder %s5566_s0, %s5562_s21 }
 0x17c   :  { %p5569_p8 = por %p5568_p7, %p5567_p6 }
 0x17e   :  { %p5570_p9 = pnand %p5569_p8, %p5563_p5 }
 0x180   :  { %5573 = shalt.err (!%p5570_p9)
}
 0x181   :  { %327 = dma.hbm_to_vmem [thread:$0]  %s6595_s10, 16, %s325_s12, [#allocation27]  }
 0x182   :  { %s5574_s16 = scalar_lea.hbm %s5939_s9, 16 }
 0x183   :  { %p5575_p10 = scmp.ne.s32.totalorder %s5939_s9, %s5574_s16  ;;  %p5578_p11 = scmp.lt.u32.totalorder %s5574_s16, %s5939_s9 }
 0x185   :  { %p5580_p12 = pnand %p5578_p11, %p5575_p10 }
 0x187   :  { %5583 = shalt.err (!%p5580_p12)
}
 0x188   :  { %s5584_s19 = scalar_lea.vmem %s335_s15, 16  ;;  %s5588_s6 = scalar_lea.vmem %s335_s15, 32 }
 0x189   :  { %p5585_p13 = scmp.ne.s32.totalorder %s335_s15, %s5584_s19  ;;  %p5589_p0 = scmp.lt.s32.totalorder %s335_s15, %s335_s15 }
 0x18a   :  { %p5590_p1 = scmp.lt.s32.totalorder %s5588_s6, %s5584_s19 }
 0x18c   :  { %p5591_p2 = por %p5590_p1, %p5589_p0 }
 0x18e   :  { %p5592_p3 = pnand %p5591_p2, %p5585_p13 }
 0x190   :  { %5595 = shalt.err (!%p5592_p3)
}
 0x191   :  { %337 = dma.hbm_to_vmem [thread:$0]  %s5939_s9, 16, %s335_s15, [#allocation30]  }
 0x192   :  { %5618 = dma.done.wait [#allocation3], 16  }
 0x193   :  { %5619 = vsyncadd [#allocation3], 4294967280 }
 0x194   :  { %5620 = dma.done.wait [#allocation6], 32  }
 0x195   :  { %5621 = vsyncadd [#allocation6], 4294967264 }
 0x196   :  { %5622 = dma.done.wait [#allocation9], 32  }
 0x197   :  { %5623 = vsyncadd [#allocation9], 4294967264 }
 0x198   :  { %5624 = dma.done.wait [#allocation12], 32  }
 0x199   :  { %5625 = vsyncadd [#allocation12], 4294967264 }
 0x19a   :  { %5626 = dma.done.wait [#allocation15], 32  }
 0x19b   :  { %5627 = vsyncadd [#allocation15], 4294967264 }
 0x19c   :  { %5628 = dma.done.wait [#allocation18], 32  }
 0x19d   :  { %5629 = vsyncadd [#allocation18], 4294967264 }
 0x19e   :  { %5630 = dma.done.wait [#allocation21], 32  }
 0x19f   :  { %5631 = vsyncadd [#allocation21], 4294967264 }
 0x1a0   :  { %5632 = dma.done.wait [#allocation24], 32  }
 0x1a1   :  { %5633 = vsyncadd [#allocation24], 4294967264 }
 0x1a2   :  { %5634 = dma.done.wait [#allocation27], 32  }
 0x1a3   :  { %5635 = vsyncadd [#allocation27], 4294967264 }
 0x1a4   :  { %5636 = dma.done.wait [#allocation30], 16  }
 0x1a5   :  { %5637 = vsyncadd [#allocation30], 4294967280  ;;  %s6596_s9 = sld [smem:[#allocation44_spill]]  ;;  %s6597_s18 = sld [smem:[#allocation43_spill]]  ;;  %v5703_v0 = vmov 0.0|0.0   ;;  %vm5704_vm0 = vmmov 0  }
 0x1a6   :  { %4879 = vmatprep.subr.bf16.mxu0 %v5703_v0  ;;  %4891 = vmatprep.subr.bf16.mxu1 %v5703_v0  ;;  %v5705_v1 = vmov 0.0   ;;  %s6598_s3 = sld [smem:[#allocation66_spill]]  ;;  %s6599_s22 = sld [smem:[#allocation56_spill]]  ;;  %vm420_vm1 = vcmask 523264   ;;  %vm579_vm3 = vcmask 261120   ;;  %vm1372_vm4 = vcmask 64512  }
 0x1a7   :  { %4570 = vmatprep.mubr.msk.f32.mxu0 %vm5704_vm0, %v5705_v1  ;;  %4589 = vmatprep.mubr.msk.f32.mxu1 %vm5704_vm0, %v5705_v1  ;;  %s6600_s23 = sld [smem:[#allocation45_spill]]  ;;  %s5706_s26 = smov 64   ;;  %v4299_v54 = vld [vmem:[#allocation14] ss:$0 sm:$0xff]  ;;  %vm6489_vm5 = vmpackc.low %vm579_vm3, %vm579_vm3  ;;  %vm3793_vm6 = vcmask 31744  }
 0x1a8   :  { %s6601_s28 = sld [smem:[#allocation65_spill]]  ;;  %s6602_s29 = sld [smem:[#allocation55_spill]] }
 0x1a9   :  { %s5707_s17 = smov 96   ;;  %s5708_s8 = smov 32  }
 0x1aa   :  { %s6603_s20 = sld [smem:[#allocation60_spill]]  ;;  %s6604_s1 = sld [smem:[#allocation59_spill]] }
 0x1ab   :  { %v408_v2 = vld [vmem:[%s6596_s9] sm:$0xff]  ;;  %v393_v4 = vld [vmem:[%s6597_s18 + $0x8] sm:$0xff]  ;;  %v394_v9 = vld [vmem:[%s6597_s18 + $0x10] sm:$0xff]  ;;  %s6605_s24 = sld [smem:[#allocation49_spill]]  ;;  %s6606_s4 = sld [smem:[#allocation48_spill]] }
 0x1ac   :  { %v392_v3 = vld [vmem:[%s6597_s18] sm:$0xff]  ;;  %v4292_v5 = vmul.f32 -1.442695, %v408_v2  ;;  %v401_v8 = vld [vmem:[%s6597_s18 + $0x48] sm:$0xff]  ;;  %v395_v11 = vld [vmem:[%s6597_s18 + $0x18] sm:$0xff]  ;;  %s5709_s2 = smov 88  }
 0x1ad   :  { %v6037_v6 = vpack.c.bf16 %v393_v4, %v392_v3  ;;  %v400_v7 = vld [vmem:[%s6597_s18 + $0x40] sm:$0xff]  ;;  %v402_v12 = vld [vmem:[%s6597_s18 + $0x50] sm:$0xff]  ;;  %v403_v13 = vld [vmem:[%s6597_s18 + $0x58] sm:$0xff]  ;;  %v6048_v14 = vpack.c.bf16 %v395_v11, %v394_v9  ;;  %s5710_s27 = smov 120   ;;  %s6607_s7 = sld [smem:[#allocation51_spill]] }
 0x1ae   :  { %v6042_v10 = vpack.c.bf16 %v401_v8, %v400_v7  ;;  %5112 = vpow2.f32 %v4292_v5  ;;  %v6052_v15 = vpack.c.bf16 %v403_v13, %v402_v12  ;;  %v396_v16 = vld [vmem:[%s6597_s18 + $0x20] sm:$0xff]  ;;  %v397_v17 = vld [vmem:[%s6597_s18 + $0x28] sm:$0xff]  ;;  %v398_v22 = vld [vmem:[%s6597_s18 + $0x30] sm:$0xff]  ;;  %s5711_s10 = smov 80   ;;  %s5712_s11 = smov 112  }
 0x1af   :  { %4881 = vmatpush3.bf16.msra.mxu0 %v6037_v6  ;;  %v404_v18 = vld [vmem:[%s6597_s18 + $0x60] sm:$0xff]  ;;  %v405_v19 = vld [vmem:[%s6597_s18 + $0x68] sm:$0xff]  ;;  %v6060_v20 = vpack.c.bf16 %v397_v17, %v396_v16  ;;  %v399_v23 = vld [vmem:[%s6597_s18 + $0x38] sm:$0xff]  ;;  %s5713_s12 = smov 56   ;;  %s5714_s14 = smov 48  }
 0x1b0   :  { %4893 = vmatpush3.bf16.msra.mxu1 %v6042_v10  ;;  %4882 = vmatprep.subr.bf16.mxu0 %v5703_v0  ;;  %v6064_v21 = vpack.c.bf16 %v405_v19, %v404_v18  ;;  %v406_v24 = vld [vmem:[%s6597_s18 + $0x70] sm:$0xff]  ;;  %v407_v25 = vld [vmem:[%s6597_s18 + $0x78] sm:$0xff]  ;;  %v6072_v26 = vpack.c.bf16 %v399_v23, %v398_v22  ;;  %v661_v28 = vld [vmem:[%s6598_s3] sm:$0xff]  ;;  %s5715_s15 = smov 104   ;;  %s5716_s30 = smov 72  }
 0x1b1   :  { %4894 = vmatprep.subr.bf16.mxu1 %v5703_v0  ;;  %v6076_v27 = vpack.c.bf16 %v407_v25, %v406_v24  ;;  %v662_v29 = vld [vmem:[%s6598_s3 + $0x8] sm:$0xff]  ;;  %v568_v33 = vld [vmem:[%s6599_s22] sm:$0xff]  ;;  %v570_v35 = vld [vmem:[%s6599_s22 + $0x10] sm:$0xff]  ;;  %s5717_s21 = smov 40   ;;  %s6608_s0 = sld [smem:[#allocation50_spill]] }
 0x1b2   :  { %v4911_v31 = vpack.c.bf16 %v662_v29, %v661_v28  ;;  %v569_v34 = vld [vmem:[%s6599_s22 + $0x8] sm:$0xff]  ;;  %v571_v37 = vld [vmem:[%s6599_s22 + $0x18] sm:$0xff]  ;;  %v663_v41 = vld [vmem:[%s6598_s3 + $0x10] sm:$0xff]  ;;  %s6609_s16 = sld [smem:[#allocation47_spill]]  ;;  %s6610_s19 = sld [smem:[#allocation46_spill]] }
 0x1b3   :  { %4884 = vmatpush3.bf16.msra.mxu0 %v6048_v14  ;;  %v4903_v36 = vpack.c.bf16 %v569_v34, %v568_v33  ;;  %v4907_v39 = vpack.c.bf16 %v571_v37, %v570_v35  ;;  %v664_v42 = vld [vmem:[%s6598_s3 + $0x18] sm:$0xff]  ;;  %v409_v44 = vld [vmem:[%s6600_s23] sm:$0xff]  ;;  %v410_v46 = vld [vmem:[%s6600_s23 + $0x8] sm:$0xff]  ;;  %s6611_s6 = sld [smem:[#allocation63_spill]]  ;;  %s6612_s9 = sld [smem:[#allocation64_spill]] }
 0x1b4   :  { %4896 = vmatpush3.bf16.msra.mxu1 %v6052_v15  ;;  %4885 = vmatprep.subr.bf16.mxu0 %v5703_v0  ;;  %v4915_v43 = vpack.c.bf16 %v664_v42, %v663_v41  ;;  %v755_v50 = vld [vmem:[%s6601_s28] sm:$0xff]  ;;  %v756_v51 = vld [vmem:[%s6601_s28 + $0x8] sm:$0xff]  ;;  %v757_v59 = vld [vmem:[%s6601_s28 + $0x10] sm:$0xff]  ;;  %s6613_s18 = sld [smem:[#allocation52_spill]]  ;;  %s6614_s3 = sld [smem:[#allocation67_spill]] }
 0x1b5   :  { %4897 = vmatprep.subr.bf16.mxu1 %v5703_v0  ;;  %v4919_v53 = vpack.c.bf16 %v756_v51, %v755_v50  ;;  %v758_v60 = vld [vmem:[%s6601_s28 + $0x18] sm:$0xff]  ;;  %v4296_v4 = vld [vmem:[%s6602_s29] ss:$0 sm:$0xff]  ;;  %v4302_v16 = vld [vmem:[#allocation13] ss:$0 sm:$0xff]  ;;  %s6616_s22 = sld [smem:[#allocation62_spill]] }
 0x1b6   :  { %v4923_v61 = vpack.c.bf16 %v758_v60, %v757_v59  ;;  %s6619_s23 = sld [smem:[#allocation54_spill]]  ;;  %s6620_s28 = sld [smem:[#allocation53_spill]] }
 0x1b7   :  { %4887 = vmatpush3.bf16.msra.mxu0 %v6060_v20  ;;  %s6621_s29 = sld [smem:[#allocation57_spill]] }
 0x1b8   :  { %4899 = vmatpush3.bf16.msra.mxu1 %v6064_v21  ;;  %4888 = vmatprep.subr.bf16.mxu0 %v5703_v0  ;;  %v5113_v30 = vpop.eup %5112 }
 0x1b9   :  { %4900 = vmatprep.subr.bf16.mxu1 %v5703_v0  ;;  %v414_v32 = vadd.f32 1.0, %v5113_v30 }
 0x1bb   :  { %4890 = vmatpush3.bf16.msra.mxu0 %v6072_v26  ;;  %5114 = vrcp.f32 %v414_v32 }
 0x1bc   :  { %4902 = vmatpush3.bf16.msra.mxu1 %v6076_v27  ;;  %4904 = vmatprep.subr.bf16.mxu0 %v4903_v36 }
 0x1bd   :  { %4912 = vmatprep.subr.bf16.mxu1 %v4911_v31 }
 0x1c5   :  { %v5115_v38 = vpop.eup %5114 }
 0x1c6   :  { %vm417_vm2 = vcmp.gt.f32.partialorder %v5115_v38, 0.5 }
 0x1c7   :  { %v4293_v40 = vsel %vm417_vm2, 1.0, %v5705_v1 }
 0x1c8   :  { %494 = vrot.lane.b32.xlu0 %v4293_v40, %s5706_s26  ;;  %4571 = vmatmul.mubr.msk.f32.vlgmr.msra.gmra.mrb[0].mxu0 %vm420_vm1, %v4293_v40 }
 0x1c9   :  { %4906 = vmatpush3.bf16.msra.mxu0 %v4903_v36 }
 0x1ca   :  { %4908 = vmatprep.subr.bf16.mxu0 %v4907_v39 }
 0x1cd   :  { %4910 = vmatpush3.bf16.msra.mxu0 %v4907_v39 }
 0x1ce   :  { %4920 = vmatprep.subr.bf16.mxu0 %v4919_v53 }
 0x23a   :  { %v495_v45 = vpop.permute.xlu0 %494 }
 0x23b   :  { %4590 = vmatmul.mubr.msk.f32.vlgmr.msra.gmra.mrb[0].mxu1 %vm420_vm1, %v495_v45 }
 0x23c   :  { %4914 = vmatpush3.bf16.msra.mxu1 %v4911_v31  ;;  %4611 = vmatprep.mubr.msk.f32.mxu1 %vm579_vm3, %v409_v44 }
 0x23d   :  { %4916 = vmatprep.subr.bf16.mxu1 %v4915_v43 }
 0x240   :  { %4918 = vmatpush3.bf16.msra.mxu1 %v4915_v43 }
 0x243   :  { %4612 = vmatmul.mubr.msk.f32.vlgmr.msra.gmra.mrb[2].mxu1 %vm579_vm3, %v410_v46  ;;  %v4315_v46 = vld [vmem:[#allocation20] ss:$0 sm:$0xff] }
 0x29b   :  { %v490_v47 = vpop.f32.mrb[0].mxu0 }
 0x29c   :  { %v4572_v48 = vpop.f32.mrb[1].mxu0  ;;  %4600 = vmatprep.mubr.msk.f32.mxu0 %vm579_vm3, %v490_v47 }
 0x30e   :  { %v564_v49 = vpop.f32.mrb[0].mxu1 }
 0x30f   :  { %v4591_v52 = vpop.f32.mrb[1].mxu1  ;;  %4601 = vmatmul.mubr.msk.f32.vlgmr.msra.gmra.mrb[2].mxu0 %vm579_vm3, %v564_v49 }
 0x310   :  { %4922 = vmatpush3.bf16.msra.mxu0 %v4919_v53  ;;  %v4316_v52 = vld [vmem:[#allocation19] ss:$0 sm:$0xff] }
 0x311   :  { %4924 = vmatprep.subr.bf16.mxu0 %v4923_v61 }
 0x314   :  { %4926 = vmatpush3.bf16.msra.mxu0 %v4923_v61 }
 0x316   :  { %v4613_v55 = vpop.f32.mrb[2].mxu1 }
 0x317   :  { %v750_v56 = vadd.f32 %v4613_v55, %v4299_v54  ;;  %v744_v57 = vpop.f32.mrb[3].mxu1 }
 0x318   :  { %v745_v58 = vadd.f32 %v4299_v54, %v744_v57 }
 0x319   :  { %1048 = vrot.lane.b32.xlu1 %v750_v56, %s5707_s17 }
 0x31a   :  { %1046 = vrot.lane.b32.xlu0 %v745_v58, %s5707_s17 }
 0x38b   :  { %v1049_v62 = vpop.permute.xlu1 %1048 }
 0x38c   :  { %v1047_v63 = vpop.permute.xlu0 %1046  ;;  %v1055_v2 = vsel %vm579_vm3, %v1049_v62, 0.0 }
 0x38d   :  { %1056 = vadd.xlane.f32.xlu0 %v1055_v2  ;;  %v1052_v3 = vsel %vm579_vm3, %v1047_v63, 0.0 }
 0x38e   :  { %1053 = vadd.xlane.f32.xlu1 %v1052_v3 }
 0x3e2   :  { %v4602_v5 = vpop.f32.mrb[2].mxu0 }
 0x3e3   :  { %v6108_v7 = vadd.f32 %v4602_v5, %v4296_v4  ;;  %v652_v8 = vpop.f32.mrb[3].mxu0 }
 0x3e4   :  { %v6110_v9 = vadd.f32 %v4296_v4, %v652_v8 }
 0x3e5   :  { %v754_v12 = vmul.f32 %v750_v56, %v6108_v7 }
 0x3e6   :  { %v753_v11 = vmul.f32 %v745_v58, %v6110_v9 }
 0x3e8   :  { %4622 = vmatprep.mubr.msk.f32.mxu0 %vm579_vm3, %v753_v11 }
 0x3e9   :  { %4623 = vmatmul.mubr.msk.f32.vlgmr.msra.gmra.mrb[4].mxu0 %vm579_vm3, %v754_v12 }
 0x41a   :  { %v1057_v17 = vpop.xlane.xlu0 %1056 }
 0x41b   :  { %v1054_v13 = vpop.xlane.xlu1 %1053  ;;  %v1059_v24 = vmul.f32 0.03125, %v1057_v17 }
 0x41c   :  { %v1058_v19 = vmul.f32 0.03125, %v1054_v13 }
 0x41d   :  { %v6123_v29 = vsub.f32 %v750_v56, %v1059_v24 }
 0x41e   :  { %v6121_v28 = vsub.f32 %v745_v58, %v1058_v19 }
 0x41f   :  { %v1063_v31 = vmul.f32 %v6123_v29, %v6123_v29 }
 0x420   :  { %v1062_v30 = vmul.f32 %v6121_v28, %v6121_v28 }
 0x4bc   :  { %v4624_v18 = vpop.f32.mrb[4].mxu0 }
 0x4bd   :  { %v6116_v22 = vadd.f32 %v4624_v18, %v4302_v16  ;;  %v838_v23 = vpop.f32.mrb[5].mxu0 }
 0x4be   :  { %v839_v25 = vadd.f32 %v4302_v16, %v838_v23 }
 0x4bf   :  { %908 = vrot.lane.b32.xlu1 %v6116_v22, %s5707_s17  ;;  %v850_v39 = vsel %vm579_vm3, %v6116_v22, 0.0 }
 0x4c0   :  { %906 = vrot.lane.b32.xlu0 %v839_v25, %s5707_s17  ;;  %v847_v32 = vsel %vm579_vm3, %v839_v25, 0.0 }
 0x4c3   :  { %982 = vrot.lane.b32.xlu1 %v6110_v9, %s5707_s17 }
 0x4c4   :  { %984 = vrot.lane.b32.xlu0 %v6108_v7, %s5707_s17 }
 0x4c7   :  { %1066 = vrot.lane.b32.xlu1 %v1062_v30, %s5707_s17 }
 0x4c8   :  { %1068 = vrot.lane.b32.xlu0 %v1063_v31, %s5707_s17 }
 0x4eb   :  { %848 = vadd.xlane.f32.xlu1 %v847_v32 }
 0x531   :  { %v909_v33 = vpop.permute.xlu1 %908 }
 0x532   :  { %v907_v34 = vpop.permute.xlu0 %906  ;;  %v915_v35 = vsel %vm579_vm3, %v909_v33, 0.0 }
 0x533   :  { %916 = vadd.xlane.f32.xlu1 %v915_v35  ;;  %v912_v36 = vsel %vm579_vm3, %v907_v34, 0.0 }
 0x534   :  { %913 = vadd.xlane.f32.xlu0 %v912_v36 }
 0x535   :  { %v983_v37 = vpop.permute.xlu1 %982 }
 0x536   :  { %v985_v38 = vpop.permute.xlu0 %984  ;;  %v988_v42 = vsel %vm579_vm3, %v983_v37, 0.0 }
 0x537   :  { %v991_v40 = vsel %vm579_vm3, %v985_v38, 0.0 }
 0x538   :  { %851 = vadd.xlane.f32.xlu0 %v850_v39  ;;  %992 = vadd.xlane.f32.xlu1 %v991_v40 }
 0x539   :  { %v1067_v44 = vpop.permute.xlu1 %1066 }
 0x53a   :  { %v1069_v41 = vpop.permute.xlu0 %1068  ;;  %v1072_v45 = vsel %vm579_vm3, %v1067_v44, 0.0  ;;  %v4314_v44 = vld [vmem:[#allocation28] ss:$0 sm:$0xff] }
 0x53b   :  { %v1075_v43 = vsel %vm579_vm3, %v1069_v41, 0.0 }
 0x53c   :  { %989 = vadd.xlane.f32.xlu0 %v988_v42  ;;  %1076 = vadd.xlane.f32.xlu1 %v1075_v43 }
 0x540   :  { %1073 = vadd.xlane.f32.xlu0 %v1072_v45 }
 0x54d   :  { %1092 = vrot.lane.b32.xlu1 %v4315_v46, %s5708_s8 }
 0x578   :  { %v849_v47 = vpop.xlane.xlu1 %848 }
 0x579   :  { %v854_v48 = vmul.f32 0.03125, %v849_v47  ;;  %v4305_v47 = vld [vmem:[#allocation17] ss:$0 sm:$0xff] }
 0x57b   :  { %v6145_v49 = vsub.f32 %v839_v25, %v854_v48 }
 0x57d   :  { %v858_v50 = vmul.f32 %v6145_v49, %v6145_v49 }
 0x57f   :  { %v860_v51 = vsel %vm579_vm3, %v858_v50, 0.0  ;;  %v4306_v50 = vld [vmem:[#allocation16] ss:$0 sm:$0xff] }
 0x580   :  { %861 = vadd.xlane.f32.xlu1 %v860_v51 }
 0x591   :  { %1103 = vrot.lane.b32.xlu1 %v4316_v52, %s5708_s8 }
 0x5c0   :  { %v917_v53 = vpop.xlane.xlu1 %916 }
 0x5c1   :  { %v919_v54 = vmul.f32 0.03125, %v917_v53  ;;  %v914_v55 = vpop.xlane.xlu0 %913 }
 0x5c2   :  { %v918_v56 = vmul.f32 0.03125, %v914_v55 }
 0x5c3   :  { %v6152_v57 = vsub.f32 %v6116_v22, %v919_v54 }
 0x5c4   :  { %v6154_v58 = vsub.f32 %v839_v25, %v918_v56 }
 0x5c5   :  { %v993_v59 = vpop.xlane.xlu1 %992  ;;  %v923_v60 = vmul.f32 %v6152_v57, %v6152_v57  ;;  %v852_v3 = vpop.xlane.xlu0 %851 }
 0x5c6   :  { %v995_v61 = vmul.f32 0.03125, %v993_v59  ;;  %v922_v63 = vmul.f32 %v6154_v58, %v6154_v58  ;;  %v855_v4 = vmul.f32 0.03125, %v852_v3 }
 0x5c7   :  { %928 = vrot.lane.b32.xlu0 %v923_v60, %s5707_s17 }
 0x5c8   :  { %v6160_v62 = vsub.f32 %v6108_v7, %v995_v61  ;;  %v6169_v5 = vsub.f32 %v6116_v22, %v855_v4 }
 0x5c9   :  { %v990_v11 = vpop.xlane.xlu0 %989  ;;  %v1077_v12 = vpop.xlane.xlu1 %1076 }
 0x5ca   :  { %v999_v2 = vmul.f32 %v6160_v62, %v6160_v62  ;;  %v859_v8 = vmul.f32 %v6169_v5, %v6169_v5  ;;  %v994_v16 = vmul.f32 0.03125, %v990_v11  ;;  %v1079_v17 = vmul.f32 0.03125, %v1077_v12  ;;  %v4310_v11 = vld [vmem:[#allocation25] ss:$0 sm:$0xff]  ;;  %v4313_v12 = vld [vmem:[#allocation29] ss:$0 sm:$0xff] }
 0x5cb   :  { %926 = vrot.lane.b32.xlu0 %v922_v63, %s5707_s17 }
 0x5cc   :  { %1004 = vrot.lane.b32.xlu1 %v999_v2, %s5707_s17  ;;  %v863_v7 = vsel %vm579_vm3, %v859_v8, 0.0  ;;  %v6175_v19 = vsub.f32 %v6110_v9, %v994_v16  ;;  %v1081_v23 = vadd.f32 1e-05, %v1079_v17 }
 0x5cd   :  { %v1074_v13 = vpop.xlane.xlu0 %1073  ;;  %v1093_v31 = vpop.permute.xlu1 %1092 }
 0x5ce   :  { %v1078_v18 = vmul.f32 0.03125, %v1074_v13  ;;  %5116 = vrsqrt.f32 %v1081_v23  ;;  %v998_v22 = vmul.f32 %v6175_v19, %v6175_v19 }
 0x5d0   :  { %v1080_v24 = vadd.f32 1e-05, %v1078_v18 }
 0x5d2   :  { %5118 = vrsqrt.f32 %v1080_v24 }
 0x5d8   :  { %v5117_v25 = vpop.eup %5116 }
 0x5d9   :  { %v1085_v33 = vmul.f32 %v5117_v25, %v6123_v29  ;;  %v4309_v29 = vld [vmem:[#allocation26] ss:$0 sm:$0xff] }
 0x5db   :  { %v1096_v9 = vmul.f32 %v1093_v31, %v1085_v33 }
 0x5dc   :  { %v5119_v30 = vpop.eup %5118 }
 0x5dd   :  { %v1084_v32 = vmul.f32 %v5119_v30, %v6121_v28 }
 0x5df   :  { %v1095_v35 = vmul.f32 %v1093_v31, %v1084_v32 }
 0x5ea   :  { %864 = vadd.xlane.f32.xlu0 %v863_v7 }
 0x600   :  { %1002 = vrot.lane.b32.xlu0 %v998_v22, %s5707_s17 }
 0x60d   :  { %v862_v34 = vpop.xlane.xlu1 %861 }
 0x60e   :  { %v866_v28 = vmul.f32 0.03125, %v862_v34 }
 0x610   :  { %v868_v43 = vadd.f32 1e-05, %v866_v28 }
 0x611   :  { %v1104_v36 = vpop.permute.xlu1 %1103 }
 0x612   :  { %v1106_v37 = vadd.f32 %v1104_v36, %v1095_v35  ;;  %v1107_v38 = vadd.f32 %v1104_v36, %v1096_v9  ;;  %5120 = vrsqrt.f32 %v868_v43 }
 0x614   :  { %1114 = vrot.lane.b32.xlu1 %v1107_v38, %s5707_s17  ;;  %1112 = vrot.lane.b32.xlu0 %v1106_v37, %s5707_s17 }
 0x61c   :  { %v5121_v45 = vpop.eup %5120 }
 0x61d   :  { %v872_v46 = vmul.f32 %v5121_v45, %v6145_v49 }
 0x61f   :  { %v881_v48 = vmul.f32 %v4305_v47, %v872_v46 }
 0x621   :  { %v890_v52 = vadd.f32 %v4306_v50, %v881_v48 }
 0x623   :  { %v4307_v54 = vmul.f32 -1.442695, %v890_v52 }
 0x625   :  { %5122 = vpow2.f32 %v4307_v54  ;;  %v1131_v54 = vld [vmem:[%s6603_s20 + $0x8] sm:$0xff] }
 0x62f   :  { %v5123_v63 = vpop.eup %5122 }
 0x630   :  { %v898_v4 = vadd.f32 1.0, %v5123_v63 }
 0x639   :  { %v929_v41 = vpop.permute.xlu0 %928 }
 0x63a   :  { %v935_v42 = vsel %vm579_vm3, %v929_v41, 0.0 }
 0x63d   :  { %v927_v51 = vpop.permute.xlu0 %926 }
 0x63e   :  { %v1005_v39 = vpop.permute.xlu1 %1004  ;;  %v932_v61 = vsel %vm579_vm3, %v927_v51, 0.0 }
 0x63f   :  { %v1011_v40 = vsel %vm579_vm3, %v1005_v39, 0.0 }
 0x640   :  { %1012 = vadd.xlane.f32.xlu0 %v1011_v40 }
 0x644   :  { %936 = vadd.xlane.f32.xlu0 %v935_v42 }
 0x65a   :  { %952 = vrot.lane.b32.xlu0 %v4309_v29, %s5708_s8 }
 0x65e   :  { %1039 = vrot.lane.b32.xlu0 %v4314_v44, %s5708_s8 }
 0x677   :  { %v865_v53 = vpop.xlane.xlu0 %864 }
 0x678   :  { %v867_v55 = vmul.f32 0.03125, %v865_v53  ;;  %v1130_v53 = vld [vmem:[%s6603_s20] sm:$0xff] }
 0x67a   :  { %v869_v56 = vadd.f32 1e-05, %v867_v55  ;;  %v1132_v55 = vld [vmem:[%s6603_s20 + $0x10] sm:$0xff] }
 0x67b   :  { %v1003_v59 = vpop.permute.xlu0 %1002 }
 0x67c   :  { %5124 = vrsqrt.f32 %v869_v56  ;;  %v1008_v60 = vsel %vm579_vm3, %v1003_v59, 0.0  ;;  %v4927_v59 = vpack.c.bf16 %v1131_v54, %v1130_v53 }
 0x67d   :  { %1009 = vadd.xlane.f32.xlu1 %v1008_v60  ;;  %5126 = vrcp.f32 %v898_v4  ;;  %v1133_v60 = vld [vmem:[%s6603_s20 + $0x18] sm:$0xff] }
 0x67e   :  { %4928 = vmatprep.subr.bf16.mxu1 %v4927_v59 }
 0x67f   :  { %4930 = vmatpush3.bf16.msra.mxu1 %v4927_v59 }
 0x681   :  { %933 = vadd.xlane.f32.xlu1 %v932_v61  ;;  %v4931_v61 = vpack.c.bf16 %v1133_v60, %v1132_v55 }
 0x683   :  { %4932 = vmatprep.subr.bf16.mxu1 %v4931_v61 }
 0x684   :  { %4934 = vmatpush3.bf16.msra.mxu1 %v4931_v61  ;;  %v4321_v61 = vld [vmem:[#allocation2] ss:$0 sm:$0xff] }
 0x685   :  { %4647 = vmatprep.subr.mxu1 %v5705_v1 }
 0x686   :  { %v5125_v49 = vpop.eup %5124  ;;  %v1113_v13 = vpop.permute.xlu0 %1112 }
 0x687   :  { %v873_v2 = vmul.f32 %v5125_v49, %v6169_v5  ;;  %v5127_v16 = vpop.eup %5126  ;;  %v1115_v24 = vpop.permute.xlu1 %1114 }
 0x688   :  { %v1118_v17 = vmul.f32 %v5127_v16, %v1113_v13 }
 0x689   :  { %v882_v3 = vmul.f32 %v4305_v47, %v873_v2 }
 0x68b   :  { %v891_v8 = vadd.f32 %v4306_v50, %v882_v3 }
 0x68d   :  { %v4308_v7 = vmul.f32 -1.442695, %v891_v8 }
 0x68f   :  { %5128 = vpow2.f32 %v4308_v7 }
 0x692   :  { %963 = vrot.lane.b32.xlu1 %v4310_v11, %s5708_s8 }
 0x696   :  { %1028 = vrot.lane.b32.xlu1 %v4313_v12, %s5708_s8 }
 0x699   :  { %v5129_v18 = vpop.eup %5128 }
 0x69a   :  { %v899_v23 = vadd.f32 1.0, %v5129_v18  ;;  %1122 = vrot.lane.b32.xlu1 %v1118_v17, %s5708_s8 }
 0x69c   :  { %5130 = vrcp.f32 %v899_v23 }
 0x6a6   :  { %v5131_v5 = vpop.eup %5130 }
 0x6a7   :  { %v1119_v22 = vmul.f32 %v5131_v5, %v1115_v24 }
 0x6a9   :  { %1124 = vrot.lane.b32.xlu0 %v1119_v22, %s5708_s8  ;;  %s5718_s8 = smov [#allocation31]  }
 0x6aa   :  { %s4218_s20 = sshll.u32 %s5718_s8, 4  ;;  %s4219_s20 = int_to_ptr.vmem [resolvable:$true] %s4218_s20 }
 0x6ab   :  { %p5601_p5 = scmp.lt.s32.totalorder %s4219_s20, %s4219_s20 }
 0x6cd   :  { %v1013_v25 = vpop.xlane.xlu0 %1012 }
 0x6ce   :  { %v1015_v40 = vmul.f32 0.03125, %v1013_v25 }
 0x6d0   :  { %v1017_v29 = vadd.f32 1e-05, %v1015_v40 }
 0x6d1   :  { %v937_v30 = vpop.xlane.xlu0 %936 }
 0x6d2   :  { %v939_v31 = vmul.f32 0.03125, %v937_v30  ;;  %v4317_v30 = vld [vmem:[%s6604_s1] ss:$0 sm:$0xff]  ;;  %s5596_s1 = scalar_lea.vmem %s4219_s20, 256 }
 0x6d3   :  { %p5597_p4 = scmp.ne.s32.totalorder %s4219_s20, %s5596_s1  ;;  %p5602_p6 = scmp.lt.s32.totalorder %s5596_s1, %s5596_s1 }
 0x6d4   :  { %v941_v32 = vadd.f32 1e-05, %v939_v31 }
 0x6d5   :  { %v953_v9 = vpop.permute.xlu0 %952  ;;  %p5603_p7 = por %p5602_p6, %p5601_p5 }
 0x6d6   :  { %5132 = vrsqrt.f32 %v941_v32 }
 0x6d7   :  { %p5604_p8 = pnand %p5603_p7, %p5597_p4 }
 0x6d9   :  { %v1040_v49 = vpop.permute.xlu0 %1039 }
 0x6e0   :  { %v5133_v33 = vpop.eup %5132 }
 0x6e1   :  { %v945_v35 = vmul.f32 %v5133_v33, %v6152_v57 }
 0x6e3   :  { %v956_v38 = vmul.f32 %v953_v9, %v945_v35 }
 0x70a   :  { %v1010_v34 = vpop.xlane.xlu1 %1009 }
 0x70b   :  { %v1014_v57 = vmul.f32 0.03125, %v1010_v34 }
 0x70d   :  { %v1016_v50 = vadd.f32 1e-05, %v1014_v57  ;;  %v1274_v57 = vld [vmem:[%s6605_s24 + $0x10] sm:$0xff] }
 0x70e   :  { %v934_v36 = vpop.xlane.xlu1 %933 }
 0x70f   :  { %v938_v37 = vmul.f32 0.03125, %v934_v36 }
 0x711   :  { %v940_v39 = vadd.f32 1e-05, %v938_v37 }
 0x712   :  { %v964_v41 = vpop.permute.xlu1 %963 }
 0x713   :  { %5134 = vrsqrt.f32 %v940_v39  ;;  %v967_v42 = vadd.f32 %v964_v41, %v956_v38 }
 0x715   :  { %v4312_v28 = vmul.f32 -1.442695, %v967_v42 }
 0x716   :  { %v1029_v56 = vpop.permute.xlu1 %1028 }
 0x717   :  { %5136 = vpow2.f32 %v4312_v28 }
 0x718   :  { %5138 = vrsqrt.f32 %v1017_v29 }
 0x71a   :  { %v1123_v5 = vpop.permute.xlu1 %1122 }
 0x71b   :  { %v1125_v7 = vpop.permute.xlu0 %1124 }
 0x71d   :  { %v5135_v43 = vpop.eup %5134 }
 0x71e   :  { %v944_v44 = vmul.f32 %v5135_v43, %v6154_v58  ;;  %v1272_v43 = vld [vmem:[%s6605_s24] sm:$0xff] }
 0x720   :  { %v955_v45 = vmul.f32 %v953_v9, %v944_v44  ;;  %v1273_v44 = vld [vmem:[%s6605_s24 + $0x8] sm:$0xff] }
 0x721   :  { %v5137_v46 = vpop.eup %5136 }
 0x722   :  { %v966_v47 = vadd.f32 %v964_v41, %v955_v45  ;;  %v975_v48 = vadd.f32 1.0, %v5137_v46  ;;  %v5139_v51 = vpop.eup %5138  ;;  %v4935_v45 = vpack.c.bf16 %v1273_v44, %v1272_v43  ;;  %v1275_v46 = vld [vmem:[%s6605_s24 + $0x18] sm:$0xff]  ;;  %v6267_v44 = vld [vmem:[%s6607_s7 + $0x8] sm:$0xff] }
 0x723   :  { %v1021_v58 = vmul.f32 %v5139_v51, %v6160_v62 }
 0x724   :  { %v4311_v52 = vmul.f32 -1.442695, %v966_v47  ;;  %5140 = vrcp.f32 %v975_v48  ;;  %v4939_v47 = vpack.c.bf16 %v1275_v46, %v1274_v57  ;;  %4936 = vmatprep.subr.bf16.mxu0 %v4935_v45 }
 0x725   :  { %v1032_v63 = vmul.f32 %v1029_v56, %v1021_v58  ;;  %4938 = vmatpush3.bf16.msra.mxu0 %v4935_v45 }
 0x726   :  { %5142 = vpow2.f32 %v4311_v52  ;;  %4940 = vmatprep.subr.bf16.mxu0 %v4939_v47 }
 0x727   :  { %5144 = vrsqrt.f32 %v1016_v50  ;;  %v1043_v2 = vadd.f32 %v1040_v49, %v1032_v63 }
 0x729   :  { %4942 = vmatpush3.bf16.msra.mxu0 %v4939_v47 }
 0x72a   :  { %4667 = vmatprep.subr.mxu0 %v5705_v1 }
 0x72e   :  { %v5141_v3 = vpop.eup %5140 }
 0x72f   :  { %v1109_v4 = vmul.f32 %v5141_v3, %v1043_v2 }
 0x730   :  { %v5143_v8 = vpop.eup %5142 }
 0x731   :  { %v5145_v11 = vpop.eup %5144  ;;  %v974_v12 = vadd.f32 1.0, %v5143_v8  ;;  %v1129_v13 = vadd.f32 %v1125_v7, %v1109_v4  ;;  %v4322_v7 = vld [vmem:[%s6606_s4] ss:$0 sm:$0xff] }
 0x732   :  { %v1020_v62 = vmul.f32 %v5145_v11, %v6175_v19 }
 0x733   :  { %5146 = vrcp.f32 %v974_v12  ;;  %1145 = vrot.lane.b32.xlu0 %v1129_v13, %s5707_s17 }
 0x734   :  { %v1031_v16 = vmul.f32 %v1029_v56, %v1020_v62  ;;  %v4320_v56 = vld [vmem:[#allocation5] ss:$0 sm:$0xff] }
 0x736   :  { %v1042_v17 = vadd.f32 %v1040_v49, %v1031_v16 }
 0x73d   :  { %v5147_v18 = vpop.eup %5146 }
 0x73e   :  { %v1108_v23 = vmul.f32 %v5147_v18, %v1042_v17 }
 0x740   :  { %v1128_v24 = vadd.f32 %v1123_v5, %v1108_v23 }
 0x742   :  { %1143 = vrot.lane.b32.xlu1 %v1128_v24, %s5707_s17 }
 0x7a5   :  { %v1146_v25 = vpop.permute.xlu0 %1145 }
 0x7b4   :  { %v1144_v22 = vpop.permute.xlu1 %1143 }
 0x7b5   :  { %4633 = vmatprep.mubr.msk.f32.mxu1 %vm579_vm3, %v1144_v22 }
 0x7b6   :  { %4634 = vmatmul.mubr.msk.f32.vlgmr.msra.gmra.mrb[4].mxu1 %vm579_vm3, %v1146_v25 }
 0x7b7   :  { %4649 = vmatprep.mubr.msk.f32.mxu1 %vm5704_vm0, %v5705_v1 }
 0x889   :  { %v4635_v31 = vpop.f32.mrb[4].mxu1 }
 0x88a   :  { %v1223_v19 = vadd.f32 %v4635_v31, %v4317_v30  ;;  %v1217_v32 = vpop.f32.mrb[5].mxu1 }
 0x88b   :  { %v1218_v33 = vadd.f32 %v4317_v30, %v1217_v32 }
 0x88c   :  { %v1229_v34 = vsel %vm579_vm3, %v1223_v19, 0.0 }
 0x88d   :  { %1230 = vadd.xlane.f32.xlu0 %v1229_v34  ;;  %v1226_v35 = vsel %vm579_vm3, %v1218_v33, 0.0 }
 0x88e   :  { %1227 = vadd.xlane.f32.xlu1 %v1226_v35 }
 0x91a   :  { %v1231_v9 = vpop.xlane.xlu0 %1230 }
 0x91b   :  { %v1233_v36 = vmul.f32 0.03125, %v1231_v9  ;;  %v1228_v37 = vpop.xlane.xlu1 %1227 }
 0x91c   :  { %v1232_v38 = vmul.f32 0.03125, %v1228_v37 }
 0x91d   :  { %v1235_v39 = vsub.f32 %v1223_v19, %v1233_v36 }
 0x91e   :  { %v1234_v40 = vsub.f32 %v1218_v33, %v1232_v38 }
 0x91f   :  { %v1237_v41 = vmul.f32 %v1235_v39, %v1235_v39 }
 0x920   :  { %v1236_v42 = vmul.f32 %v1234_v40, %v1234_v40 }
 0x921   :  { %v1241_v28 = vsel %vm579_vm3, %v1237_v41, 0.0 }
 0x922   :  { %1242 = vadd.xlane.f32.xlu1 %v1241_v28  ;;  %v1238_v29 = vsel %vm579_vm3, %v1236_v42, 0.0 }
 0x923   :  { %1239 = vadd.xlane.f32.xlu0 %v1238_v29 }
 0x9af   :  { %v1243_v48 = vpop.xlane.xlu1 %1242 }
 0x9b0   :  { %v1245_v50 = vmul.f32 0.03125, %v1243_v48  ;;  %v1240_v51 = vpop.xlane.xlu0 %1239  ;;  %v6273_v48 = vld [vmem:[%s6607_s7] sm:$0xff] }
 0x9b1   :  { %v1244_v52 = vmul.f32 0.03125, %v1240_v51 }
 0x9b2   :  { %v1247_v53 = vadd.f32 1e-05, %v1245_v50 }
 0x9b3   :  { %v1246_v54 = vadd.f32 1e-05, %v1244_v52 }
 0x9b4   :  { %5148 = vrsqrt.f32 %v1247_v53 }
 0x9b5   :  { %5150 = vrsqrt.f32 %v1246_v54 }
 0x9be   :  { %v5149_v55 = vpop.eup %5148 }
 0x9bf   :  { %v5151_v59 = vpop.eup %5150  ;;  %v1251_v60 = vmul.f32 %v5149_v55, %v1235_v39 }
 0x9c0   :  { %v1250_v58 = vmul.f32 %v5151_v59, %v1234_v40 }
 0x9c1   :  { %v1260_v63 = vmul.f32 %v4320_v56, %v1251_v60 }
 0x9c2   :  { %v1259_v49 = vmul.f32 %v4320_v56, %v1250_v58 }
 0x9c3   :  { %v1269_v2 = vadd.f32 %v4321_v61, %v1260_v63 }
 0x9c4   :  { %v1268_v3 = vadd.f32 %v4321_v61, %v1259_v49 }
 0x9c5   :  { %v1271_v8 = vmax.f32 %v1269_v2, 0.0 }
 0x9c6   :  { %v1270_v4 = vmax.f32 %v1268_v3, 0.0 }
 0x9c8   :  { %4644 = vmatprep.mubr.msk.f32.mxu0 %vm579_vm3, %v1270_v4 }
 0x9c9   :  { %4645 = vmatmul.mubr.msk.f32.vlgmr.msra.gmra.mrb[6].mxu0 %vm579_vm3, %v1271_v8 }
 0x9ca   :  { %4669 = vmatprep.mubr.msk.f32.mxu0 %vm5704_vm0, %v5705_v1  ;;  %4668 = vmatpush3.msra.mxu0 %v6267_v44 }
 0x9cb   :  { %4677 = vmatprep.subr.mxu0 %v5705_v1 }
 0xa9c   :  { %v4646_v11 = vpop.f32.mrb[6].mxu0 }
 0xa9d   :  { %v6226_v12 = vadd.f32 %v4646_v11, %v4322_v7  ;;  %v1355_v13 = vpop.f32.mrb[7].mxu0 }
 0xa9e   :  { %v6228_v62 = vadd.f32 %v4322_v7, %v1355_v13 }
 0xaa0   :  { %1370 = vrot.lane.b32.xlu0 %v6228_v62, %s5707_s17  ;;  %v6235_v16 = vmul.f32 0.35355338, %v6228_v62 }
 0xaa4   :  { %1537 = vrot.lane.b32.xlu0 %v6228_v62, %s5709_s2 }
 0xaa8   :  { %1535 = vrot.lane.b32.xlu0 %v6235_v16, %s5710_s27 }
 0xb12   :  { %v1371_v17 = vpop.permute.xlu0 %1370 }
 0xb13   :  { %4648 = vmatpush3.xpose.msk.msra.mxu1 %vm1372_vm4, %v1371_v17 }
 0xb14   :  { %4652 = vmatprep.subr.mxu1 %v5705_v1 }
 0xb16   :  { %4650 = vmatmul.mubr.msk.f32.vlgmr.msra.gmra.mrb[6].mxu1 %vm1372_vm4, %v6235_v16  ;;  %v1538_v34 = vpop.permute.xlu0 %1537 }
 0xb17   :  { %4654 = vmatprep.mubr.msk.f32.mxu1 %vm5704_vm0, %v5705_v1 }
 0xb1a   :  { %v1536_v9 = vpop.permute.xlu0 %1535 }
 0xbe9   :  { %v1444_v18 = vpop.f32.mrb[6].mxu1 }
 0xbea   :  { %v4651_v23 = vpop.f32.mrb[7].mxu1  ;;  %v1448_v5 = vsel %vm1372_vm4, %v1444_v18, -inf }
 0xbeb   :  { %1449 = vmax.xlane.f32.xlu1 %v1448_v5  ;;  %v6309_v23 = vld [vmem:[%s6607_s7 + $0x10] sm:$0xff] }
 0xc78   :  { %v1450_v24 = vpop.xlane.xlu1 %1449 }
 0xc79   :  { %v1451_v22 = vsub.f32 %v1444_v18, %v1450_v24 }
 0xc7b   :  { %v1452_v25 = vmul.f32 1.442695, %v1451_v22 }
 0xc7d   :  { %5152 = vpow2.f32 %v1452_v25 }
 0xc87   :  { %v5153_v30 = vpop.eup %5152 }
 0xc88   :  { %v1454_v31 = vsel %vm1372_vm4, %v5153_v30, 0.0 }
 0xc89   :  { %1455 = vadd.xlane.f32.xlu1 %v1454_v31 }
 0xc9a   :  { %1459 = vrot.lane.b32.xlu1 %v6228_v62, %s5706_s26 }
 0xd16   :  { %v1456_v19 = vpop.xlane.xlu1 %1455 }
 0xd17   :  { %5154 = vrcp.f32 %v1456_v19 }
 0xd1a   :  { %v1460_v32 = vpop.permute.xlu1 %1459 }
 0xd1b   :  { %4653 = vmatpush3.msra.mxu1 %v1460_v32 }
 0xd1c   :  { %4657 = vmatprep.subr.mxu1 %v5705_v1 }
 0xd21   :  { %v5155_v33 = vpop.eup %5154 }
 0xd22   :  { %v1458_v35 = vmul.f32 %v5155_v33, %v5153_v30 }
 0xd24   :  { %4655 = vmatmul.mubr.msk.f32.vlgmr.msra.gmra.mrb[8].mxu1 %vm1372_vm4, %v1458_v35  ;;  %v6325_v35 = vmul.f32 0.35355338, %v6226_v12 }
 0xd25   :  { %4658 = vmatpush3.xpose.msk.msra.mxu1 %vm1372_vm4, %v1538_v34  ;;  %4659 = vmatprep.mubr.msk.f32.mxu1 %vm5704_vm0, %v5705_v1 }
 0xd26   :  { %4662 = vmatprep.subr.mxu1 %v5705_v1 }
 0xd28   :  { %4660 = vmatmul.mubr.msk.f32.vlgmr.msra.gmra.mrb[10].mxu1 %vm1372_vm4, %v1536_v9 }
 0xd29   :  { %4664 = vmatprep.mubr.msk.f32.mxu1 %vm5704_vm0, %v5705_v1 }
 0xdf7   :  { %v1531_v36 = vpop.f32.mrb[8].mxu1 }
 0xdf8   :  { %v4656_v37 = vpop.f32.mrb[9].mxu1 }
 0xdfb   :  { %v1609_v38 = vpop.f32.mrb[10].mxu1 }
 0xdfc   :  { %v4661_v39 = vpop.f32.mrb[11].mxu1  ;;  %v1613_v40 = vsel %vm1372_vm4, %v1609_v38, -inf }
 0xdfd   :  { %1614 = vmax.xlane.f32.xlu1 %v1613_v40 }
 0xe0e   :  { %1848 = vrot.lane.b32.xlu1 %v6228_v62, %s5711_s10 }
 0xe12   :  { %1846 = vrot.lane.b32.xlu1 %v6235_v16, %s5712_s11 }
 0xe8a   :  { %v1615_v41 = vpop.xlane.xlu1 %1614 }
 0xe8b   :  { %v1616_v42 = vsub.f32 %v1609_v38, %v1615_v41 }
 0xe8d   :  { %v1617_v28 = vmul.f32 1.442695, %v1616_v42 }
 0xe8e   :  { %v1849_v50 = vpop.permute.xlu1 %1848 }
 0xe8f   :  { %5156 = vpow2.f32 %v1617_v28 }
 0xe92   :  { %v1847_v53 = vpop.permute.xlu1 %1846 }
 0xe99   :  { %v5157_v29 = vpop.eup %5156 }
 0xe9a   :  { %v1619_v43 = vsel %vm1372_vm4, %v5157_v29, 0.0 }
 0xe9b   :  { %1620 = vadd.xlane.f32.xlu0 %v1619_v43 }
 0xeb1   :  { %1624 = vrot.lane.b32.xlu0 %v6228_v62, %s5713_s12 }
 0xf28   :  { %v1621_v57 = vpop.xlane.xlu0 %1620 }
 0xf29   :  { %5158 = vrcp.f32 %v1621_v57 }
 0xf2c   :  { %v1625_v45 = vpop.permute.xlu0 %1624 }
 0xf2d   :  { %4663 = vmatpush3.msra.mxu1 %v1625_v45 }
 0xf2e   :  { %4672 = vmatprep.subr.mxu1 %v5705_v1 }
 0xf33   :  { %v5159_v46 = vpop.eup %5158 }
 0xf34   :  { %v1623_v47 = vmul.f32 %v5159_v46, %v5157_v29  ;;  %v6347_v29 = vld [vmem:[%s6607_s7 + $0x18] sm:$0xff] }
 0xf36   :  { %4665 = vmatmul.mubr.msk.f32.vlgmr.msra.gmra.mrb[12].mxu1 %vm1372_vm4, %v1623_v47 }
 0xf37   :  { %4673 = vmatpush3.msra.mxu1 %v6273_v48  ;;  %4674 = vmatprep.mubr.msk.f32.mxu1 %vm5704_vm0, %v5705_v1 }
 0xf38   :  { %4682 = vmatprep.subr.mxu1 %v5705_v1 }
 0xf3a   :  { %4675 = vmatmul.mubr.msk.f32.vlgmr.msra.gmra.mrb[14].mxu1 %vm1372_vm4, %v1531_v36 }
 0xf3b   :  { %4684 = vmatprep.mubr.msk.f32.mxu1 %vm5704_vm0, %v5705_v1 }
0x1009   :  { %v1696_v51 = vpop.f32.mrb[12].mxu1 }
0x100a   :  { %v4666_v52 = vpop.f32.mrb[13].mxu1  ;;  %4670 = vmatmul.mubr.msk.f32.vlgmr.msra.gmra.mrb[8].mxu0 %vm1372_vm4, %v1696_v51 }
0x100b   :  { %4678 = vmatpush3.xpose.msk.msra.mxu0 %vm1372_vm4, %v1849_v50  ;;  %4679 = vmatprep.mubr.msk.f32.mxu0 %vm5704_vm0, %v5705_v1 }
0x100c   :  { %4687 = vmatprep.subr.mxu0 %v5705_v1 }
0x100d   :  { %v1842_v54 = vpop.f32.mrb[14].mxu1 }
0x100e   :  { %v4676_v55 = vpop.f32.mrb[15].mxu1  ;;  %4680 = vmatmul.mubr.msk.f32.vlgmr.msra.gmra.mrb[10].mxu0 %vm1372_vm4, %v1847_v53 }
0x100f   :  { %4689 = vmatprep.mubr.msk.f32.mxu0 %vm5704_vm0, %v5705_v1  ;;  %4688 = vmatpush3.msra.mxu0 %v6309_v23 }
0x1010   :  { %4697 = vmatprep.subr.mxu0 %v5705_v1 }
0x10dd   :  { %v1769_v56 = vpop.f32.mrb[8].mxu0 }
0x10de   :  { %v1843_v59 = vadd.f32 %v1842_v54, %v1769_v56  ;;  %v4671_v60 = vpop.f32.mrb[9].mxu0 }
0x10e1   :  { %v1920_v58 = vpop.f32.mrb[10].mxu0 }
0x10e2   :  { %v4681_v61 = vpop.f32.mrb[11].mxu0  ;;  %v1924_v63 = vsel %vm1372_vm4, %v1920_v58, -inf }
0x10e3   :  { %1925 = vmax.xlane.f32.xlu0 %v1924_v63 }
0x10f9   :  { %1935 = vrot.lane.b32.xlu0 %v6228_v62, %s5714_s14 }
0x10fd   :  { %2085 = vrot.lane.b32.xlu0 %v6235_v16, %s5715_s15 }
0x1170   :  { %v1926_v49 = vpop.xlane.xlu0 %1925 }
0x1171   :  { %v1927_v2 = vsub.f32 %v1920_v58, %v1926_v49 }
0x1173   :  { %v1928_v3 = vmul.f32 1.442695, %v1927_v2 }
0x1174   :  { %v1936_v4 = vpop.permute.xlu0 %1935 }
0x1175   :  { %5160 = vpow2.f32 %v1928_v3  ;;  %4683 = vmatpush3.msra.mxu1 %v1936_v4 }
0x1176   :  { %4692 = vmatprep.subr.mxu1 %v5705_v1 }
0x1178   :  { %v2086_v18 = vpop.permute.xlu0 %2085 }
0x117f   :  { %v5161_v8 = vpop.eup %5160 }
0x1180   :  { %v1930_v7 = vsel %vm1372_vm4, %v5161_v8, 0.0 }
0x1181   :  { %1931 = vadd.xlane.f32.xlu1 %v1930_v7 }
0x1192   :  { %2087 = vrot.lane.b32.xlu1 %v6228_v62, %s5716_s30 }
0x120e   :  { %v1932_v11 = vpop.xlane.xlu1 %1931 }
0x120f   :  { %5162 = vrcp.f32 %v1932_v11 }
0x1212   :  { %v2088_v17 = vpop.permute.xlu1 %2087 }
0x1219   :  { %v5163_v13 = vpop.eup %5162 }
0x121a   :  { %v1934_v16 = vmul.f32 %v5163_v13, %v5161_v8 }
0x121c   :  { %4685 = vmatmul.mubr.msk.f32.vlgmr.msra.gmra.mrb[16].mxu1 %vm1372_vm4, %v1934_v16 }
0x121d   :  { %4693 = vmatpush3.xpose.msk.msra.mxu1 %vm1372_vm4, %v2088_v17  ;;  %4694 = vmatprep.mubr.msk.f32.mxu1 %vm5704_vm0, %v5705_v1 }
0x121e   :  { %4702 = vmatprep.subr.mxu1 %v5705_v1 }
0x1220   :  { %4695 = vmatmul.mubr.msk.f32.vlgmr.msra.gmra.mrb[18].mxu1 %vm1372_vm4, %v2086_v18 }
0x1221   :  { %4704 = vmatprep.mubr.msk.f32.mxu1 %vm5704_vm0, %v5705_v1  ;;  %4703 = vmatpush3.msra.mxu1 %v6347_v29 }
0x1222   :  { %4712 = vmatprep.subr.mxu1 %v5705_v1 }
0x12ef   :  { %v2007_v5 = vpop.f32.mrb[16].mxu1 }
0x12f0   :  { %v4686_v24 = vpop.f32.mrb[17].mxu1  ;;  %4690 = vmatmul.mubr.msk.f32.vlgmr.msra.gmra.mrb[12].mxu0 %vm1372_vm4, %v2007_v5 }
0x12f1   :  { %4699 = vmatprep.mubr.msk.f32.mxu0 %vm5704_vm0, %v5705_v1 }
0x12f3   :  { %v2159_v22 = vpop.f32.mrb[18].mxu1 }
0x12f4   :  { %v4696_v25 = vpop.f32.mrb[19].mxu1  ;;  %v2163_v30 = vsel %vm1372_vm4, %v2159_v22, -inf }
0x12f5   :  { %2164 = vmax.xlane.f32.xlu1 %v2163_v30 }
0x1306   :  { %2326 = vrot.lane.b32.xlu1 %v6226_v12, %s5707_s17  ;;  %s6622_s17 = sld [smem:[#allocation61_spill]] }
0x130a   :  { %2492 = vrot.lane.b32.xlu1 %v6226_v12, %s5709_s2 }
0x1382   :  { %v2165_v31 = vpop.xlane.xlu1 %2164 }
0x1383   :  { %v2166_v19 = vsub.f32 %v2159_v22, %v2165_v31 }
0x1385   :  { %v2167_v32 = vmul.f32 1.442695, %v2166_v19 }
0x1386   :  { %v2327_v41 = vpop.permute.xlu1 %2326 }
0x1387   :  { %5164 = vpow2.f32 %v2167_v32 }
0x1391   :  { %v5165_v33 = vpop.eup %5164 }
0x1392   :  { %v2169_v34 = vsel %vm1372_vm4, %v5165_v33, 0.0 }
0x1393   :  { %2170 = vadd.xlane.f32.xlu0 %v2169_v34 }
0x13a9   :  { %2174 = vrot.lane.b32.xlu0 %v6228_v62, %s5717_s21  ;;  %v2493_v62 = vpop.permute.xlu1 %2492 }
0x13ad   :  { %2490 = vrot.lane.b32.xlu0 %v6325_v35, %s5710_s27 }
0x13c3   :  { %v2080_v9 = vpop.f32.mrb[12].mxu0 }
0x13c4   :  { %v2084_v36 = vadd.f32 %v2080_v9, %v1843_v59  ;;  %v4691_v37 = vpop.f32.mrb[13].mxu0 }
0x1420   :  { %v2171_v38 = vpop.xlane.xlu0 %2170 }
0x1421   :  { %5166 = vrcp.f32 %v2171_v38 }
0x1424   :  { %v2175_v39 = vpop.permute.xlu0 %2174 }
0x1425   :  { %4698 = vmatpush3.msra.mxu0 %v2175_v39 }
0x1426   :  { %4707 = vmatprep.subr.mxu0 %v5705_v1 }
0x1428   :  { %v2491_v28 = vpop.permute.xlu0 %2490 }
0x142b   :  { %v5167_v40 = vpop.eup %5166 }
0x142c   :  { %v2173_v42 = vmul.f32 %v5167_v40, %v5165_v33 }
0x142e   :  { %4700 = vmatmul.mubr.msk.f32.vlgmr.msra.gmra.mrb[14].mxu0 %vm1372_vm4, %v2173_v42 }
0x142f   :  { %4708 = vmatpush3.xpose.msk.msra.mxu0 %vm1372_vm4, %v2327_v41  ;;  %4709 = vmatprep.mubr.msk.f32.mxu0 %vm5704_vm0, %v5705_v1 }
0x1430   :  { %4717 = vmatprep.subr.mxu0 %v5705_v1 }
0x1432   :  { %4710 = vmatmul.mubr.msk.f32.vlgmr.msra.gmra.mrb[16].mxu0 %vm1372_vm4, %v6325_v35 }
0x1433   :  { %4718 = vmatpush3.xpose.msk.msra.mxu0 %vm1372_vm4, %v2493_v62  ;;  %4719 = vmatprep.mubr.msk.f32.mxu0 %vm5704_vm0, %v5705_v1 }
0x1434   :  { %4727 = vmatprep.subr.mxu0 %v5705_v1 }
0x1436   :  { %4720 = vmatmul.mubr.msk.f32.vlgmr.msra.gmra.mrb[18].mxu0 %vm1372_vm4, %v2491_v28 }
0x1437   :  { %4728 = vmatpush3.msra.mxu0 %v6267_v44  ;;  %4729 = vmatprep.mubr.msk.f32.mxu0 %vm5704_vm0, %v5705_v1 }
0x1438   :  { %4737 = vmatprep.subr.mxu0 %v5705_v1 }
0x1501   :  { %v2246_v43 = vpop.f32.mrb[14].mxu0 }
0x1502   :  { %v4701_v57 = vpop.f32.mrb[15].mxu0  ;;  %4705 = vmatmul.mubr.msk.f32.vlgmr.msra.gmra.mrb[20].mxu1 %vm1372_vm4, %v2246_v43 }
0x1503   :  { %4714 = vmatprep.mubr.msk.f32.mxu1 %vm5704_vm0, %v5705_v1 }
0x1505   :  { %v2399_v45 = vpop.f32.mrb[16].mxu0 }
0x1506   :  { %v4711_v44 = vpop.f32.mrb[17].mxu0  ;;  %v2403_v46 = vsel %vm1372_vm4, %v2399_v45, -inf }
0x1507   :  { %2404 = vmax.xlane.f32.xlu1 %v2403_v46 }
0x1509   :  { %v2564_v47 = vpop.f32.mrb[18].mxu0 }
0x150a   :  { %v4721_v50 = vpop.f32.mrb[19].mxu0  ;;  %v2568_v51 = vsel %vm1372_vm4, %v2564_v47, -inf }
0x150b   :  { %2569 = vmax.xlane.f32.xlu0 %v2568_v51 }
0x1594   :  { %v2405_v52 = vpop.xlane.xlu1 %2404 }
0x1595   :  { %v2406_v53 = vsub.f32 %v2399_v45, %v2405_v52 }
0x1597   :  { %v2407_v54 = vmul.f32 1.442695, %v2406_v53 }
0x1598   :  { %v2570_v55 = vpop.xlane.xlu0 %2569 }
0x1599   :  { %5168 = vpow2.f32 %v2407_v54  ;;  %v2571_v56 = vsub.f32 %v2564_v47, %v2570_v55  ;;  %v4357_v54 = vld [vmem:[%s6608_s0] ss:$0 sm:$0xff] }
0x159b   :  { %v2572_v59 = vmul.f32 1.442695, %v2571_v56 }
0x159d   :  { %5170 = vpow2.f32 %v2572_v59 }
0x15a3   :  { %v5169_v60 = vpop.eup %5168 }
0x15a4   :  { %v2409_v58 = vsel %vm1372_vm4, %v5169_v60, 0.0 }
0x15a5   :  { %2410 = vadd.xlane.f32.xlu0 %v2409_v58 }
0x15a7   :  { %v5171_v61 = vpop.eup %5170 }
0x15a8   :  { %v2574_v63 = vsel %vm1372_vm4, %v5171_v61, 0.0 }
0x15a9   :  { %2575 = vadd.xlane.f32.xlu1 %v2574_v63 }
0x15ba   :  { %2579 = vrot.lane.b32.xlu1 %v6226_v12, %s5713_s12 }
0x15bb   :  { %2414 = vrot.lane.b32.xlu0 %v6226_v12, %s5706_s26 }
0x15be   :  { %2803 = vrot.lane.b32.xlu1 %v6226_v12, %s5711_s10 }
0x15bf   :  { %2801 = vrot.lane.b32.xlu0 %v6325_v35, %s5712_s11 }
0x15d5   :  { %v2319_v49 = vpop.f32.mrb[20].mxu1 }
0x15d6   :  { %v6366_v2 = vadd.f32 %v2319_v49, %v2084_v36  ;;  %v4706_v3 = vpop.f32.mrb[21].mxu1 }
0x15d8   :  { %v3286_v59 = vadd.f32 %v4357_v54, %v6366_v2 }
0x1632   :  { %v2411_v4 = vpop.xlane.xlu0 %2410 }
0x1633   :  { %5172 = vrcp.f32 %v2411_v4 }
0x1636   :  { %v2415_v8 = vpop.permute.xlu0 %2414  ;;  %v2576_v7 = vpop.xlane.xlu1 %2575 }
0x1637   :  { %5174 = vrcp.f32 %v2576_v7  ;;  %4713 = vmatpush3.msra.mxu1 %v2415_v8 }
0x1638   :  { %4722 = vmatprep.subr.mxu1 %v5705_v1 }
0x163a   :  { %v2580_v16 = vpop.permute.xlu1 %2579 }
0x163d   :  { %v5173_v11 = vpop.eup %5172 }
0x163e   :  { %v2413_v13 = vmul.f32 %v5173_v11, %v5169_v60  ;;  %v2804_v25 = vpop.permute.xlu1 %2803  ;;  %v3288_v60 = vsel %vm579_vm3, %v3286_v59, 0.0 }
0x1640   :  { %4715 = vmatmul.mubr.msk.f32.vlgmr.msra.gmra.mrb[22].mxu1 %vm1372_vm4, %v2413_v13 }
0x1641   :  { %v5175_v17 = vpop.eup %5174  ;;  %4723 = vmatpush3.msra.mxu1 %v2580_v16  ;;  %4724 = vmatprep.mubr.msk.f32.mxu1 %vm5704_vm0, %v5705_v1 }
0x1642   :  { %v2578_v18 = vmul.f32 %v5175_v17, %v5171_v61  ;;  %4732 = vmatprep.subr.mxu1 %v5705_v1 }
0x1644   :  { %4725 = vmatmul.mubr.msk.f32.vlgmr.msra.gmra.mrb[24].mxu1 %vm1372_vm4, %v2578_v18 }
0x1645   :  { %4733 = vmatpush3.msra.mxu1 %v6273_v48  ;;  %4734 = vmatprep.mubr.msk.f32.mxu1 %vm5704_vm0, %v5705_v1  ;;  %v2802_v48 = vpop.permute.xlu0 %2801 }
0x1646   :  { %4742 = vmatprep.subr.mxu1 %v5705_v1 }
0x1713   :  { %v2486_v5 = vpop.f32.mrb[22].mxu1 }
0x1714   :  { %v4716_v24 = vpop.f32.mrb[23].mxu1  ;;  %4735 = vmatmul.mubr.msk.f32.vlgmr.msra.gmra.mrb[26].mxu1 %vm1372_vm4, %v2486_v5 }
0x1715   :  { %4744 = vmatprep.mubr.msk.f32.mxu1 %vm5704_vm0, %v5705_v1 }
0x1717   :  { %v2651_v22 = vpop.f32.mrb[24].mxu1 }
0x1718   :  { %v4726_v30 = vpop.f32.mrb[25].mxu1  ;;  %4730 = vmatmul.mubr.msk.f32.vlgmr.msra.gmra.mrb[20].mxu0 %vm1372_vm4, %v2651_v22 }
0x1719   :  { %4738 = vmatpush3.xpose.msk.msra.mxu0 %vm1372_vm4, %v2804_v25  ;;  %4739 = vmatprep.mubr.msk.f32.mxu0 %vm5704_vm0, %v5705_v1 }
0x171a   :  { %4747 = vmatprep.subr.mxu0 %v5705_v1 }
0x171c   :  { %4740 = vmatmul.mubr.msk.f32.vlgmr.msra.gmra.mrb[22].mxu0 %vm1372_vm4, %v2802_v48 }
0x171d   :  { %4748 = vmatpush3.msra.mxu0 %v6309_v23  ;;  %4749 = vmatprep.mubr.msk.f32.mxu0 %vm5704_vm0, %v5705_v1 }
0x171e   :  { %4757 = vmatprep.subr.mxu0 %v5705_v1 }
0x17e7   :  { %v2797_v31 = vpop.f32.mrb[26].mxu1 }
0x17e8   :  { %v4736_v19 = vpop.f32.mrb[27].mxu1 }
0x17eb   :  { %v2724_v32 = vpop.f32.mrb[20].mxu0 }
0x17ec   :  { %v2798_v33 = vadd.f32 %v2797_v31, %v2724_v32  ;;  %v4731_v34 = vpop.f32.mrb[21].mxu0 }
0x17ef   :  { %v2875_v9 = vpop.f32.mrb[22].mxu0 }
0x17f0   :  { %v4741_v36 = vpop.f32.mrb[23].mxu0  ;;  %v2879_v37 = vsel %vm1372_vm4, %v2875_v9, -inf }
0x17f1   :  { %2880 = vmax.xlane.f32.xlu1 %v2879_v37  ;;  %v4358_v36 = vld [vmem:[%s6609_s16] ss:$0 sm:$0xff] }
0x1802   :  { %3042 = vrot.lane.b32.xlu1 %v6226_v12, %s5716_s30 }
0x1806   :  { %3040 = vrot.lane.b32.xlu1 %v6325_v35, %s5715_s15 }
0x187e   :  { %v2881_v23 = vpop.xlane.xlu1 %2880 }
0x187f   :  { %v2882_v38 = vsub.f32 %v2875_v9, %v2881_v23  ;;  %v4359_v23 = vld [vmem:[%s6610_s19] ss:$0 sm:$0xff] }
0x1881   :  { %v2883_v39 = vmul.f32 1.442695, %v2882_v38 }
0x1882   :  { %v3043_v43 = vpop.permute.xlu1 %3042 }
0x1883   :  { %5176 = vpow2.f32 %v2883_v39 }
0x1886   :  { %v3041_v57 = vpop.permute.xlu1 %3040 }
0x188d   :  { %v5177_v40 = vpop.eup %5176 }
0x188e   :  { %v2885_v41 = vsel %vm1372_vm4, %v5177_v40, 0.0 }
0x188f   :  { %2886 = vadd.xlane.f32.xlu0 %v2885_v41  ;;  %v3333_v41 = vld [vmem:[%s6611_s6 + $0x8] sm:$0xff] }
0x18a5   :  { %2890 = vrot.lane.b32.xlu0 %v6226_v12, %s5714_s14 }
0x191c   :  { %v2887_v42 = vpop.xlane.xlu0 %2886 }
0x191d   :  { %5178 = vrcp.f32 %v2887_v42 }
0x1920   :  { %v2891_v62 = vpop.permute.xlu0 %2890 }
0x1921   :  { %4743 = vmatpush3.msra.mxu1 %v2891_v62  ;;  %v3334_v62 = vld [vmem:[%s6611_s6 + $0x10] sm:$0xff] }
0x1922   :  { %4752 = vmatprep.subr.mxu1 %v5705_v1 }
0x1927   :  { %v5179_v28 = vpop.eup %5178 }
0x1928   :  { %v2889_v35 = vmul.f32 %v5179_v28, %v5177_v40  ;;  %v3332_v40 = vld [vmem:[%s6611_s6] sm:$0xff]  ;;  %v3335_v28 = vld [vmem:[%s6611_s6 + $0x18] sm:$0xff] }
0x1929   :  { %v4943_v42 = vpack.c.bf16 %v3333_v41, %v3332_v40  ;;  %v3797_v41 = vld [vmem:[%s6614_s3 + $0x8] sm:$0xff] }
0x192a   :  { %4745 = vmatmul.mubr.msk.f32.vlgmr.msra.gmra.mrb[28].mxu1 %vm1372_vm4, %v2889_v35  ;;  %v3426_v35 = vld [vmem:[%s6612_s9] sm:$0xff] }
0x192b   :  { %4753 = vmatpush3.xpose.msk.msra.mxu1 %vm1372_vm4, %v3043_v43  ;;  %4754 = vmatprep.mubr.msk.f32.mxu1 %vm5704_vm0, %v5705_v1  ;;  %v4947_v43 = vpack.c.bf16 %v3335_v28, %v3334_v62  ;;  %v3572_v62 = vld [vmem:[%s6613_s18 + $0x10] sm:$0xff]  ;;  %v3573_v28 = vld [vmem:[%s6613_s18 + $0x18] sm:$0xff] }
0x192c   :  { %4762 = vmatprep.subr.mxu1 %v5705_v1 }
0x192e   :  { %4755 = vmatmul.mubr.msk.f32.vlgmr.msra.gmra.mrb[30].mxu1 %vm1372_vm4, %v3041_v57  ;;  %v3427_v57 = vld [vmem:[%s6612_s9 + $0x8] sm:$0xff] }
0x192f   :  { %4763 = vmatpush3.msra.mxu1 %v6347_v29  ;;  %4764 = vmatprep.mubr.msk.f32.mxu1 %vm5704_vm0, %v5705_v1 }
0x19fd   :  { %v2962_v45 = vpop.f32.mrb[28].mxu1 }
0x19fe   :  { %v4746_v44 = vpop.f32.mrb[29].mxu1  ;;  %4750 = vmatmul.mubr.msk.f32.vlgmr.msra.gmra.mrb[24].mxu0 %vm1372_vm4, %v2962_v45  ;;  %v3428_v45 = vld [vmem:[%s6612_s9 + $0x10] sm:$0xff] }
0x19ff   :  { %4759 = vmatprep.mubr.msk.f32.mxu0 %vm5704_vm0, %v5705_v1  ;;  %v4951_v44 = vpack.c.bf16 %v3427_v57, %v3426_v35  ;;  %v3798_v35 = vld [vmem:[%s6614_s3 + $0x10] sm:$0xff]  ;;  %v3799_v57 = vld [vmem:[%s6614_s3 + $0x18] sm:$0xff] }
0x1a01   :  { %v3114_v46 = vpop.f32.mrb[30].mxu1  ;;  %4952 = vmatprep.subr.bf16.mxu1 %v4951_v44 }
0x1a02   :  { %v4756_v47 = vpop.f32.mrb[31].mxu1  ;;  %v3118_v50 = vsel %vm1372_vm4, %v3114_v46, -inf }
0x1a03   :  { %3119 = vmax.xlane.f32.xlu0 %v3118_v50  ;;  %v3430_v50 = vld [vmem:[%s6612_s9 + $0x20] sm:$0xff] }
0x1a19   :  { %3129 = vrot.lane.b32.xlu0 %v6226_v12, %s5717_s21 }
0x1a90   :  { %v3120_v29 = vpop.xlane.xlu0 %3119 }
0x1a91   :  { %v3121_v51 = vsub.f32 %v3114_v46, %v3120_v29  ;;  %v3429_v46 = vld [vmem:[%s6612_s9 + $0x18] sm:$0xff]  ;;  %v3431_v29 = vld [vmem:[%s6612_s9 + $0x28] sm:$0xff] }
0x1a92   :  { %v4955_v47 = vpack.c.bf16 %v3429_v46, %v3428_v45  ;;  %v4987_v45 = vpack.c.bf16 %v3799_v57, %v3798_v35  ;;  %v3922_v35 = vld [vmem:[%s6616_s22 + $0x8] sm:$0xff] }
0x1a93   :  { %v3122_v52 = vmul.f32 1.442695, %v3121_v51  ;;  %v4959_v51 = vpack.c.bf16 %v3431_v29, %v3430_v50 }
0x1a94   :  { %v3130_v53 = vpop.permute.xlu0 %3129 }
0x1a95   :  { %5180 = vpow2.f32 %v3122_v52  ;;  %4758 = vmatpush3.msra.mxu0 %v3130_v53 }
0x1a96   :  { %4944 = vmatprep.subr.bf16.mxu0 %v4943_v42 }
0x1a9f   :  { %v5181_v55 = vpop.eup %5180 }
0x1aa0   :  { %v3124_v56 = vsel %vm1372_vm4, %v5181_v55, 0.0 }
0x1aa1   :  { %3125 = vadd.xlane.f32.xlu1 %v3124_v56 }
0x1aa5   :  { %3289 = vadd.xlane.f32.xlu1 %v3288_v60 }
0x1ad1   :  { %v3035_v58 = vpop.f32.mrb[24].mxu0 }
0x1ad2   :  { %v3039_v61 = vadd.f32 %v3035_v58, %v2798_v33  ;;  %v4751_v63 = vpop.f32.mrb[25].mxu0  ;;  %v3432_v58 = vld [vmem:[%s6612_s9 + $0x30] sm:$0xff] }
0x1b2e   :  { %v3126_v12 = vpop.xlane.xlu1 %3125 }
0x1b2f   :  { %5182 = vrcp.f32 %v3126_v12  ;;  %v4360_v12 = vld [vmem:[#allocation7] ss:$0 sm:$0xff] }
0x1b32   :  { %v3290_v7 = vpop.xlane.xlu1 %3289 }
0x1b33   :  { %v3294_v11 = vmul.f32 0.03125, %v3290_v7 }
0x1b35   :  { %v3296_v13 = vsub.f32 %v3286_v59, %v3294_v11 }
0x1b37   :  { %v3298_v24 = vmul.f32 %v3296_v13, %v3296_v13 }
0x1b39   :  { %v5183_v49 = vpop.eup %5182  ;;  %v3300_v22 = vsel %vm579_vm3, %v3298_v24, 0.0 }
0x1b3a   :  { %v3128_v3 = vmul.f32 %v5183_v49, %v5181_v55 }
0x1b3c   :  { %4760 = vmatmul.mubr.msk.f32.vlgmr.msra.gmra.mrb[26].mxu0 %vm1372_vm4, %v3128_v3 }
0x1b3d   :  { %4946 = vmatpush3.bf16.msra.mxu0 %v4943_v42 }
0x1b3e   :  { %4948 = vmatprep.subr.bf16.mxu0 %v4947_v43 }
0x1b41   :  { %4950 = vmatpush3.bf16.msra.mxu0 %v4947_v43  ;;  %v4971_v43 = vpack.c.bf16 %v3573_v28, %v3572_v62 }
0x1c0f   :  { %v3201_v4 = vpop.f32.mrb[26].mxu0 }
0x1c10   :  { %v4761_v8 = vpop.f32.mrb[27].mxu0  ;;  %4765 = vmatmul.mubr.msk.f32.vlgmr.msra.gmra.mrb[32].mxu1 %vm1372_vm4, %v3201_v4 }
0x1c11   :  { %4954 = vmatpush3.bf16.msra.mxu1 %v4951_v44 }
0x1c12   :  { %4956 = vmatprep.subr.bf16.mxu1 %v4955_v47 }
0x1c15   :  { %4958 = vmatpush3.bf16.msra.mxu1 %v4955_v47 }
0x1c16   :  { %4960 = vmatprep.subr.bf16.mxu1 %v4959_v51 }
0x1c19   :  { %4962 = vmatpush3.bf16.msra.mxu1 %v4959_v51 }
0x1ce3   :  { %v3274_v2 = vpop.f32.mrb[32].mxu1 }
0x1ce4   :  { %v3278_v16 = vadd.f32 %v3274_v2, %v3039_v61  ;;  %v4766_v17 = vpop.f32.mrb[33].mxu1  ;;  %v3433_v61 = vld [vmem:[%s6612_s9 + $0x38] sm:$0xff]  ;;  %v4363_v2 = vld [vmem:[#allocation8] ss:$0 sm:$0xff] }
0x1ce5   :  { %v4963_v63 = vpack.c.bf16 %v3433_v61, %v3432_v58 }
0x1ce6   :  { %v3287_v18 = vadd.f32 %v4357_v54, %v3278_v16 }
0x1ce7   :  { %4964 = vmatprep.subr.bf16.mxu1 %v4963_v63 }
0x1ce8   :  { %v3291_v5 = vsel %vm579_vm3, %v3287_v18, 0.0  ;;  %4966 = vmatpush3.bf16.msra.mxu1 %v4963_v63 }
0x1ce9   :  { %3292 = vadd.xlane.f32.xlu1 %v3291_v5 }
0x1ced   :  { %3301 = vadd.xlane.f32.xlu1 %v3300_v22 }
0x1d76   :  { %v3293_v25 = vpop.xlane.xlu1 %3292 }
0x1d77   :  { %v3295_v30 = vmul.f32 0.03125, %v3293_v25 }
0x1d79   :  { %v3297_v48 = vsub.f32 %v3287_v18, %v3295_v30 }
0x1d7a   :  { %v3302_v31 = vpop.xlane.xlu1 %3301 }
0x1d7b   :  { %v3306_v19 = vmul.f32 0.03125, %v3302_v31  ;;  %v3299_v32 = vmul.f32 %v3297_v48, %v3297_v48 }
0x1d7d   :  { %v3308_v33 = vadd.f32 1e-05, %v3306_v19  ;;  %v3303_v34 = vsel %vm579_vm3, %v3299_v32, 0.0 }
0x1d7e   :  { %3304 = vadd.xlane.f32.xlu1 %v3303_v34 }
0x1d7f   :  { %5184 = vrsqrt.f32 %v3308_v33 }
0x1d89   :  { %v5185_v9 = vpop.eup %5184 }
0x1d8a   :  { %v3312_v37 = vmul.f32 %v5185_v9, %v3296_v13 }
0x1d8c   :  { %v3321_v38 = vmul.f32 %v4358_v36, %v3312_v37 }
0x1d8e   :  { %v3330_v39 = vadd.f32 %v4359_v23, %v3321_v38  ;;  %v3571_v38 = vld [vmem:[%s6613_s18 + $0x8] sm:$0xff] }
0x1d90   :  { %4775 = vmatprep.mubr.msk.f32.mxu0 %vm579_vm3, %v3330_v39 }
0x1e0b   :  { %v3305_v52 = vpop.xlane.xlu1 %3304 }
0x1e0c   :  { %v3307_v53 = vmul.f32 0.03125, %v3305_v52 }
0x1e0e   :  { %v3309_v54 = vadd.f32 1e-05, %v3307_v53  ;;  %v4366_v53 = vld [vmem:[#allocation11] ss:$0 sm:$0xff] }
0x1e10   :  { %5186 = vrsqrt.f32 %v3309_v54 }
0x1e1a   :  { %v5187_v55 = vpop.eup %5186 }
0x1e1b   :  { %v3313_v56 = vmul.f32 %v5187_v55, %v3297_v48  ;;  %v4367_v55 = vld [vmem:[#allocation10] ss:$0 sm:$0xff] }
0x1e1d   :  { %v3322_v59 = vmul.f32 %v4358_v36, %v3313_v56 }
0x1e1f   :  { %v3331_v60 = vadd.f32 %v4359_v23, %v3322_v59  ;;  %v3570_v23 = vld [vmem:[%s6613_s18] sm:$0xff] }
0x1e20   :  { %v4967_v40 = vpack.c.bf16 %v3571_v38, %v3570_v23 }
0x1e21   :  { %4776 = vmatmul.mubr.msk.f32.vlgmr.msra.gmra.mrb[28].mxu0 %vm579_vm3, %v3331_v60 }
0x1e22   :  { %4968 = vmatprep.subr.bf16.mxu0 %v4967_v40 }
0x1e23   :  { %4970 = vmatpush3.bf16.msra.mxu0 %v4967_v40 }
0x1e24   :  { %4972 = vmatprep.subr.bf16.mxu0 %v4971_v43 }
0x1e27   :  { %4974 = vmatpush3.bf16.msra.mxu0 %v4971_v43  ;;  %v3921_v43 = vld [vmem:[%s6616_s22] sm:$0xff] }
0x1e28   :  { %v4991_v57 = vpack.c.bf16 %v3922_v35, %v3921_v43 }
0x1ef4   :  { %v4777_v49 = vpop.f32.mrb[28].mxu0 }
0x1ef5   :  { %v3421_v3 = vadd.f32 %v4777_v49, %v4360_v12  ;;  %v3415_v4 = vpop.f32.mrb[29].mxu0 }
0x1ef6   :  { %v3416_v8 = vadd.f32 %v4360_v12, %v3415_v4 }
0x1ef7   :  { %v3425_v11 = vmax.f32 %v3421_v3, 0.0 }
0x1ef8   :  { %v3424_v7 = vmax.f32 %v3416_v8, 0.0 }
0x1efa   :  { %4794 = vmatprep.mubr.msk.f32.mxu1 %vm420_vm1, %v3424_v7 }
0x1efb   :  { %4795 = vmatmul.mubr.msk.f32.vlgmr.msra.gmra.mrb[34].mxu1 %vm420_vm1, %v3425_v11 }
0x1fce   :  { %v4796_v13 = vpop.f32.mrb[34].mxu1 }
0x1fcf   :  { %v3519_v16 = vadd.f32 %v4796_v13, %v4363_v2  ;;  %v3513_v17 = vpop.f32.mrb[35].mxu1 }
0x1fd0   :  { %v3514_v18 = vadd.f32 %v4363_v2, %v3513_v17 }
0x1fd1   :  { %v3523_v5 = vadd.f32 %v3519_v16, %v3331_v60 }
0x1fd2   :  { %v3522_v24 = vadd.f32 %v3514_v18, %v3330_v39  ;;  %v3796_v39 = vld [vmem:[%s6614_s3] sm:$0xff] }
0x1fd3   :  { %v3527_v22 = vsel %vm579_vm3, %v3523_v5, 0.0  ;;  %v4983_v42 = vpack.c.bf16 %v3797_v41, %v3796_v39 }
0x1fd4   :  { %3528 = vadd.xlane.f32.xlu0 %v3527_v22  ;;  %v3524_v25 = vsel %vm579_vm3, %v3522_v24, 0.0 }
0x1fd5   :  { %3525 = vadd.xlane.f32.xlu1 %v3524_v25  ;;  %4984 = vmatprep.subr.bf16.mxu1 %v4983_v42 }
0x1fd6   :  { %4986 = vmatpush3.bf16.msra.mxu1 %v4983_v42 }
0x1fd7   :  { %4988 = vmatprep.subr.bf16.mxu1 %v4987_v45 }
0x1fda   :  { %4990 = vmatpush3.bf16.msra.mxu1 %v4987_v45 }
0x1fdb   :  { %4999 = vmatprep.subr.bf16.mxu1 %v5703_v0 }
0x2061   :  { %v3529_v30 = vpop.xlane.xlu0 %3528 }
0x2062   :  { %v3531_v48 = vmul.f32 0.03125, %v3529_v30  ;;  %v3526_v31 = vpop.xlane.xlu1 %3525 }
0x2063   :  { %v3530_v19 = vmul.f32 0.03125, %v3526_v31 }
0x2064   :  { %v3533_v32 = vsub.f32 %v3523_v5, %v3531_v48 }
0x2065   :  { %v3532_v33 = vsub.f32 %v3522_v24, %v3530_v19 }
0x2066   :  { %v3535_v36 = vmul.f32 %v3533_v32, %v3533_v32 }
0x2067   :  { %v3534_v34 = vmul.f32 %v3532_v33, %v3532_v33 }
0x2068   :  { %v3539_v37 = vsel %vm579_vm3, %v3535_v36, 0.0 }
0x2069   :  { %v3536_v9 = vsel %vm579_vm3, %v3534_v34, 0.0 }
0x206a   :  { %3537 = vadd.xlane.f32.xlu1 %v3536_v9 }
0x206e   :  { %3540 = vadd.xlane.f32.xlu1 %v3539_v37 }
0x20f7   :  { %v3538_v44 = vpop.xlane.xlu1 %3537 }
0x20f8   :  { %v3542_v46 = vmul.f32 0.03125, %v3538_v44 }
0x20fa   :  { %v3544_v47 = vadd.f32 1e-05, %v3542_v46 }
0x20fb   :  { %v3541_v50 = vpop.xlane.xlu1 %3540 }
0x20fc   :  { %5188 = vrsqrt.f32 %v3544_v47  ;;  %v3543_v29 = vmul.f32 0.03125, %v3541_v50 }
0x20fe   :  { %v3545_v51 = vadd.f32 1e-05, %v3543_v29 }
0x2100   :  { %5190 = vrsqrt.f32 %v3545_v51 }
0x2106   :  { %v5189_v52 = vpop.eup %5188 }
0x2107   :  { %v3548_v54 = vmul.f32 %v5189_v52, %v3532_v33 }
0x2109   :  { %v3557_v56 = vmul.f32 %v4366_v53, %v3548_v54 }
0x210a   :  { %v5191_v59 = vpop.eup %5190 }
0x210b   :  { %v3549_v60 = vmul.f32 %v5191_v59, %v3533_v32  ;;  %v3566_v58 = vadd.f32 %v4367_v55, %v3557_v56  ;;  %v4370_v56 = vld [vmem:[%s6619_s23] ss:$0 sm:$0xff] }
0x210d   :  { %v3558_v61 = vmul.f32 %v4366_v53, %v3549_v60  ;;  %3568 = vst.msk [vmem:[%s5954_s5] sm:$0xff] %vm579_vm3, %v3566_v58  ;;  %4805 = vmatprep.mubr.msk.f32.mxu0 %vm579_vm3, %v3566_v58  ;;  %4827 = vmatprep.mubr.msk.f32.mxu1 %vm579_vm3, %v3566_v58 }
0x210f   :  { %v3567_v63 = vadd.f32 %v4367_v55, %v3558_v61  ;;  %v4371_v61 = vld [vmem:[%s6620_s28] ss:$0 sm:$0xff] }
0x2111   :  { %3569 = vst.msk [vmem:[%s5954_s5 + $0x8] sm:$0xff] %vm579_vm3, %v3567_v63  ;;  %4806 = vmatmul.mubr.msk.f32.vlgmr.msra.gmra.mrb[30].mxu0 %vm579_vm3, %v3567_v63  ;;  %4828 = vmatmul.mubr.msk.f32.vlgmr.msra.gmra.mrb[36].mxu1 %vm579_vm3, %v3567_v63  ;;  %s6615_s5 = sld [smem:[#allocation58_spill]] }
0x2112   :  { %4857 = vmatprep.mubr.msk.f32.mxu1 %vm5704_vm0, %v5705_v1  ;;  %5002 = vmatpush3.bf16.xpose.msk.msra.mxu1 %vm6489_vm5, %v6037_v6 }
0x2113   :  { %5003 = vmatprep.subr.bf16.mxu1 %v5703_v0 }
0x2117   :  { %v3701_v39 = vld [vmem:[%s6615_s5] sm:$0xff]  ;;  %v3702_v40 = vld [vmem:[%s6615_s5 + $0x8] sm:$0xff]  ;;  %v3703_v42 = vld [vmem:[%s6615_s5 + $0x10] sm:$0xff] }
0x2118   :  { %v4975_v41 = vpack.c.bf16 %v3702_v40, %v3701_v39  ;;  %v3704_v62 = vld [vmem:[%s6615_s5 + $0x18] sm:$0xff] }
0x2119   :  { %v4979_v28 = vpack.c.bf16 %v3704_v62, %v3703_v42 }
0x211a   :  { %4976 = vmatprep.subr.bf16.mxu0 %v4975_v41  ;;  %5006 = vmatpush3.bf16.xpose.msk.msra.mxu1 %vm6489_vm5, %v6048_v14 }
0x211b   :  { %4978 = vmatpush3.bf16.msra.mxu0 %v4975_v41  ;;  %5007 = vmatprep.subr.bf16.mxu1 %v5703_v0 }
0x211c   :  { %4980 = vmatprep.subr.bf16.mxu0 %v4979_v28 }
0x211f   :  { %4982 = vmatpush3.bf16.msra.mxu0 %v4979_v28 }
0x2120   :  { %4992 = vmatprep.subr.bf16.mxu0 %v4991_v57 }
0x2122   :  { %5010 = vmatpush3.bf16.xpose.msk.msra.mxu1 %vm6489_vm5, %v6060_v20 }
0x2123   :  { %5011 = vmatprep.subr.bf16.mxu1 %v5703_v0 }
0x212a   :  { %5014 = vmatpush3.bf16.xpose.msk.msra.mxu1 %vm6489_vm5, %v6072_v26 }
0x21e4   :  { %v4807_v12 = vpop.f32.mrb[30].mxu0  ;;  %v4829_v49 = vpop.f32.mrb[36].mxu1 }
0x21e5   :  { %v3646_v3 = vpop.f32.mrb[31].mxu0  ;;  %v3866_v4 = vpop.f32.mrb[37].mxu1  ;;  %v3658_v8 = vsel %vm579_vm3, %v4807_v12, 0.0  ;;  %v3878_v2 = vsel %vm579_vm3, %v4829_v49, 0.0 }
0x21e6   :  { %3659 = vadd.xlane.f32.xlu1 %v3658_v8  ;;  %v3655_v7 = vsel %vm579_vm3, %v3646_v3, 0.0  ;;  %v3875_v11 = vsel %vm579_vm3, %v3866_v4, 0.0  ;;  %v3923_v8 = vld [vmem:[%s6616_s22 + $0x10] sm:$0xff] }
0x21ea   :  { %3656 = vadd.xlane.f32.xlu1 %v3655_v7  ;;  %v3924_v7 = vld [vmem:[%s6616_s22 + $0x18] sm:$0xff] }
0x21ee   :  { %3876 = vadd.xlane.f32.xlu1 %v3875_v11 }
0x21f2   :  { %3879 = vadd.xlane.f32.xlu1 %v3878_v2  ;;  %v4378_v2 = vld [vmem:[#allocation22] ss:$0 sm:$0xff] }
0x2273   :  { %v3660_v13 = vpop.xlane.xlu1 %3659 }
0x2274   :  { %v3662_v16 = vmul.f32 0.03125, %v3660_v13 }
0x2276   :  { %v3664_v17 = vsub.f32 %v4807_v12, %v3662_v16 }
0x2277   :  { %v3657_v18 = vpop.xlane.xlu1 %3656 }
0x2278   :  { %v3661_v5 = vmul.f32 0.03125, %v3657_v18  ;;  %v3666_v24 = vmul.f32 %v3664_v17, %v3664_v17 }
0x227a   :  { %v3663_v22 = vsub.f32 %v3646_v3, %v3661_v5  ;;  %v3670_v25 = vsel %vm579_vm3, %v3666_v24, 0.0  ;;  %v4377_v3 = vld [vmem:[#allocation23] ss:$0 sm:$0xff]  ;;  %v4995_v5 = vpack.c.bf16 %v3924_v7, %v3923_v8 }
0x227b   :  { %3671 = vadd.xlane.f32.xlu0 %v3670_v25  ;;  %v3877_v30 = vpop.xlane.xlu1 %3876 }
0x227c   :  { %v3881_v48 = vmul.f32 0.03125, %v3877_v30  ;;  %v3665_v31 = vmul.f32 %v3663_v22, %v3663_v22 }
0x227e   :  { %v6470_v19 = vsub.f32 %v3866_v4, %v3881_v48  ;;  %v3667_v32 = vsel %vm579_vm3, %v3665_v31, 0.0 }
0x227f   :  { %3668 = vadd.xlane.f32.xlu1 %v3667_v32  ;;  %v3880_v33 = vpop.xlane.xlu1 %3879 }
0x2280   :  { %v3882_v34 = vmul.f32 0.03125, %v3880_v33  ;;  %v3885_v9 = vmul.f32 %v6470_v19, %v6470_v19 }
0x2282   :  { %v6475_v36 = vsub.f32 %v4829_v49, %v3882_v34  ;;  %v3887_v37 = vsel %vm579_vm3, %v3885_v9, 0.0 }
0x2283   :  { %3888 = vadd.xlane.f32.xlu1 %v3887_v37 }
0x2284   :  { %v3886_v23 = vmul.f32 %v6475_v36, %v6475_v36 }
0x2286   :  { %v3890_v38 = vsel %vm579_vm3, %v3886_v23, 0.0 }
0x2287   :  { %3891 = vadd.xlane.f32.xlu0 %v3890_v38 }
0x2308   :  { %v3672_v44 = vpop.xlane.xlu0 %3671 }
0x2309   :  { %v3674_v6 = vmul.f32 0.03125, %v3672_v44 }
0x230b   :  { %v3676_v46 = vadd.f32 1e-05, %v3674_v6 }
0x230c   :  { %v3669_v47 = vpop.xlane.xlu1 %3668 }
0x230d   :  { %5192 = vrsqrt.f32 %v3676_v46  ;;  %v3673_v50 = vmul.f32 0.03125, %v3669_v47 }
0x230f   :  { %v3675_v14 = vadd.f32 1e-05, %v3673_v50 }
0x2310   :  { %v3889_v29 = vpop.xlane.xlu1 %3888 }
0x2311   :  { %5194 = vrsqrt.f32 %v3675_v14  ;;  %v3893_v51 = vmul.f32 0.03125, %v3889_v29 }
0x2313   :  { %v3895_v52 = vadd.f32 1e-05, %v3893_v51 }
0x2314   :  { %v3892_v20 = vpop.xlane.xlu0 %3891 }
0x2315   :  { %5196 = vrsqrt.f32 %v3895_v52  ;;  %v3894_v53 = vmul.f32 0.03125, %v3892_v20 }
0x2317   :  { %v5193_v54 = vpop.eup %5192  ;;  %v3896_v26 = vadd.f32 1e-05, %v3894_v53 }
0x2318   :  { %v3680_v55 = vmul.f32 %v5193_v54, %v3664_v17 }
0x2319   :  { %5198 = vrsqrt.f32 %v3896_v26 }
0x231a   :  { %v3689_v60 = vmul.f32 %v4370_v56, %v3680_v55 }
0x231b   :  { %v5195_v59 = vpop.eup %5194 }
0x231c   :  { %v3679_v58 = vmul.f32 %v5195_v59, %v3663_v22  ;;  %v3698_v49 = vadd.f32 %v4371_v61, %v3689_v60 }
0x231e   :  { %v3688_v63 = vmul.f32 %v4370_v56, %v3679_v58  ;;  %v3700_v17 = vmax.f32 %v3698_v49, 0.0 }
0x231f   :  { %v5197_v12 = vpop.eup %5196 }
0x2320   :  { %v3697_v4 = vadd.f32 %v4371_v61, %v3688_v63  ;;  %v3899_v11 = vmul.f32 %v5197_v12, %v6470_v19 }
0x2322   :  { %v3699_v13 = vmax.f32 %v3697_v4, 0.0  ;;  %v3908_v16 = vmul.f32 %v4377_v3, %v3899_v11 }
0x2323   :  { %v5199_v18 = vpop.eup %5198 }
0x2324   :  { %v3900_v24 = vmul.f32 %v5199_v18, %v6475_v36  ;;  %4816 = vmatprep.mubr.msk.f32.mxu0 %vm579_vm3, %v3699_v13  ;;  %v3917_v22 = vadd.f32 %v4378_v2, %v3908_v16 }
0x2325   :  { %4817 = vmatmul.mubr.msk.f32.vlgmr.msra.gmra.mrb[32].mxu0 %vm579_vm3, %v3700_v17 }
0x2326   :  { %4994 = vmatpush3.bf16.msra.mxu0 %v4991_v57  ;;  %v3909_v25 = vmul.f32 %v4377_v3, %v3900_v24  ;;  %v3919_v30 = vmax.f32 %v3917_v22, 0.0 }
0x2327   :  { %4996 = vmatprep.subr.bf16.mxu0 %v4995_v5 }
0x2328   :  { %v3918_v48 = vadd.f32 %v4378_v2, %v3909_v25  ;;  %4838 = vmatprep.mubr.msk.f32.mxu0 %vm579_vm3, %v3919_v30 }
0x232a   :  { %v3920_v31 = vmax.f32 %v3918_v48, 0.0  ;;  %4998 = vmatpush3.bf16.msra.mxu0 %v4995_v5 }
0x232b   :  { %5015 = vmatprep.subr.bf16.mxu0 %v5703_v0 }
0x232d   :  { %4839 = vmatmul.mubr.msk.f32.vlgmr.msra.gmra.mrb[34].mxu0 %vm579_vm3, %v3920_v31 }
0x232e   :  { %4876 = vmatprep.mubr.msk.f32.mxu0 %vm5704_vm0, %v5705_v1  ;;  %v4372_v1 = vld [vmem:[%s6621_s29] ss:$0 sm:$0xff] }
0x2333   :  { %5018 = vmatpush3.bf16.xpose.msk.msra.mxu0 %vm6489_vm5, %v6042_v10 }
0x2334   :  { %5019 = vmatprep.subr.bf16.mxu0 %v5703_v0 }
0x233b   :  { %5022 = vmatpush3.bf16.xpose.msk.msra.mxu0 %vm6489_vm5, %v6052_v15  ;;  %v4379_v15 = vld [vmem:[%s6622_s17] ss:$0 sm:$0xff] }
0x233c   :  { %5023 = vmatprep.subr.bf16.mxu0 %v5703_v0 }
0x2343   :  { %5026 = vmatpush3.bf16.xpose.msk.msra.mxu0 %vm6489_vm5, %v6064_v21 }
0x2344   :  { %5027 = vmatprep.subr.bf16.mxu0 %v5703_v0 }
0x234b   :  { %5030 = vmatpush3.bf16.xpose.msk.msra.mxu0 %vm6489_vm5, %v6076_v27 }
0x23f8   :  { %v4818_v10 = vpop.f32.mrb[32].mxu0 }
0x23f9   :  { %v3790_v19 = vadd.f32 %v4818_v10, %v4372_v1  ;;  %v3784_v32 = vpop.f32.mrb[33].mxu0 }
0x23fa   :  { %v3785_v33 = vadd.f32 %v4372_v1, %v3784_v32 }
0x23fb   :  { %3795 = vst.msk [vmem:[#allocation31 + $0x8] sm:$0xff] %vm3793_vm6, %v3790_v19 }
0x23fc   :  { %3794 = vst.msk [vmem:[#allocation31] sm:$0xff] %vm3793_vm6, %v3785_v33 }
0x2400   :  { %v4840_v34 = vpop.f32.mrb[34].mxu0 }
0x2401   :  { %v4010_v9 = vadd.f32 %v4840_v34, %v4379_v15  ;;  %v4004_v36 = vpop.f32.mrb[35].mxu0 }
0x2402   :  { %v4005_v37 = vadd.f32 %v4379_v15, %v4004_v36 }
0x2403   :  { %4877 = vmatmul.mubr.msk.f32.vlgmr.msra.gmra.mrb[36].mxu0 %vm579_vm3, %v4010_v9 }
0x2404   :  { %4858 = vmatmul.mubr.msk.f32.vlgmr.msra.gmra.mrb[38].mxu1 %vm579_vm3, %v4005_v37 }
0x2405   :  { %5607 = shalt.err (!%p5604_p8)
}
0x2406   :  { %s5608_s24 = scalar_lea.hbm %s5944_s25, 256 }
0x2407   :  { %p5609_p9 = scmp.ne.s32.totalorder %s5944_s25, %s5608_s24  ;;  %p5612_p10 = scmp.lt.u32.totalorder %s5608_s24, %s5944_s25 }
0x2409   :  { %p5614_p11 = pnand %p5612_p10, %p5609_p9 }
0x240b   :  { %5617 = shalt.err (!%p5614_p11)
}
0x240c   :  { %s5719_s4 = smov 128   ;;  %s5720_s2 = smov 8  }
0x240d   :  { %4224 = dma.vmem_to_hbm [thread:$0]  %s4219_s20, 256, %s5944_s25, [#allocation4], %s5719_s4, %s5719_s4, %s5720_s2  }
0x24d6   :  { %v4203_v0 = vpop.f32.mrb[36].mxu0 }
0x24d7   :  { %4208 = vrot.lane.b32.xlu1 %v4203_v0, %s5706_s26  ;;  %v4106_v21 = vpop.f32.mrb[38].mxu1  ;;  %v4878_v27 = vpop.f32.mrb[37].mxu0 }
0x24d8   :  { %v4859_v23 = vpop.f32.mrb[39].mxu1 }
0x2549   :  { %v4209_v38 = vpop.permute.xlu1 %4208 }
0x254a   :  { %v4211_v39 = vsel %vm420_vm1, %v4106_v21, %v4209_v38 }
0x254b   :  { %4212 = vst [vmem:[%s5949_s13] sm:$0xff] %v4211_v39 }
0x254c   :  { %5638 = dma.done.wait [#allocation4], 256  }
0x254d   :  { %5639 = vsyncadd [#allocation4], 4294967040 }
0x254e   :  { %4236 = vsyncpa [#allocation3], 1 }
0x254f   :  { %4237 = vsyncpa [#allocation6], 1 }
0x2550   :  { %4238 = vsyncpa [#allocation9], 1 }
0x2551   :  { %4239 = vsyncpa [#allocation12], 1 }
0x2552   :  { %4240 = vsyncpa [#allocation15], 1 }
0x2553   :  { %4241 = vsyncpa [#allocation18], 1 }
0x2554   :  { %4242 = vsyncpa [#allocation21], 1 }
0x2555   :  { %4243 = vsyncpa [#allocation24], 1 }
0x2556   :  { %4244 = vsyncpa [#allocation27], 1 }
0x2557   :  { %4245 = vsyncpa [#allocation30], 1 }
0x2558   :  { %4246 = vsyncpa [#allocation4], 1 }

// kernel: knet_inference.7
= control target key start
LH: loop header
LB: loop body
LE: loop exit
PB: predicated region body
PF: predicated region fallthrough
CT: control target
= control target key end

     0   :  { %s5746_s6 = smov 1   ;;  %s5747_s10 = smov 2   ;;  %s6665_s0 = inlined_call_operand.smem [shape: u32[46], index: -1, kind: input, shape index: {}] }
   0x1   :  { %s5838_s5 = sld [smem:[%s6665_s0]]   ;;  %s5748_s14 = smov 3  }
   0x2   :  { %s5843_s9 = sld [smem:[%s6665_s0 + %s5746_s6]]   ;;  %s5749_s18 = smov 4  }
   0x3   :  { %s5848_s13 = sld [smem:[%s6665_s0 + %s5747_s10]]   ;;  %s5750_s22 = smov 5  }
   0x4   :  { %s5853_s17 = sld [smem:[%s6665_s0 + %s5748_s14]]   ;;  %s5751_s26 = smov 6  }
   0x5   :  { %s5858_s21 = sld [smem:[%s6665_s0 + %s5749_s18]]   ;;  %s5752_s30 = smov 7  }
   0x6   :  { %s5863_s25 = sld [smem:[%s6665_s0 + %s5750_s22]]   ;;  %s5753_s4 = smov 8  }
   0x7   :  { %6686 = sst [smem:[#allocation48_spill]] %s5838_s5  ;;  %s5754_s10 = smov 9  }
   0x8   :  { %6687 = sst [smem:[#allocation49_spill]] %s5843_s9  ;;  %s5755_s15 = smov 10  }
   0x9   :  { %6688 = sst [smem:[#allocation50_spill]] %s5848_s13  ;;  %s5756_s20 = smov 11  }
   0xa   :  { %6689 = sst [smem:[#allocation51_spill]] %s5853_s17  ;;  %s5758_s1 = smov 13  }
   0xb   :  { %6690 = sst [smem:[#allocation52_spill]] %s5858_s21  ;;  %s5759_s7 = smov 14  }
   0xc   :  { %6691 = sst [smem:[#allocation53_spill]] %s5863_s25  ;;  %s5761_s22 = smov 16  }
   0xd   :  { %s5868_s29 = sld [smem:[%s6665_s0 + %s5751_s26]]   ;;  %s5757_s26 = smov 12  }
   0xe   :  { %s5873_s3 = sld [smem:[%s6665_s0 + %s5752_s30]]   ;;  %s5762_s28 = smov 17  }
   0xf   :  { %s5878_s8 = sld [smem:[%s6665_s0 + %s5753_s4]]  }
  0x10   :  { %s5883_s14 = sld [smem:[%s6665_s0 + %s5754_s10]]  }
  0x11   :  { %s5888_s19 = sld [smem:[%s6665_s0 + %s5755_s15]]   ;;  %s5760_s15 = smov 15  }
  0x12   :  { %s5893_s24 = sld [smem:[%s6665_s0 + %s5756_s20]]  }
  0x13   :  { %6692 = sst [smem:[#allocation54_spill]] %s5868_s29 }
  0x14   :  { %6693 = sst [smem:[#allocation55_spill]] %s5873_s3 }
  0x15   :  { %6694 = sst [smem:[#allocation56_spill]] %s5878_s8 }
  0x16   :  { %6695 = sst [smem:[#allocation57_spill]] %s5883_s14 }
  0x17   :  { %6696 = sst [smem:[#allocation58_spill]] %s5888_s19 }
  0x18   :  { %6697 = sst [smem:[#allocation59_spill]] %s5893_s24 }
  0x19   :  { %s5898_s30 = sld [smem:[%s6665_s0 + %s5757_s26]]  }
  0x1a   :  { %s5903_s6 = sld [smem:[%s6665_s0 + %s5758_s1]]  }
  0x1b   :  { %s5908_s12 = sld [smem:[%s6665_s0 + %s5759_s7]]   ;;  %s5763_s7 = smov 18  }
  0x1c   :  { %s5913_s20 = sld [smem:[%s6665_s0 + %s5760_s15]]   ;;  %s5764_s15 = smov 19  }
  0x1d   :  { %s5918_s27 = sld [smem:[%s6665_s0 + %s5761_s22]]   ;;  %s5765_s22 = smov 20  }
  0x1e   :  { %s5923_s4 = sld [smem:[%s6665_s0 + %s5762_s28]]   ;;  %s5766_s28 = smov 21  }
  0x1f   :  { %6698 = sst [smem:[#allocation60_spill]] %s5898_s30 }
  0x20   :  { %6699 = sst [smem:[#allocation61_spill]] %s5903_s6 }
  0x21   :  { %s5928_s19 = sld [smem:[%s6665_s0 + %s5763_s7]]   ;;  %s5767_s7 = smov 22  }
  0x22   :  { %6700 = sst [smem:[#allocation62_spill]] %s5913_s20 }
  0x23   :  { %s5933_s24 = sld [smem:[%s6665_s0 + %s5764_s15]]   ;;  %s5768_s15 = smov 23  }
  0x24   :  { %6701 = sst [smem:[#allocation63_spill]] %s5923_s4 }
  0x25   :  { %s5938_s20 = sld [smem:[%s6665_s0 + %s5765_s22]]   ;;  %s5769_s22 = smov 24  }
  0x26   :  { %s5943_s14 = sld [smem:[%s6665_s0 + %s5766_s28]]   ;;  %s5770_s28 = smov 25  }
  0x27   :  { %s5948_s17 = sld [smem:[%s6665_s0 + %s5767_s7]]   ;;  %s5771_s7 = smov 26  }
  0x28   :  { %s5958_s21 = sld [smem:[%s6665_s0 + %s5769_s22]]   ;;  %s5773_s22 = smov 28  }
  0x29   :  { %6702 = sst [smem:[#allocation64_spill]] %s5933_s24 }
  0x2a   :  { %s5953_s24 = sld [smem:[%s6665_s0 + %s5768_s15]]   ;;  %s5772_s15 = smov 27  }
  0x2b   :  { %s5963_s3 = sld [smem:[%s6665_s0 + %s5770_s28]]   ;;  %s5774_s28 = smov 29  }
  0x2c   :  { %s5968_s8 = sld [smem:[%s6665_s0 + %s5771_s7]]   ;;  %s5775_s7 = smov 30  }
  0x2d   :  { %s5978_s25 = sld [smem:[%s6665_s0 + %s5773_s22]]   ;;  %s5777_s22 = smov 32  }
  0x2e   :  { %s5988_s29 = sld [smem:[%s6665_s0 + %s5775_s7]]   ;;  %s5779_s7 = smov 34  }
  0x2f   :  { %s5998_s30 = sld [smem:[%s6665_s0 + %s5777_s22]]   ;;  %s5781_s22 = smov 36  }
  0x30   :  { %6703 = sst [smem:[#allocation65_spill]] %s5953_s24 }
  0x31   :  { %6704 = sst [smem:[#allocation66_spill]] %s5963_s3 }
  0x32   :  { %s5973_s24 = sld [smem:[%s6665_s0 + %s5772_s15]]   ;;  %s5776_s15 = smov 31  }
  0x33   :  { %s5983_s3 = sld [smem:[%s6665_s0 + %s5774_s28]]   ;;  %s5778_s28 = smov 33  }
  0x34   :  { %6707 = sst [smem:[#allocation69_spill]] %s5988_s29 }
  0x35   :  { %s5993_s4 = sld [smem:[%s6665_s0 + %s5776_s15]]   ;;  %s5780_s15 = smov 35  }
  0x36   :  { %s6008_s13 = sld [smem:[%s6665_s0 + %s5779_s7]]   ;;  %s5783_s7 = smov 38  }
  0x37   :  { %s6013_s6 = sld [smem:[%s6665_s0 + %s5780_s15]]   ;;  %s5784_s15 = smov 39  }
  0x38   :  { %6705 = sst [smem:[#allocation67_spill]] %s5973_s24 }
  0x39   :  { %6706 = sst [smem:[#allocation68_spill]] %s5983_s3 }
  0x3a   :  { %s6003_s3 = sld [smem:[%s6665_s0 + %s5778_s28]]   ;;  %s5782_s28 = smov 37  }
  0x3b   :  { %6708 = sst [smem:[#allocation70_spill]] %s5993_s4 }
  0x3c   :  { %s6018_s4 = sld [smem:[%s6665_s0 + %s5781_s22]]   ;;  %s5785_s22 = smov 40  }
  0x3d   :  { %6710 = sst [smem:[#allocation72_spill]] %s6013_s6 }
  0x3e   :  { %s6023_s5 = sld [smem:[%s6665_s0 + %s5782_s28]]   ;;  %s5786_s28 = smov 41  }
  0x3f   :  { %s6028_s9 = sld [smem:[%s6665_s0 + %s5783_s7]]   ;;  %s5787_s7 = smov 42  }
  0x40   :  { %6709 = sst [smem:[#allocation71_spill]] %s6003_s3 }
  0x41   :  { %s6033_s6 = sld [smem:[%s6665_s0 + %s5784_s15]]   ;;  %s5788_s15 = smov 43  }
  0x42   :  { %6711 = sst [smem:[#allocation73_spill]] %s6018_s4 }
  0x43   :  { %s6038_s4 = sld [smem:[%s6665_s0 + %s5785_s22]]   ;;  %s5789_s22 = smov 44  }
  0x44   :  { %s6043_s3 = sld [smem:[%s6665_s0 + %s5786_s28]]   ;;  %s5790_s28 = smov 45  }
  0x45   :  { %6712 = sst [smem:[#allocation74_spill]] %s6028_s9 }
  0x46   :  { %s6048_s9 = sld [smem:[%s6665_s0 + %s5787_s7]]  }
  0x47   :  { %s6053_s29 = sld [smem:[%s6665_s0 + %s5788_s15]]  }
  0x48   :  { %s6063_s24 = sld [smem:[%s6665_s0 + %s5790_s28]]  }
  0x49   :  { %6713 = sst [smem:[#allocation75_spill]] %s6038_s4 }
  0x4a   :  { %s6058_s4 = sld [smem:[%s6665_s0 + %s5789_s22]]  }
  0x4b   :  { %97 = vsyncpa [#allocation3], 0 }
  0x4c   :  { %98 = vsyncpa [#allocation6], 0 }
  0x4d   :  { %99 = vsyncpa [#allocation9], 0 }
  0x4e   :  { %100 = vsyncpa [#allocation12], 0 }
  0x4f   :  { %101 = vsyncpa [#allocation15], 0 }
  0x50   :  { %102 = vsyncpa [#allocation18], 0 }
  0x51   :  { %103 = vsyncpa [#allocation21], 0 }
  0x52   :  { %104 = vsyncpa [#allocation24], 0 }
  0x53   :  { %105 = vsyncpa [#allocation27], 0 }
  0x54   :  { %106 = vsyncpa [#allocation30], 0 }
  0x55   :  { %107 = vsyncpa [#allocation33], 0 }
  0x56   :  { %108 = vsyncpa [#allocation4], 0  ;;  %s5791_s7 = smov [#allocation5]   ;;  %s5792_s11 = smov [#allocation8]  }
  0x57   :  { %s155_s10 = sshll.u32 %s5791_s7, 4  ;;  %s179_s0 = sshll.u32 %s5792_s11, 4  ;;  %s156_s10 = int_to_ptr.vmem [resolvable:$true] %s155_s10  ;;  %s180_s0 = int_to_ptr.vmem [resolvable:$true] %s179_s0 }
  0x58   :  { %s5238_s15 = scalar_lea.hbm %s5918_s27, 16 }
  0x59   :  { %p5239_p0 = scmp.ne.s32.totalorder %s5918_s27, %s5238_s15  ;;  %p5242_p1 = scmp.lt.u32.totalorder %s5238_s15, %s5918_s27 }
  0x5b   :  { %p5244_p2 = pnand %p5242_p1, %p5239_p0 }
  0x5d   :  { %5247 = shalt.err (!%p5244_p2)
}
  0x5e   :  { %s5248_s16 = scalar_lea.vmem %s156_s10, 16  ;;  %s5252_s18 = scalar_lea.vmem %s156_s10, 32 }
  0x5f   :  { %p5249_p3 = scmp.ne.s32.totalorder %s156_s10, %s5248_s16  ;;  %p5253_p4 = scmp.lt.s32.totalorder %s156_s10, %s156_s10 }
  0x60   :  { %p5254_p5 = scmp.lt.s32.totalorder %s5252_s18, %s5248_s16 }
  0x62   :  { %p5255_p6 = por %p5254_p5, %p5253_p4 }
  0x64   :  { %p5256_p7 = pnand %p5255_p6, %p5249_p3 }
  0x66   :  { %5259 = shalt.err (!%p5256_p7)
}
  0x67   :  { %158 = dma.hbm_to_vmem [thread:$0]  %s5918_s27, 16, %s156_s10, [#allocation6]  }
  0x68   :  { %s5260_s22 = scalar_lea.hbm %s5938_s20, 16 }
  0x69   :  { %p5261_p8 = scmp.ne.s32.totalorder %s5938_s20, %s5260_s22  ;;  %p5264_p9 = scmp.lt.u32.totalorder %s5260_s22, %s5938_s20 }
  0x6b   :  { %p5266_p10 = pnand %p5264_p9, %p5261_p8 }
  0x6d   :  { %5269 = shalt.err (!%p5266_p10)
}
  0x6e   :  { %s5270_s23 = scalar_lea.vmem %s180_s0, 16  ;;  %s5274_s26 = scalar_lea.vmem %s180_s0, 32 }
  0x6f   :  { %p5271_p11 = scmp.ne.s32.totalorder %s180_s0, %s5270_s23  ;;  %p5275_p12 = scmp.lt.s32.totalorder %s180_s0, %s180_s0 }
  0x70   :  { %p5276_p13 = scmp.lt.s32.totalorder %s5274_s26, %s5270_s23 }
  0x72   :  { %p5277_p0 = por %p5276_p13, %p5275_p12 }
  0x74   :  { %p5278_p1 = pnand %p5277_p0, %p5271_p11 }
  0x76   :  { %5281 = shalt.err (!%p5278_p1)
}
  0x77   :  { %182 = dma.hbm_to_vmem [thread:$0]  %s5938_s20, 16, %s180_s0, [#allocation9]  }
  0x78   :  { %s5793_s28 = smov [#allocation11]   ;;  %s5794_s1 = smov [#allocation14]  }
  0x79   :  { %s199_s27 = sshll.u32 %s5793_s28, 4  ;;  %s223_s2 = sshll.u32 %s5794_s1, 4  ;;  %s200_s27 = int_to_ptr.vmem [resolvable:$true] %s199_s27  ;;  %s224_s2 = int_to_ptr.vmem [resolvable:$true] %s223_s2 }
  0x7a   :  { %s5282_s7 = scalar_lea.hbm %s5948_s17, 16 }
  0x7b   :  { %p5283_p2 = scmp.ne.s32.totalorder %s5948_s17, %s5282_s7  ;;  %p5286_p3 = scmp.lt.u32.totalorder %s5282_s7, %s5948_s17 }
  0x7d   :  { %p5288_p4 = pnand %p5286_p3, %p5283_p2 }
  0x7f   :  { %5291 = shalt.err (!%p5288_p4)
}
  0x80   :  { %s5292_s10 = scalar_lea.vmem %s200_s27, 16  ;;  %s5296_s11 = scalar_lea.vmem %s200_s27, 32 }
  0x81   :  { %p5293_p5 = scmp.ne.s32.totalorder %s200_s27, %s5292_s10  ;;  %p5297_p6 = scmp.lt.s32.totalorder %s200_s27, %s200_s27 }
  0x82   :  { %p5298_p7 = scmp.lt.s32.totalorder %s5296_s11, %s5292_s10 }
  0x84   :  { %p5299_p8 = por %p5298_p7, %p5297_p6 }
  0x86   :  { %p5300_p9 = pnand %p5299_p8, %p5293_p5 }
  0x88   :  { %5303 = shalt.err (!%p5300_p9)
}
  0x89   :  { %202 = dma.hbm_to_vmem [thread:$0]  %s5948_s17, 16, %s200_s27, [#allocation12]  }
  0x8a   :  { %s5304_s20 = scalar_lea.hbm %s5968_s8, 16 }
  0x8b   :  { %p5305_p10 = scmp.ne.s32.totalorder %s5968_s8, %s5304_s20  ;;  %p5308_p11 = scmp.lt.u32.totalorder %s5304_s20, %s5968_s8 }
  0x8d   :  { %p5310_p12 = pnand %p5308_p11, %p5305_p10 }
  0x8f   :  { %5313 = shalt.err (!%p5310_p12)
}
  0x90   :  { %s5314_s0 = scalar_lea.vmem %s224_s2, 16  ;;  %s5318_s15 = scalar_lea.vmem %s224_s2, 32 }
  0x91   :  { %p5315_p13 = scmp.ne.s32.totalorder %s224_s2, %s5314_s0  ;;  %p5319_p0 = scmp.lt.s32.totalorder %s224_s2, %s224_s2 }
  0x92   :  { %p5320_p1 = scmp.lt.s32.totalorder %s5318_s15, %s5314_s0 }
  0x94   :  { %p5321_p2 = por %p5320_p1, %p5319_p0 }
  0x96   :  { %p5322_p3 = pnand %p5321_p2, %p5315_p13 }
  0x98   :  { %5325 = shalt.err (!%p5322_p3)
}
  0x99   :  { %226 = dma.hbm_to_vmem [thread:$0]  %s5968_s8, 16, %s224_s2, [#allocation15]  }
  0x9a   :  { %s5795_s16 = smov [#allocation17]   ;;  %s5796_s18 = smov [#allocation20]  }
  0x9b   :  { %s243_s17 = sshll.u32 %s5795_s16, 4  ;;  %s267_s22 = sshll.u32 %s5796_s18, 4  ;;  %s244_s17 = int_to_ptr.vmem [resolvable:$true] %s243_s17  ;;  %s268_s22 = int_to_ptr.vmem [resolvable:$true] %s267_s22 }
  0x9c   :  { %s5326_s23 = scalar_lea.hbm %s5978_s25, 16 }
  0x9d   :  { %p5327_p4 = scmp.ne.s32.totalorder %s5978_s25, %s5326_s23  ;;  %p5330_p5 = scmp.lt.u32.totalorder %s5326_s23, %s5978_s25 }
  0x9f   :  { %p5332_p6 = pnand %p5330_p5, %p5327_p4 }
  0xa1   :  { %5335 = shalt.err (!%p5332_p6)
}
  0xa2   :  { %s5336_s26 = scalar_lea.vmem %s244_s17, 16  ;;  %s5340_s28 = scalar_lea.vmem %s244_s17, 32 }
  0xa3   :  { %p5337_p7 = scmp.ne.s32.totalorder %s244_s17, %s5336_s26  ;;  %p5341_p8 = scmp.lt.s32.totalorder %s244_s17, %s244_s17 }
  0xa4   :  { %p5342_p9 = scmp.lt.s32.totalorder %s5340_s28, %s5336_s26 }
  0xa6   :  { %p5343_p10 = por %p5342_p9, %p5341_p8 }
  0xa8   :  { %p5344_p11 = pnand %p5343_p10, %p5337_p7 }
  0xaa   :  { %5347 = shalt.err (!%p5344_p11)
}
  0xab   :  { %246 = dma.hbm_to_vmem [thread:$0]  %s5978_s25, 16, %s244_s17, [#allocation18]  }
  0xac   :  { %s5348_s8 = scalar_lea.hbm %s5998_s30, 16 }
  0xad   :  { %p5349_p12 = scmp.ne.s32.totalorder %s5998_s30, %s5348_s8  ;;  %p5352_p13 = scmp.lt.u32.totalorder %s5348_s8, %s5998_s30 }
  0xaf   :  { %p5354_p0 = pnand %p5352_p13, %p5349_p12 }
  0xb1   :  { %5357 = shalt.err (!%p5354_p0)
}
  0xb2   :  { %s5358_s27 = scalar_lea.vmem %s268_s22, 16  ;;  %s5362_s1 = scalar_lea.vmem %s268_s22, 32 }
  0xb3   :  { %p5359_p1 = scmp.ne.s32.totalorder %s268_s22, %s5358_s27  ;;  %p5363_p2 = scmp.lt.s32.totalorder %s268_s22, %s268_s22 }
  0xb4   :  { %p5364_p3 = scmp.lt.s32.totalorder %s5362_s1, %s5358_s27 }
  0xb6   :  { %p5365_p4 = por %p5364_p3, %p5363_p2 }
  0xb8   :  { %p5366_p5 = pnand %p5365_p4, %p5359_p1 }
  0xba   :  { %5369 = shalt.err (!%p5366_p5)
}
  0xbb   :  { %270 = dma.hbm_to_vmem [thread:$0]  %s5998_s30, 16, %s268_s22, [#allocation21]  }
  0xbc   :  { %s5797_s2 = smov [#allocation23]   ;;  %s5798_s7 = smov [#allocation26]  }
  0xbd   :  { %s287_s25 = sshll.u32 %s5797_s2, 4  ;;  %s309_s10 = sshll.u32 %s5798_s7, 4  ;;  %s288_s25 = int_to_ptr.vmem [resolvable:$true] %s287_s25  ;;  %s310_s10 = int_to_ptr.vmem [resolvable:$true] %s309_s10 }
  0xbe   :  { %s5370_s11 = scalar_lea.hbm %s6008_s13, 16 }
  0xbf   :  { %p5371_p6 = scmp.ne.s32.totalorder %s6008_s13, %s5370_s11  ;;  %p5374_p7 = scmp.lt.u32.totalorder %s5370_s11, %s6008_s13 }
  0xc1   :  { %p5376_p8 = pnand %p5374_p7, %p5371_p6 }
  0xc3   :  { %5379 = shalt.err (!%p5376_p8)
}
  0xc4   :  { %s5380_s20 = scalar_lea.vmem %s288_s25, 16  ;;  %s5384_s0 = scalar_lea.vmem %s288_s25, 32 }
  0xc5   :  { %p5381_p9 = scmp.ne.s32.totalorder %s288_s25, %s5380_s20  ;;  %p5385_p10 = scmp.lt.s32.totalorder %s288_s25, %s288_s25 }
  0xc6   :  { %p5386_p11 = scmp.lt.s32.totalorder %s5384_s0, %s5380_s20 }
  0xc8   :  { %p5387_p12 = por %p5386_p11, %p5385_p10 }
  0xca   :  { %p5388_p13 = pnand %p5387_p12, %p5381_p9 }
  0xcc   :  { %5391 = shalt.err (!%p5388_p13)
}
  0xcd   :  { %290 = dma.hbm_to_vmem [thread:$0]  %s6008_s13, 16, %s288_s25, [#allocation24]  }
  0xce   :  { %s5392_s30 = scalar_lea.hbm %s6023_s5, 16 }
  0xcf   :  { %p5393_p0 = scmp.ne.s32.totalorder %s6023_s5, %s5392_s30  ;;  %p5396_p1 = scmp.lt.u32.totalorder %s5392_s30, %s6023_s5 }
  0xd1   :  { %p5398_p2 = pnand %p5396_p1, %p5393_p0 }
  0xd3   :  { %5401 = shalt.err (!%p5398_p2)
}
  0xd4   :  { %s5402_s15 = scalar_lea.vmem %s310_s10, 16  ;;  %s5406_s16 = scalar_lea.vmem %s310_s10, 32 }
  0xd5   :  { %p5403_p3 = scmp.ne.s32.totalorder %s310_s10, %s5402_s15  ;;  %p5407_p4 = scmp.lt.s32.totalorder %s310_s10, %s310_s10 }
  0xd6   :  { %p5408_p5 = scmp.lt.s32.totalorder %s5406_s16, %s5402_s15 }
  0xd8   :  { %p5409_p6 = por %p5408_p5, %p5407_p4 }
  0xda   :  { %p5410_p7 = pnand %p5409_p6, %p5403_p3 }
  0xdc   :  { %5413 = shalt.err (!%p5410_p7)
}
  0xdd   :  { %312 = dma.hbm_to_vmem [thread:$0]  %s6023_s5, 16, %s310_s10, [#allocation27]  }
  0xde   :  { %s5799_s17 = smov [#allocation29]   ;;  %s5800_s18 = smov [#allocation32]  }
  0xdf   :  { %s329_s13 = sshll.u32 %s5799_s17, 4  ;;  %s349_s22 = sshll.u32 %s5800_s18, 4  ;;  %s330_s13 = int_to_ptr.vmem [resolvable:$true] %s329_s13  ;;  %s350_s22 = int_to_ptr.vmem [resolvable:$true] %s349_s22 }
  0xe0   :  { %s5414_s23 = scalar_lea.hbm %s6033_s6, 16 }
  0xe1   :  { %p5415_p8 = scmp.ne.s32.totalorder %s6033_s6, %s5414_s23  ;;  %p5418_p9 = scmp.lt.u32.totalorder %s5414_s23, %s6033_s6 }
  0xe3   :  { %p5420_p10 = pnand %p5418_p9, %p5415_p8 }
  0xe5   :  { %5423 = shalt.err (!%p5420_p10)
}
  0xe6   :  { %s5424_s26 = scalar_lea.vmem %s330_s13, 16  ;;  %s5428_s28 = scalar_lea.vmem %s330_s13, 32 }
  0xe7   :  { %p5425_p11 = scmp.ne.s32.totalorder %s330_s13, %s5424_s26  ;;  %p5429_p12 = scmp.lt.s32.totalorder %s330_s13, %s330_s13 }
  0xe8   :  { %p5430_p13 = scmp.lt.s32.totalorder %s5428_s28, %s5424_s26 }
  0xea   :  { %p5431_p0 = por %p5430_p13, %p5429_p12 }
  0xec   :  { %p5432_p1 = pnand %p5431_p0, %p5425_p11 }
  0xee   :  { %5435 = shalt.err (!%p5432_p1)
}
  0xef   :  { %332 = dma.hbm_to_vmem [thread:$0]  %s6033_s6, 16, %s330_s13, [#allocation30]  }
  0xf0   :  { %s5436_s5 = scalar_lea.hbm %s6043_s3, 16 }
  0xf1   :  { %p5437_p2 = scmp.ne.s32.totalorder %s6043_s3, %s5436_s5  ;;  %p5440_p3 = scmp.lt.u32.totalorder %s5436_s5, %s6043_s3 }
  0xf3   :  { %p5442_p4 = pnand %p5440_p3, %p5437_p2 }
  0xf5   :  { %5445 = shalt.err (!%p5442_p4)
}
  0xf6   :  { %s5446_s8 = scalar_lea.vmem %s350_s22, 16  ;;  %s5450_s27 = scalar_lea.vmem %s350_s22, 32 }
  0xf7   :  { %p5447_p5 = scmp.ne.s32.totalorder %s350_s22, %s5446_s8  ;;  %p5451_p6 = scmp.lt.s32.totalorder %s350_s22, %s350_s22 }
  0xf8   :  { %p5452_p7 = scmp.lt.s32.totalorder %s5450_s27, %s5446_s8 }
  0xfa   :  { %p5453_p8 = por %p5452_p7, %p5451_p6 }
  0xfc   :  { %p5454_p9 = pnand %p5453_p8, %p5447_p5 }
  0xfe   :  { %5457 = shalt.err (!%p5454_p9)
}
  0xff   :  { %352 = dma.hbm_to_vmem [thread:$0]  %s6043_s3, 16, %s350_s22, [#allocation33]  }
 0x100   :  { %s5801_s1 = smov [#allocation2]   ;;  %s5802_s2 = smov [#allocation7]  }
 0x101   :  { %s143_s6 = sshll.u32 %s5801_s1, 4  ;;  %s167_s25 = sshll.u32 %s5802_s2, 4  ;;  %s144_s6 = int_to_ptr.vmem [resolvable:$true] %s143_s6  ;;  %s168_s25 = int_to_ptr.vmem [resolvable:$true] %s167_s25 }
 0x102   :  { %s5458_s7 = scalar_lea.hbm %s5908_s12, 16 }
 0x103   :  { %p5459_p10 = scmp.ne.s32.totalorder %s5908_s12, %s5458_s7  ;;  %p5462_p11 = scmp.lt.u32.totalorder %s5458_s7, %s5908_s12 }
 0x105   :  { %p5464_p12 = pnand %p5462_p11, %p5459_p10 }
 0x107   :  { %5467 = shalt.err (!%p5464_p12)
}
 0x108   :  { %s5468_s10 = scalar_lea.vmem %s144_s6, 16  ;;  %s5472_s11 = scalar_lea.vmem %s144_s6, 32 }
 0x109   :  { %p5469_p13 = scmp.ne.s32.totalorder %s144_s6, %s5468_s10  ;;  %p5473_p0 = scmp.lt.s32.totalorder %s144_s6, %s144_s6 }
 0x10a   :  { %p5474_p1 = scmp.lt.s32.totalorder %s5472_s11, %s5468_s10 }
 0x10c   :  { %p5475_p2 = por %p5474_p1, %p5473_p0 }
 0x10e   :  { %p5476_p3 = pnand %p5475_p2, %p5469_p13 }
 0x110   :  { %5479 = shalt.err (!%p5476_p3)
}
 0x111   :  { %146 = dma.hbm_to_vmem [thread:$0]  %s5908_s12, 16, %s144_s6, [#allocation3]  }
 0x112   :  { %s5480_s3 = scalar_lea.hbm %s5928_s19, 16 }
 0x113   :  { %p5481_p4 = scmp.ne.s32.totalorder %s5928_s19, %s5480_s3  ;;  %p5484_p5 = scmp.lt.u32.totalorder %s5480_s3, %s5928_s19 }
 0x115   :  { %p5486_p6 = pnand %p5484_p5, %p5481_p4 }
 0x117   :  { %5489 = shalt.err (!%p5486_p6)
}
 0x118   :  { %s5490_s20 = scalar_lea.vmem %s168_s25, 16  ;;  %s5494_s0 = scalar_lea.vmem %s168_s25, 32 }
 0x119   :  { %p5491_p7 = scmp.ne.s32.totalorder %s168_s25, %s5490_s20  ;;  %p5495_p8 = scmp.lt.s32.totalorder %s168_s25, %s168_s25 }
 0x11a   :  { %p5496_p9 = scmp.lt.s32.totalorder %s5494_s0, %s5490_s20 }
 0x11c   :  { %p5497_p10 = por %p5496_p9, %p5495_p8 }
 0x11e   :  { %p5498_p11 = pnand %p5497_p10, %p5491_p7 }
 0x120   :  { %5501 = shalt.err (!%p5498_p11)
}
 0x121   :  { %170 = dma.hbm_to_vmem [thread:$0]  %s5928_s19, 16, %s168_s25, [#allocation6]  }
 0x122   :  { %s5803_s30 = smov [#allocation10]   ;;  %s5804_s15 = smov [#allocation13]  }
 0x123   :  { %s189_s12 = sshll.u32 %s5803_s30, 4  ;;  %s211_s16 = sshll.u32 %s5804_s15, 4  ;;  %s190_s12 = int_to_ptr.vmem [resolvable:$true] %s189_s12  ;;  %s212_s16 = int_to_ptr.vmem [resolvable:$true] %s211_s16 }
 0x124   :  { %s5502_s17 = scalar_lea.hbm %s5943_s14, 16 }
 0x125   :  { %p5503_p12 = scmp.ne.s32.totalorder %s5943_s14, %s5502_s17  ;;  %p5506_p13 = scmp.lt.u32.totalorder %s5502_s17, %s5943_s14 }
 0x127   :  { %p5508_p0 = pnand %p5506_p13, %p5503_p12 }
 0x129   :  { %5511 = shalt.err (!%p5508_p0)
}
 0x12a   :  { %s5512_s13 = scalar_lea.vmem %s190_s12, 16  ;;  %s5516_s18 = scalar_lea.vmem %s190_s12, 32 }
 0x12b   :  { %p5513_p1 = scmp.ne.s32.totalorder %s190_s12, %s5512_s13  ;;  %p5517_p2 = scmp.lt.s32.totalorder %s190_s12, %s190_s12 }
 0x12c   :  { %p5518_p3 = scmp.lt.s32.totalorder %s5516_s18, %s5512_s13 }
 0x12e   :  { %p5519_p4 = por %p5518_p3, %p5517_p2 }
 0x130   :  { %p5520_p5 = pnand %p5519_p4, %p5513_p1 }
 0x132   :  { %5523 = shalt.err (!%p5520_p5)
}
 0x133   :  { %192 = dma.hbm_to_vmem [thread:$0]  %s5943_s14, 16, %s190_s12, [#allocation9]  }
 0x134   :  { %s5524_s19 = scalar_lea.hbm %s5958_s21, 16 }
 0x135   :  { %p5525_p6 = scmp.ne.s32.totalorder %s5958_s21, %s5524_s19  ;;  %p5528_p7 = scmp.lt.u32.totalorder %s5524_s19, %s5958_s21 }
 0x137   :  { %p5530_p8 = pnand %p5528_p7, %p5525_p6 }
 0x139   :  { %5533 = shalt.err (!%p5530_p8)
}
 0x13a   :  { %s5534_s22 = scalar_lea.vmem %s212_s16, 16  ;;  %s5538_s23 = scalar_lea.vmem %s212_s16, 32 }
 0x13b   :  { %p5535_p9 = scmp.ne.s32.totalorder %s212_s16, %s5534_s22  ;;  %p5539_p10 = scmp.lt.s32.totalorder %s212_s16, %s212_s16 }
 0x13c   :  { %p5540_p11 = scmp.lt.s32.totalorder %s5538_s23, %s5534_s22 }
 0x13e   :  { %p5541_p12 = por %p5540_p11, %p5539_p10 }
 0x140   :  { %p5542_p13 = pnand %p5541_p12, %p5535_p9 }
 0x142   :  { %5545 = shalt.err (!%p5542_p13)
}
 0x143   :  { %s6714_s26 = sld [smem:[#allocation67_spill]]  ;;  %s5805_s28 = smov [#allocation16]  }
 0x144   :  { %214 = dma.hbm_to_vmem [thread:$0]  %s5958_s21, 16, %s212_s16, [#allocation12]  }
 0x145   :  { %s233_s14 = sshll.u32 %s5805_s28, 4  ;;  %s5806_s5 = smov [#allocation19]   ;;  %s234_s14 = int_to_ptr.vmem [resolvable:$true] %s233_s14 }
 0x146   :  { %s255_s8 = sshll.u32 %s5806_s5, 4  ;;  %s256_s8 = int_to_ptr.vmem [resolvable:$true] %s255_s8 }
 0x149   :  { %s5546_s27 = scalar_lea.hbm %s6714_s26, 16 }
 0x14a   :  { %p5547_p0 = scmp.ne.s32.totalorder %s6714_s26, %s5546_s27  ;;  %p5550_p1 = scmp.lt.u32.totalorder %s5546_s27, %s6714_s26 }
 0x14c   :  { %p5552_p2 = pnand %p5550_p1, %p5547_p0 }
 0x14e   :  { %5555 = shalt.err (!%p5552_p2)
}
 0x14f   :  { %s5556_s1 = scalar_lea.vmem %s234_s14, 16  ;;  %s5560_s6 = scalar_lea.vmem %s234_s14, 32 }
 0x150   :  { %p5557_p3 = scmp.ne.s32.totalorder %s234_s14, %s5556_s1  ;;  %p5561_p4 = scmp.lt.s32.totalorder %s234_s14, %s234_s14 }
 0x151   :  { %p5562_p5 = scmp.lt.s32.totalorder %s5560_s6, %s5556_s1 }
 0x153   :  { %p5563_p6 = por %p5562_p5, %p5561_p4 }
 0x155   :  { %p5564_p7 = pnand %p5563_p6, %p5557_p3 }
 0x157   :  { %5567 = shalt.err (!%p5564_p7)
}
 0x158   :  { %s6715_s21 = sld [smem:[#allocation69_spill]] }
 0x159   :  { %236 = dma.hbm_to_vmem [thread:$0]  %s6714_s26, 16, %s234_s14, [#allocation15]  }
 0x15e   :  { %s5568_s2 = scalar_lea.hbm %s6715_s21, 16 }
 0x15f   :  { %p5569_p8 = scmp.ne.s32.totalorder %s6715_s21, %s5568_s2  ;;  %p5572_p9 = scmp.lt.u32.totalorder %s5568_s2, %s6715_s21 }
 0x161   :  { %p5574_p10 = pnand %p5572_p9, %p5569_p8 }
 0x163   :  { %5577 = shalt.err (!%p5574_p10)
}
 0x164   :  { %s5578_s25 = scalar_lea.vmem %s256_s8, 16  ;;  %s5582_s7 = scalar_lea.vmem %s256_s8, 32 }
 0x165   :  { %p5579_p11 = scmp.ne.s32.totalorder %s256_s8, %s5578_s25  ;;  %p5583_p12 = scmp.lt.s32.totalorder %s256_s8, %s256_s8 }
 0x166   :  { %p5584_p13 = scmp.lt.s32.totalorder %s5582_s7, %s5578_s25 }
 0x168   :  { %p5585_p0 = por %p5584_p13, %p5583_p12 }
 0x16a   :  { %p5586_p1 = pnand %p5585_p0, %p5579_p11 }
 0x16c   :  { %5589 = shalt.err (!%p5586_p1)
}
 0x16d   :  { %s6716_s10 = sld [smem:[#allocation71_spill]]  ;;  %s5807_s11 = smov [#allocation22]  }
 0x16e   :  { %258 = dma.hbm_to_vmem [thread:$0]  %s6715_s21, 16, %s256_s8, [#allocation18]  }
 0x16f   :  { %s277_s3 = sshll.u32 %s5807_s11, 4  ;;  %s5808_s20 = smov [#allocation25]   ;;  %s278_s3 = int_to_ptr.vmem [resolvable:$true] %s277_s3 }
 0x170   :  { %s297_s0 = sshll.u32 %s5808_s20, 4  ;;  %s298_s0 = int_to_ptr.vmem [resolvable:$true] %s297_s0 }
 0x173   :  { %s5590_s30 = scalar_lea.hbm %s6716_s10, 16 }
 0x174   :  { %p5591_p2 = scmp.ne.s32.totalorder %s6716_s10, %s5590_s30  ;;  %p5594_p3 = scmp.lt.u32.totalorder %s5590_s30, %s6716_s10 }
 0x176   :  { %p5596_p4 = pnand %p5594_p3, %p5591_p2 }
 0x178   :  { %5599 = shalt.err (!%p5596_p4)
}
 0x179   :  { %s5600_s12 = scalar_lea.vmem %s278_s3, 16  ;;  %s5604_s15 = scalar_lea.vmem %s278_s3, 32 }
 0x17a   :  { %p5601_p5 = scmp.ne.s32.totalorder %s278_s3, %s5600_s12  ;;  %p5605_p6 = scmp.lt.s32.totalorder %s278_s3, %s278_s3 }
 0x17b   :  { %p5606_p7 = scmp.lt.s32.totalorder %s5604_s15, %s5600_s12 }
 0x17d   :  { %p5607_p8 = por %p5606_p7, %p5605_p6 }
 0x17f   :  { %p5608_p9 = pnand %p5607_p8, %p5601_p5 }
 0x181   :  { %5611 = shalt.err (!%p5608_p9)
}
 0x182   :  { %s6717_s16 = sld [smem:[#allocation72_spill]] }
 0x183   :  { %280 = dma.hbm_to_vmem [thread:$0]  %s6716_s10, 16, %s278_s3, [#allocation21]  }
 0x188   :  { %s5612_s17 = scalar_lea.hbm %s6717_s16, 16 }
 0x189   :  { %p5613_p10 = scmp.ne.s32.totalorder %s6717_s16, %s5612_s17  ;;  %p5616_p11 = scmp.lt.u32.totalorder %s5612_s17, %s6717_s16 }
 0x18b   :  { %p5618_p12 = pnand %p5616_p11, %p5613_p10 }
 0x18d   :  { %5621 = shalt.err (!%p5618_p12)
}
 0x18e   :  { %s5622_s13 = scalar_lea.vmem %s298_s0, 16  ;;  %s5626_s18 = scalar_lea.vmem %s298_s0, 32 }
 0x18f   :  { %p5623_p13 = scmp.ne.s32.totalorder %s298_s0, %s5622_s13  ;;  %p5627_p0 = scmp.lt.s32.totalorder %s298_s0, %s298_s0 }
 0x190   :  { %p5628_p1 = scmp.lt.s32.totalorder %s5626_s18, %s5622_s13 }
 0x192   :  { %p5629_p2 = por %p5628_p1, %p5627_p0 }
 0x194   :  { %p5630_p3 = pnand %p5629_p2, %p5623_p13 }
 0x196   :  { %5633 = shalt.err (!%p5630_p3)
}
 0x197   :  { %s6718_s19 = sld [smem:[#allocation74_spill]]  ;;  %s5809_s22 = smov [#allocation28]  }
 0x198   :  { %300 = dma.hbm_to_vmem [thread:$0]  %s6717_s16, 16, %s298_s0, [#allocation24]  }
 0x199   :  { %s319_s23 = sshll.u32 %s5809_s22, 4  ;;  %s5810_s26 = smov [#allocation31]   ;;  %s320_s23 = int_to_ptr.vmem [resolvable:$true] %s319_s23 }
 0x19a   :  { %s339_s28 = sshll.u32 %s5810_s26, 4  ;;  %s340_s28 = int_to_ptr.vmem [resolvable:$true] %s339_s28 }
 0x19d   :  { %s5634_s14 = scalar_lea.hbm %s6718_s19, 16 }
 0x19e   :  { %p5635_p4 = scmp.ne.s32.totalorder %s6718_s19, %s5634_s14  ;;  %p5638_p5 = scmp.lt.u32.totalorder %s5634_s14, %s6718_s19 }
 0x1a0   :  { %p5640_p6 = pnand %p5638_p5, %p5635_p4 }
 0x1a2   :  { %5643 = shalt.err (!%p5640_p6)
}
 0x1a3   :  { %s5644_s5 = scalar_lea.vmem %s320_s23, 16  ;;  %s5648_s8 = scalar_lea.vmem %s320_s23, 32 }
 0x1a4   :  { %p5645_p7 = scmp.ne.s32.totalorder %s320_s23, %s5644_s5  ;;  %p5649_p8 = scmp.lt.s32.totalorder %s320_s23, %s320_s23 }
 0x1a5   :  { %p5650_p9 = scmp.lt.s32.totalorder %s5648_s8, %s5644_s5 }
 0x1a7   :  { %p5651_p10 = por %p5650_p9, %p5649_p8 }
 0x1a9   :  { %p5652_p11 = pnand %p5651_p10, %p5645_p7 }
 0x1ab   :  { %5655 = shalt.err (!%p5652_p11)
}
 0x1ac   :  { %s6719_s27 = sld [smem:[#allocation75_spill]] }
 0x1ad   :  { %322 = dma.hbm_to_vmem [thread:$0]  %s6718_s19, 16, %s320_s23, [#allocation27]  }
 0x1b2   :  { %s5656_s1 = scalar_lea.hbm %s6719_s27, 16 }
 0x1b3   :  { %p5657_p12 = scmp.ne.s32.totalorder %s6719_s27, %s5656_s1  ;;  %p5660_p13 = scmp.lt.u32.totalorder %s5656_s1, %s6719_s27 }
 0x1b5   :  { %p5662_p0 = pnand %p5660_p13, %p5657_p12 }
 0x1b7   :  { %5665 = shalt.err (!%p5662_p0)
}
 0x1b8   :  { %s5666_s6 = scalar_lea.vmem %s340_s28, 16  ;;  %s5670_s21 = scalar_lea.vmem %s340_s28, 32 }
 0x1b9   :  { %p5667_p1 = scmp.ne.s32.totalorder %s340_s28, %s5666_s6  ;;  %p5671_p2 = scmp.lt.s32.totalorder %s340_s28, %s340_s28 }
 0x1ba   :  { %p5672_p3 = scmp.lt.s32.totalorder %s5670_s21, %s5666_s6 }
 0x1bc   :  { %p5673_p4 = por %p5672_p3, %p5671_p2 }
 0x1be   :  { %p5674_p5 = pnand %p5673_p4, %p5667_p1 }
 0x1c0   :  { %5677 = shalt.err (!%p5674_p5)
}
 0x1c1   :  { %342 = dma.hbm_to_vmem [thread:$0]  %s6719_s27, 16, %s340_s28, [#allocation30]  }
 0x1c2   :  { %s5811_s2 = smov [#allocation34]   ;;  %s5678_s7 = scalar_lea.hbm %s6048_s9, 16 }
 0x1c3   :  { %s359_s25 = sshll.u32 %s5811_s2, 4  ;;  %p5679_p6 = scmp.ne.s32.totalorder %s6048_s9, %s5678_s7  ;;  %s360_s25 = int_to_ptr.vmem [resolvable:$true] %s359_s25 }
 0x1c4   :  { %p5682_p7 = scmp.lt.u32.totalorder %s5678_s7, %s6048_s9 }
 0x1c6   :  { %p5684_p8 = pnand %p5682_p7, %p5679_p6 }
 0x1c8   :  { %5687 = shalt.err (!%p5684_p8)
}
 0x1c9   :  { %s5688_s10 = scalar_lea.vmem %s360_s25, 16  ;;  %s5692_s11 = scalar_lea.vmem %s360_s25, 32 }
 0x1ca   :  { %p5689_p9 = scmp.ne.s32.totalorder %s360_s25, %s5688_s10  ;;  %p5693_p10 = scmp.lt.s32.totalorder %s360_s25, %s360_s25 }
 0x1cb   :  { %p5694_p11 = scmp.lt.s32.totalorder %s5692_s11, %s5688_s10 }
 0x1cd   :  { %p5695_p12 = por %p5694_p11, %p5693_p10 }
 0x1cf   :  { %p5696_p13 = pnand %p5695_p12, %p5689_p9 }
 0x1d1   :  { %5699 = shalt.err (!%p5696_p13)
}
 0x1d2   :  { %362 = dma.hbm_to_vmem [thread:$0]  %s6048_s9, 16, %s360_s25, [#allocation33]  }
 0x1d3   :  { %5722 = dma.done.wait [#allocation3], 16  }
 0x1d4   :  { %5723 = vsyncadd [#allocation3], 4294967280 }
 0x1d5   :  { %5724 = dma.done.wait [#allocation6], 32  }
 0x1d6   :  { %5725 = vsyncadd [#allocation6], 4294967264 }
 0x1d7   :  { %5726 = dma.done.wait [#allocation9], 32  }
 0x1d8   :  { %5727 = vsyncadd [#allocation9], 4294967264 }
 0x1d9   :  { %5728 = dma.done.wait [#allocation12], 32  }
 0x1da   :  { %5729 = vsyncadd [#allocation12], 4294967264 }
 0x1db   :  { %5730 = dma.done.wait [#allocation15], 32  }
 0x1dc   :  { %5731 = vsyncadd [#allocation15], 4294967264 }
 0x1dd   :  { %5732 = dma.done.wait [#allocation18], 32  }
 0x1de   :  { %5733 = vsyncadd [#allocation18], 4294967264 }
 0x1df   :  { %5734 = dma.done.wait [#allocation21], 32  }
 0x1e0   :  { %5735 = vsyncadd [#allocation21], 4294967264 }
 0x1e1   :  { %5736 = dma.done.wait [#allocation24], 32  }
 0x1e2   :  { %5737 = vsyncadd [#allocation24], 4294967264 }
 0x1e3   :  { %5738 = dma.done.wait [#allocation27], 32  }
 0x1e4   :  { %5739 = vsyncadd [#allocation27], 4294967264 }
 0x1e5   :  { %5740 = dma.done.wait [#allocation30], 32  }
 0x1e6   :  { %5741 = vsyncadd [#allocation30], 4294967264 }
 0x1e7   :  { %5742 = dma.done.wait [#allocation33], 32  }
 0x1e8   :  { %5743 = vsyncadd [#allocation33], 4294967264  ;;  %s6720_s9 = sld [smem:[#allocation49_spill]]  ;;  %s6721_s3 = sld [smem:[#allocation48_spill]]  ;;  %v5812_v0 = vmov 0.0|0.0   ;;  %vm5813_vm0 = vmmov 0  }
 0x1e9   :  { %4914 = vmatprep.subr.bf16.mxu0 %v5812_v0  ;;  %4926 = vmatprep.subr.bf16.mxu1 %v5812_v0  ;;  %v5814_v1 = vmov 0.0   ;;  %s6722_s20 = sld [smem:[#allocation70_spill]]  ;;  %s6723_s0 = sld [smem:[#allocation61_spill]]  ;;  %vm454_vm1 = vcmask 523264   ;;  %vm613_vm3 = vcmask 261120   ;;  %vm1406_vm4 = vcmask 64512  }
 0x1ea   :  { %4605 = vmatprep.mubr.msk.f32.mxu0 %vm5813_vm0, %v5814_v1  ;;  %4624 = vmatprep.mubr.msk.f32.mxu1 %vm5813_vm0, %v5814_v1  ;;  %s6724_s30 = sld [smem:[#allocation50_spill]]  ;;  %s5815_s12 = smov 64   ;;  %v4334_v54 = vld [vmem:[#allocation19] ss:$0 sm:$0xff]  ;;  %vm6607_vm5 = vmpackc.low %vm613_vm3, %vm613_vm3  ;;  %vm3827_vm6 = vcmask 31744  }
 0x1eb   :  { %s6725_s15 = sld [smem:[#allocation68_spill]]  ;;  %s5816_s17 = smov 96  }
 0x1ec   :  { %s6726_s16 = sld [smem:[#allocation60_spill]]  ;;  %s5817_s13 = smov 32  }
 0x1ed   :  { %s6727_s18 = sld [smem:[#allocation63_spill]]  ;;  %s6728_s19 = sld [smem:[#allocation54_spill]] }
 0x1ee   :  { %v442_v2 = vld [vmem:[%s6720_s9] sm:$0xff]  ;;  %v427_v4 = vld [vmem:[%s6721_s3 + $0x8] sm:$0xff]  ;;  %v428_v9 = vld [vmem:[%s6721_s3 + $0x10] sm:$0xff]  ;;  %s6729_s22 = sld [smem:[#allocation53_spill]]  ;;  %s5818_s23 = smov 88  }
 0x1ef   :  { %v426_v3 = vld [vmem:[%s6721_s3] sm:$0xff]  ;;  %v4327_v5 = vmul.f32 -1.442695, %v442_v2  ;;  %v435_v8 = vld [vmem:[%s6721_s3 + $0x48] sm:$0xff]  ;;  %v429_v11 = vld [vmem:[%s6721_s3 + $0x18] sm:$0xff]  ;;  %s5819_s26 = smov 120  }
 0x1f0   :  { %v6158_v6 = vpack.c.bf16 %v427_v4, %v426_v3  ;;  %v434_v7 = vld [vmem:[%s6721_s3 + $0x40] sm:$0xff]  ;;  %v436_v12 = vld [vmem:[%s6721_s3 + $0x50] sm:$0xff]  ;;  %v437_v13 = vld [vmem:[%s6721_s3 + $0x58] sm:$0xff]  ;;  %v6169_v14 = vpack.c.bf16 %v429_v11, %v428_v9  ;;  %s6730_s28 = sld [smem:[#allocation56_spill]]  ;;  %s5820_s14 = smov 80  }
 0x1f1   :  { %v6163_v10 = vpack.c.bf16 %v435_v8, %v434_v7  ;;  %5150 = vpow2.f32 %v4327_v5  ;;  %v6173_v15 = vpack.c.bf16 %v437_v13, %v436_v12  ;;  %v430_v16 = vld [vmem:[%s6721_s3 + $0x20] sm:$0xff]  ;;  %v431_v17 = vld [vmem:[%s6721_s3 + $0x28] sm:$0xff]  ;;  %v432_v22 = vld [vmem:[%s6721_s3 + $0x30] sm:$0xff]  ;;  %s5821_s5 = smov 112   ;;  %s5822_s8 = smov 56  }
 0x1f2   :  { %4916 = vmatpush3.bf16.msra.mxu0 %v6158_v6  ;;  %v438_v18 = vld [vmem:[%s6721_s3 + $0x60] sm:$0xff]  ;;  %v439_v19 = vld [vmem:[%s6721_s3 + $0x68] sm:$0xff]  ;;  %v6181_v20 = vpack.c.bf16 %v431_v17, %v430_v16  ;;  %v433_v23 = vld [vmem:[%s6721_s3 + $0x38] sm:$0xff]  ;;  %s5823_s27 = smov 48   ;;  %s5824_s1 = smov 104  }
 0x1f3   :  { %4928 = vmatpush3.bf16.msra.mxu1 %v6163_v10  ;;  %4917 = vmatprep.subr.bf16.mxu0 %v5812_v0  ;;  %v6185_v21 = vpack.c.bf16 %v439_v19, %v438_v18  ;;  %v440_v24 = vld [vmem:[%s6721_s3 + $0x70] sm:$0xff]  ;;  %v441_v25 = vld [vmem:[%s6721_s3 + $0x78] sm:$0xff]  ;;  %v6193_v26 = vpack.c.bf16 %v433_v23, %v432_v22  ;;  %v695_v28 = vld [vmem:[%s6722_s20] sm:$0xff]  ;;  %s5825_s6 = smov 72   ;;  %s5826_s21 = smov 40  }
 0x1f4   :  { %4929 = vmatprep.subr.bf16.mxu1 %v5812_v0  ;;  %v6197_v27 = vpack.c.bf16 %v441_v25, %v440_v24  ;;  %v696_v29 = vld [vmem:[%s6722_s20 + $0x8] sm:$0xff]  ;;  %v602_v33 = vld [vmem:[%s6723_s0] sm:$0xff]  ;;  %v604_v35 = vld [vmem:[%s6723_s0 + $0x10] sm:$0xff]  ;;  %s6731_s2 = sld [smem:[#allocation55_spill]]  ;;  %s6732_s25 = sld [smem:[#allocation52_spill]] }
 0x1f5   :  { %v4946_v31 = vpack.c.bf16 %v696_v29, %v695_v28  ;;  %v603_v34 = vld [vmem:[%s6723_s0 + $0x8] sm:$0xff]  ;;  %v605_v37 = vld [vmem:[%s6723_s0 + $0x18] sm:$0xff]  ;;  %v697_v41 = vld [vmem:[%s6722_s20 + $0x10] sm:$0xff]  ;;  %s6733_s7 = sld [smem:[#allocation51_spill]]  ;;  %s6734_s10 = sld [smem:[#allocation65_spill]] }
 0x1f6   :  { %4919 = vmatpush3.bf16.msra.mxu0 %v6169_v14  ;;  %v4938_v36 = vpack.c.bf16 %v603_v34, %v602_v33  ;;  %v4942_v39 = vpack.c.bf16 %v605_v37, %v604_v35  ;;  %v698_v42 = vld [vmem:[%s6722_s20 + $0x18] sm:$0xff]  ;;  %v443_v44 = vld [vmem:[%s6724_s30] sm:$0xff]  ;;  %v444_v46 = vld [vmem:[%s6724_s30 + $0x8] sm:$0xff]  ;;  %s6735_s11 = sld [smem:[#allocation66_spill]]  ;;  %s6736_s9 = sld [smem:[#allocation57_spill]] }
 0x1f7   :  { %4931 = vmatpush3.bf16.msra.mxu1 %v6173_v15  ;;  %4920 = vmatprep.subr.bf16.mxu0 %v5812_v0  ;;  %v4950_v43 = vpack.c.bf16 %v698_v42, %v697_v41  ;;  %v789_v50 = vld [vmem:[%s6725_s15] sm:$0xff]  ;;  %v790_v51 = vld [vmem:[%s6725_s15 + $0x8] sm:$0xff]  ;;  %v791_v59 = vld [vmem:[%s6725_s15 + $0x10] sm:$0xff]  ;;  %s6737_s3 = sld [smem:[#allocation73_spill]]  ;;  %s6738_s20 = sld [smem:[#allocation62_spill]] }
 0x1f8   :  { %4932 = vmatprep.subr.bf16.mxu1 %v5812_v0  ;;  %v4954_v53 = vpack.c.bf16 %v790_v51, %v789_v50  ;;  %v792_v60 = vld [vmem:[%s6725_s15 + $0x18] sm:$0xff]  ;;  %v4331_v4 = vld [vmem:[%s6726_s16] ss:$0 sm:$0xff]  ;;  %v4337_v16 = vld [vmem:[#allocation17] ss:$0 sm:$0xff]  ;;  %s6739_s0 = sld [smem:[#allocation64_spill]] }
 0x1f9   :  { %v4958_v61 = vpack.c.bf16 %v792_v60, %v791_v59  ;;  %s6742_s30 = sld [smem:[#allocation59_spill]]  ;;  %s6743_s15 = sld [smem:[#allocation58_spill]] }
 0x1fa   :  { %4922 = vmatpush3.bf16.msra.mxu0 %v6181_v20  ;;  %s5827_s16 = smov [#allocation35]  }
 0x1fb   :  { %4934 = vmatpush3.bf16.msra.mxu1 %v6185_v21  ;;  %4923 = vmatprep.subr.bf16.mxu0 %v5812_v0  ;;  %v5151_v30 = vpop.eup %5150 }
 0x1fc   :  { %4935 = vmatprep.subr.bf16.mxu1 %v5812_v0  ;;  %v448_v32 = vadd.f32 1.0, %v5151_v30 }
 0x1fe   :  { %4925 = vmatpush3.bf16.msra.mxu0 %v6193_v26  ;;  %5152 = vrcp.f32 %v448_v32 }
 0x1ff   :  { %4937 = vmatpush3.bf16.msra.mxu1 %v6197_v27  ;;  %4939 = vmatprep.subr.bf16.mxu0 %v4938_v36 }
 0x200   :  { %4947 = vmatprep.subr.bf16.mxu1 %v4946_v31 }
 0x208   :  { %v5153_v38 = vpop.eup %5152 }
 0x209   :  { %vm451_vm2 = vcmp.gt.f32.partialorder %v5153_v38, 0.5 }
 0x20a   :  { %v4328_v40 = vsel %vm451_vm2, 1.0, %v5814_v1 }
 0x20b   :  { %528 = vrot.lane.b32.xlu0 %v4328_v40, %s5815_s12  ;;  %4606 = vmatmul.mubr.msk.f32.vlgmr.msra.gmra.mrb[0].mxu0 %vm454_vm1, %v4328_v40 }
 0x20c   :  { %4941 = vmatpush3.bf16.msra.mxu0 %v4938_v36 }
 0x20d   :  { %4943 = vmatprep.subr.bf16.mxu0 %v4942_v39 }
 0x210   :  { %4945 = vmatpush3.bf16.msra.mxu0 %v4942_v39 }
 0x211   :  { %4955 = vmatprep.subr.bf16.mxu0 %v4954_v53 }
 0x27d   :  { %v529_v45 = vpop.permute.xlu0 %528 }
 0x27e   :  { %4625 = vmatmul.mubr.msk.f32.vlgmr.msra.gmra.mrb[0].mxu1 %vm454_vm1, %v529_v45 }
 0x27f   :  { %4949 = vmatpush3.bf16.msra.mxu1 %v4946_v31  ;;  %4646 = vmatprep.mubr.msk.f32.mxu1 %vm613_vm3, %v443_v44 }
 0x280   :  { %4951 = vmatprep.subr.bf16.mxu1 %v4950_v43 }
 0x283   :  { %4953 = vmatpush3.bf16.msra.mxu1 %v4950_v43 }
 0x286   :  { %4647 = vmatmul.mubr.msk.f32.vlgmr.msra.gmra.mrb[2].mxu1 %vm613_vm3, %v444_v46  ;;  %v4350_v46 = vld [vmem:[#allocation25] ss:$0 sm:$0xff] }
 0x2de   :  { %v524_v47 = vpop.f32.mrb[0].mxu0 }
 0x2df   :  { %v4607_v48 = vpop.f32.mrb[1].mxu0  ;;  %4635 = vmatprep.mubr.msk.f32.mxu0 %vm613_vm3, %v524_v47 }
 0x351   :  { %v598_v49 = vpop.f32.mrb[0].mxu1 }
 0x352   :  { %v4626_v52 = vpop.f32.mrb[1].mxu1  ;;  %4636 = vmatmul.mubr.msk.f32.vlgmr.msra.gmra.mrb[2].mxu0 %vm613_vm3, %v598_v49 }
 0x353   :  { %4957 = vmatpush3.bf16.msra.mxu0 %v4954_v53  ;;  %v4351_v52 = vld [vmem:[#allocation23] ss:$0 sm:$0xff] }
 0x354   :  { %4959 = vmatprep.subr.bf16.mxu0 %v4958_v61 }
 0x357   :  { %4961 = vmatpush3.bf16.msra.mxu0 %v4958_v61 }
 0x359   :  { %v4648_v55 = vpop.f32.mrb[2].mxu1 }
 0x35a   :  { %v784_v56 = vadd.f32 %v4648_v55, %v4334_v54  ;;  %v778_v57 = vpop.f32.mrb[3].mxu1 }
 0x35b   :  { %v779_v58 = vadd.f32 %v4334_v54, %v778_v57 }
 0x35c   :  { %1082 = vrot.lane.b32.xlu1 %v784_v56, %s5816_s17 }
 0x35d   :  { %1080 = vrot.lane.b32.xlu0 %v779_v58, %s5816_s17 }
 0x3ce   :  { %v1083_v62 = vpop.permute.xlu1 %1082 }
 0x3cf   :  { %v1081_v63 = vpop.permute.xlu0 %1080  ;;  %v1089_v2 = vsel %vm613_vm3, %v1083_v62, 0.0 }
 0x3d0   :  { %1090 = vadd.xlane.f32.xlu0 %v1089_v2  ;;  %v1086_v3 = vsel %vm613_vm3, %v1081_v63, 0.0 }
 0x3d1   :  { %1087 = vadd.xlane.f32.xlu1 %v1086_v3 }
 0x425   :  { %v4637_v5 = vpop.f32.mrb[2].mxu0 }
 0x426   :  { %v6229_v7 = vadd.f32 %v4637_v5, %v4331_v4  ;;  %v686_v8 = vpop.f32.mrb[3].mxu0 }
 0x427   :  { %v6231_v9 = vadd.f32 %v4331_v4, %v686_v8 }
 0x428   :  { %v788_v12 = vmul.f32 %v784_v56, %v6229_v7 }
 0x429   :  { %v787_v11 = vmul.f32 %v779_v58, %v6231_v9 }
 0x42b   :  { %4657 = vmatprep.mubr.msk.f32.mxu0 %vm613_vm3, %v787_v11 }
 0x42c   :  { %4658 = vmatmul.mubr.msk.f32.vlgmr.msra.gmra.mrb[4].mxu0 %vm613_vm3, %v788_v12 }
 0x45d   :  { %v1091_v17 = vpop.xlane.xlu0 %1090 }
 0x45e   :  { %v1088_v13 = vpop.xlane.xlu1 %1087  ;;  %v1093_v24 = vmul.f32 0.03125, %v1091_v17 }
 0x45f   :  { %v1092_v19 = vmul.f32 0.03125, %v1088_v13 }
 0x460   :  { %v6244_v29 = vsub.f32 %v784_v56, %v1093_v24 }
 0x461   :  { %v6242_v28 = vsub.f32 %v779_v58, %v1092_v19 }
 0x462   :  { %v1097_v31 = vmul.f32 %v6244_v29, %v6244_v29 }
 0x463   :  { %v1096_v30 = vmul.f32 %v6242_v28, %v6242_v28 }
 0x4ff   :  { %v4659_v18 = vpop.f32.mrb[4].mxu0 }
 0x500   :  { %v6237_v22 = vadd.f32 %v4659_v18, %v4337_v16  ;;  %v872_v23 = vpop.f32.mrb[5].mxu0 }
 0x501   :  { %v873_v25 = vadd.f32 %v4337_v16, %v872_v23 }
 0x502   :  { %942 = vrot.lane.b32.xlu1 %v6237_v22, %s5816_s17  ;;  %v884_v39 = vsel %vm613_vm3, %v6237_v22, 0.0 }
 0x503   :  { %940 = vrot.lane.b32.xlu0 %v873_v25, %s5816_s17  ;;  %v881_v32 = vsel %vm613_vm3, %v873_v25, 0.0 }
 0x506   :  { %1016 = vrot.lane.b32.xlu1 %v6231_v9, %s5816_s17 }
 0x507   :  { %1018 = vrot.lane.b32.xlu0 %v6229_v7, %s5816_s17 }
 0x50a   :  { %1100 = vrot.lane.b32.xlu1 %v1096_v30, %s5816_s17 }
 0x50b   :  { %1102 = vrot.lane.b32.xlu0 %v1097_v31, %s5816_s17 }
 0x52e   :  { %882 = vadd.xlane.f32.xlu1 %v881_v32 }
 0x574   :  { %v943_v33 = vpop.permute.xlu1 %942 }
 0x575   :  { %v941_v34 = vpop.permute.xlu0 %940  ;;  %v949_v35 = vsel %vm613_vm3, %v943_v33, 0.0 }
 0x576   :  { %950 = vadd.xlane.f32.xlu1 %v949_v35  ;;  %v946_v36 = vsel %vm613_vm3, %v941_v34, 0.0 }
 0x577   :  { %947 = vadd.xlane.f32.xlu0 %v946_v36 }
 0x578   :  { %v1017_v37 = vpop.permute.xlu1 %1016 }
 0x579   :  { %v1019_v38 = vpop.permute.xlu0 %1018  ;;  %v1022_v42 = vsel %vm613_vm3, %v1017_v37, 0.0 }
 0x57a   :  { %v1025_v40 = vsel %vm613_vm3, %v1019_v38, 0.0 }
 0x57b   :  { %885 = vadd.xlane.f32.xlu0 %v884_v39  ;;  %1026 = vadd.xlane.f32.xlu1 %v1025_v40 }
 0x57c   :  { %v1101_v44 = vpop.permute.xlu1 %1100 }
 0x57d   :  { %v1103_v41 = vpop.permute.xlu0 %1102  ;;  %v1106_v45 = vsel %vm613_vm3, %v1101_v44, 0.0  ;;  %v4349_v44 = vld [vmem:[#allocation32] ss:$0 sm:$0xff] }
 0x57e   :  { %v1109_v43 = vsel %vm613_vm3, %v1103_v41, 0.0 }
 0x57f   :  { %1023 = vadd.xlane.f32.xlu0 %v1022_v42  ;;  %1110 = vadd.xlane.f32.xlu1 %v1109_v43 }
 0x583   :  { %1107 = vadd.xlane.f32.xlu0 %v1106_v45 }
 0x590   :  { %1126 = vrot.lane.b32.xlu1 %v4350_v46, %s5817_s13 }
 0x5bb   :  { %v883_v47 = vpop.xlane.xlu1 %882 }
 0x5bc   :  { %v888_v48 = vmul.f32 0.03125, %v883_v47  ;;  %v4340_v47 = vld [vmem:[#allocation22] ss:$0 sm:$0xff] }
 0x5be   :  { %v6266_v49 = vsub.f32 %v873_v25, %v888_v48 }
 0x5c0   :  { %v892_v50 = vmul.f32 %v6266_v49, %v6266_v49 }
 0x5c2   :  { %v894_v51 = vsel %vm613_vm3, %v892_v50, 0.0  ;;  %v4341_v50 = vld [vmem:[#allocation20] ss:$0 sm:$0xff] }
 0x5c3   :  { %895 = vadd.xlane.f32.xlu1 %v894_v51 }
 0x5d4   :  { %1137 = vrot.lane.b32.xlu1 %v4351_v52, %s5817_s13 }
 0x603   :  { %v951_v53 = vpop.xlane.xlu1 %950 }
 0x604   :  { %v953_v54 = vmul.f32 0.03125, %v951_v53  ;;  %v948_v55 = vpop.xlane.xlu0 %947 }
 0x605   :  { %v952_v56 = vmul.f32 0.03125, %v948_v55 }
 0x606   :  { %v6273_v57 = vsub.f32 %v6237_v22, %v953_v54 }
 0x607   :  { %v6275_v58 = vsub.f32 %v873_v25, %v952_v56 }
 0x608   :  { %v1027_v59 = vpop.xlane.xlu1 %1026  ;;  %v957_v60 = vmul.f32 %v6273_v57, %v6273_v57  ;;  %v886_v3 = vpop.xlane.xlu0 %885 }
 0x609   :  { %v1029_v61 = vmul.f32 0.03125, %v1027_v59  ;;  %v956_v63 = vmul.f32 %v6275_v58, %v6275_v58  ;;  %v889_v4 = vmul.f32 0.03125, %v886_v3 }
 0x60a   :  { %962 = vrot.lane.b32.xlu0 %v957_v60, %s5816_s17 }
 0x60b   :  { %v6281_v62 = vsub.f32 %v6229_v7, %v1029_v61  ;;  %v6290_v5 = vsub.f32 %v6237_v22, %v889_v4 }
 0x60c   :  { %v1024_v11 = vpop.xlane.xlu0 %1023  ;;  %v1111_v12 = vpop.xlane.xlu1 %1110 }
 0x60d   :  { %v1033_v2 = vmul.f32 %v6281_v62, %v6281_v62  ;;  %v893_v8 = vmul.f32 %v6290_v5, %v6290_v5  ;;  %v1028_v16 = vmul.f32 0.03125, %v1024_v11  ;;  %v1113_v17 = vmul.f32 0.03125, %v1111_v12  ;;  %v4345_v11 = vld [vmem:[#allocation29] ss:$0 sm:$0xff]  ;;  %v4348_v12 = vld [vmem:[#allocation34] ss:$0 sm:$0xff] }
 0x60e   :  { %960 = vrot.lane.b32.xlu0 %v956_v63, %s5816_s17 }
 0x60f   :  { %1038 = vrot.lane.b32.xlu1 %v1033_v2, %s5816_s17  ;;  %v897_v7 = vsel %vm613_vm3, %v893_v8, 0.0  ;;  %v6296_v19 = vsub.f32 %v6231_v9, %v1028_v16  ;;  %v1115_v23 = vadd.f32 1e-05, %v1113_v17 }
 0x610   :  { %v1108_v13 = vpop.xlane.xlu0 %1107  ;;  %v1127_v31 = vpop.permute.xlu1 %1126 }
 0x611   :  { %v1112_v18 = vmul.f32 0.03125, %v1108_v13  ;;  %5154 = vrsqrt.f32 %v1115_v23  ;;  %v1032_v22 = vmul.f32 %v6296_v19, %v6296_v19 }
 0x613   :  { %v1114_v24 = vadd.f32 1e-05, %v1112_v18 }
 0x615   :  { %5156 = vrsqrt.f32 %v1114_v24 }
 0x61b   :  { %v5155_v25 = vpop.eup %5154 }
 0x61c   :  { %v1119_v33 = vmul.f32 %v5155_v25, %v6244_v29  ;;  %v4344_v29 = vld [vmem:[#allocation31] ss:$0 sm:$0xff] }
 0x61e   :  { %v1130_v9 = vmul.f32 %v1127_v31, %v1119_v33 }
 0x61f   :  { %v5157_v30 = vpop.eup %5156 }
 0x620   :  { %v1118_v32 = vmul.f32 %v5157_v30, %v6242_v28 }
 0x622   :  { %v1129_v35 = vmul.f32 %v1127_v31, %v1118_v32 }
 0x62d   :  { %898 = vadd.xlane.f32.xlu0 %v897_v7 }
 0x643   :  { %1036 = vrot.lane.b32.xlu0 %v1032_v22, %s5816_s17 }
 0x650   :  { %v896_v34 = vpop.xlane.xlu1 %895 }
 0x651   :  { %v900_v28 = vmul.f32 0.03125, %v896_v34 }
 0x653   :  { %v902_v43 = vadd.f32 1e-05, %v900_v28 }
 0x654   :  { %v1138_v36 = vpop.permute.xlu1 %1137 }
 0x655   :  { %v1140_v37 = vadd.f32 %v1138_v36, %v1129_v35  ;;  %v1141_v38 = vadd.f32 %v1138_v36, %v1130_v9  ;;  %5158 = vrsqrt.f32 %v902_v43 }
 0x657   :  { %1148 = vrot.lane.b32.xlu1 %v1141_v38, %s5816_s17  ;;  %1146 = vrot.lane.b32.xlu0 %v1140_v37, %s5816_s17 }
 0x65f   :  { %v5159_v45 = vpop.eup %5158 }
 0x660   :  { %v906_v46 = vmul.f32 %v5159_v45, %v6266_v49 }
 0x662   :  { %v915_v48 = vmul.f32 %v4340_v47, %v906_v46 }
 0x664   :  { %v924_v52 = vadd.f32 %v4341_v50, %v915_v48 }
 0x666   :  { %v4342_v54 = vmul.f32 -1.442695, %v924_v52 }
 0x668   :  { %5160 = vpow2.f32 %v4342_v54  ;;  %v1165_v54 = vld [vmem:[%s6727_s18 + $0x8] sm:$0xff] }
 0x672   :  { %v5161_v63 = vpop.eup %5160 }
 0x673   :  { %v932_v4 = vadd.f32 1.0, %v5161_v63 }
 0x67c   :  { %v963_v41 = vpop.permute.xlu0 %962 }
 0x67d   :  { %v969_v42 = vsel %vm613_vm3, %v963_v41, 0.0 }
 0x680   :  { %v961_v51 = vpop.permute.xlu0 %960 }
 0x681   :  { %v1039_v39 = vpop.permute.xlu1 %1038  ;;  %v966_v61 = vsel %vm613_vm3, %v961_v51, 0.0 }
 0x682   :  { %v1045_v40 = vsel %vm613_vm3, %v1039_v39, 0.0 }
 0x683   :  { %1046 = vadd.xlane.f32.xlu0 %v1045_v40 }
 0x687   :  { %970 = vadd.xlane.f32.xlu0 %v969_v42 }
 0x69d   :  { %986 = vrot.lane.b32.xlu0 %v4344_v29, %s5817_s13 }
 0x6a1   :  { %1073 = vrot.lane.b32.xlu0 %v4349_v44, %s5817_s13 }
 0x6ba   :  { %v899_v53 = vpop.xlane.xlu0 %898 }
 0x6bb   :  { %v901_v55 = vmul.f32 0.03125, %v899_v53  ;;  %v1164_v53 = vld [vmem:[%s6727_s18] sm:$0xff] }
 0x6bd   :  { %v903_v56 = vadd.f32 1e-05, %v901_v55  ;;  %v1166_v55 = vld [vmem:[%s6727_s18 + $0x10] sm:$0xff] }
 0x6be   :  { %v1037_v59 = vpop.permute.xlu0 %1036 }
 0x6bf   :  { %5162 = vrsqrt.f32 %v903_v56  ;;  %v1042_v60 = vsel %vm613_vm3, %v1037_v59, 0.0  ;;  %v4962_v59 = vpack.c.bf16 %v1165_v54, %v1164_v53 }
 0x6c0   :  { %1043 = vadd.xlane.f32.xlu1 %v1042_v60  ;;  %5164 = vrcp.f32 %v932_v4  ;;  %v1167_v60 = vld [vmem:[%s6727_s18 + $0x18] sm:$0xff] }
 0x6c1   :  { %4963 = vmatprep.subr.bf16.mxu1 %v4962_v59 }
 0x6c2   :  { %4965 = vmatpush3.bf16.msra.mxu1 %v4962_v59 }
 0x6c4   :  { %967 = vadd.xlane.f32.xlu1 %v966_v61  ;;  %v4966_v61 = vpack.c.bf16 %v1167_v60, %v1166_v55 }
 0x6c6   :  { %4967 = vmatprep.subr.bf16.mxu1 %v4966_v61 }
 0x6c7   :  { %4969 = vmatpush3.bf16.msra.mxu1 %v4966_v61  ;;  %v4356_v61 = vld [vmem:[#allocation8] ss:$0 sm:$0xff] }
 0x6c8   :  { %4682 = vmatprep.subr.mxu1 %v5814_v1 }
 0x6c9   :  { %v5163_v49 = vpop.eup %5162  ;;  %v1147_v13 = vpop.permute.xlu0 %1146 }
 0x6ca   :  { %v907_v2 = vmul.f32 %v5163_v49, %v6290_v5  ;;  %v5165_v16 = vpop.eup %5164  ;;  %v1149_v24 = vpop.permute.xlu1 %1148 }
 0x6cb   :  { %v1152_v17 = vmul.f32 %v5165_v16, %v1147_v13 }
 0x6cc   :  { %v916_v3 = vmul.f32 %v4340_v47, %v907_v2 }
 0x6ce   :  { %v925_v8 = vadd.f32 %v4341_v50, %v916_v3 }
 0x6d0   :  { %v4343_v7 = vmul.f32 -1.442695, %v925_v8 }
 0x6d2   :  { %5166 = vpow2.f32 %v4343_v7 }
 0x6d5   :  { %997 = vrot.lane.b32.xlu1 %v4345_v11, %s5817_s13 }
 0x6d9   :  { %1062 = vrot.lane.b32.xlu1 %v4348_v12, %s5817_s13 }
 0x6dc   :  { %v5167_v18 = vpop.eup %5166 }
 0x6dd   :  { %v933_v23 = vadd.f32 1.0, %v5167_v18  ;;  %1156 = vrot.lane.b32.xlu1 %v1152_v17, %s5817_s13 }
 0x6df   :  { %5168 = vrcp.f32 %v933_v23 }
 0x6e9   :  { %v5169_v5 = vpop.eup %5168 }
 0x6ea   :  { %v1153_v22 = vmul.f32 %v5169_v5, %v1149_v24 }
 0x6ec   :  { %1158 = vrot.lane.b32.xlu0 %v1153_v22, %s5817_s13 }
 0x710   :  { %v1047_v25 = vpop.xlane.xlu0 %1046 }
 0x711   :  { %v1049_v40 = vmul.f32 0.03125, %v1047_v25 }
 0x713   :  { %v1051_v29 = vadd.f32 1e-05, %v1049_v40 }
 0x714   :  { %v971_v30 = vpop.xlane.xlu0 %970 }
 0x715   :  { %v973_v31 = vmul.f32 0.03125, %v971_v30  ;;  %v4352_v30 = vld [vmem:[#allocation5] ss:$0 sm:$0xff] }
 0x717   :  { %v975_v32 = vadd.f32 1e-05, %v973_v31 }
 0x718   :  { %v987_v9 = vpop.permute.xlu0 %986 }
 0x719   :  { %5170 = vrsqrt.f32 %v975_v32 }
 0x71c   :  { %v1074_v49 = vpop.permute.xlu0 %1073 }
 0x723   :  { %v5171_v33 = vpop.eup %5170 }
 0x724   :  { %v979_v35 = vmul.f32 %v5171_v33, %v6273_v57 }
 0x726   :  { %v990_v38 = vmul.f32 %v987_v9, %v979_v35 }
 0x74d   :  { %v1044_v34 = vpop.xlane.xlu1 %1043 }
 0x74e   :  { %v1048_v57 = vmul.f32 0.03125, %v1044_v34 }
 0x750   :  { %v1050_v50 = vadd.f32 1e-05, %v1048_v57  ;;  %v1308_v57 = vld [vmem:[%s6728_s19 + $0x10] sm:$0xff] }
 0x751   :  { %v968_v36 = vpop.xlane.xlu1 %967 }
 0x752   :  { %v972_v37 = vmul.f32 0.03125, %v968_v36 }
 0x754   :  { %v974_v39 = vadd.f32 1e-05, %v972_v37 }
 0x755   :  { %v998_v41 = vpop.permute.xlu1 %997 }
 0x756   :  { %5172 = vrsqrt.f32 %v974_v39  ;;  %v1001_v42 = vadd.f32 %v998_v41, %v990_v38 }
 0x758   :  { %v4347_v28 = vmul.f32 -1.442695, %v1001_v42 }
 0x759   :  { %v1063_v56 = vpop.permute.xlu1 %1062 }
 0x75a   :  { %5174 = vpow2.f32 %v4347_v28 }
 0x75b   :  { %5176 = vrsqrt.f32 %v1051_v29 }
 0x75d   :  { %v1157_v5 = vpop.permute.xlu1 %1156 }
 0x75e   :  { %v1159_v7 = vpop.permute.xlu0 %1158 }
 0x760   :  { %v5173_v43 = vpop.eup %5172 }
 0x761   :  { %v978_v44 = vmul.f32 %v5173_v43, %v6275_v58  ;;  %v1306_v43 = vld [vmem:[%s6728_s19] sm:$0xff] }
 0x763   :  { %v989_v45 = vmul.f32 %v987_v9, %v978_v44  ;;  %v1307_v44 = vld [vmem:[%s6728_s19 + $0x8] sm:$0xff] }
 0x764   :  { %v5175_v46 = vpop.eup %5174 }
 0x765   :  { %v1000_v47 = vadd.f32 %v998_v41, %v989_v45  ;;  %v1009_v48 = vadd.f32 1.0, %v5175_v46  ;;  %v5177_v51 = vpop.eup %5176  ;;  %v4970_v45 = vpack.c.bf16 %v1307_v44, %v1306_v43  ;;  %v1309_v46 = vld [vmem:[%s6728_s19 + $0x18] sm:$0xff]  ;;  %v6387_v44 = vld [vmem:[%s6730_s28 + $0x8] sm:$0xff] }
 0x766   :  { %v1055_v58 = vmul.f32 %v5177_v51, %v6281_v62 }
 0x767   :  { %v4346_v52 = vmul.f32 -1.442695, %v1000_v47  ;;  %5178 = vrcp.f32 %v1009_v48  ;;  %v4974_v47 = vpack.c.bf16 %v1309_v46, %v1308_v57  ;;  %4971 = vmatprep.subr.bf16.mxu0 %v4970_v45 }
 0x768   :  { %v1066_v63 = vmul.f32 %v1063_v56, %v1055_v58  ;;  %4973 = vmatpush3.bf16.msra.mxu0 %v4970_v45 }
 0x769   :  { %5180 = vpow2.f32 %v4346_v52  ;;  %4975 = vmatprep.subr.bf16.mxu0 %v4974_v47 }
 0x76a   :  { %5182 = vrsqrt.f32 %v1050_v50  ;;  %v1077_v2 = vadd.f32 %v1074_v49, %v1066_v63 }
 0x76c   :  { %4977 = vmatpush3.bf16.msra.mxu0 %v4974_v47 }
 0x76d   :  { %4702 = vmatprep.subr.mxu0 %v5814_v1 }
 0x771   :  { %v5179_v3 = vpop.eup %5178 }
 0x772   :  { %v1143_v4 = vmul.f32 %v5179_v3, %v1077_v2 }
 0x773   :  { %v5181_v8 = vpop.eup %5180 }
 0x774   :  { %v5183_v11 = vpop.eup %5182  ;;  %v1008_v12 = vadd.f32 1.0, %v5181_v8  ;;  %v1163_v13 = vadd.f32 %v1159_v7, %v1143_v4  ;;  %v4357_v7 = vld [vmem:[%s6729_s22] ss:$0 sm:$0xff] }
 0x775   :  { %v1054_v62 = vmul.f32 %v5183_v11, %v6296_v19 }
 0x776   :  { %5184 = vrcp.f32 %v1008_v12  ;;  %1179 = vrot.lane.b32.xlu0 %v1163_v13, %s5816_s17 }
 0x777   :  { %v1065_v16 = vmul.f32 %v1063_v56, %v1054_v62  ;;  %v4355_v56 = vld [vmem:[#allocation10] ss:$0 sm:$0xff] }
 0x779   :  { %v1076_v17 = vadd.f32 %v1074_v49, %v1065_v16 }
 0x780   :  { %v5185_v18 = vpop.eup %5184 }
 0x781   :  { %v1142_v23 = vmul.f32 %v5185_v18, %v1076_v17 }
 0x783   :  { %v1162_v24 = vadd.f32 %v1157_v5, %v1142_v23 }
 0x785   :  { %1177 = vrot.lane.b32.xlu1 %v1162_v24, %s5816_s17 }
 0x7e8   :  { %v1180_v25 = vpop.permute.xlu0 %1179 }
 0x7f7   :  { %v1178_v22 = vpop.permute.xlu1 %1177 }
 0x7f8   :  { %4668 = vmatprep.mubr.msk.f32.mxu1 %vm613_vm3, %v1178_v22 }
 0x7f9   :  { %4669 = vmatmul.mubr.msk.f32.vlgmr.msra.gmra.mrb[4].mxu1 %vm613_vm3, %v1180_v25 }
 0x7fa   :  { %4684 = vmatprep.mubr.msk.f32.mxu1 %vm5813_vm0, %v5814_v1 }
 0x8cc   :  { %v4670_v31 = vpop.f32.mrb[4].mxu1 }
 0x8cd   :  { %v1257_v19 = vadd.f32 %v4670_v31, %v4352_v30  ;;  %v1251_v32 = vpop.f32.mrb[5].mxu1 }
 0x8ce   :  { %v1252_v33 = vadd.f32 %v4352_v30, %v1251_v32 }
 0x8cf   :  { %v1263_v34 = vsel %vm613_vm3, %v1257_v19, 0.0 }
 0x8d0   :  { %1264 = vadd.xlane.f32.xlu0 %v1263_v34  ;;  %v1260_v35 = vsel %vm613_vm3, %v1252_v33, 0.0 }
 0x8d1   :  { %1261 = vadd.xlane.f32.xlu1 %v1260_v35 }
 0x95d   :  { %v1265_v9 = vpop.xlane.xlu0 %1264 }
 0x95e   :  { %v1267_v36 = vmul.f32 0.03125, %v1265_v9  ;;  %v1262_v37 = vpop.xlane.xlu1 %1261 }
 0x95f   :  { %v1266_v38 = vmul.f32 0.03125, %v1262_v37 }
 0x960   :  { %v1269_v39 = vsub.f32 %v1257_v19, %v1267_v36 }
 0x961   :  { %v1268_v40 = vsub.f32 %v1252_v33, %v1266_v38 }
 0x962   :  { %v1271_v41 = vmul.f32 %v1269_v39, %v1269_v39 }
 0x963   :  { %v1270_v42 = vmul.f32 %v1268_v40, %v1268_v40 }
 0x964   :  { %v1275_v28 = vsel %vm613_vm3, %v1271_v41, 0.0 }
 0x965   :  { %1276 = vadd.xlane.f32.xlu1 %v1275_v28  ;;  %v1272_v29 = vsel %vm613_vm3, %v1270_v42, 0.0 }
 0x966   :  { %1273 = vadd.xlane.f32.xlu0 %v1272_v29 }
 0x9f2   :  { %v1277_v48 = vpop.xlane.xlu1 %1276 }
 0x9f3   :  { %v1279_v50 = vmul.f32 0.03125, %v1277_v48  ;;  %v1274_v51 = vpop.xlane.xlu0 %1273  ;;  %v6393_v48 = vld [vmem:[%s6730_s28] sm:$0xff] }
 0x9f4   :  { %v1278_v52 = vmul.f32 0.03125, %v1274_v51 }
 0x9f5   :  { %v1281_v53 = vadd.f32 1e-05, %v1279_v50 }
 0x9f6   :  { %v1280_v54 = vadd.f32 1e-05, %v1278_v52 }
 0x9f7   :  { %5186 = vrsqrt.f32 %v1281_v53 }
 0x9f8   :  { %5188 = vrsqrt.f32 %v1280_v54 }
 0xa01   :  { %v5187_v55 = vpop.eup %5186 }
 0xa02   :  { %v5189_v59 = vpop.eup %5188  ;;  %v1285_v60 = vmul.f32 %v5187_v55, %v1269_v39 }
 0xa03   :  { %v1284_v58 = vmul.f32 %v5189_v59, %v1268_v40 }
 0xa04   :  { %v1294_v63 = vmul.f32 %v4355_v56, %v1285_v60 }
 0xa05   :  { %v1293_v49 = vmul.f32 %v4355_v56, %v1284_v58 }
 0xa06   :  { %v1303_v2 = vadd.f32 %v4356_v61, %v1294_v63 }
 0xa07   :  { %v1302_v3 = vadd.f32 %v4356_v61, %v1293_v49 }
 0xa08   :  { %v1305_v8 = vmax.f32 %v1303_v2, 0.0 }
 0xa09   :  { %v1304_v4 = vmax.f32 %v1302_v3, 0.0 }
 0xa0b   :  { %4679 = vmatprep.mubr.msk.f32.mxu0 %vm613_vm3, %v1304_v4 }
 0xa0c   :  { %4680 = vmatmul.mubr.msk.f32.vlgmr.msra.gmra.mrb[6].mxu0 %vm613_vm3, %v1305_v8 }
 0xa0d   :  { %4704 = vmatprep.mubr.msk.f32.mxu0 %vm5813_vm0, %v5814_v1  ;;  %4703 = vmatpush3.msra.mxu0 %v6387_v44 }
 0xa0e   :  { %4712 = vmatprep.subr.mxu0 %v5814_v1 }
 0xadf   :  { %v4681_v11 = vpop.f32.mrb[6].mxu0 }
 0xae0   :  { %v6346_v12 = vadd.f32 %v4681_v11, %v4357_v7  ;;  %v1389_v13 = vpop.f32.mrb[7].mxu0 }
 0xae1   :  { %v6348_v62 = vadd.f32 %v4357_v7, %v1389_v13 }
 0xae3   :  { %1404 = vrot.lane.b32.xlu0 %v6348_v62, %s5816_s17  ;;  %v6355_v16 = vmul.f32 0.35355338, %v6348_v62 }
 0xae7   :  { %1571 = vrot.lane.b32.xlu0 %v6348_v62, %s5818_s23 }
 0xaeb   :  { %1569 = vrot.lane.b32.xlu0 %v6355_v16, %s5819_s26 }
 0xb55   :  { %v1405_v17 = vpop.permute.xlu0 %1404 }
 0xb56   :  { %4683 = vmatpush3.xpose.msk.msra.mxu1 %vm1406_vm4, %v1405_v17 }
 0xb57   :  { %4687 = vmatprep.subr.mxu1 %v5814_v1 }
 0xb59   :  { %4685 = vmatmul.mubr.msk.f32.vlgmr.msra.gmra.mrb[6].mxu1 %vm1406_vm4, %v6355_v16  ;;  %v1572_v34 = vpop.permute.xlu0 %1571 }
 0xb5a   :  { %4689 = vmatprep.mubr.msk.f32.mxu1 %vm5813_vm0, %v5814_v1 }
 0xb5d   :  { %v1570_v9 = vpop.permute.xlu0 %1569 }
 0xc2c   :  { %v1478_v18 = vpop.f32.mrb[6].mxu1 }
 0xc2d   :  { %v4686_v23 = vpop.f32.mrb[7].mxu1  ;;  %v1482_v5 = vsel %vm1406_vm4, %v1478_v18, -inf }
 0xc2e   :  { %1483 = vmax.xlane.f32.xlu1 %v1482_v5  ;;  %v6429_v23 = vld [vmem:[%s6730_s28 + $0x10] sm:$0xff] }
 0xcbb   :  { %v1484_v24 = vpop.xlane.xlu1 %1483 }
 0xcbc   :  { %v1485_v22 = vsub.f32 %v1478_v18, %v1484_v24 }
 0xcbe   :  { %v1486_v25 = vmul.f32 1.442695, %v1485_v22 }
 0xcc0   :  { %5190 = vpow2.f32 %v1486_v25 }
 0xcca   :  { %v5191_v30 = vpop.eup %5190 }
 0xccb   :  { %v1488_v31 = vsel %vm1406_vm4, %v5191_v30, 0.0 }
 0xccc   :  { %1489 = vadd.xlane.f32.xlu1 %v1488_v31 }
 0xcdd   :  { %1493 = vrot.lane.b32.xlu1 %v6348_v62, %s5815_s12 }
 0xd59   :  { %v1490_v19 = vpop.xlane.xlu1 %1489 }
 0xd5a   :  { %5192 = vrcp.f32 %v1490_v19 }
 0xd5d   :  { %v1494_v32 = vpop.permute.xlu1 %1493 }
 0xd5e   :  { %4688 = vmatpush3.msra.mxu1 %v1494_v32 }
 0xd5f   :  { %4692 = vmatprep.subr.mxu1 %v5814_v1 }
 0xd64   :  { %v5193_v33 = vpop.eup %5192 }
 0xd65   :  { %v1492_v35 = vmul.f32 %v5193_v33, %v5191_v30 }
 0xd67   :  { %4690 = vmatmul.mubr.msk.f32.vlgmr.msra.gmra.mrb[8].mxu1 %vm1406_vm4, %v1492_v35  ;;  %v6445_v35 = vmul.f32 0.35355338, %v6346_v12 }
 0xd68   :  { %4693 = vmatpush3.xpose.msk.msra.mxu1 %vm1406_vm4, %v1572_v34  ;;  %4694 = vmatprep.mubr.msk.f32.mxu1 %vm5813_vm0, %v5814_v1 }
 0xd69   :  { %4697 = vmatprep.subr.mxu1 %v5814_v1 }
 0xd6b   :  { %4695 = vmatmul.mubr.msk.f32.vlgmr.msra.gmra.mrb[10].mxu1 %vm1406_vm4, %v1570_v9 }
 0xd6c   :  { %4699 = vmatprep.mubr.msk.f32.mxu1 %vm5813_vm0, %v5814_v1 }
 0xe3a   :  { %v1565_v36 = vpop.f32.mrb[8].mxu1 }
 0xe3b   :  { %v4691_v37 = vpop.f32.mrb[9].mxu1 }
 0xe3e   :  { %v1643_v38 = vpop.f32.mrb[10].mxu1 }
 0xe3f   :  { %v4696_v39 = vpop.f32.mrb[11].mxu1  ;;  %v1647_v40 = vsel %vm1406_vm4, %v1643_v38, -inf }
 0xe40   :  { %1648 = vmax.xlane.f32.xlu1 %v1647_v40 }
 0xe51   :  { %1882 = vrot.lane.b32.xlu1 %v6348_v62, %s5820_s14 }
 0xe55   :  { %1880 = vrot.lane.b32.xlu1 %v6355_v16, %s5821_s5 }
 0xecd   :  { %v1649_v41 = vpop.xlane.xlu1 %1648 }
 0xece   :  { %v1650_v42 = vsub.f32 %v1643_v38, %v1649_v41 }
 0xed0   :  { %v1651_v28 = vmul.f32 1.442695, %v1650_v42 }
 0xed1   :  { %v1883_v50 = vpop.permute.xlu1 %1882 }
 0xed2   :  { %5194 = vpow2.f32 %v1651_v28 }
 0xed5   :  { %v1881_v53 = vpop.permute.xlu1 %1880 }
 0xedc   :  { %v5195_v29 = vpop.eup %5194 }
 0xedd   :  { %v1653_v43 = vsel %vm1406_vm4, %v5195_v29, 0.0 }
 0xede   :  { %1654 = vadd.xlane.f32.xlu0 %v1653_v43 }
 0xef4   :  { %1658 = vrot.lane.b32.xlu0 %v6348_v62, %s5822_s8 }
 0xf6b   :  { %v1655_v57 = vpop.xlane.xlu0 %1654 }
 0xf6c   :  { %5196 = vrcp.f32 %v1655_v57 }
 0xf6f   :  { %v1659_v45 = vpop.permute.xlu0 %1658 }
 0xf70   :  { %4698 = vmatpush3.msra.mxu1 %v1659_v45 }
 0xf71   :  { %4707 = vmatprep.subr.mxu1 %v5814_v1 }
 0xf76   :  { %v5197_v46 = vpop.eup %5196 }
 0xf77   :  { %v1657_v47 = vmul.f32 %v5197_v46, %v5195_v29  ;;  %v6467_v29 = vld [vmem:[%s6730_s28 + $0x18] sm:$0xff] }
 0xf79   :  { %4700 = vmatmul.mubr.msk.f32.vlgmr.msra.gmra.mrb[12].mxu1 %vm1406_vm4, %v1657_v47 }
 0xf7a   :  { %4708 = vmatpush3.msra.mxu1 %v6393_v48  ;;  %4709 = vmatprep.mubr.msk.f32.mxu1 %vm5813_vm0, %v5814_v1 }
 0xf7b   :  { %4717 = vmatprep.subr.mxu1 %v5814_v1 }
 0xf7d   :  { %4710 = vmatmul.mubr.msk.f32.vlgmr.msra.gmra.mrb[14].mxu1 %vm1406_vm4, %v1565_v36 }
 0xf7e   :  { %4719 = vmatprep.mubr.msk.f32.mxu1 %vm5813_vm0, %v5814_v1 }
0x104c   :  { %v1730_v51 = vpop.f32.mrb[12].mxu1 }
0x104d   :  { %v4701_v52 = vpop.f32.mrb[13].mxu1  ;;  %4705 = vmatmul.mubr.msk.f32.vlgmr.msra.gmra.mrb[8].mxu0 %vm1406_vm4, %v1730_v51 }
0x104e   :  { %4713 = vmatpush3.xpose.msk.msra.mxu0 %vm1406_vm4, %v1883_v50  ;;  %4714 = vmatprep.mubr.msk.f32.mxu0 %vm5813_vm0, %v5814_v1 }
0x104f   :  { %4722 = vmatprep.subr.mxu0 %v5814_v1 }
0x1050   :  { %v1876_v54 = vpop.f32.mrb[14].mxu1 }
0x1051   :  { %v4711_v55 = vpop.f32.mrb[15].mxu1  ;;  %4715 = vmatmul.mubr.msk.f32.vlgmr.msra.gmra.mrb[10].mxu0 %vm1406_vm4, %v1881_v53 }
0x1052   :  { %4724 = vmatprep.mubr.msk.f32.mxu0 %vm5813_vm0, %v5814_v1  ;;  %4723 = vmatpush3.msra.mxu0 %v6429_v23 }
0x1053   :  { %4732 = vmatprep.subr.mxu0 %v5814_v1 }
0x1120   :  { %v1803_v56 = vpop.f32.mrb[8].mxu0 }
0x1121   :  { %v1877_v59 = vadd.f32 %v1876_v54, %v1803_v56  ;;  %v4706_v60 = vpop.f32.mrb[9].mxu0 }
0x1124   :  { %v1954_v58 = vpop.f32.mrb[10].mxu0 }
0x1125   :  { %v4716_v61 = vpop.f32.mrb[11].mxu0  ;;  %v1958_v63 = vsel %vm1406_vm4, %v1954_v58, -inf }
0x1126   :  { %1959 = vmax.xlane.f32.xlu0 %v1958_v63 }
0x113c   :  { %1969 = vrot.lane.b32.xlu0 %v6348_v62, %s5823_s27 }
0x1140   :  { %2119 = vrot.lane.b32.xlu0 %v6355_v16, %s5824_s1 }
0x11b3   :  { %v1960_v49 = vpop.xlane.xlu0 %1959 }
0x11b4   :  { %v1961_v2 = vsub.f32 %v1954_v58, %v1960_v49 }
0x11b6   :  { %v1962_v3 = vmul.f32 1.442695, %v1961_v2 }
0x11b7   :  { %v1970_v4 = vpop.permute.xlu0 %1969 }
0x11b8   :  { %5198 = vpow2.f32 %v1962_v3  ;;  %4718 = vmatpush3.msra.mxu1 %v1970_v4 }
0x11b9   :  { %4727 = vmatprep.subr.mxu1 %v5814_v1 }
0x11bb   :  { %v2120_v18 = vpop.permute.xlu0 %2119 }
0x11c2   :  { %v5199_v8 = vpop.eup %5198 }
0x11c3   :  { %v1964_v7 = vsel %vm1406_vm4, %v5199_v8, 0.0 }
0x11c4   :  { %1965 = vadd.xlane.f32.xlu1 %v1964_v7 }
0x11d5   :  { %2121 = vrot.lane.b32.xlu1 %v6348_v62, %s5825_s6 }
0x1251   :  { %v1966_v11 = vpop.xlane.xlu1 %1965 }
0x1252   :  { %5200 = vrcp.f32 %v1966_v11 }
0x1255   :  { %v2122_v17 = vpop.permute.xlu1 %2121 }
0x125c   :  { %v5201_v13 = vpop.eup %5200 }
0x125d   :  { %v1968_v16 = vmul.f32 %v5201_v13, %v5199_v8 }
0x125f   :  { %4720 = vmatmul.mubr.msk.f32.vlgmr.msra.gmra.mrb[16].mxu1 %vm1406_vm4, %v1968_v16 }
0x1260   :  { %4728 = vmatpush3.xpose.msk.msra.mxu1 %vm1406_vm4, %v2122_v17  ;;  %4729 = vmatprep.mubr.msk.f32.mxu1 %vm5813_vm0, %v5814_v1 }
0x1261   :  { %4737 = vmatprep.subr.mxu1 %v5814_v1 }
0x1263   :  { %4730 = vmatmul.mubr.msk.f32.vlgmr.msra.gmra.mrb[18].mxu1 %vm1406_vm4, %v2120_v18 }
0x1264   :  { %4739 = vmatprep.mubr.msk.f32.mxu1 %vm5813_vm0, %v5814_v1  ;;  %4738 = vmatpush3.msra.mxu1 %v6467_v29 }
0x1265   :  { %4747 = vmatprep.subr.mxu1 %v5814_v1 }
0x1332   :  { %v2041_v5 = vpop.f32.mrb[16].mxu1 }
0x1333   :  { %v4721_v24 = vpop.f32.mrb[17].mxu1  ;;  %4725 = vmatmul.mubr.msk.f32.vlgmr.msra.gmra.mrb[12].mxu0 %vm1406_vm4, %v2041_v5 }
0x1334   :  { %4734 = vmatprep.mubr.msk.f32.mxu0 %vm5813_vm0, %v5814_v1 }
0x1336   :  { %v2193_v22 = vpop.f32.mrb[18].mxu1 }
0x1337   :  { %v4731_v25 = vpop.f32.mrb[19].mxu1  ;;  %v2197_v30 = vsel %vm1406_vm4, %v2193_v22, -inf }
0x1338   :  { %2198 = vmax.xlane.f32.xlu1 %v2197_v30 }
0x1349   :  { %2360 = vrot.lane.b32.xlu1 %v6346_v12, %s5816_s17  ;;  %s4256_s17 = sshll.u32 %s5827_s16, 4  ;;  %s4257_s17 = int_to_ptr.vmem [resolvable:$true] %s4256_s17 }
0x134a   :  { %s5700_s13 = scalar_lea.vmem %s4257_s17, 256  ;;  %p5705_p1 = scmp.lt.s32.totalorder %s4257_s17, %s4257_s17 }
0x134b   :  { %p5701_p0 = scmp.ne.s32.totalorder %s4257_s17, %s5700_s13  ;;  %p5706_p2 = scmp.lt.s32.totalorder %s5700_s13, %s5700_s13 }
0x134d   :  { %2526 = vrot.lane.b32.xlu1 %v6346_v12, %s5818_s23  ;;  %p5707_p3 = por %p5706_p2, %p5705_p1 }
0x134f   :  { %p5708_p4 = pnand %p5707_p3, %p5701_p0 }
0x13c5   :  { %v2199_v31 = vpop.xlane.xlu1 %2198 }
0x13c6   :  { %v2200_v19 = vsub.f32 %v2193_v22, %v2199_v31 }
0x13c8   :  { %v2201_v32 = vmul.f32 1.442695, %v2200_v19 }
0x13c9   :  { %v2361_v41 = vpop.permute.xlu1 %2360 }
0x13ca   :  { %5202 = vpow2.f32 %v2201_v32 }
0x13d4   :  { %v5203_v33 = vpop.eup %5202 }
0x13d5   :  { %v2203_v34 = vsel %vm1406_vm4, %v5203_v33, 0.0 }
0x13d6   :  { %2204 = vadd.xlane.f32.xlu0 %v2203_v34 }
0x13ec   :  { %2208 = vrot.lane.b32.xlu0 %v6348_v62, %s5826_s21  ;;  %v2527_v62 = vpop.permute.xlu1 %2526 }
0x13f0   :  { %2524 = vrot.lane.b32.xlu0 %v6445_v35, %s5819_s26 }
0x1406   :  { %v2114_v9 = vpop.f32.mrb[12].mxu0 }
0x1407   :  { %v2118_v36 = vadd.f32 %v2114_v9, %v1877_v59  ;;  %v4726_v37 = vpop.f32.mrb[13].mxu0 }
0x1463   :  { %v2205_v38 = vpop.xlane.xlu0 %2204 }
0x1464   :  { %5204 = vrcp.f32 %v2205_v38 }
0x1467   :  { %v2209_v39 = vpop.permute.xlu0 %2208 }
0x1468   :  { %4733 = vmatpush3.msra.mxu0 %v2209_v39 }
0x1469   :  { %4742 = vmatprep.subr.mxu0 %v5814_v1 }
0x146b   :  { %v2525_v28 = vpop.permute.xlu0 %2524 }
0x146e   :  { %v5205_v40 = vpop.eup %5204 }
0x146f   :  { %v2207_v42 = vmul.f32 %v5205_v40, %v5203_v33 }
0x1471   :  { %4735 = vmatmul.mubr.msk.f32.vlgmr.msra.gmra.mrb[14].mxu0 %vm1406_vm4, %v2207_v42 }
0x1472   :  { %4743 = vmatpush3.xpose.msk.msra.mxu0 %vm1406_vm4, %v2361_v41  ;;  %4744 = vmatprep.mubr.msk.f32.mxu0 %vm5813_vm0, %v5814_v1 }
0x1473   :  { %4752 = vmatprep.subr.mxu0 %v5814_v1 }
0x1475   :  { %4745 = vmatmul.mubr.msk.f32.vlgmr.msra.gmra.mrb[16].mxu0 %vm1406_vm4, %v6445_v35 }
0x1476   :  { %4753 = vmatpush3.xpose.msk.msra.mxu0 %vm1406_vm4, %v2527_v62  ;;  %4754 = vmatprep.mubr.msk.f32.mxu0 %vm5813_vm0, %v5814_v1 }
0x1477   :  { %4762 = vmatprep.subr.mxu0 %v5814_v1 }
0x1479   :  { %4755 = vmatmul.mubr.msk.f32.vlgmr.msra.gmra.mrb[18].mxu0 %vm1406_vm4, %v2525_v28 }
0x147a   :  { %4763 = vmatpush3.msra.mxu0 %v6387_v44  ;;  %4764 = vmatprep.mubr.msk.f32.mxu0 %vm5813_vm0, %v5814_v1 }
0x147b   :  { %4772 = vmatprep.subr.mxu0 %v5814_v1 }
0x1544   :  { %v2280_v43 = vpop.f32.mrb[14].mxu0 }
0x1545   :  { %v4736_v57 = vpop.f32.mrb[15].mxu0  ;;  %4740 = vmatmul.mubr.msk.f32.vlgmr.msra.gmra.mrb[20].mxu1 %vm1406_vm4, %v2280_v43 }
0x1546   :  { %4749 = vmatprep.mubr.msk.f32.mxu1 %vm5813_vm0, %v5814_v1 }
0x1548   :  { %v2433_v45 = vpop.f32.mrb[16].mxu0 }
0x1549   :  { %v4746_v44 = vpop.f32.mrb[17].mxu0  ;;  %v2437_v46 = vsel %vm1406_vm4, %v2433_v45, -inf }
0x154a   :  { %2438 = vmax.xlane.f32.xlu1 %v2437_v46 }
0x154c   :  { %v2598_v47 = vpop.f32.mrb[18].mxu0 }
0x154d   :  { %v4756_v50 = vpop.f32.mrb[19].mxu0  ;;  %v2602_v51 = vsel %vm1406_vm4, %v2598_v47, -inf }
0x154e   :  { %2603 = vmax.xlane.f32.xlu0 %v2602_v51 }
0x15d7   :  { %v2439_v52 = vpop.xlane.xlu1 %2438 }
0x15d8   :  { %v2440_v53 = vsub.f32 %v2433_v45, %v2439_v52 }
0x15da   :  { %v2441_v54 = vmul.f32 1.442695, %v2440_v53 }
0x15db   :  { %v2604_v55 = vpop.xlane.xlu0 %2603 }
0x15dc   :  { %5206 = vpow2.f32 %v2441_v54  ;;  %v2605_v56 = vsub.f32 %v2598_v47, %v2604_v55  ;;  %v4392_v54 = vld [vmem:[%s6731_s2] ss:$0 sm:$0xff] }
0x15de   :  { %v2606_v59 = vmul.f32 1.442695, %v2605_v56 }
0x15e0   :  { %5208 = vpow2.f32 %v2606_v59 }
0x15e6   :  { %v5207_v60 = vpop.eup %5206 }
0x15e7   :  { %v2443_v58 = vsel %vm1406_vm4, %v5207_v60, 0.0 }
0x15e8   :  { %2444 = vadd.xlane.f32.xlu0 %v2443_v58 }
0x15ea   :  { %v5209_v61 = vpop.eup %5208 }
0x15eb   :  { %v2608_v63 = vsel %vm1406_vm4, %v5209_v61, 0.0 }
0x15ec   :  { %2609 = vadd.xlane.f32.xlu1 %v2608_v63 }
0x15fd   :  { %2613 = vrot.lane.b32.xlu1 %v6346_v12, %s5822_s8 }
0x15fe   :  { %2448 = vrot.lane.b32.xlu0 %v6346_v12, %s5815_s12 }
0x1601   :  { %2837 = vrot.lane.b32.xlu1 %v6346_v12, %s5820_s14 }
0x1602   :  { %2835 = vrot.lane.b32.xlu0 %v6445_v35, %s5821_s5 }
0x1618   :  { %v2353_v49 = vpop.f32.mrb[20].mxu1 }
0x1619   :  { %v6486_v2 = vadd.f32 %v2353_v49, %v2118_v36  ;;  %v4741_v3 = vpop.f32.mrb[21].mxu1 }
0x161b   :  { %v3320_v59 = vadd.f32 %v4392_v54, %v6486_v2 }
0x1675   :  { %v2445_v4 = vpop.xlane.xlu0 %2444 }
0x1676   :  { %5210 = vrcp.f32 %v2445_v4 }
0x1679   :  { %v2449_v8 = vpop.permute.xlu0 %2448  ;;  %v2610_v7 = vpop.xlane.xlu1 %2609 }
0x167a   :  { %5212 = vrcp.f32 %v2610_v7  ;;  %4748 = vmatpush3.msra.mxu1 %v2449_v8 }
0x167b   :  { %4757 = vmatprep.subr.mxu1 %v5814_v1 }
0x167d   :  { %v2614_v16 = vpop.permute.xlu1 %2613 }
0x1680   :  { %v5211_v11 = vpop.eup %5210 }
0x1681   :  { %v2447_v13 = vmul.f32 %v5211_v11, %v5207_v60  ;;  %v2838_v25 = vpop.permute.xlu1 %2837  ;;  %v3322_v60 = vsel %vm613_vm3, %v3320_v59, 0.0 }
0x1683   :  { %4750 = vmatmul.mubr.msk.f32.vlgmr.msra.gmra.mrb[22].mxu1 %vm1406_vm4, %v2447_v13 }
0x1684   :  { %v5213_v17 = vpop.eup %5212  ;;  %4758 = vmatpush3.msra.mxu1 %v2614_v16  ;;  %4759 = vmatprep.mubr.msk.f32.mxu1 %vm5813_vm0, %v5814_v1 }
0x1685   :  { %v2612_v18 = vmul.f32 %v5213_v17, %v5209_v61  ;;  %4767 = vmatprep.subr.mxu1 %v5814_v1 }
0x1687   :  { %4760 = vmatmul.mubr.msk.f32.vlgmr.msra.gmra.mrb[24].mxu1 %vm1406_vm4, %v2612_v18 }
0x1688   :  { %4768 = vmatpush3.msra.mxu1 %v6393_v48  ;;  %4769 = vmatprep.mubr.msk.f32.mxu1 %vm5813_vm0, %v5814_v1  ;;  %v2836_v48 = vpop.permute.xlu0 %2835 }
0x1689   :  { %4777 = vmatprep.subr.mxu1 %v5814_v1 }
0x1756   :  { %v2520_v5 = vpop.f32.mrb[22].mxu1 }
0x1757   :  { %v4751_v24 = vpop.f32.mrb[23].mxu1  ;;  %4770 = vmatmul.mubr.msk.f32.vlgmr.msra.gmra.mrb[26].mxu1 %vm1406_vm4, %v2520_v5 }
0x1758   :  { %4779 = vmatprep.mubr.msk.f32.mxu1 %vm5813_vm0, %v5814_v1 }
0x175a   :  { %v2685_v22 = vpop.f32.mrb[24].mxu1 }
0x175b   :  { %v4761_v30 = vpop.f32.mrb[25].mxu1  ;;  %4765 = vmatmul.mubr.msk.f32.vlgmr.msra.gmra.mrb[20].mxu0 %vm1406_vm4, %v2685_v22 }
0x175c   :  { %4773 = vmatpush3.xpose.msk.msra.mxu0 %vm1406_vm4, %v2838_v25  ;;  %4774 = vmatprep.mubr.msk.f32.mxu0 %vm5813_vm0, %v5814_v1 }
0x175d   :  { %4782 = vmatprep.subr.mxu0 %v5814_v1 }
0x175f   :  { %4775 = vmatmul.mubr.msk.f32.vlgmr.msra.gmra.mrb[22].mxu0 %vm1406_vm4, %v2836_v48 }
0x1760   :  { %4783 = vmatpush3.msra.mxu0 %v6429_v23  ;;  %4784 = vmatprep.mubr.msk.f32.mxu0 %vm5813_vm0, %v5814_v1 }
0x1761   :  { %4792 = vmatprep.subr.mxu0 %v5814_v1 }
0x182a   :  { %v2831_v31 = vpop.f32.mrb[26].mxu1 }
0x182b   :  { %v4771_v19 = vpop.f32.mrb[27].mxu1 }
0x182e   :  { %v2758_v32 = vpop.f32.mrb[20].mxu0 }
0x182f   :  { %v2832_v33 = vadd.f32 %v2831_v31, %v2758_v32  ;;  %v4766_v34 = vpop.f32.mrb[21].mxu0 }
0x1832   :  { %v2909_v9 = vpop.f32.mrb[22].mxu0 }
0x1833   :  { %v4776_v36 = vpop.f32.mrb[23].mxu0  ;;  %v2913_v37 = vsel %vm1406_vm4, %v2909_v9, -inf }
0x1834   :  { %2914 = vmax.xlane.f32.xlu1 %v2913_v37  ;;  %v4393_v36 = vld [vmem:[%s6732_s25] ss:$0 sm:$0xff] }
0x1845   :  { %3076 = vrot.lane.b32.xlu1 %v6346_v12, %s5825_s6 }
0x1849   :  { %3074 = vrot.lane.b32.xlu1 %v6445_v35, %s5824_s1 }
0x18c1   :  { %v2915_v23 = vpop.xlane.xlu1 %2914 }
0x18c2   :  { %v2916_v38 = vsub.f32 %v2909_v9, %v2915_v23  ;;  %v4394_v23 = vld [vmem:[%s6733_s7] ss:$0 sm:$0xff] }
0x18c4   :  { %v2917_v39 = vmul.f32 1.442695, %v2916_v38 }
0x18c5   :  { %v3077_v43 = vpop.permute.xlu1 %3076 }
0x18c6   :  { %5214 = vpow2.f32 %v2917_v39 }
0x18c9   :  { %v3075_v57 = vpop.permute.xlu1 %3074 }
0x18d0   :  { %v5215_v40 = vpop.eup %5214 }
0x18d1   :  { %v2919_v41 = vsel %vm1406_vm4, %v5215_v40, 0.0 }
0x18d2   :  { %2920 = vadd.xlane.f32.xlu0 %v2919_v41  ;;  %v3367_v41 = vld [vmem:[%s6734_s10 + $0x8] sm:$0xff] }
0x18e8   :  { %2924 = vrot.lane.b32.xlu0 %v6346_v12, %s5823_s27 }
0x195f   :  { %v2921_v42 = vpop.xlane.xlu0 %2920 }
0x1960   :  { %5216 = vrcp.f32 %v2921_v42 }
0x1963   :  { %v2925_v62 = vpop.permute.xlu0 %2924 }
0x1964   :  { %4778 = vmatpush3.msra.mxu1 %v2925_v62  ;;  %v3368_v62 = vld [vmem:[%s6734_s10 + $0x10] sm:$0xff] }
0x1965   :  { %4787 = vmatprep.subr.mxu1 %v5814_v1 }
0x196a   :  { %v5217_v28 = vpop.eup %5216 }
0x196b   :  { %v2923_v35 = vmul.f32 %v5217_v28, %v5215_v40  ;;  %v3366_v40 = vld [vmem:[%s6734_s10] sm:$0xff]  ;;  %v3369_v28 = vld [vmem:[%s6734_s10 + $0x18] sm:$0xff] }
0x196c   :  { %v4978_v42 = vpack.c.bf16 %v3367_v41, %v3366_v40  ;;  %v3831_v41 = vld [vmem:[%s6737_s3 + $0x8] sm:$0xff] }
0x196d   :  { %4780 = vmatmul.mubr.msk.f32.vlgmr.msra.gmra.mrb[28].mxu1 %vm1406_vm4, %v2923_v35  ;;  %v3460_v35 = vld [vmem:[%s6735_s11] sm:$0xff] }
0x196e   :  { %4788 = vmatpush3.xpose.msk.msra.mxu1 %vm1406_vm4, %v3077_v43  ;;  %4789 = vmatprep.mubr.msk.f32.mxu1 %vm5813_vm0, %v5814_v1  ;;  %v4982_v43 = vpack.c.bf16 %v3369_v28, %v3368_v62  ;;  %v3606_v62 = vld [vmem:[%s6736_s9 + $0x10] sm:$0xff]  ;;  %v3607_v28 = vld [vmem:[%s6736_s9 + $0x18] sm:$0xff] }
0x196f   :  { %4797 = vmatprep.subr.mxu1 %v5814_v1 }
0x1971   :  { %4790 = vmatmul.mubr.msk.f32.vlgmr.msra.gmra.mrb[30].mxu1 %vm1406_vm4, %v3075_v57  ;;  %v3461_v57 = vld [vmem:[%s6735_s11 + $0x8] sm:$0xff] }
0x1972   :  { %4798 = vmatpush3.msra.mxu1 %v6467_v29  ;;  %4799 = vmatprep.mubr.msk.f32.mxu1 %vm5813_vm0, %v5814_v1 }
0x1a40   :  { %v2996_v45 = vpop.f32.mrb[28].mxu1 }
0x1a41   :  { %v4781_v44 = vpop.f32.mrb[29].mxu1  ;;  %4785 = vmatmul.mubr.msk.f32.vlgmr.msra.gmra.mrb[24].mxu0 %vm1406_vm4, %v2996_v45  ;;  %v3462_v45 = vld [vmem:[%s6735_s11 + $0x10] sm:$0xff] }
0x1a42   :  { %4794 = vmatprep.mubr.msk.f32.mxu0 %vm5813_vm0, %v5814_v1  ;;  %v4986_v44 = vpack.c.bf16 %v3461_v57, %v3460_v35  ;;  %v3832_v35 = vld [vmem:[%s6737_s3 + $0x10] sm:$0xff]  ;;  %v3833_v57 = vld [vmem:[%s6737_s3 + $0x18] sm:$0xff] }
0x1a44   :  { %v3148_v46 = vpop.f32.mrb[30].mxu1  ;;  %4987 = vmatprep.subr.bf16.mxu1 %v4986_v44 }
0x1a45   :  { %v4791_v47 = vpop.f32.mrb[31].mxu1  ;;  %v3152_v50 = vsel %vm1406_vm4, %v3148_v46, -inf }
0x1a46   :  { %3153 = vmax.xlane.f32.xlu0 %v3152_v50  ;;  %v3464_v50 = vld [vmem:[%s6735_s11 + $0x20] sm:$0xff] }
0x1a5c   :  { %3163 = vrot.lane.b32.xlu0 %v6346_v12, %s5826_s21 }
0x1ad3   :  { %v3154_v29 = vpop.xlane.xlu0 %3153 }
0x1ad4   :  { %v3155_v51 = vsub.f32 %v3148_v46, %v3154_v29  ;;  %v3463_v46 = vld [vmem:[%s6735_s11 + $0x18] sm:$0xff]  ;;  %v3465_v29 = vld [vmem:[%s6735_s11 + $0x28] sm:$0xff] }
0x1ad5   :  { %v4990_v47 = vpack.c.bf16 %v3463_v46, %v3462_v45  ;;  %v5022_v45 = vpack.c.bf16 %v3833_v57, %v3832_v35  ;;  %v3956_v35 = vld [vmem:[%s6739_s0 + $0x8] sm:$0xff] }
0x1ad6   :  { %v3156_v52 = vmul.f32 1.442695, %v3155_v51  ;;  %v4994_v51 = vpack.c.bf16 %v3465_v29, %v3464_v50 }
0x1ad7   :  { %v3164_v53 = vpop.permute.xlu0 %3163 }
0x1ad8   :  { %5218 = vpow2.f32 %v3156_v52  ;;  %4793 = vmatpush3.msra.mxu0 %v3164_v53 }
0x1ad9   :  { %4979 = vmatprep.subr.bf16.mxu0 %v4978_v42 }
0x1ae2   :  { %v5219_v55 = vpop.eup %5218 }
0x1ae3   :  { %v3158_v56 = vsel %vm1406_vm4, %v5219_v55, 0.0 }
0x1ae4   :  { %3159 = vadd.xlane.f32.xlu1 %v3158_v56 }
0x1ae8   :  { %3323 = vadd.xlane.f32.xlu1 %v3322_v60 }
0x1b14   :  { %v3069_v58 = vpop.f32.mrb[24].mxu0 }
0x1b15   :  { %v3073_v61 = vadd.f32 %v3069_v58, %v2832_v33  ;;  %v4786_v63 = vpop.f32.mrb[25].mxu0  ;;  %v3466_v58 = vld [vmem:[%s6735_s11 + $0x30] sm:$0xff] }
0x1b71   :  { %v3160_v12 = vpop.xlane.xlu1 %3159 }
0x1b72   :  { %5220 = vrcp.f32 %v3160_v12  ;;  %v4395_v12 = vld [vmem:[#allocation11] ss:$0 sm:$0xff] }
0x1b75   :  { %v3324_v7 = vpop.xlane.xlu1 %3323 }
0x1b76   :  { %v3328_v11 = vmul.f32 0.03125, %v3324_v7 }
0x1b78   :  { %v3330_v13 = vsub.f32 %v3320_v59, %v3328_v11 }
0x1b7a   :  { %v3332_v24 = vmul.f32 %v3330_v13, %v3330_v13 }
0x1b7c   :  { %v5221_v49 = vpop.eup %5220  ;;  %v3334_v22 = vsel %vm613_vm3, %v3332_v24, 0.0 }
0x1b7d   :  { %v3162_v3 = vmul.f32 %v5221_v49, %v5219_v55 }
0x1b7f   :  { %4795 = vmatmul.mubr.msk.f32.vlgmr.msra.gmra.mrb[26].mxu0 %vm1406_vm4, %v3162_v3 }
0x1b80   :  { %4981 = vmatpush3.bf16.msra.mxu0 %v4978_v42 }
0x1b81   :  { %4983 = vmatprep.subr.bf16.mxu0 %v4982_v43 }
0x1b84   :  { %4985 = vmatpush3.bf16.msra.mxu0 %v4982_v43  ;;  %v5006_v43 = vpack.c.bf16 %v3607_v28, %v3606_v62  ;;  %v3738_v62 = vld [vmem:[%s6738_s20 + $0x18] sm:$0xff] }
0x1c52   :  { %v3235_v4 = vpop.f32.mrb[26].mxu0 }
0x1c53   :  { %v4796_v8 = vpop.f32.mrb[27].mxu0  ;;  %4800 = vmatmul.mubr.msk.f32.vlgmr.msra.gmra.mrb[32].mxu1 %vm1406_vm4, %v3235_v4 }
0x1c54   :  { %4989 = vmatpush3.bf16.msra.mxu1 %v4986_v44 }
0x1c55   :  { %4991 = vmatprep.subr.bf16.mxu1 %v4990_v47 }
0x1c58   :  { %4993 = vmatpush3.bf16.msra.mxu1 %v4990_v47 }
0x1c59   :  { %4995 = vmatprep.subr.bf16.mxu1 %v4994_v51 }
0x1c5c   :  { %4997 = vmatpush3.bf16.msra.mxu1 %v4994_v51 }
0x1d26   :  { %v3308_v2 = vpop.f32.mrb[32].mxu1 }
0x1d27   :  { %v3312_v16 = vadd.f32 %v3308_v2, %v3073_v61  ;;  %v4801_v17 = vpop.f32.mrb[33].mxu1  ;;  %v3467_v61 = vld [vmem:[%s6735_s11 + $0x38] sm:$0xff]  ;;  %v4398_v2 = vld [vmem:[#allocation13] ss:$0 sm:$0xff] }
0x1d28   :  { %v4998_v63 = vpack.c.bf16 %v3467_v61, %v3466_v58 }
0x1d29   :  { %v3321_v18 = vadd.f32 %v4392_v54, %v3312_v16 }
0x1d2a   :  { %4999 = vmatprep.subr.bf16.mxu1 %v4998_v63 }
0x1d2b   :  { %v3325_v5 = vsel %vm613_vm3, %v3321_v18, 0.0  ;;  %5001 = vmatpush3.bf16.msra.mxu1 %v4998_v63 }
0x1d2c   :  { %3326 = vadd.xlane.f32.xlu1 %v3325_v5 }
0x1d30   :  { %3335 = vadd.xlane.f32.xlu1 %v3334_v22 }
0x1db9   :  { %v3327_v25 = vpop.xlane.xlu1 %3326 }
0x1dba   :  { %v3329_v30 = vmul.f32 0.03125, %v3327_v25 }
0x1dbc   :  { %v3331_v48 = vsub.f32 %v3321_v18, %v3329_v30 }
0x1dbd   :  { %v3336_v31 = vpop.xlane.xlu1 %3335 }
0x1dbe   :  { %v3340_v19 = vmul.f32 0.03125, %v3336_v31  ;;  %v3333_v32 = vmul.f32 %v3331_v48, %v3331_v48 }
0x1dc0   :  { %v3342_v33 = vadd.f32 1e-05, %v3340_v19  ;;  %v3337_v34 = vsel %vm613_vm3, %v3333_v32, 0.0 }
0x1dc1   :  { %3338 = vadd.xlane.f32.xlu1 %v3337_v34 }
0x1dc2   :  { %5222 = vrsqrt.f32 %v3342_v33 }
0x1dcc   :  { %v5223_v9 = vpop.eup %5222 }
0x1dcd   :  { %v3346_v37 = vmul.f32 %v5223_v9, %v3330_v13 }
0x1dcf   :  { %v3355_v38 = vmul.f32 %v4393_v36, %v3346_v37 }
0x1dd1   :  { %v3364_v39 = vadd.f32 %v4394_v23, %v3355_v38  ;;  %v3605_v38 = vld [vmem:[%s6736_s9 + $0x8] sm:$0xff] }
0x1dd3   :  { %4810 = vmatprep.mubr.msk.f32.mxu0 %vm613_vm3, %v3364_v39 }
0x1e4e   :  { %v3339_v52 = vpop.xlane.xlu1 %3338 }
0x1e4f   :  { %v3341_v53 = vmul.f32 0.03125, %v3339_v52 }
0x1e51   :  { %v3343_v54 = vadd.f32 1e-05, %v3341_v53  ;;  %v4401_v53 = vld [vmem:[#allocation16] ss:$0 sm:$0xff] }
0x1e53   :  { %5224 = vrsqrt.f32 %v3343_v54 }
0x1e5d   :  { %v5225_v55 = vpop.eup %5224 }
0x1e5e   :  { %v3347_v56 = vmul.f32 %v5225_v55, %v3331_v48  ;;  %v4402_v55 = vld [vmem:[#allocation14] ss:$0 sm:$0xff] }
0x1e60   :  { %v3356_v59 = vmul.f32 %v4393_v36, %v3347_v56 }
0x1e62   :  { %v3365_v60 = vadd.f32 %v4394_v23, %v3356_v59  ;;  %v3604_v23 = vld [vmem:[%s6736_s9] sm:$0xff] }
0x1e63   :  { %v5002_v40 = vpack.c.bf16 %v3605_v38, %v3604_v23 }
0x1e64   :  { %4811 = vmatmul.mubr.msk.f32.vlgmr.msra.gmra.mrb[28].mxu0 %vm613_vm3, %v3365_v60 }
0x1e65   :  { %5003 = vmatprep.subr.bf16.mxu0 %v5002_v40 }
0x1e66   :  { %5005 = vmatpush3.bf16.msra.mxu0 %v5002_v40  ;;  %v3736_v40 = vld [vmem:[%s6738_s20 + $0x8] sm:$0xff] }
0x1e67   :  { %5007 = vmatprep.subr.bf16.mxu0 %v5006_v43 }
0x1e6a   :  { %5009 = vmatpush3.bf16.msra.mxu0 %v5006_v43  ;;  %v3955_v43 = vld [vmem:[%s6739_s0] sm:$0xff] }
0x1e6b   :  { %v5026_v57 = vpack.c.bf16 %v3956_v35, %v3955_v43 }
0x1f37   :  { %v4812_v49 = vpop.f32.mrb[28].mxu0 }
0x1f38   :  { %v3455_v3 = vadd.f32 %v4812_v49, %v4395_v12  ;;  %v3449_v4 = vpop.f32.mrb[29].mxu0 }
0x1f39   :  { %v3450_v8 = vadd.f32 %v4395_v12, %v3449_v4 }
0x1f3a   :  { %v3459_v11 = vmax.f32 %v3455_v3, 0.0 }
0x1f3b   :  { %v3458_v7 = vmax.f32 %v3450_v8, 0.0 }
0x1f3d   :  { %4829 = vmatprep.mubr.msk.f32.mxu1 %vm454_vm1, %v3458_v7 }
0x1f3e   :  { %4830 = vmatmul.mubr.msk.f32.vlgmr.msra.gmra.mrb[34].mxu1 %vm454_vm1, %v3459_v11 }
0x2011   :  { %v4831_v13 = vpop.f32.mrb[34].mxu1 }
0x2012   :  { %v3553_v16 = vadd.f32 %v4831_v13, %v4398_v2  ;;  %v3547_v17 = vpop.f32.mrb[35].mxu1 }
0x2013   :  { %v3548_v18 = vadd.f32 %v4398_v2, %v3547_v17 }
0x2014   :  { %v3557_v5 = vadd.f32 %v3553_v16, %v3365_v60 }
0x2015   :  { %v3556_v24 = vadd.f32 %v3548_v18, %v3364_v39  ;;  %v3830_v39 = vld [vmem:[%s6737_s3] sm:$0xff] }
0x2016   :  { %v3561_v22 = vsel %vm613_vm3, %v3557_v5, 0.0  ;;  %v5018_v42 = vpack.c.bf16 %v3831_v41, %v3830_v39  ;;  %v3735_v39 = vld [vmem:[%s6738_s20] sm:$0xff] }
0x2017   :  { %3562 = vadd.xlane.f32.xlu0 %v3561_v22  ;;  %v3558_v25 = vsel %vm613_vm3, %v3556_v24, 0.0  ;;  %v5010_v41 = vpack.c.bf16 %v3736_v40, %v3735_v39 }
0x2018   :  { %3559 = vadd.xlane.f32.xlu1 %v3558_v25  ;;  %5019 = vmatprep.subr.bf16.mxu1 %v5018_v42 }
0x2019   :  { %5021 = vmatpush3.bf16.msra.mxu1 %v5018_v42  ;;  %5011 = vmatprep.subr.bf16.mxu0 %v5010_v41  ;;  %v3737_v42 = vld [vmem:[%s6738_s20 + $0x10] sm:$0xff] }
0x201a   :  { %5023 = vmatprep.subr.bf16.mxu1 %v5022_v45  ;;  %v5014_v28 = vpack.c.bf16 %v3738_v62, %v3737_v42 }
0x201d   :  { %5025 = vmatpush3.bf16.msra.mxu1 %v5022_v45 }
0x201e   :  { %5034 = vmatprep.subr.bf16.mxu1 %v5812_v0 }
0x20a4   :  { %v3563_v30 = vpop.xlane.xlu0 %3562 }
0x20a5   :  { %v3565_v48 = vmul.f32 0.03125, %v3563_v30  ;;  %v3560_v31 = vpop.xlane.xlu1 %3559 }
0x20a6   :  { %v3564_v19 = vmul.f32 0.03125, %v3560_v31 }
0x20a7   :  { %v3567_v32 = vsub.f32 %v3557_v5, %v3565_v48 }
0x20a8   :  { %v3566_v33 = vsub.f32 %v3556_v24, %v3564_v19 }
0x20a9   :  { %v3569_v36 = vmul.f32 %v3567_v32, %v3567_v32 }
0x20aa   :  { %v3568_v34 = vmul.f32 %v3566_v33, %v3566_v33 }
0x20ab   :  { %v3573_v37 = vsel %vm613_vm3, %v3569_v36, 0.0 }
0x20ac   :  { %v3570_v9 = vsel %vm613_vm3, %v3568_v34, 0.0 }
0x20ad   :  { %3571 = vadd.xlane.f32.xlu1 %v3570_v9 }
0x20b1   :  { %3574 = vadd.xlane.f32.xlu1 %v3573_v37 }
0x213a   :  { %v3572_v44 = vpop.xlane.xlu1 %3571 }
0x213b   :  { %v3576_v46 = vmul.f32 0.03125, %v3572_v44 }
0x213d   :  { %v3578_v47 = vadd.f32 1e-05, %v3576_v46 }
0x213e   :  { %v3575_v50 = vpop.xlane.xlu1 %3574 }
0x213f   :  { %5226 = vrsqrt.f32 %v3578_v47  ;;  %v3577_v29 = vmul.f32 0.03125, %v3575_v50 }
0x2141   :  { %v3579_v51 = vadd.f32 1e-05, %v3577_v29 }
0x2143   :  { %5228 = vrsqrt.f32 %v3579_v51 }
0x2149   :  { %v5227_v52 = vpop.eup %5226 }
0x214a   :  { %v3582_v54 = vmul.f32 %v5227_v52, %v3566_v33 }
0x214c   :  { %v3591_v56 = vmul.f32 %v4401_v53, %v3582_v54 }
0x214d   :  { %v5229_v59 = vpop.eup %5228 }
0x214e   :  { %v3583_v60 = vmul.f32 %v5229_v59, %v3567_v32  ;;  %v3600_v58 = vadd.f32 %v4402_v55, %v3591_v56  ;;  %v4405_v56 = vld [vmem:[%s6742_s30] ss:$0 sm:$0xff] }
0x2150   :  { %v3592_v61 = vmul.f32 %v4401_v53, %v3583_v60  ;;  %4840 = vmatprep.mubr.msk.f32.mxu0 %vm613_vm3, %v3600_v58  ;;  %3602 = vst.msk [vmem:[#allocation35] sm:$0xff] %vm613_vm3, %v3600_v58  ;;  %4862 = vmatprep.mubr.msk.f32.mxu1 %vm613_vm3, %v3600_v58 }
0x2152   :  { %v3601_v63 = vadd.f32 %v4402_v55, %v3592_v61  ;;  %v4406_v61 = vld [vmem:[%s6743_s15] ss:$0 sm:$0xff] }
0x2154   :  { %3603 = vst.msk [vmem:[#allocation35 + $0x8] sm:$0xff] %vm613_vm3, %v3601_v63  ;;  %4841 = vmatmul.mubr.msk.f32.vlgmr.msra.gmra.mrb[30].mxu0 %vm613_vm3, %v3601_v63  ;;  %4863 = vmatmul.mubr.msk.f32.vlgmr.msra.gmra.mrb[36].mxu1 %vm613_vm3, %v3601_v63 }
0x2155   :  { %4892 = vmatprep.mubr.msk.f32.mxu1 %vm5813_vm0, %v5814_v1  ;;  %5013 = vmatpush3.bf16.msra.mxu0 %v5010_v41 }
0x2156   :  { %5015 = vmatprep.subr.bf16.mxu0 %v5014_v28  ;;  %5037 = vmatpush3.bf16.xpose.msk.msra.mxu1 %vm6607_vm5, %v6158_v6 }
0x2157   :  { %5038 = vmatprep.subr.bf16.mxu1 %v5812_v0 }
0x2159   :  { %5017 = vmatpush3.bf16.msra.mxu0 %v5014_v28 }
0x215a   :  { %5027 = vmatprep.subr.bf16.mxu0 %v5026_v57 }
0x215e   :  { %5041 = vmatpush3.bf16.xpose.msk.msra.mxu1 %vm6607_vm5, %v6169_v14 }
0x215f   :  { %5042 = vmatprep.subr.bf16.mxu1 %v5812_v0 }
0x2166   :  { %5045 = vmatpush3.bf16.xpose.msk.msra.mxu1 %vm6607_vm5, %v6181_v20 }
0x2167   :  { %5046 = vmatprep.subr.bf16.mxu1 %v5812_v0 }
0x216e   :  { %5049 = vmatpush3.bf16.xpose.msk.msra.mxu1 %vm6607_vm5, %v6193_v26 }
0x2227   :  { %v4842_v12 = vpop.f32.mrb[30].mxu0  ;;  %v4864_v49 = vpop.f32.mrb[36].mxu1 }
0x2228   :  { %v3680_v3 = vpop.f32.mrb[31].mxu0  ;;  %v3900_v4 = vpop.f32.mrb[37].mxu1  ;;  %v3692_v8 = vsel %vm613_vm3, %v4842_v12, 0.0  ;;  %v3912_v2 = vsel %vm613_vm3, %v4864_v49, 0.0 }
0x2229   :  { %3693 = vadd.xlane.f32.xlu1 %v3692_v8  ;;  %v3689_v7 = vsel %vm613_vm3, %v3680_v3, 0.0  ;;  %v3909_v11 = vsel %vm613_vm3, %v3900_v4, 0.0  ;;  %v3957_v8 = vld [vmem:[%s6739_s0 + $0x10] sm:$0xff] }
0x222d   :  { %3690 = vadd.xlane.f32.xlu1 %v3689_v7  ;;  %v3958_v7 = vld [vmem:[%s6739_s0 + $0x18] sm:$0xff] }
0x2231   :  { %3910 = vadd.xlane.f32.xlu1 %v3909_v11 }
0x2235   :  { %3913 = vadd.xlane.f32.xlu1 %v3912_v2  ;;  %v4413_v2 = vld [vmem:[#allocation26] ss:$0 sm:$0xff] }
0x22b6   :  { %v3694_v13 = vpop.xlane.xlu1 %3693 }
0x22b7   :  { %v3696_v16 = vmul.f32 0.03125, %v3694_v13 }
0x22b9   :  { %v3698_v17 = vsub.f32 %v4842_v12, %v3696_v16 }
0x22ba   :  { %v3691_v18 = vpop.xlane.xlu1 %3690 }
0x22bb   :  { %v3695_v5 = vmul.f32 0.03125, %v3691_v18  ;;  %v3700_v24 = vmul.f32 %v3698_v17, %v3698_v17 }
0x22bd   :  { %v3697_v22 = vsub.f32 %v3680_v3, %v3695_v5  ;;  %v3704_v25 = vsel %vm613_vm3, %v3700_v24, 0.0  ;;  %v4412_v3 = vld [vmem:[#allocation28] ss:$0 sm:$0xff]  ;;  %v5030_v5 = vpack.c.bf16 %v3958_v7, %v3957_v8 }
0x22be   :  { %3705 = vadd.xlane.f32.xlu0 %v3704_v25  ;;  %v3911_v30 = vpop.xlane.xlu1 %3910 }
0x22bf   :  { %v3915_v48 = vmul.f32 0.03125, %v3911_v30  ;;  %v3699_v31 = vmul.f32 %v3697_v22, %v3697_v22 }
0x22c1   :  { %v6588_v19 = vsub.f32 %v3900_v4, %v3915_v48  ;;  %v3701_v32 = vsel %vm613_vm3, %v3699_v31, 0.0 }
0x22c2   :  { %3702 = vadd.xlane.f32.xlu1 %v3701_v32  ;;  %v3914_v33 = vpop.xlane.xlu1 %3913 }
0x22c3   :  { %v3916_v34 = vmul.f32 0.03125, %v3914_v33  ;;  %v3919_v9 = vmul.f32 %v6588_v19, %v6588_v19 }
0x22c5   :  { %v6593_v36 = vsub.f32 %v4864_v49, %v3916_v34  ;;  %v3921_v37 = vsel %vm613_vm3, %v3919_v9, 0.0 }
0x22c6   :  { %3922 = vadd.xlane.f32.xlu1 %v3921_v37 }
0x22c7   :  { %v3920_v23 = vmul.f32 %v6593_v36, %v6593_v36 }
0x22c9   :  { %v3924_v38 = vsel %vm613_vm3, %v3920_v23, 0.0 }
0x22ca   :  { %3925 = vadd.xlane.f32.xlu0 %v3924_v38 }
0x234b   :  { %v3706_v44 = vpop.xlane.xlu0 %3705 }
0x234c   :  { %v3708_v6 = vmul.f32 0.03125, %v3706_v44 }
0x234e   :  { %v3710_v46 = vadd.f32 1e-05, %v3708_v6 }
0x234f   :  { %v3703_v47 = vpop.xlane.xlu1 %3702 }
0x2350   :  { %5230 = vrsqrt.f32 %v3710_v46  ;;  %v3707_v50 = vmul.f32 0.03125, %v3703_v47 }
0x2352   :  { %v3709_v14 = vadd.f32 1e-05, %v3707_v50 }
0x2353   :  { %v3923_v29 = vpop.xlane.xlu1 %3922 }
0x2354   :  { %5232 = vrsqrt.f32 %v3709_v14  ;;  %v3927_v51 = vmul.f32 0.03125, %v3923_v29 }
0x2356   :  { %v3929_v52 = vadd.f32 1e-05, %v3927_v51 }
0x2357   :  { %v3926_v20 = vpop.xlane.xlu0 %3925 }
0x2358   :  { %5234 = vrsqrt.f32 %v3929_v52  ;;  %v3928_v53 = vmul.f32 0.03125, %v3926_v20 }
0x235a   :  { %v5231_v54 = vpop.eup %5230  ;;  %v3930_v26 = vadd.f32 1e-05, %v3928_v53 }
0x235b   :  { %v3714_v55 = vmul.f32 %v5231_v54, %v3698_v17 }
0x235c   :  { %5236 = vrsqrt.f32 %v3930_v26 }
0x235d   :  { %v3723_v60 = vmul.f32 %v4405_v56, %v3714_v55 }
0x235e   :  { %v5233_v59 = vpop.eup %5232 }
0x235f   :  { %v3713_v58 = vmul.f32 %v5233_v59, %v3697_v22  ;;  %v3732_v49 = vadd.f32 %v4406_v61, %v3723_v60 }
0x2361   :  { %v3722_v63 = vmul.f32 %v4405_v56, %v3713_v58  ;;  %v3734_v17 = vmax.f32 %v3732_v49, 0.0 }
0x2362   :  { %v5235_v12 = vpop.eup %5234 }
0x2363   :  { %v3731_v4 = vadd.f32 %v4406_v61, %v3722_v63  ;;  %v3933_v11 = vmul.f32 %v5235_v12, %v6588_v19 }
0x2365   :  { %v3733_v13 = vmax.f32 %v3731_v4, 0.0  ;;  %v3942_v16 = vmul.f32 %v4412_v3, %v3933_v11 }
0x2366   :  { %v5237_v18 = vpop.eup %5236 }
0x2367   :  { %v3934_v24 = vmul.f32 %v5237_v18, %v6593_v36  ;;  %4851 = vmatprep.mubr.msk.f32.mxu0 %vm613_vm3, %v3733_v13  ;;  %v3951_v22 = vadd.f32 %v4413_v2, %v3942_v16 }
0x2368   :  { %4852 = vmatmul.mubr.msk.f32.vlgmr.msra.gmra.mrb[32].mxu0 %vm613_vm3, %v3734_v17 }
0x2369   :  { %5029 = vmatpush3.bf16.msra.mxu0 %v5026_v57  ;;  %v3943_v25 = vmul.f32 %v4412_v3, %v3934_v24  ;;  %v3953_v30 = vmax.f32 %v3951_v22, 0.0 }
0x236a   :  { %5031 = vmatprep.subr.bf16.mxu0 %v5030_v5 }
0x236b   :  { %v3952_v48 = vadd.f32 %v4413_v2, %v3943_v25  ;;  %4873 = vmatprep.mubr.msk.f32.mxu0 %vm613_vm3, %v3953_v30 }
0x236d   :  { %v3954_v31 = vmax.f32 %v3952_v48, 0.0  ;;  %5033 = vmatpush3.bf16.msra.mxu0 %v5030_v5 }
0x236e   :  { %5050 = vmatprep.subr.bf16.mxu0 %v5812_v0 }
0x2370   :  { %4874 = vmatmul.mubr.msk.f32.vlgmr.msra.gmra.mrb[34].mxu0 %vm613_vm3, %v3954_v31 }
0x2371   :  { %4911 = vmatprep.mubr.msk.f32.mxu0 %vm5813_vm0, %v5814_v1  ;;  %v4407_v1 = vld [vmem:[#allocation2] ss:$0 sm:$0xff] }
0x2376   :  { %5053 = vmatpush3.bf16.xpose.msk.msra.mxu0 %vm6607_vm5, %v6163_v10 }
0x2377   :  { %5054 = vmatprep.subr.bf16.mxu0 %v5812_v0 }
0x237e   :  { %5057 = vmatpush3.bf16.xpose.msk.msra.mxu0 %vm6607_vm5, %v6173_v15  ;;  %v4414_v15 = vld [vmem:[#allocation7] ss:$0 sm:$0xff] }
0x237f   :  { %5058 = vmatprep.subr.bf16.mxu0 %v5812_v0 }
0x2386   :  { %5061 = vmatpush3.bf16.xpose.msk.msra.mxu0 %vm6607_vm5, %v6185_v21 }
0x2387   :  { %5062 = vmatprep.subr.bf16.mxu0 %v5812_v0 }
0x238e   :  { %5065 = vmatpush3.bf16.xpose.msk.msra.mxu0 %vm6607_vm5, %v6197_v27 }
0x243b   :  { %v4853_v10 = vpop.f32.mrb[32].mxu0 }
0x243c   :  { %v3824_v19 = vadd.f32 %v4853_v10, %v4407_v1  ;;  %v3818_v32 = vpop.f32.mrb[33].mxu0 }
0x243d   :  { %v3819_v33 = vadd.f32 %v4407_v1, %v3818_v32 }
0x243e   :  { %3829 = vst.msk [vmem:[%s6053_s29 + $0x8] sm:$0xff] %vm3827_vm6, %v3824_v19 }
0x243f   :  { %3828 = vst.msk [vmem:[%s6053_s29] sm:$0xff] %vm3827_vm6, %v3819_v33 }
0x2443   :  { %v4875_v34 = vpop.f32.mrb[34].mxu0 }
0x2444   :  { %v4044_v9 = vadd.f32 %v4875_v34, %v4414_v15  ;;  %v4038_v36 = vpop.f32.mrb[35].mxu0 }
0x2445   :  { %v4039_v37 = vadd.f32 %v4414_v15, %v4038_v36 }
0x2446   :  { %4912 = vmatmul.mubr.msk.f32.vlgmr.msra.gmra.mrb[36].mxu0 %vm613_vm3, %v4044_v9 }
0x2447   :  { %4893 = vmatmul.mubr.msk.f32.vlgmr.msra.gmra.mrb[38].mxu1 %vm613_vm3, %v4039_v37 }
0x2448   :  { %5711 = shalt.err (!%p5708_p4)
}
0x2449   :  { %s5712_s29 = scalar_lea.hbm %s6063_s24, 256 }
0x244a   :  { %p5713_p5 = scmp.ne.s32.totalorder %s6063_s24, %s5712_s29  ;;  %p5716_p6 = scmp.lt.u32.totalorder %s5712_s29, %s6063_s24 }
0x244c   :  { %p5718_p7 = pnand %p5716_p6, %p5713_p5 }
0x244e   :  { %5721 = shalt.err (!%p5718_p7)
}
0x244f   :  { %s5828_s18 = smov 128   ;;  %s5829_s19 = smov 8  }
0x2450   :  { %4262 = dma.vmem_to_hbm [thread:$0]  %s4257_s17, 256, %s6063_s24, [#allocation4], %s5828_s18, %s5828_s18, %s5829_s19  }
0x2519   :  { %v4237_v0 = vpop.f32.mrb[36].mxu0 }
0x251a   :  { %4242 = vrot.lane.b32.xlu1 %v4237_v0, %s5815_s12  ;;  %v4140_v21 = vpop.f32.mrb[38].mxu1  ;;  %v4913_v27 = vpop.f32.mrb[37].mxu0 }
0x251b   :  { %v4894_v23 = vpop.f32.mrb[39].mxu1 }
0x258c   :  { %v4243_v38 = vpop.permute.xlu1 %4242 }
0x258d   :  { %v4245_v39 = vsel %vm454_vm1, %v4140_v21, %v4243_v38 }
0x258e   :  { %4246 = vst [vmem:[%s6058_s4] sm:$0xff] %v4245_v39 }
0x258f   :  { %5744 = dma.done.wait [#allocation4], 256  }
0x2590   :  { %5745 = vsyncadd [#allocation4], 4294967040 }
0x2591   :  { %4270 = vsyncpa [#allocation3], 1 }
0x2592   :  { %4271 = vsyncpa [#allocation6], 1 }
0x2593   :  { %4272 = vsyncpa [#allocation9], 1 }
0x2594   :  { %4273 = vsyncpa [#allocation12], 1 }
0x2595   :  { %4274 = vsyncpa [#allocation15], 1 }
0x2596   :  { %4275 = vsyncpa [#allocation18], 1 }
0x2597   :  { %4276 = vsyncpa [#allocation21], 1 }
0x2598   :  { %4277 = vsyncpa [#allocation24], 1 }
0x2599   :  { %4278 = vsyncpa [#allocation27], 1 }
0x259a   :  { %4279 = vsyncpa [#allocation30], 1 }
0x259b   :  { %4280 = vsyncpa [#allocation33], 1 }
0x259c   :  { %4281 = vsyncpa [#allocation4], 1 }

</bundles_post_ra>
